<compile_context>
chip_gen: v7x
topology: tpu7x:2x2x1
jax: 0.10.0
libtpu: 0.0.40
codegen_flags: <defaults>
</compile_context>

<pallas_src>
import numpy as np
import jax
import jax.numpy as jnp
from jax.experimental import pallas as pl
from jax.experimental.pallas import tpu as pltpu

VMEM_SPEC = pl.BlockSpec(memory_space=pltpu.MemorySpace.VMEM)


# ---------------------------------------------------------------------------
# Fused forward kernel
# ---------------------------------------------------------------------------
def _fused_forward_kernel(
        img_ref, hx_ref,
        r1_ref, m1_ref, b1_ref,
        r2_ref, m2_ref, b2_ref,
        r3_ref, m3_ref, b3_ref,
        r4_ref, m4_ref, b4_ref,
        wih_ref, whh_ref, bih_ref, bhh_ref,
        whead_ref, bhead_ref,
        h_out_ref, logp_ref, head_ref, enc_out_ref):
    f32 = jnp.float32
    cdt = m1_ref.dtype                       # MXU operand dtype (bf16 default)

    def elu(y):
        # exp(min(y,0)) - 1 : overflow-safe in the unselected branch
        # (expm1 is not guaranteed to lower in Mosaic).
        return jnp.where(y > 0.0, y, jnp.exp(jnp.minimum(y, 0.0)) - 1.0)

    # -------- conv1: channel planes read straight from the CHW image --------
    n_in = img_ref.shape[0]
    ho1 = r1_ref.shape[0] // 3
    r1 = r1_ref[...]
    acc = jnp.zeros((ho1, m1_ref.shape[2]), f32)
    for ci in range(n_in):
        plane = img_ref[ci].astype(cdt)                       # (H, W)
        sel = jnp.dot(r1, plane, preferred_element_type=f32).astype(cdt)
        for kh in range(3):
            acc = acc + jnp.dot(sel[kh * ho1:(kh + 1) * ho1, :],
                                m1_ref[kh * n_in + ci],
                                preferred_element_type=f32)
    act = elu(acc + b1_ref[...])                              # (Ho1, Wo1*32)

    # -------- conv2..conv4: activation columns are [w*Cin + ci] -------------
    def conv_block(a, r_ref, m_ref, b_ref):
        ho = r_ref.shape[0] // 3
        sel = jnp.dot(r_ref[...], a.astype(m_ref.dtype),
                      preferred_element_type=f32).astype(m_ref.dtype)
        out = jnp.zeros((ho, m_ref.shape[2]), f32)
        for kh in range(3):
            out = out + jnp.dot(sel[kh * ho:(kh + 1) * ho, :], m_ref[kh],
                                preferred_element_type=f32)
        return elu(out + b_ref[...])

    act = conv_block(act, r2_ref, m2_ref, b2_ref)
    act = conv_block(act, r3_ref, m3_ref, b3_ref)
    act = conv_block(act, r4_ref, m4_ref, b4_ref)             # (Ho4, Wo4*32)
    enc_out_ref[...] = act

    # -------- GRUCell (w_ih pre-permuted to consume this flatten order) -----
    gdt = wih_ref.dtype
    gi = bih_ref[...]                                         # (1, 3*hidden)
    for row in range(wih_ref.shape[0]):                       # Ho4 static rows
        gi = gi + jnp.dot(act[row:row + 1, :].astype(gdt), wih_ref[row],
                          preferred_element_type=f32)
    h = hx_ref[...]                                           # (1, hidden) f32
    gh = bhh_ref[...] + jnp.dot(h.astype(gdt), whh_ref[...],
                                preferred_element_type=f32)
    hd = h.shape[1]

    def sigmoid(t):                                           # EUP approx divide
        return pl.reciprocal(1.0 + jnp.exp(-t), approx=True)

    r = sigmoid(gi[:, :hd] + gh[:, :hd])
    z = sigmoid(gi[:, hd:2 * hd] + gh[:, hd:2 * hd])
    n = jnp.tanh(gi[:, 2 * hd:] + r * gh[:, 2 * hd:])
    h_new = (1.0 - z) * n + z * h
    h_out_ref[...] = h_new

    # -------- merged [pi | v] head + log-softmax over actions ---------------
    head = jnp.dot(h_new.astype(whead_ref.dtype), whead_ref[...],
                   preferred_element_type=f32) + bhead_ref[...]
    head_ref[...] = head
    n_act = logp_ref.shape[1]
    logits = head[:, :n_act]
    m = jnp.max(logits, axis=1, keepdims=True)
    lse = jnp.log(jnp.sum(jnp.exp(logits - m), axis=1, keepdims=True)) + m
    logp_ref[...] = logits - lse


# ---------------------------------------------------------------------------
# Parameter init (PyTorch-style uniform(-1/sqrt(fan_in), 1/sqrt(fan_in)))
# ---------------------------------------------------------------------------
def init_params(key, input_dims, n_actions, hidden=256):
    def unif(k, shape, fan_in):
        bound = 1.0 / float(fan_in) ** 0.5
        return jax.random.uniform(k, shape, jnp.float32, -bound, bound)

    h, w = input_dims[1], input_dims[2]
    for _ in range(4):
        h, w = (h - 1) // 2 + 1, (w - 1) // 2 + 1
    feature_dims = 32 * h * w

    keys = jax.random.split(key, 16)
    params = {}
    convs = []
    c_prev = input_dims[0]
    for i in range(4):
        wt = unif(keys[2 * i], (32, c_prev, 3, 3), c_prev * 9)
        bt = unif(keys[2 * i + 1], (32,), c_prev * 9)
        convs.append((wt, bt))
        c_prev = 32
    params['convs'] = convs
    params['w_ih'] = unif(keys[8], (3 * hidden, feature_dims), hidden)
    params['w_hh'] = unif(keys[9], (3 * hidden, hidden), hidden)
    params['b_ih'] = unif(keys[10], (3 * hidden,), hidden)
    params['b_hh'] = unif(keys[11], (3 * hidden,), hidden)
    params['w_pi'] = unif(keys[12], (n_actions, hidden), hidden)
    params['b_pi'] = unif(keys[13], (n_actions,), hidden)
    params['w_v'] = unif(keys[14], (1, hidden), hidden)
    params['b_v'] = unif(keys[15], (1,), hidden)
    return params


# ---------------------------------------------------------------------------
# One-time weight packing (all per-step transposes/reshapes hoisted to init)
# ---------------------------------------------------------------------------
def pack_params(params, input_dims, mxu_dtype=jnp.bfloat16):
    packed = {}
    convs = [(np.asarray(w, np.float32), np.asarray(b, np.float32))
             for (w, b) in params['convs']]

    def conv_out(s):                        # kernel 3, stride 2, pad 1
        return (s - 1) // 2 + 1

    h, w_sz = int(input_dims[1]), int(input_dims[2])
    for li, (wt, bt) in enumerate(convs):
        c_out, c_in = wt.shape[0], wt.shape[1]
        ho, wo_sz = conv_out(h), conv_out(w_sz)
        # 0/1 row-selection, stacked over the 3 kernel rows; zero rows = padding
        rsel = np.zeros((3 * ho, h), np.float32)
        for kh in range(3):
            for r in range(ho):
                hin = 2 * r + kh - 1
                if 0 <= hin < h:
                    rsel[kh * ho + r, hin] = 1.0
        # block-Toeplitz weight expansion: stride-2 column selection + padding
        # + Cin->Cout contraction in a single matmul operand
        if li == 0:                         # per-input-channel planes
            m = np.zeros((3, c_in, w_sz, wo_sz * c_out), np.float32)
            for kh in range(3):
                for wo in range(wo_sz):
                    for kw in range(3):
                        win = 2 * wo + kw - 1
                        if 0 <= win < w_sz:
                            m[kh, :, win, wo * c_out:(wo + 1) * c_out] = wt[:, :, kh, kw].T
            m = m.reshape(3 * c_in, w_sz, wo_sz * c_out)
        else:                               # activation columns [w*Cin + ci]
            m = np.zeros((3, w_sz * c_in, wo_sz * c_out), np.float32)
            for kh in range(3):
                for wo in range(wo_sz):
                    for kw in range(3):
                        win = 2 * wo + kw - 1
                        if 0 <= win < w_sz:
                            m[kh, win * c_in:(win + 1) * c_in,
                              wo * c_out:(wo + 1) * c_out] = wt[:, :, kh, kw].T
        packed[f'r{li + 1}'] = jnp.asarray(rsel, mxu_dtype)
        packed[f'm{li + 1}'] = jnp.asarray(m, mxu_dtype)
        packed[f'b{li + 1}'] = jnp.asarray(np.tile(bt, wo_sz)[None, :], jnp.float32)
        h, w_sz = ho, wo_sz

    ho4, wo4, c4 = h, w_sz, convs[-1][0].shape[0]
    # GRU input weights, column-permuted to consume the kernel's (ho, wo*C+co)
    # encoder layout (torch flatten order is f = co*Ho*Wo + ho*Wo + wo).
    w_ih = np.asarray(params['w_ih'], np.float32)
    gates3, feat = w_ih.shape
    assert feat == c4 * ho4 * wo4
    wih4 = w_ih.reshape(gates3, c4, ho4, wo4)                 # [g, co, ho, wo]
    packed['w_ih'] = jnp.asarray(
        np.transpose(wih4, (2, 3, 1, 0)).reshape(ho4, wo4 * c4, gates3), mxu_dtype)
    packed['w_hh'] = jnp.asarray(np.asarray(params['w_hh']).T, mxu_dtype)
    packed['b_ih'] = jnp.asarray(np.asarray(params['b_ih'])[None, :], jnp.float32)
    packed['b_hh'] = jnp.asarray(np.asarray(params['b_hh'])[None, :], jnp.float32)
    # merged [pi | v] head: one matmul, one output buffer
    w_head = np.concatenate([np.asarray(params['w_pi']), np.asarray(params['w_v'])], 0).T
    b_head = np.concatenate([np.asarray(params['b_pi']), np.asarray(params['b_v'])])[None, :]
    packed['w_head'] = jnp.asarray(w_head, mxu_dtype)
    packed['b_head'] = jnp.asarray(b_head, jnp.float32)
    return packed


# ---------------------------------------------------------------------------
# Forward
# ---------------------------------------------------------------------------
def _forward_pallas(packed, img_chw, hx):
    hidden = hx.shape[1]
    n_actions = packed['b_head'].shape[1] - 1
    ho4, wc4 = packed['w_ih'].shape[0], packed['w_ih'].shape[1]
    inputs = (img_chw, hx,
              packed['r1'], packed['m1'], packed['b1'],
              packed['r2'], packed['m2'], packed['b2'],
              packed['r3'], packed['m3'], packed['b3'],
              packed['r4'], packed['m4'], packed['b4'],
              packed['w_ih'], packed['w_hh'], packed['b_ih'], packed['b_hh'],
              packed['w_head'], packed['b_head'])
    return pl.pallas_call(
        _fused_forward_kernel,
        out_shape=(jax.ShapeDtypeStruct((1, hidden), jnp.float32),        # h_new
                   jax.ShapeDtypeStruct((1, n_actions), jnp.float32),     # log-softmax
                   jax.ShapeDtypeStruct((1, n_actions + 1), jnp.float32), # [logits | v]
                   jax.ShapeDtypeStruct((ho4, wc4), jnp.float32)),        # encoder feats
        in_specs=[VMEM_SPEC] * len(inputs),
        out_specs=(VMEM_SPEC, VMEM_SPEC, VMEM_SPEC, VMEM_SPEC),
    )(*inputs)


def actor_critic_forward(packed, img_nchw, hx, sample_key):
    """Matches ActorCritic.forward: returns (action[0], v, log_prob, hx_new)."""
    assert img_nchw.shape[0] == 1 and hx.shape[0] == 1, "per-step module is batch=1"
    img_chw = jnp.reshape(img_nchw, img_nchw.shape[1:])       # metadata-only
    h_new, logp, head, _ = _forward_pallas(packed, img_chw, hx)
    n_actions = logp.shape[1]
    v = head[:, n_actions:n_actions + 1]                      # (1, 1) value head
    # Categorical(probs).sample() / .log_prob(action)  (sampling is glue)
    action = jax.random.categorical(sample_key, logp, axis=-1)          # (1,)
    log_prob = jnp.take_along_axis(logp, action[:, None], axis=1)[:, 0]
    return action[0], v, log_prob, h_new


# ---------------------------------------------------------------------------
# Pure-JAX/XLA f32 reference (for a correctness sanity check)
# ---------------------------------------------------------------------------
def reference_forward(params, img, hx):
    with jax.default_matmul_precision("float32"):
        x = img
        for w, b in params['convs']:
            x = jax.lax.conv_general_dilated(
                x, w, window_strides=(2, 2), padding=((1, 1), (1, 1)),
                dimension_numbers=('NCHW', 'OIHW', 'NCHW'),
                precision=jax.lax.Precision.HIGHEST)
            x = jax.nn.elu(x + b[None, :, None, None])
        state = x.reshape(x.shape[0], -1)
        gi = state @ params['w_ih'].T + params['b_ih']
        gh = hx @ params['w_hh'].T + params['b_hh']
        hd = hx.shape[1]
        r = jax.nn.sigmoid(gi[:, :hd] + gh[:, :hd])
        z = jax.nn.sigmoid(gi[:, hd:2 * hd] + gh[:, hd:2 * hd])
        n = jnp.tanh(gi[:, 2 * hd:] + r * gh[:, 2 * hd:])
        h_new = (1.0 - z) * n + z * hx
        logits = h_new @ params['w_pi'].T + params['b_pi']
        v = h_new @ params['w_v'].T + params['b_v']
        logp = jax.nn.log_softmax(logits, axis=1)
    return h_new, logp, v, x


if __name__ == "__main__":
    key = jax.random.PRNGKey(0)
    pk, ik, hk, sk = jax.random.split(key, 4)

    input_dims = (4, 42, 42)   # 42 -> 21 -> 11 -> 6 -> 3 ; 32*3*3 = 288 features
    n_actions = 6
    batch = 1                  # torch module indexes action.numpy()[0] => batch of 1
    hidden = 256

    params = init_params(pk, input_dims, n_actions, hidden=hidden)
    packed = pack_params(params, input_dims)    # one-time weight packing

    img = jax.random.normal(ik, (batch, *input_dims), jnp.float32)
    hx = jax.random.normal(hk, (batch, hidden), jnp.float32)

    fwd = jax.jit(actor_critic_forward)
    action, v, log_prob, h_new = fwd(packed, img, hx, sk)
    jax.block_until_ready((action, v, log_prob, h_new))

    assert v.shape == (batch, 1)
    assert log_prob.shape == (batch,)
    assert h_new.shape == (batch, hidden)

    # Sanity check against the f32 XLA reference (loose tolerance: the kernel
    # uses bf16 MXU operands and an approximate-reciprocal sigmoid).
    h_k, logp_k, head_k, enc_k = jax.jit(_forward_pallas)(
        packed, img.reshape(input_dims), hx)
    h_r, logp_r, v_r, enc_nchw = reference_forward(params, img, hx)
    enc_r = jnp.transpose(enc_nchw[0], (1, 2, 0)).reshape(enc_k.shape)
    assert float(jnp.max(jnp.abs(enc_k - enc_r))) < 2e-2, "encoder mismatch"
    err = max(float(jnp.max(jnp.abs(h_k - h_r))),
              float(jnp.max(jnp.abs(logp_k - logp_r))),
              float(jnp.max(jnp.abs(head_k[:, -1:] - v_r))))
    assert err < 1.5e-1, f"GRU/head mismatch: {err}"

    print("KERNEL_OK")
</pallas_src>

<mosaic_0001>
module attributes {stable_mosaic.version = 11 : i64} {
  func.func @_fused_forward_kernel(%arg0: memref<4x42x42xf32, #tpu.memory_space<vmem>>, %arg1: memref<1x256xf32, #tpu.memory_space<vmem>>, %arg2: memref<63x42xbf16, #tpu.memory_space<vmem>>, %arg3: memref<12x42x672xbf16, #tpu.memory_space<vmem>>, %arg4: memref<1x672xf32, #tpu.memory_space<vmem>>, %arg5: memref<33x21xbf16, #tpu.memory_space<vmem>>, %arg6: memref<3x672x352xbf16, #tpu.memory_space<vmem>>, %arg7: memref<1x352xf32, #tpu.memory_space<vmem>>, %arg8: memref<18x11xbf16, #tpu.memory_space<vmem>>, %arg9: memref<3x352x192xbf16, #tpu.memory_space<vmem>>, %arg10: memref<1x192xf32, #tpu.memory_space<vmem>>, %arg11: memref<9x6xbf16, #tpu.memory_space<vmem>>, %arg12: memref<3x192x96xbf16, #tpu.memory_space<vmem>>, %arg13: memref<1x96xf32, #tpu.memory_space<vmem>>, %arg14: memref<3x96x768xbf16, #tpu.memory_space<vmem>>, %arg15: memref<256x768xbf16, #tpu.memory_space<vmem>>, %arg16: memref<1x768xf32, #tpu.memory_space<vmem>>, %arg17: memref<1x768xf32, #tpu.memory_space<vmem>>, %arg18: memref<256x7xbf16, #tpu.memory_space<vmem>>, %arg19: memref<1x7xf32, #tpu.memory_space<vmem>>, %arg20: memref<1x256xf32, #tpu.memory_space<vmem>>, %arg21: memref<1x6xf32, #tpu.memory_space<vmem>>, %arg22: memref<1x7xf32, #tpu.memory_space<vmem>>, %arg23: memref<3x96xf32, #tpu.memory_space<vmem>>) attributes {dimension_semantics = [], scalar_prefetch = 0 : i64, scratch_operands = 0 : i64, tpu.core_type = #tpu.core_type<tc>} {
    %c0 = arith.constant 0 : index
    %c0_0 = arith.constant 0 : index
    %0 = vector.load %arg2[%c0, %c0_0] : memref<63x42xbf16, #tpu.memory_space<vmem>>, vector<63x42xbf16>
    %cst = arith.constant 0.000000e+00 : f32
    %1 = vector.broadcast %cst : f32 to vector<21x672xf32>
    %c0_1 = arith.constant 0 : index
    %c0_2 = arith.constant 0 : index
    %c0_3 = arith.constant 0 : index
    %2 = vector.load %arg0[%c0_1, %c0_2, %c0_3] : memref<4x42x42xf32, #tpu.memory_space<vmem>>, vector<1x42x42xf32>
    %3 = vector.shape_cast %2 : vector<1x42x42xf32> to vector<42x42xf32>
    %4 = arith.truncf %3 : vector<42x42xf32> to vector<42x42xbf16>
    %cst_4 = arith.constant dense<0.000000e+00> : vector<63x42xf32>
    %5 = tpu.matmul %0, %4, %cst_4 {dimension_numbers = #tpu.dot_dimension_numbers<[1], [0], [0], [1], [0, 0, 1, 1], [], []>} : vector<63x42xbf16>, vector<42x42xbf16>, vector<63x42xf32> -> vector<63x42xf32>
    %6 = arith.truncf %5 : vector<63x42xf32> to vector<63x42xbf16>
    %7 = vector.extract_strided_slice %6 {offsets = [0, 0], sizes = [21, 42], strides = [1, 1]} : vector<63x42xbf16> to vector<21x42xbf16>
    %c0_5 = arith.constant 0 : index
    %c0_6 = arith.constant 0 : index
    %c0_7 = arith.constant 0 : index
    %8 = vector.load %arg3[%c0_5, %c0_6, %c0_7] : memref<12x42x672xbf16, #tpu.memory_space<vmem>>, vector<1x42x672xbf16>
    %9 = vector.shape_cast %8 : vector<1x42x672xbf16> to vector<42x672xbf16>
    %cst_8 = arith.constant dense<0.000000e+00> : vector<21x672xf32>
    %10 = tpu.matmul %7, %9, %cst_8 {dimension_numbers = #tpu.dot_dimension_numbers<[1], [0], [0], [1], [0, 0, 1, 1], [], []>} : vector<21x42xbf16>, vector<42x672xbf16>, vector<21x672xf32> -> vector<21x672xf32>
    %11 = arith.addf %1, %10 : vector<21x672xf32>
    %12 = vector.extract_strided_slice %6 {offsets = [21, 0], sizes = [21, 42], strides = [1, 1]} : vector<63x42xbf16> to vector<21x42xbf16>
    %c4 = arith.constant 4 : index
    %c0_9 = arith.constant 0 : index
    %c0_10 = arith.constant 0 : index
    %13 = vector.load %arg3[%c4, %c0_9, %c0_10] : memref<12x42x672xbf16, #tpu.memory_space<vmem>>, vector<1x42x672xbf16>
    %14 = vector.shape_cast %13 : vector<1x42x672xbf16> to vector<42x672xbf16>
    %cst_11 = arith.constant dense<0.000000e+00> : vector<21x672xf32>
    %15 = tpu.matmul %12, %14, %cst_11 {dimension_numbers = #tpu.dot_dimension_numbers<[1], [0], [0], [1], [0, 0, 1, 1], [], []>} : vector<21x42xbf16>, vector<42x672xbf16>, vector<21x672xf32> -> vector<21x672xf32>
    %16 = arith.addf %11, %15 : vector<21x672xf32>
    %17 = vector.extract_strided_slice %6 {offsets = [42, 0], sizes = [21, 42], strides = [1, 1]} : vector<63x42xbf16> to vector<21x42xbf16>
    %c8 = arith.constant 8 : index
    %c0_12 = arith.constant 0 : index
    %c0_13 = arith.constant 0 : index
    %18 = vector.load %arg3[%c8, %c0_12, %c0_13] : memref<12x42x672xbf16, #tpu.memory_space<vmem>>, vector<1x42x672xbf16>
    %19 = vector.shape_cast %18 : vector<1x42x672xbf16> to vector<42x672xbf16>
    %cst_14 = arith.constant dense<0.000000e+00> : vector<21x672xf32>
    %20 = tpu.matmul %17, %19, %cst_14 {dimension_numbers = #tpu.dot_dimension_numbers<[1], [0], [0], [1], [0, 0, 1, 1], [], []>} : vector<21x42xbf16>, vector<42x672xbf16>, vector<21x672xf32> -> vector<21x672xf32>
    %21 = arith.addf %16, %20 : vector<21x672xf32>
    %c1 = arith.constant 1 : index
    %c0_15 = arith.constant 0 : index
    %c0_16 = arith.constant 0 : index
    %22 = vector.load %arg0[%c1, %c0_15, %c0_16] : memref<4x42x42xf32, #tpu.memory_space<vmem>>, vector<1x42x42xf32>
    %23 = vector.shape_cast %22 : vector<1x42x42xf32> to vector<42x42xf32>
    %24 = arith.truncf %23 : vector<42x42xf32> to vector<42x42xbf16>
    %cst_17 = arith.constant dense<0.000000e+00> : vector<63x42xf32>
    %25 = tpu.matmul %0, %24, %cst_17 {dimension_numbers = #tpu.dot_dimension_numbers<[1], [0], [0], [1], [0, 0, 1, 1], [], []>} : vector<63x42xbf16>, vector<42x42xbf16>, vector<63x42xf32> -> vector<63x42xf32>
    %26 = arith.truncf %25 : vector<63x42xf32> to vector<63x42xbf16>
    %27 = vector.extract_strided_slice %26 {offsets = [0, 0], sizes = [21, 42], strides = [1, 1]} : vector<63x42xbf16> to vector<21x42xbf16>
    %c1_18 = arith.constant 1 : index
    %c0_19 = arith.constant 0 : index
    %c0_20 = arith.constant 0 : index
    %28 = vector.load %arg3[%c1_18, %c0_19, %c0_20] : memref<12x42x672xbf16, #tpu.memory_space<vmem>>, vector<1x42x672xbf16>
    %29 = vector.shape_cast %28 : vector<1x42x672xbf16> to vector<42x672xbf16>
    %cst_21 = arith.constant dense<0.000000e+00> : vector<21x672xf32>
    %30 = tpu.matmul %27, %29, %cst_21 {dimension_numbers = #tpu.dot_dimension_numbers<[1], [0], [0], [1], [0, 0, 1, 1], [], []>} : vector<21x42xbf16>, vector<42x672xbf16>, vector<21x672xf32> -> vector<21x672xf32>
    %31 = arith.addf %21, %30 : vector<21x672xf32>
    %32 = vector.extract_strided_slice %26 {offsets = [21, 0], sizes = [21, 42], strides = [1, 1]} : vector<63x42xbf16> to vector<21x42xbf16>
    %c5 = arith.constant 5 : index
    %c0_22 = arith.constant 0 : index
    %c0_23 = arith.constant 0 : index
    %33 = vector.load %arg3[%c5, %c0_22, %c0_23] : memref<12x42x672xbf16, #tpu.memory_space<vmem>>, vector<1x42x672xbf16>
    %34 = vector.shape_cast %33 : vector<1x42x672xbf16> to vector<42x672xbf16>
    %cst_24 = arith.constant dense<0.000000e+00> : vector<21x672xf32>
    %35 = tpu.matmul %32, %34, %cst_24 {dimension_numbers = #tpu.dot_dimension_numbers<[1], [0], [0], [1], [0, 0, 1, 1], [], []>} : vector<21x42xbf16>, vector<42x672xbf16>, vector<21x672xf32> -> vector<21x672xf32>
    %36 = arith.addf %31, %35 : vector<21x672xf32>
    %37 = vector.extract_strided_slice %26 {offsets = [42, 0], sizes = [21, 42], strides = [1, 1]} : vector<63x42xbf16> to vector<21x42xbf16>
    %c9 = arith.constant 9 : index
    %c0_25 = arith.constant 0 : index
    %c0_26 = arith.constant 0 : index
    %38 = vector.load %arg3[%c9, %c0_25, %c0_26] : memref<12x42x672xbf16, #tpu.memory_space<vmem>>, vector<1x42x672xbf16>
    %39 = vector.shape_cast %38 : vector<1x42x672xbf16> to vector<42x672xbf16>
    %cst_27 = arith.constant dense<0.000000e+00> : vector<21x672xf32>
    %40 = tpu.matmul %37, %39, %cst_27 {dimension_numbers = #tpu.dot_dimension_numbers<[1], [0], [0], [1], [0, 0, 1, 1], [], []>} : vector<21x42xbf16>, vector<42x672xbf16>, vector<21x672xf32> -> vector<21x672xf32>
    %41 = arith.addf %36, %40 : vector<21x672xf32>
    %c2 = arith.constant 2 : index
    %c0_28 = arith.constant 0 : index
    %c0_29 = arith.constant 0 : index
    %42 = vector.load %arg0[%c2, %c0_28, %c0_29] : memref<4x42x42xf32, #tpu.memory_space<vmem>>, vector<1x42x42xf32>
    %43 = vector.shape_cast %42 : vector<1x42x42xf32> to vector<42x42xf32>
    %44 = arith.truncf %43 : vector<42x42xf32> to vector<42x42xbf16>
    %cst_30 = arith.constant dense<0.000000e+00> : vector<63x42xf32>
    %45 = tpu.matmul %0, %44, %cst_30 {dimension_numbers = #tpu.dot_dimension_numbers<[1], [0], [0], [1], [0, 0, 1, 1], [], []>} : vector<63x42xbf16>, vector<42x42xbf16>, vector<63x42xf32> -> vector<63x42xf32>
    %46 = arith.truncf %45 : vector<63x42xf32> to vector<63x42xbf16>
    %47 = vector.extract_strided_slice %46 {offsets = [0, 0], sizes = [21, 42], strides = [1, 1]} : vector<63x42xbf16> to vector<21x42xbf16>
    %c2_31 = arith.constant 2 : index
    %c0_32 = arith.constant 0 : index
    %c0_33 = arith.constant 0 : index
    %48 = vector.load %arg3[%c2_31, %c0_32, %c0_33] : memref<12x42x672xbf16, #tpu.memory_space<vmem>>, vector<1x42x672xbf16>
    %49 = vector.shape_cast %48 : vector<1x42x672xbf16> to vector<42x672xbf16>
    %cst_34 = arith.constant dense<0.000000e+00> : vector<21x672xf32>
    %50 = tpu.matmul %47, %49, %cst_34 {dimension_numbers = #tpu.dot_dimension_numbers<[1], [0], [0], [1], [0, 0, 1, 1], [], []>} : vector<21x42xbf16>, vector<42x672xbf16>, vector<21x672xf32> -> vector<21x672xf32>
    %51 = arith.addf %41, %50 : vector<21x672xf32>
    %52 = vector.extract_strided_slice %46 {offsets = [21, 0], sizes = [21, 42], strides = [1, 1]} : vector<63x42xbf16> to vector<21x42xbf16>
    %c6 = arith.constant 6 : index
    %c0_35 = arith.constant 0 : index
    %c0_36 = arith.constant 0 : index
    %53 = vector.load %arg3[%c6, %c0_35, %c0_36] : memref<12x42x672xbf16, #tpu.memory_space<vmem>>, vector<1x42x672xbf16>
    %54 = vector.shape_cast %53 : vector<1x42x672xbf16> to vector<42x672xbf16>
    %cst_37 = arith.constant dense<0.000000e+00> : vector<21x672xf32>
    %55 = tpu.matmul %52, %54, %cst_37 {dimension_numbers = #tpu.dot_dimension_numbers<[1], [0], [0], [1], [0, 0, 1, 1], [], []>} : vector<21x42xbf16>, vector<42x672xbf16>, vector<21x672xf32> -> vector<21x672xf32>
    %56 = arith.addf %51, %55 : vector<21x672xf32>
    %57 = vector.extract_strided_slice %46 {offsets = [42, 0], sizes = [21, 42], strides = [1, 1]} : vector<63x42xbf16> to vector<21x42xbf16>
    %c10 = arith.constant 10 : index
    %c0_38 = arith.constant 0 : index
    %c0_39 = arith.constant 0 : index
    %58 = vector.load %arg3[%c10, %c0_38, %c0_39] : memref<12x42x672xbf16, #tpu.memory_space<vmem>>, vector<1x42x672xbf16>
    %59 = vector.shape_cast %58 : vector<1x42x672xbf16> to vector<42x672xbf16>
    %cst_40 = arith.constant dense<0.000000e+00> : vector<21x672xf32>
    %60 = tpu.matmul %57, %59, %cst_40 {dimension_numbers = #tpu.dot_dimension_numbers<[1], [0], [0], [1], [0, 0, 1, 1], [], []>} : vector<21x42xbf16>, vector<42x672xbf16>, vector<21x672xf32> -> vector<21x672xf32>
    %61 = arith.addf %56, %60 : vector<21x672xf32>
    %c3 = arith.constant 3 : index
    %c0_41 = arith.constant 0 : index
    %c0_42 = arith.constant 0 : index
    %62 = vector.load %arg0[%c3, %c0_41, %c0_42] : memref<4x42x42xf32, #tpu.memory_space<vmem>>, vector<1x42x42xf32>
    %63 = vector.shape_cast %62 : vector<1x42x42xf32> to vector<42x42xf32>
    %64 = arith.truncf %63 : vector<42x42xf32> to vector<42x42xbf16>
    %cst_43 = arith.constant dense<0.000000e+00> : vector<63x42xf32>
    %65 = tpu.matmul %0, %64, %cst_43 {dimension_numbers = #tpu.dot_dimension_numbers<[1], [0], [0], [1], [0, 0, 1, 1], [], []>} : vector<63x42xbf16>, vector<42x42xbf16>, vector<63x42xf32> -> vector<63x42xf32>
    %66 = arith.truncf %65 : vector<63x42xf32> to vector<63x42xbf16>
    %67 = vector.extract_strided_slice %66 {offsets = [0, 0], sizes = [21, 42], strides = [1, 1]} : vector<63x42xbf16> to vector<21x42xbf16>
    %c3_44 = arith.constant 3 : index
    %c0_45 = arith.constant 0 : index
    %c0_46 = arith.constant 0 : index
    %68 = vector.load %arg3[%c3_44, %c0_45, %c0_46] : memref<12x42x672xbf16, #tpu.memory_space<vmem>>, vector<1x42x672xbf16>
    %69 = vector.shape_cast %68 : vector<1x42x672xbf16> to vector<42x672xbf16>
    %cst_47 = arith.constant dense<0.000000e+00> : vector<21x672xf32>
    %70 = tpu.matmul %67, %69, %cst_47 {dimension_numbers = #tpu.dot_dimension_numbers<[1], [0], [0], [1], [0, 0, 1, 1], [], []>} : vector<21x42xbf16>, vector<42x672xbf16>, vector<21x672xf32> -> vector<21x672xf32>
    %71 = arith.addf %61, %70 : vector<21x672xf32>
    %72 = vector.extract_strided_slice %66 {offsets = [21, 0], sizes = [21, 42], strides = [1, 1]} : vector<63x42xbf16> to vector<21x42xbf16>
    %c7 = arith.constant 7 : index
    %c0_48 = arith.constant 0 : index
    %c0_49 = arith.constant 0 : index
    %73 = vector.load %arg3[%c7, %c0_48, %c0_49] : memref<12x42x672xbf16, #tpu.memory_space<vmem>>, vector<1x42x672xbf16>
    %74 = vector.shape_cast %73 : vector<1x42x672xbf16> to vector<42x672xbf16>
    %cst_50 = arith.constant dense<0.000000e+00> : vector<21x672xf32>
    %75 = tpu.matmul %72, %74, %cst_50 {dimension_numbers = #tpu.dot_dimension_numbers<[1], [0], [0], [1], [0, 0, 1, 1], [], []>} : vector<21x42xbf16>, vector<42x672xbf16>, vector<21x672xf32> -> vector<21x672xf32>
    %76 = arith.addf %71, %75 : vector<21x672xf32>
    %77 = vector.extract_strided_slice %66 {offsets = [42, 0], sizes = [21, 42], strides = [1, 1]} : vector<63x42xbf16> to vector<21x42xbf16>
    %c11 = arith.constant 11 : index
    %c0_51 = arith.constant 0 : index
    %c0_52 = arith.constant 0 : index
    %78 = vector.load %arg3[%c11, %c0_51, %c0_52] : memref<12x42x672xbf16, #tpu.memory_space<vmem>>, vector<1x42x672xbf16>
    %79 = vector.shape_cast %78 : vector<1x42x672xbf16> to vector<42x672xbf16>
    %cst_53 = arith.constant dense<0.000000e+00> : vector<21x672xf32>
    %80 = tpu.matmul %77, %79, %cst_53 {dimension_numbers = #tpu.dot_dimension_numbers<[1], [0], [0], [1], [0, 0, 1, 1], [], []>} : vector<21x42xbf16>, vector<42x672xbf16>, vector<21x672xf32> -> vector<21x672xf32>
    %81 = arith.addf %76, %80 : vector<21x672xf32>
    %c0_54 = arith.constant 0 : index
    %c0_55 = arith.constant 0 : index
    %82 = vector.load %arg4[%c0_54, %c0_55] : memref<1x672xf32, #tpu.memory_space<vmem>>, vector<1x672xf32>
    %83 = vector.broadcast %82 : vector<1x672xf32> to vector<21x672xf32>
    %84 = arith.addf %81, %83 : vector<21x672xf32>
    %cst_56 = arith.constant 0.000000e+00 : f32
    %85 = vector.broadcast %cst_56 : f32 to vector<21x672xf32>
    %86 = arith.cmpf ogt, %84, %85 : vector<21x672xf32>
    %cst_57 = arith.constant 0.000000e+00 : f32
    %87 = vector.broadcast %cst_57 : f32 to vector<21x672xf32>
    %88 = arith.minimumf %84, %87 : vector<21x672xf32>
    %89 = math.exp %88 : vector<21x672xf32>
    %cst_58 = arith.constant 1.000000e+00 : f32
    %90 = vector.broadcast %cst_58 : f32 to vector<21x672xf32>
    %91 = arith.subf %89, %90 : vector<21x672xf32>
    %92 = arith.select %86, %84, %91 : vector<21x672xi1>, vector<21x672xf32>
    %c0_59 = arith.constant 0 : index
    %c0_60 = arith.constant 0 : index
    %93 = vector.load %arg5[%c0_59, %c0_60] : memref<33x21xbf16, #tpu.memory_space<vmem>>, vector<33x21xbf16>
    %94 = arith.truncf %92 : vector<21x672xf32> to vector<21x672xbf16>
    %cst_61 = arith.constant dense<0.000000e+00> : vector<33x672xf32>
    %95 = tpu.matmul %93, %94, %cst_61 {dimension_numbers = #tpu.dot_dimension_numbers<[1], [0], [0], [1], [0, 0, 1, 1], [], []>} : vector<33x21xbf16>, vector<21x672xbf16>, vector<33x672xf32> -> vector<33x672xf32>
    %96 = arith.truncf %95 : vector<33x672xf32> to vector<33x672xbf16>
    %cst_62 = arith.constant 0.000000e+00 : f32
    %97 = vector.broadcast %cst_62 : f32 to vector<11x352xf32>
    %98 = vector.extract_strided_slice %96 {offsets = [0, 0], sizes = [11, 672], strides = [1, 1]} : vector<33x672xbf16> to vector<11x672xbf16>
    %c0_63 = arith.constant 0 : index
    %c0_64 = arith.constant 0 : index
    %c0_65 = arith.constant 0 : index
    %99 = vector.load %arg6[%c0_63, %c0_64, %c0_65] : memref<3x672x352xbf16, #tpu.memory_space<vmem>>, vector<1x672x352xbf16>
    %100 = vector.shape_cast %99 : vector<1x672x352xbf16> to vector<672x352xbf16>
    %cst_66 = arith.constant dense<0.000000e+00> : vector<11x352xf32>
    %101 = tpu.matmul %98, %100, %cst_66 {dimension_numbers = #tpu.dot_dimension_numbers<[1], [0], [0], [1], [0, 0, 1, 1], [], []>} : vector<11x672xbf16>, vector<672x352xbf16>, vector<11x352xf32> -> vector<11x352xf32>
    %102 = arith.addf %97, %101 : vector<11x352xf32>
    %103 = vector.extract_strided_slice %96 {offsets = [11, 0], sizes = [11, 672], strides = [1, 1]} : vector<33x672xbf16> to vector<11x672xbf16>
    %c1_67 = arith.constant 1 : index
    %c0_68 = arith.constant 0 : index
    %c0_69 = arith.constant 0 : index
    %104 = vector.load %arg6[%c1_67, %c0_68, %c0_69] : memref<3x672x352xbf16, #tpu.memory_space<vmem>>, vector<1x672x352xbf16>
    %105 = vector.shape_cast %104 : vector<1x672x352xbf16> to vector<672x352xbf16>
    %cst_70 = arith.constant dense<0.000000e+00> : vector<11x352xf32>
    %106 = tpu.matmul %103, %105, %cst_70 {dimension_numbers = #tpu.dot_dimension_numbers<[1], [0], [0], [1], [0, 0, 1, 1], [], []>} : vector<11x672xbf16>, vector<672x352xbf16>, vector<11x352xf32> -> vector<11x352xf32>
    %107 = arith.addf %102, %106 : vector<11x352xf32>
    %108 = vector.extract_strided_slice %96 {offsets = [22, 0], sizes = [11, 672], strides = [1, 1]} : vector<33x672xbf16> to vector<11x672xbf16>
    %c2_71 = arith.constant 2 : index
    %c0_72 = arith.constant 0 : index
    %c0_73 = arith.constant 0 : index
    %109 = vector.load %arg6[%c2_71, %c0_72, %c0_73] : memref<3x672x352xbf16, #tpu.memory_space<vmem>>, vector<1x672x352xbf16>
    %110 = vector.shape_cast %109 : vector<1x672x352xbf16> to vector<672x352xbf16>
    %cst_74 = arith.constant dense<0.000000e+00> : vector<11x352xf32>
    %111 = tpu.matmul %108, %110, %cst_74 {dimension_numbers = #tpu.dot_dimension_numbers<[1], [0], [0], [1], [0, 0, 1, 1], [], []>} : vector<11x672xbf16>, vector<672x352xbf16>, vector<11x352xf32> -> vector<11x352xf32>
    %112 = arith.addf %107, %111 : vector<11x352xf32>
    %c0_75 = arith.constant 0 : index
    %c0_76 = arith.constant 0 : index
    %113 = vector.load %arg7[%c0_75, %c0_76] : memref<1x352xf32, #tpu.memory_space<vmem>>, vector<1x352xf32>
    %114 = vector.broadcast %113 : vector<1x352xf32> to vector<11x352xf32>
    %115 = arith.addf %112, %114 : vector<11x352xf32>
    %cst_77 = arith.constant 0.000000e+00 : f32
    %116 = vector.broadcast %cst_77 : f32 to vector<11x352xf32>
    %117 = arith.cmpf ogt, %115, %116 : vector<11x352xf32>
    %cst_78 = arith.constant 0.000000e+00 : f32
    %118 = vector.broadcast %cst_78 : f32 to vector<11x352xf32>
    %119 = arith.minimumf %115, %118 : vector<11x352xf32>
    %120 = math.exp %119 : vector<11x352xf32>
    %cst_79 = arith.constant 1.000000e+00 : f32
    %121 = vector.broadcast %cst_79 : f32 to vector<11x352xf32>
    %122 = arith.subf %120, %121 : vector<11x352xf32>
    %123 = arith.select %117, %115, %122 : vector<11x352xi1>, vector<11x352xf32>
    %c0_80 = arith.constant 0 : index
    %c0_81 = arith.constant 0 : index
    %124 = vector.load %arg8[%c0_80, %c0_81] : memref<18x11xbf16, #tpu.memory_space<vmem>>, vector<18x11xbf16>
    %125 = arith.truncf %123 : vector<11x352xf32> to vector<11x352xbf16>
    %cst_82 = arith.constant dense<0.000000e+00> : vector<18x352xf32>
    %126 = tpu.matmul %124, %125, %cst_82 {dimension_numbers = #tpu.dot_dimension_numbers<[1], [0], [0], [1], [0, 0, 1, 1], [], []>} : vector<18x11xbf16>, vector<11x352xbf16>, vector<18x352xf32> -> vector<18x352xf32>
    %127 = arith.truncf %126 : vector<18x352xf32> to vector<18x352xbf16>
    %cst_83 = arith.constant 0.000000e+00 : f32
    %128 = vector.broadcast %cst_83 : f32 to vector<6x192xf32>
    %129 = vector.extract_strided_slice %127 {offsets = [0, 0], sizes = [6, 352], strides = [1, 1]} : vector<18x352xbf16> to vector<6x352xbf16>
    %c0_84 = arith.constant 0 : index
    %c0_85 = arith.constant 0 : index
    %c0_86 = arith.constant 0 : index
    %130 = vector.load %arg9[%c0_84, %c0_85, %c0_86] : memref<3x352x192xbf16, #tpu.memory_space<vmem>>, vector<1x352x192xbf16>
    %131 = vector.shape_cast %130 : vector<1x352x192xbf16> to vector<352x192xbf16>
    %cst_87 = arith.constant dense<0.000000e+00> : vector<6x192xf32>
    %132 = tpu.matmul %129, %131, %cst_87 {dimension_numbers = #tpu.dot_dimension_numbers<[1], [0], [0], [1], [0, 0, 1, 1], [], []>} : vector<6x352xbf16>, vector<352x192xbf16>, vector<6x192xf32> -> vector<6x192xf32>
    %133 = arith.addf %128, %132 : vector<6x192xf32>
    %134 = vector.extract_strided_slice %127 {offsets = [6, 0], sizes = [6, 352], strides = [1, 1]} : vector<18x352xbf16> to vector<6x352xbf16>
    %c1_88 = arith.constant 1 : index
    %c0_89 = arith.constant 0 : index
    %c0_90 = arith.constant 0 : index
    %135 = vector.load %arg9[%c1_88, %c0_89, %c0_90] : memref<3x352x192xbf16, #tpu.memory_space<vmem>>, vector<1x352x192xbf16>
    %136 = vector.shape_cast %135 : vector<1x352x192xbf16> to vector<352x192xbf16>
    %cst_91 = arith.constant dense<0.000000e+00> : vector<6x192xf32>
    %137 = tpu.matmul %134, %136, %cst_91 {dimension_numbers = #tpu.dot_dimension_numbers<[1], [0], [0], [1], [0, 0, 1, 1], [], []>} : vector<6x352xbf16>, vector<352x192xbf16>, vector<6x192xf32> -> vector<6x192xf32>
    %138 = arith.addf %133, %137 : vector<6x192xf32>
    %139 = vector.extract_strided_slice %127 {offsets = [12, 0], sizes = [6, 352], strides = [1, 1]} : vector<18x352xbf16> to vector<6x352xbf16>
    %c2_92 = arith.constant 2 : index
    %c0_93 = arith.constant 0 : index
    %c0_94 = arith.constant 0 : index
    %140 = vector.load %arg9[%c2_92, %c0_93, %c0_94] : memref<3x352x192xbf16, #tpu.memory_space<vmem>>, vector<1x352x192xbf16>
    %141 = vector.shape_cast %140 : vector<1x352x192xbf16> to vector<352x192xbf16>
    %cst_95 = arith.constant dense<0.000000e+00> : vector<6x192xf32>
    %142 = tpu.matmul %139, %141, %cst_95 {dimension_numbers = #tpu.dot_dimension_numbers<[1], [0], [0], [1], [0, 0, 1, 1], [], []>} : vector<6x352xbf16>, vector<352x192xbf16>, vector<6x192xf32> -> vector<6x192xf32>
    %143 = arith.addf %138, %142 : vector<6x192xf32>
    %c0_96 = arith.constant 0 : index
    %c0_97 = arith.constant 0 : index
    %144 = vector.load %arg10[%c0_96, %c0_97] : memref<1x192xf32, #tpu.memory_space<vmem>>, vector<1x192xf32>
    %145 = vector.broadcast %144 : vector<1x192xf32> to vector<6x192xf32>
    %146 = arith.addf %143, %145 : vector<6x192xf32>
    %cst_98 = arith.constant 0.000000e+00 : f32
    %147 = vector.broadcast %cst_98 : f32 to vector<6x192xf32>
    %148 = arith.cmpf ogt, %146, %147 : vector<6x192xf32>
    %cst_99 = arith.constant 0.000000e+00 : f32
    %149 = vector.broadcast %cst_99 : f32 to vector<6x192xf32>
    %150 = arith.minimumf %146, %149 : vector<6x192xf32>
    %151 = math.exp %150 : vector<6x192xf32>
    %cst_100 = arith.constant 1.000000e+00 : f32
    %152 = vector.broadcast %cst_100 : f32 to vector<6x192xf32>
    %153 = arith.subf %151, %152 : vector<6x192xf32>
    %154 = arith.select %148, %146, %153 : vector<6x192xi1>, vector<6x192xf32>
    %c0_101 = arith.constant 0 : index
    %c0_102 = arith.constant 0 : index
    %155 = vector.load %arg11[%c0_101, %c0_102] : memref<9x6xbf16, #tpu.memory_space<vmem>>, vector<9x6xbf16>
    %156 = arith.truncf %154 : vector<6x192xf32> to vector<6x192xbf16>
    %cst_103 = arith.constant dense<0.000000e+00> : vector<9x192xf32>
    %157 = tpu.matmul %155, %156, %cst_103 {dimension_numbers = #tpu.dot_dimension_numbers<[1], [0], [0], [1], [0, 0, 1, 1], [], []>} : vector<9x6xbf16>, vector<6x192xbf16>, vector<9x192xf32> -> vector<9x192xf32>
    %158 = arith.truncf %157 : vector<9x192xf32> to vector<9x192xbf16>
    %cst_104 = arith.constant 0.000000e+00 : f32
    %159 = vector.broadcast %cst_104 : f32 to vector<3x96xf32>
    %160 = vector.extract_strided_slice %158 {offsets = [0, 0], sizes = [3, 192], strides = [1, 1]} : vector<9x192xbf16> to vector<3x192xbf16>
    %c0_105 = arith.constant 0 : index
    %c0_106 = arith.constant 0 : index
    %c0_107 = arith.constant 0 : index
    %161 = vector.load %arg12[%c0_105, %c0_106, %c0_107] : memref<3x192x96xbf16, #tpu.memory_space<vmem>>, vector<1x192x96xbf16>
    %162 = vector.shape_cast %161 : vector<1x192x96xbf16> to vector<192x96xbf16>
    %cst_108 = arith.constant dense<0.000000e+00> : vector<3x96xf32>
    %163 = tpu.matmul %160, %162, %cst_108 {dimension_numbers = #tpu.dot_dimension_numbers<[1], [0], [0], [1], [0, 0, 1, 1], [], []>} : vector<3x192xbf16>, vector<192x96xbf16>, vector<3x96xf32> -> vector<3x96xf32>
    %164 = arith.addf %159, %163 : vector<3x96xf32>
    %165 = vector.extract_strided_slice %158 {offsets = [3, 0], sizes = [3, 192], strides = [1, 1]} : vector<9x192xbf16> to vector<3x192xbf16>
    %c1_109 = arith.constant 1 : index
    %c0_110 = arith.constant 0 : index
    %c0_111 = arith.constant 0 : index
    %166 = vector.load %arg12[%c1_109, %c0_110, %c0_111] : memref<3x192x96xbf16, #tpu.memory_space<vmem>>, vector<1x192x96xbf16>
    %167 = vector.shape_cast %166 : vector<1x192x96xbf16> to vector<192x96xbf16>
    %cst_112 = arith.constant dense<0.000000e+00> : vector<3x96xf32>
    %168 = tpu.matmul %165, %167, %cst_112 {dimension_numbers = #tpu.dot_dimension_numbers<[1], [0], [0], [1], [0, 0, 1, 1], [], []>} : vector<3x192xbf16>, vector<192x96xbf16>, vector<3x96xf32> -> vector<3x96xf32>
    %169 = arith.addf %164, %168 : vector<3x96xf32>
    %170 = vector.extract_strided_slice %158 {offsets = [6, 0], sizes = [3, 192], strides = [1, 1]} : vector<9x192xbf16> to vector<3x192xbf16>
    %c2_113 = arith.constant 2 : index
    %c0_114 = arith.constant 0 : index
    %c0_115 = arith.constant 0 : index
    %171 = vector.load %arg12[%c2_113, %c0_114, %c0_115] : memref<3x192x96xbf16, #tpu.memory_space<vmem>>, vector<1x192x96xbf16>
    %172 = vector.shape_cast %171 : vector<1x192x96xbf16> to vector<192x96xbf16>
    %cst_116 = arith.constant dense<0.000000e+00> : vector<3x96xf32>
    %173 = tpu.matmul %170, %172, %cst_116 {dimension_numbers = #tpu.dot_dimension_numbers<[1], [0], [0], [1], [0, 0, 1, 1], [], []>} : vector<3x192xbf16>, vector<192x96xbf16>, vector<3x96xf32> -> vector<3x96xf32>
    %174 = arith.addf %169, %173 : vector<3x96xf32>
    %c0_117 = arith.constant 0 : index
    %c0_118 = arith.constant 0 : index
    %175 = vector.load %arg13[%c0_117, %c0_118] : memref<1x96xf32, #tpu.memory_space<vmem>>, vector<1x96xf32>
    %176 = vector.broadcast %175 : vector<1x96xf32> to vector<3x96xf32>
    %177 = arith.addf %174, %176 : vector<3x96xf32>
    %cst_119 = arith.constant 0.000000e+00 : f32
    %178 = vector.broadcast %cst_119 : f32 to vector<3x96xf32>
    %179 = arith.cmpf ogt, %177, %178 : vector<3x96xf32>
    %cst_120 = arith.constant 0.000000e+00 : f32
    %180 = vector.broadcast %cst_120 : f32 to vector<3x96xf32>
    %181 = arith.minimumf %177, %180 : vector<3x96xf32>
    %182 = math.exp %181 : vector<3x96xf32>
    %cst_121 = arith.constant 1.000000e+00 : f32
    %183 = vector.broadcast %cst_121 : f32 to vector<3x96xf32>
    %184 = arith.subf %182, %183 : vector<3x96xf32>
    %185 = arith.select %179, %177, %184 : vector<3x96xi1>, vector<3x96xf32>
    %c0_122 = arith.constant 0 : index
    %c0_123 = arith.constant 0 : index
    %186 = vector.load %arg23[%c0_122, %c0_123] : memref<3x96xf32, #tpu.memory_space<vmem>>, vector<3x96xf32>
    tpu.vector_store %arg23[%c0_122, %c0_123], %185 {strides = array<i32>} : memref<3x96xf32, #tpu.memory_space<vmem>>, vector<3x96xf32>,
    %c0_124 = arith.constant 0 : index
    %c0_125 = arith.constant 0 : index
    %187 = vector.load %arg16[%c0_124, %c0_125] : memref<1x768xf32, #tpu.memory_space<vmem>>, vector<1x768xf32>
    %188 = vector.extract_strided_slice %185 {offsets = [0, 0], sizes = [1, 96], strides = [1, 1]} : vector<3x96xf32> to vector<1x96xf32>
    %189 = arith.truncf %188 : vector<1x96xf32> to vector<1x96xbf16>
    %c0_126 = arith.constant 0 : index
    %c0_127 = arith.constant 0 : index
    %c0_128 = arith.constant 0 : index
    %190 = vector.load %arg14[%c0_126, %c0_127, %c0_128] : memref<3x96x768xbf16, #tpu.memory_space<vmem>>, vector<1x96x768xbf16>
    %191 = vector.shape_cast %190 : vector<1x96x768xbf16> to vector<96x768xbf16>
    %cst_129 = arith.constant dense<0.000000e+00> : vector<1x768xf32>
    %192 = tpu.matmul %189, %191, %cst_129 {dimension_numbers = #tpu.dot_dimension_numbers<[1], [0], [0], [1], [0, 0, 1, 1], [], []>} : vector<1x96xbf16>, vector<96x768xbf16>, vector<1x768xf32> -> vector<1x768xf32>
    %193 = arith.addf %187, %192 : vector<1x768xf32>
    %194 = vector.extract_strided_slice %185 {offsets = [1, 0], sizes = [1, 96], strides = [1, 1]} : vector<3x96xf32> to vector<1x96xf32>
    %195 = arith.truncf %194 : vector<1x96xf32> to vector<1x96xbf16>
    %c1_130 = arith.constant 1 : index
    %c0_131 = arith.constant 0 : index
    %c0_132 = arith.constant 0 : index
    %196 = vector.load %arg14[%c1_130, %c0_131, %c0_132] : memref<3x96x768xbf16, #tpu.memory_space<vmem>>, vector<1x96x768xbf16>
    %197 = vector.shape_cast %196 : vector<1x96x768xbf16> to vector<96x768xbf16>
    %cst_133 = arith.constant dense<0.000000e+00> : vector<1x768xf32>
    %198 = tpu.matmul %195, %197, %cst_133 {dimension_numbers = #tpu.dot_dimension_numbers<[1], [0], [0], [1], [0, 0, 1, 1], [], []>} : vector<1x96xbf16>, vector<96x768xbf16>, vector<1x768xf32> -> vector<1x768xf32>
    %199 = arith.addf %193, %198 : vector<1x768xf32>
    %200 = vector.extract_strided_slice %185 {offsets = [2, 0], sizes = [1, 96], strides = [1, 1]} : vector<3x96xf32> to vector<1x96xf32>
    %201 = arith.truncf %200 : vector<1x96xf32> to vector<1x96xbf16>
    %c2_134 = arith.constant 2 : index
    %c0_135 = arith.constant 0 : index
    %c0_136 = arith.constant 0 : index
    %202 = vector.load %arg14[%c2_134, %c0_135, %c0_136] : memref<3x96x768xbf16, #tpu.memory_space<vmem>>, vector<1x96x768xbf16>
    %203 = vector.shape_cast %202 : vector<1x96x768xbf16> to vector<96x768xbf16>
    %cst_137 = arith.constant dense<0.000000e+00> : vector<1x768xf32>
    %204 = tpu.matmul %201, %203, %cst_137 {dimension_numbers = #tpu.dot_dimension_numbers<[1], [0], [0], [1], [0, 0, 1, 1], [], []>} : vector<1x96xbf16>, vector<96x768xbf16>, vector<1x768xf32> -> vector<1x768xf32>
    %205 = arith.addf %199, %204 : vector<1x768xf32>
    %c0_138 = arith.constant 0 : index
    %c0_139 = arith.constant 0 : index
    %206 = vector.load %arg1[%c0_138, %c0_139] : memref<1x256xf32, #tpu.memory_space<vmem>>, vector<1x256xf32>
    %c0_140 = arith.constant 0 : index
    %c0_141 = arith.constant 0 : index
    %207 = vector.load %arg17[%c0_140, %c0_141] : memref<1x768xf32, #tpu.memory_space<vmem>>, vector<1x768xf32>
    %208 = arith.truncf %206 : vector<1x256xf32> to vector<1x256xbf16>
    %c0_142 = arith.constant 0 : index
    %c0_143 = arith.constant 0 : index
    %209 = vector.load %arg15[%c0_142, %c0_143] : memref<256x768xbf16, #tpu.memory_space<vmem>>, vector<256x768xbf16>
    %cst_144 = arith.constant dense<0.000000e+00> : vector<1x768xf32>
    %210 = tpu.matmul %208, %209, %cst_144 {dimension_numbers = #tpu.dot_dimension_numbers<[1], [0], [0], [1], [0, 0, 1, 1], [], []>} : vector<1x256xbf16>, vector<256x768xbf16>, vector<1x768xf32> -> vector<1x768xf32>
    %211 = arith.addf %207, %210 : vector<1x768xf32>
    %212 = vector.extract_strided_slice %205 {offsets = [0, 0], sizes = [1, 256], strides = [1, 1]} : vector<1x768xf32> to vector<1x256xf32>
    %213 = vector.extract_strided_slice %211 {offsets = [0, 0], sizes = [1, 256], strides = [1, 1]} : vector<1x768xf32> to vector<1x256xf32>
    %214 = arith.addf %212, %213 : vector<1x256xf32>
    %cst_145 = arith.constant 0.000000e+00 : f32
    %215 = vector.broadcast %cst_145 : f32 to vector<1x256xf32>
    %216 = arith.subf %215, %214 : vector<1x256xf32>
    %217 = math.exp %216 : vector<1x256xf32>
    %cst_146 = arith.constant 1.000000e+00 : f32
    %218 = vector.broadcast %cst_146 : f32 to vector<1x256xf32>
    %219 = arith.addf %218, %217 : vector<1x256xf32>
    %220 = tpu.reciprocal %219 {approx = true} : vector<1x256xf32> -> vector<1x256xf32>
    %221 = vector.extract_strided_slice %205 {offsets = [0, 256], sizes = [1, 256], strides = [1, 1]} : vector<1x768xf32> to vector<1x256xf32>
    %222 = vector.extract_strided_slice %211 {offsets = [0, 256], sizes = [1, 256], strides = [1, 1]} : vector<1x768xf32> to vector<1x256xf32>
    %223 = arith.addf %221, %222 : vector<1x256xf32>
    %cst_147 = arith.constant 0.000000e+00 : f32
    %224 = vector.broadcast %cst_147 : f32 to vector<1x256xf32>
    %225 = arith.subf %224, %223 : vector<1x256xf32>
    %226 = math.exp %225 : vector<1x256xf32>
    %cst_148 = arith.constant 1.000000e+00 : f32
    %227 = vector.broadcast %cst_148 : f32 to vector<1x256xf32>
    %228 = arith.addf %227, %226 : vector<1x256xf32>
    %229 = tpu.reciprocal %228 {approx = true} : vector<1x256xf32> -> vector<1x256xf32>
    %230 = vector.extract_strided_slice %205 {offsets = [0, 512], sizes = [1, 256], strides = [1, 1]} : vector<1x768xf32> to vector<1x256xf32>
    %231 = vector.extract_strided_slice %211 {offsets = [0, 512], sizes = [1, 256], strides = [1, 1]} : vector<1x768xf32> to vector<1x256xf32>
    %232 = arith.mulf %220, %231 : vector<1x256xf32>
    %233 = arith.addf %230, %232 : vector<1x256xf32>
    %234 = math.tanh %233 : vector<1x256xf32>
    %cst_149 = arith.constant 1.000000e+00 : f32
    %235 = vector.broadcast %cst_149 : f32 to vector<1x256xf32>
    %236 = arith.subf %235, %229 : vector<1x256xf32>
    %237 = arith.mulf %236, %234 : vector<1x256xf32>
    %238 = arith.mulf %229, %206 : vector<1x256xf32>
    %239 = arith.addf %237, %238 : vector<1x256xf32>
    %c0_150 = arith.constant 0 : index
    %c0_151 = arith.constant 0 : index
    %240 = vector.load %arg20[%c0_150, %c0_151] : memref<1x256xf32, #tpu.memory_space<vmem>>, vector<1x256xf32>
    tpu.vector_store %arg20[%c0_150, %c0_151], %239 {strides = array<i32>} : memref<1x256xf32, #tpu.memory_space<vmem>>, vector<1x256xf32>,
    %241 = arith.truncf %239 : vector<1x256xf32> to vector<1x256xbf16>
    %c0_152 = arith.constant 0 : index
    %c0_153 = arith.constant 0 : index
    %242 = vector.load %arg18[%c0_152, %c0_153] : memref<256x7xbf16, #tpu.memory_space<vmem>>, vector<256x7xbf16>
    %cst_154 = arith.constant dense<0.000000e+00> : vector<1x7xf32>
    %243 = tpu.matmul %241, %242, %cst_154 {dimension_numbers = #tpu.dot_dimension_numbers<[1], [0], [0], [1], [0, 0, 1, 1], [], []>} : vector<1x256xbf16>, vector<256x7xbf16>, vector<1x7xf32> -> vector<1x7xf32>
    %c0_155 = arith.constant 0 : index
    %c0_156 = arith.constant 0 : index
    %244 = vector.load %arg19[%c0_155, %c0_156] : memref<1x7xf32, #tpu.memory_space<vmem>>, vector<1x7xf32>
    %245 = arith.addf %243, %244 : vector<1x7xf32>
    %c0_157 = arith.constant 0 : index
    %c0_158 = arith.constant 0 : index
    %246 = vector.load %arg22[%c0_157, %c0_158] : memref<1x7xf32, #tpu.memory_space<vmem>>, vector<1x7xf32>
    tpu.vector_store %arg22[%c0_157, %c0_158], %245 {strides = array<i32>} : memref<1x7xf32, #tpu.memory_space<vmem>>, vector<1x7xf32>,
    %247 = vector.extract_strided_slice %245 {offsets = [0, 0], sizes = [1, 6], strides = [1, 1]} : vector<1x7xf32> to vector<1x6xf32>
    %cst_159 = arith.constant dense<0xFF800000> : vector<1xf32>
    %248 = vector.multi_reduction <maximumf>, %247, %cst_159 [1] : vector<1x6xf32> to vector<1xf32>
    %249 = vector.shape_cast %248 : vector<1xf32> to vector<1x1xf32>
    %250 = vector.broadcast %249 : vector<1x1xf32> to vector<1x6xf32>
    %251 = arith.subf %247, %250 : vector<1x6xf32>
    %252 = math.exp %251 : vector<1x6xf32>
    %cst_160 = arith.constant dense<0.000000e+00> : vector<1xf32>
    %253 = vector.multi_reduction <add>, %252, %cst_160 [1] : vector<1x6xf32> to vector<1xf32>
    %254 = vector.shape_cast %253 : vector<1xf32> to vector<1x1xf32>
    %255 = math.log %254 : vector<1x1xf32>
    %256 = arith.addf %255, %249 : vector<1x1xf32>
    %257 = vector.broadcast %256 : vector<1x1xf32> to vector<1x6xf32>
    %258 = arith.subf %247, %257 : vector<1x6xf32>
    %c0_161 = arith.constant 0 : index
    %c0_162 = arith.constant 0 : index
    %259 = vector.load %arg21[%c0_161, %c0_162] : memref<1x6xf32, #tpu.memory_space<vmem>>, vector<1x6xf32>
    tpu.vector_store %arg21[%c0_161, %c0_162], %258 {strides = array<i32>} : memref<1x6xf32, #tpu.memory_space<vmem>>, vector<1x6xf32>,
    return
  }
}

</mosaic_0001>

<bundles_post_ra>
// kernel: actor_critic_forward.1
= control target key start
LH: loop header
LB: loop body
LE: loop exit
PB: predicated region body
PF: predicated region fallthrough
CT: control target
= control target key end

     0   :  { %s18662_s0 = inlined_call_operand.vmem [shape: f32[4,42,42], index: 0, kind: input, shape index: {}]   ;;  %s18663_s1 = inlined_call_operand.hbm [shape: f32[1,256], index: 1, kind: input, shape index: {}]   ;;  %s18664_s2 = inlined_call_operand.vmem [shape: bf16[63,42], index: 2, kind: input, shape index: {}]   ;;  %s18665_s3 = inlined_call_operand.vmem [shape: bf16[12,42,672], index: 3, kind: input, shape index: {}]   ;;  %s18666_s4 = inlined_call_operand.hbm [shape: f32[1,672], index: 4, kind: input, shape index: {}]   ;;  %s18667_s5 = inlined_call_operand.vmem [shape: bf16[33,21], index: 5, kind: input, shape index: {}]   ;;  %s18668_s6 = inlined_call_operand.hbm [shape: bf16[3,672,352], index: 6, kind: input, shape index: {}]   ;;  %s18669_s7 = inlined_call_operand.hbm [shape: f32[1,352], index: 7, kind: input, shape index: {}]   ;;  %s18670_s8 = inlined_call_operand.vmem [shape: bf16[18,11], index: 8, kind: input, shape index: {}]   ;;  %s18671_s9 = inlined_call_operand.vmem [shape: bf16[3,352,192], index: 9, kind: input, shape index: {}]   ;;  %s18672_s10 = inlined_call_operand.hbm [shape: f32[1,192], index: 10, kind: input, shape index: {}]   ;;  %s18673_s11 = inlined_call_operand.vmem [shape: bf16[9,6], index: 11, kind: input, shape index: {}]   ;;  %s18674_s12 = inlined_call_operand.hbm [shape: bf16[3,192,96], index: 12, kind: input, shape index: {}]   ;;  %s18675_s13 = inlined_call_operand.hbm [shape: f32[1,96], index: 13, kind: input, shape index: {}]   ;;  %s18676_s14 = inlined_call_operand.vmem [shape: bf16[3,96,768], index: 14, kind: input, shape index: {}]   ;;  %s18677_s15 = inlined_call_operand.hbm [shape: bf16[256,768], index: 15, kind: input, shape index: {}]   ;;  %s18678_s16 = inlined_call_operand.hbm [shape: f32[1,768], index: 16, kind: input, shape index: {}]   ;;  %s18679_s17 = inlined_call_operand.hbm [shape: f32[1,768], index: 17, kind: input, shape index: {}]   ;;  %s18680_s18 = inlined_call_operand.vmem [shape: bf16[256,7], index: 18, kind: input, shape index: {}]   ;;  %s18681_s19 = inlined_call_operand.hbm [shape: f32[1,7], index: 19, kind: input, shape index: {}]   ;;  %s18682_s20 = inlined_call_operand.hbm [shape: f32[1,256], index: 20, kind: output, shape index: {0}]   ;;  %s18683_s21 = inlined_call_operand.vmem [shape: f32[1,6], index: 21, kind: output, shape index: {1}]   ;;  %s18684_s22 = inlined_call_operand.vmem [shape: f32[1,7], index: 22, kind: output, shape index: {2}]   ;;  %s18685_s23 = inlined_call_operand.hbm [shape: f32[3,96], index: 23, kind: output, shape index: {3}]  }
   0x1   :  { %18694 = sst [smem:[#allocation31_spill]] %s18662_s0 }
   0x2   :  { %18695 = sst [smem:[#allocation32_spill]] %s18663_s1 }
   0x3   :  { %18696 = sst [smem:[#allocation33_spill]] %s18664_s2 }
   0x4   :  { %18697 = sst [smem:[#allocation34_spill]] %s18665_s3 }
   0x5   :  { %18698 = sst [smem:[#allocation35_spill]] %s18666_s4 }
   0x6   :  { %18699 = sst [smem:[#allocation36_spill]] %s18667_s5 }
   0x7   :  { %18700 = sst [smem:[#allocation37_spill]] %s18668_s6 }
   0x8   :  { %18701 = sst [smem:[#allocation38_spill]] %s18669_s7 }
   0x9   :  { %29 = vsyncpa [#allocation3], 0 }
   0xa   :  { %30 = vsyncpa [#allocation6], 0 }
   0xb   :  { %31 = vsyncpa [#allocation9], 0 }
   0xc   :  { %32 = vsyncpa [#allocation12], 0 }
   0xd   :  { %33 = vsyncpa [#allocation15], 0 }
   0xe   :  { %34 = vsyncpa [#allocation18], 0 }
   0xf   :  { %35 = vsyncpa [#allocation4], 0 }
  0x10   :  { %36 = vsyncpa [#allocation22], 0  ;;  %s15863_s4 = smov [#allocation5]   ;;  %s15864_s24 = smov [#allocation8]  }
  0x11   :  { %s59_s30 = sshll.u32 %s15863_s4, 4  ;;  %s83_s25 = sshll.u32 %s15864_s24, 4  ;;  %s60_s30 = int_to_ptr.vmem [resolvable:$true] %s59_s30  ;;  %s84_s25 = int_to_ptr.vmem [resolvable:$true] %s83_s25 }
  0x12   :  { %s18702_s26 = sld [smem:[#allocation35_spill]] }
  0x18   :  { %s15561_s2 = scalar_lea.hbm %s18702_s26, 96 }
  0x19   :  { %p15562_p0 = scmp.ne.s32.totalorder %s18702_s26, %s15561_s2  ;;  %p15565_p1 = scmp.lt.u32.totalorder %s15561_s2, %s18702_s26 }
  0x1b   :  { %p15567_p2 = pnand %p15565_p1, %p15562_p0 }
  0x1d   :  { %15570 = shalt.err (!%p15567_p2)
}
  0x1e   :  { %s15571_s29 = scalar_lea.vmem %s60_s30, 96  ;;  %p15576_p4 = scmp.lt.s32.totalorder %s60_s30, %s60_s30 }
  0x1f   :  { %p15572_p3 = scmp.ne.s32.totalorder %s60_s30, %s15571_s29  ;;  %p15577_p5 = scmp.lt.s32.totalorder %s15571_s29, %s15571_s29 }
  0x21   :  { %p15578_p6 = por %p15577_p5, %p15576_p4 }
  0x23   :  { %p15579_p7 = pnand %p15578_p6, %p15572_p3 }
  0x25   :  { %15582 = shalt.err (!%p15579_p7)
}
  0x26   :  { %62 = dma.hbm_to_vmem [thread:$0]  %s18702_s26, 96, %s60_s30, [#allocation6]  }
  0x27   :  { %s18703_s5 = sld [smem:[#allocation38_spill]] }
  0x2d   :  { %s15583_s1 = scalar_lea.hbm %s18703_s5, 48 }
  0x2e   :  { %p15584_p8 = scmp.ne.s32.totalorder %s18703_s5, %s15583_s1  ;;  %p15587_p9 = scmp.lt.u32.totalorder %s15583_s1, %s18703_s5 }
  0x30   :  { %p15589_p10 = pnand %p15587_p9, %p15584_p8 }
  0x32   :  { %15592 = shalt.err (!%p15589_p10)
}
  0x33   :  { %s15593_s28 = scalar_lea.vmem %s84_s25, 48  ;;  %s15597_s29 = scalar_lea.vmem %s84_s25, 64 }
  0x34   :  { %p15594_p11 = scmp.ne.s32.totalorder %s84_s25, %s15593_s28  ;;  %p15598_p12 = scmp.lt.s32.totalorder %s84_s25, %s84_s25 }
  0x35   :  { %p15599_p13 = scmp.lt.s32.totalorder %s15597_s29, %s15593_s28 }
  0x37   :  { %p15600_p0 = por %p15599_p13, %p15598_p12 }
  0x39   :  { %p15601_p1 = pnand %p15600_p0, %p15594_p11 }
  0x3b   :  { %15604 = shalt.err (!%p15601_p1)
}
  0x3c   :  { %86 = dma.hbm_to_vmem [thread:$0]  %s18703_s5, 48, %s84_s25, [#allocation9]  }
  0x3d   :  { %s15865_s3 = smov [#allocation11]   ;;  %s15605_s1 = scalar_lea.hbm %s18674_s12, 4608 }
  0x3e   :  { %s108_s0 = sshll.u32 %s15865_s3, 4  ;;  %p15606_p2 = scmp.ne.s32.totalorder %s18674_s12, %s15605_s1  ;;  %s109_s0 = int_to_ptr.vmem [resolvable:$true] %s108_s0 }
  0x3f   :  { %p15609_p3 = scmp.lt.u32.totalorder %s15605_s1, %s18674_s12 }
  0x41   :  { %p15611_p4 = pnand %p15609_p3, %p15606_p2 }
  0x43   :  { %15614 = shalt.err (!%p15611_p4)
}
  0x44   :  { %s15615_s28 = scalar_lea.vmem %s109_s0, 4608  ;;  %p15620_p6 = scmp.lt.s32.totalorder %s109_s0, %s109_s0 }
  0x45   :  { %p15616_p5 = scmp.ne.s32.totalorder %s109_s0, %s15615_s28  ;;  %p15621_p7 = scmp.lt.s32.totalorder %s15615_s28, %s15615_s28 }
  0x47   :  { %p15622_p8 = por %p15621_p7, %p15620_p6 }
  0x49   :  { %p15623_p9 = pnand %p15622_p8, %p15616_p5 }
  0x4b   :  { %15626 = shalt.err (!%p15623_p9)
}
  0x4c   :  { %s15866_s25 = smov 64   ;;  %s15867_s5 = smov 4  }
  0x4d   :  { %114 = dma.hbm_to_vmem [thread:$0]  %s18674_s12, 4608, %s109_s0, [#allocation12], %s15866_s25, %s15866_s25, %s15867_s5  }
  0x4e   :  { %s15868_s26 = smov [#allocation14]   ;;  %s15627_s1 = scalar_lea.hbm %s18677_s15, 12288 }
  0x4f   :  { %s132_s3 = sshll.u32 %s15868_s26, 4  ;;  %p15628_p10 = scmp.ne.s32.totalorder %s18677_s15, %s15627_s1  ;;  %s133_s3 = int_to_ptr.vmem [resolvable:$true] %s132_s3 }
  0x50   :  { %p15631_p11 = scmp.lt.u32.totalorder %s15627_s1, %s18677_s15 }
  0x52   :  { %p15633_p12 = pnand %p15631_p11, %p15628_p10 }
  0x54   :  { %15636 = shalt.err (!%p15633_p12)
}
  0x55   :  { %s15637_s28 = scalar_lea.vmem %s133_s3, 12288  ;;  %p15642_p0 = scmp.lt.s32.totalorder %s133_s3, %s133_s3 }
  0x56   :  { %p15638_p13 = scmp.ne.s32.totalorder %s133_s3, %s15637_s28  ;;  %p15643_p1 = scmp.lt.s32.totalorder %s15637_s28, %s15637_s28 }
  0x58   :  { %p15644_p2 = por %p15643_p1, %p15642_p0 }
  0x5a   :  { %p15645_p3 = pnand %p15644_p2, %p15638_p13 }
  0x5c   :  { %15648 = shalt.err (!%p15645_p3)
}
  0x5d   :  { %s15869_s12 = smov 384   ;;  %s15870_s0 = smov 24  }
  0x5e   :  { %138 = dma.hbm_to_vmem [thread:$0]  %s18677_s15, 12288, %s133_s3, [#allocation15], %s15869_s12, %s15869_s12, %s15870_s0  }
  0x5f   :  { %s15871_s29 = smov [#allocation17]   ;;  %s15872_s26 = smov [#allocation2]  }
  0x60   :  { %s155_s30 = sshll.u32 %s15871_s29, 4  ;;  %s45_s4 = sshll.u32 %s15872_s26, 4  ;;  %s156_s30 = int_to_ptr.vmem [resolvable:$true] %s155_s30  ;;  %s46_s4 = int_to_ptr.vmem [resolvable:$true] %s45_s4 }
  0x61   :  { %s15649_s6 = scalar_lea.hbm %s18679_s17, 96 }
  0x62   :  { %p15650_p4 = scmp.ne.s32.totalorder %s18679_s17, %s15649_s6  ;;  %p15653_p5 = scmp.lt.u32.totalorder %s15649_s6, %s18679_s17 }
  0x64   :  { %p15655_p6 = pnand %p15653_p5, %p15650_p4 }
  0x66   :  { %15658 = shalt.err (!%p15655_p6)
}
  0x67   :  { %s15659_s15 = scalar_lea.vmem %s156_s30, 96  ;;  %p15664_p8 = scmp.lt.s32.totalorder %s156_s30, %s156_s30 }
  0x68   :  { %p15660_p7 = scmp.ne.s32.totalorder %s156_s30, %s15659_s15  ;;  %p15665_p9 = scmp.lt.s32.totalorder %s15659_s15, %s15659_s15 }
  0x6a   :  { %p15666_p10 = por %p15665_p9, %p15664_p8 }
  0x6c   :  { %p15667_p11 = pnand %p15666_p10, %p15660_p7 }
  0x6e   :  { %15670 = shalt.err (!%p15667_p11)
}
  0x6f   :  { %158 = dma.hbm_to_vmem [thread:$0]  %s18679_s17, 96, %s156_s30, [#allocation18]  }
  0x70   :  { %s18704_s5 = sld [smem:[#allocation32_spill]] }
  0x76   :  { %s15671_s29 = scalar_lea.hbm %s18704_s5, 32 }
  0x77   :  { %p15672_p12 = scmp.ne.s32.totalorder %s18704_s5, %s15671_s29  ;;  %p15675_p13 = scmp.lt.u32.totalorder %s15671_s29, %s18704_s5 }
  0x79   :  { %p15677_p0 = pnand %p15675_p13, %p15672_p12 }
  0x7b   :  { %15680 = shalt.err (!%p15677_p0)
}
  0x7c   :  { %s15681_s27 = scalar_lea.vmem %s46_s4, 32  ;;  %p15686_p2 = scmp.lt.s32.totalorder %s46_s4, %s46_s4 }
  0x7d   :  { %p15682_p1 = scmp.ne.s32.totalorder %s46_s4, %s15681_s27  ;;  %p15687_p3 = scmp.lt.s32.totalorder %s15681_s27, %s15681_s27 }
  0x7f   :  { %p15688_p4 = por %p15687_p3, %p15686_p2 }
  0x81   :  { %p15689_p5 = pnand %p15688_p4, %p15682_p1 }
  0x83   :  { %15692 = shalt.err (!%p15689_p5)
}
  0x84   :  { %48 = dma.hbm_to_vmem [thread:$0]  %s18704_s5, 32, %s46_s4, [#allocation3]  }
  0x85   :  { %s15873_s2 = smov [#allocation7]   ;;  %s18705_s3 = sld [smem:[#allocation37_spill]] }
  0x86   :  { %s70_s7 = sshll.u32 %s15873_s2, 4  ;;  %s71_s7 = int_to_ptr.vmem [resolvable:$true] %s70_s7 }
  0x8b   :  { %s15693_s12 = scalar_lea.hbm %s18705_s3, 48384 }
  0x8c   :  { %p15694_p6 = scmp.ne.s32.totalorder %s18705_s3, %s15693_s12  ;;  %p15697_p7 = scmp.lt.u32.totalorder %s15693_s12, %s18705_s3 }
  0x8e   :  { %p15699_p8 = pnand %p15697_p7, %p15694_p6 }
  0x90   :  { %15702 = shalt.err (!%p15699_p8)
}
  0x91   :  { %s15703_s24 = scalar_lea.vmem %s71_s7, 48384  ;;  %p15708_p10 = scmp.lt.s32.totalorder %s71_s7, %s71_s7 }
  0x92   :  { %p15704_p9 = scmp.ne.s32.totalorder %s71_s7, %s15703_s24  ;;  %p15709_p11 = scmp.lt.s32.totalorder %s15703_s24, %s15703_s24 }
  0x94   :  { %p15710_p12 = por %p15709_p11, %p15708_p10 }
  0x96   :  { %p15711_p13 = pnand %p15710_p12, %p15704_p9 }
  0x98   :  { %15714 = shalt.err (!%p15711_p13)
}
  0x99   :  { %s15874_s4 = smov 192   ;;  %s15875_s5 = smov 12  }
  0x9a   :  { %76 = dma.hbm_to_vmem [thread:$0]  %s18705_s3, 48384, %s71_s7, [#allocation6], %s15874_s4, %s15874_s4, %s15875_s5  }
  0x9b   :  { %s15876_s27 = smov [#allocation10]   ;;  %s15877_s30 = smov [#allocation13]  }
  0x9c   :  { %s97_s17 = sshll.u32 %s15876_s27, 4  ;;  %s121_s2 = sshll.u32 %s15877_s30, 4  ;;  %s98_s17 = int_to_ptr.vmem [resolvable:$true] %s97_s17  ;;  %s122_s2 = int_to_ptr.vmem [resolvable:$true] %s121_s2 }
  0x9d   :  { %s15715_s12 = scalar_lea.hbm %s18672_s10, 32 }
  0x9e   :  { %p15716_p0 = scmp.ne.s32.totalorder %s18672_s10, %s15715_s12  ;;  %p15719_p1 = scmp.lt.u32.totalorder %s15715_s12, %s18672_s10 }
  0xa0   :  { %p15721_p2 = pnand %p15719_p1, %p15716_p0 }
  0xa2   :  { %15724 = shalt.err (!%p15721_p2)
}
  0xa3   :  { %s15725_s7 = scalar_lea.vmem %s98_s17, 32  ;;  %p15730_p4 = scmp.lt.s32.totalorder %s98_s17, %s98_s17 }
  0xa4   :  { %p15726_p3 = scmp.ne.s32.totalorder %s98_s17, %s15725_s7  ;;  %p15731_p5 = scmp.lt.s32.totalorder %s15725_s7, %s15725_s7 }
  0xa6   :  { %p15732_p6 = por %p15731_p5, %p15730_p4 }
  0xa8   :  { %p15733_p7 = pnand %p15732_p6, %p15726_p3 }
  0xaa   :  { %15736 = shalt.err (!%p15733_p7)
}
  0xab   :  { %100 = dma.hbm_to_vmem [thread:$0]  %s18672_s10, 32, %s98_s17, [#allocation9]  }
  0xac   :  { %s15737_s1 = scalar_lea.hbm %s18675_s13, 16 }
  0xad   :  { %p15738_p8 = scmp.ne.s32.totalorder %s18675_s13, %s15737_s1  ;;  %p15741_p9 = scmp.lt.u32.totalorder %s15737_s1, %s18675_s13 }
  0xaf   :  { %p15743_p10 = pnand %p15741_p9, %p15738_p8 }
  0xb1   :  { %15746 = shalt.err (!%p15743_p10)
}
  0xb2   :  { %s15747_s15 = scalar_lea.vmem %s122_s2, 16  ;;  %s15751_s12 = scalar_lea.vmem %s122_s2, 32 }
  0xb3   :  { %p15748_p11 = scmp.ne.s32.totalorder %s122_s2, %s15747_s15  ;;  %p15752_p12 = scmp.lt.s32.totalorder %s122_s2, %s122_s2 }
  0xb4   :  { %p15753_p13 = scmp.lt.s32.totalorder %s15751_s12, %s15747_s15 }
  0xb6   :  { %p15754_p0 = por %p15753_p13, %p15752_p12 }
  0xb8   :  { %p15755_p1 = pnand %p15754_p0, %p15748_p11 }
  0xba   :  { %15758 = shalt.err (!%p15755_p1)
}
  0xbb   :  { %124 = dma.hbm_to_vmem [thread:$0]  %s18675_s13, 16, %s122_s2, [#allocation12]  }
  0xbc   :  { %s15878_s0 = smov [#allocation16]   ;;  %s15879_s29 = smov [#allocation19]  }
  0xbd   :  { %s145_s25 = sshll.u32 %s15878_s0, 4  ;;  %s167_s26 = sshll.u32 %s15879_s29, 4  ;;  %s146_s25 = int_to_ptr.vmem [resolvable:$true] %s145_s25  ;;  %s168_s26 = int_to_ptr.vmem [resolvable:$true] %s167_s26 }
  0xbe   :  { %s15759_s24 = scalar_lea.hbm %s18678_s16, 96 }
  0xbf   :  { %p15760_p2 = scmp.ne.s32.totalorder %s18678_s16, %s15759_s24  ;;  %p15763_p3 = scmp.lt.u32.totalorder %s15759_s24, %s18678_s16 }
  0xc1   :  { %p15765_p4 = pnand %p15763_p3, %p15760_p2 }
  0xc3   :  { %15768 = shalt.err (!%p15765_p4)
}
  0xc4   :  { %s15769_s13 = scalar_lea.vmem %s146_s25, 96  ;;  %p15774_p6 = scmp.lt.s32.totalorder %s146_s25, %s146_s25 }
  0xc5   :  { %p15770_p5 = scmp.ne.s32.totalorder %s146_s25, %s15769_s13  ;;  %p15775_p7 = scmp.lt.s32.totalorder %s15769_s13, %s15769_s13 }
  0xc7   :  { %p15776_p8 = por %p15775_p7, %p15774_p6 }
  0xc9   :  { %p15777_p9 = pnand %p15776_p8, %p15770_p5 }
  0xcb   :  { %15780 = shalt.err (!%p15777_p9)
}
  0xcc   :  { %148 = dma.hbm_to_vmem [thread:$0]  %s18678_s16, 96, %s146_s25, [#allocation15]  }
  0xcd   :  { %s15781_s15 = scalar_lea.hbm %s18681_s19, 16 }
  0xce   :  { %p15782_p10 = scmp.ne.s32.totalorder %s18681_s19, %s15781_s15  ;;  %p15785_p11 = scmp.lt.u32.totalorder %s15781_s15, %s18681_s19 }
  0xd0   :  { %p15787_p12 = pnand %p15785_p11, %p15782_p10 }
  0xd2   :  { %15790 = shalt.err (!%p15787_p12)
}
  0xd3   :  { %s15791_s29 = scalar_lea.vmem %s168_s26, 16  ;;  %s15795_s7 = scalar_lea.vmem %s168_s26, 32 }
  0xd4   :  { %p15792_p13 = scmp.ne.s32.totalorder %s168_s26, %s15791_s29  ;;  %p15796_p0 = scmp.lt.s32.totalorder %s168_s26, %s168_s26 }
  0xd5   :  { %p15797_p1 = scmp.lt.s32.totalorder %s15795_s7, %s15791_s29 }
  0xd7   :  { %p15798_p2 = por %p15797_p1, %p15796_p0 }
  0xd9   :  { %p15799_p3 = pnand %p15798_p2, %p15792_p13 }
  0xdb   :  { %15802 = shalt.err (!%p15799_p3)
}
  0xdc   :  { %170 = dma.hbm_to_vmem [thread:$0]  %s18681_s19, 16, %s168_s26, [#allocation18]  }
  0xdd   :  { %15847 = dma.done.wait [#allocation3], 32  }
  0xde   :  { %15848 = vsyncadd [#allocation3], 4294967264 }
  0xdf   :  { %15849 = dma.done.wait [#allocation6], 48480  }
  0xe0   :  { %15850 = vsyncadd [#allocation6], 4294918816 }
  0xe1   :  { %15851 = dma.done.wait [#allocation9], 80  }
  0xe2   :  { %15852 = vsyncadd [#allocation9], 4294967216 }
  0xe3   :  { %15853 = dma.done.wait [#allocation12], 4624  }
  0xe4   :  { %15854 = vsyncadd [#allocation12], 4294962672 }
  0xe5   :  { %15855 = dma.done.wait [#allocation15], 12384  }
  0xe6   :  { %15856 = vsyncadd [#allocation15], 4294954912 }
  0xe7   :  { %15857 = dma.done.wait [#allocation18], 112  }
  0xe8   :  { %15858 = vsyncadd [#allocation18], 4294967184  ;;  %s18706_s4 = sld [smem:[#allocation31_spill]]  ;;  %vm242_vm0 = vcmask 343040   ;;  %s18707_s10 = sld [smem:[#allocation33_spill]]  ;;  %vm255_vm1 = vcmask 1044480  }
  0xe9   :  { %s18708_s5 = sld [smem:[#allocation34_spill]]  ;;  %v15880_v28 = vmov 0   ;;  %vm925_vm2 = vcmask 1042432   ;;  %vm365_vm3 = vsmask.f32 5376  ;;  %vm4397_vm12 = vcmask 1041408  }
  0xea   :  { %523 = vmatprep.mubr.bf16.mxu1 %v15880_v28  ;;  %vm4387_vm15 = vcmask 171008   ;;  %s18709_s28 = sld [smem:[#allocation36_spill]]  ;;  %s15883_s27 = smov [#allocation20]  }
  0xee   :  { %v213_v0 = vld [vmem:[%s18706_s4] sm:$0xff]  ;;  %v214_v1 = vld [vmem:[%s18706_s4 + $0x8] sm:$0xff]  ;;  %v215_v2 = vld [vmem:[%s18706_s4 + $0x10] sm:$0xff] }
  0xef   :  { %v219_v3 = vpack.c.bf16 %v214_v1, %v213_v0  ;;  %v216_v4 = vld [vmem:[%s18706_s4 + $0x18] sm:$0xff]  ;;  %v217_v5 = vld [vmem:[%s18706_s4 + $0x20] sm:$0xff]  ;;  %v218_v6 = vld [vmem:[%s18706_s4 + $0x28] sm:$0x3] }
  0xf0   :  { %v220_v7 = vpack.c.bf16 %v216_v4, %v215_v2  ;;  %v14091_v8 = vld [vmem:[%s18707_s10] sm:$0xff]   ;;  %v221_v9 = vpack.c.bf16 %v218_v6, %v217_v5  ;;  %v14092_v11 = vld [vmem:[%s18707_s10 + $0x8] sm:$0xff]   ;;  %v14093_v12 = vld [vmem:[%s18707_s10 + $0x10] sm:$0xff]  }
  0xf1   :  { %13833 = vmatprep.subr.bf16.mxu0 %v219_v3  ;;  %13839 = vmatprep.mubr.msk.bf16.mxu0 %vm242_vm0, %v14091_v8  ;;  %v14094_v13 = vld [vmem:[%s18707_s10 + $0x18] sm:$0xff]   ;;  %v14099_v15 = vld [vmem:[%s18708_s5 + $0x24c] ss:$24 sps:$4 sm:$0xff]   ;;  %v14097_v16 = vld [vmem:[%s18708_s5 + $0x248] ss:$24 sps:$4 sm:$0xff]  }
  0xf2   :  { %13834 = vmatpush3.bf16.msra.mxu0 %v219_v3  ;;  %v257_v10 = vsel %vm255_vm1, %v221_v9, 0  ;;  %v14095_v14 = vld [vmem:[%s18708_s5 + $0x244] ss:$24 sps:$4 sm:$0xff]   ;;  %v14100_v17 = vld [vmem:[%s18708_s5 + $0x240] ss:$24 sps:$4 sm:$0xff]  }
  0xf3   :  { %13835 = vmatprep.subr.bf16.mxu0 %v220_v7  ;;  %491 = vmatprep.subr.bf16.mxu1 %v14095_v14  ;;  %v14101_v18 = vld [vmem:[%s18708_s5 + $0x274] ss:$24 sps:$4 sm:$0xff]   ;;  %v14103_v20 = vld [vmem:[%s18708_s5 + $0x278] ss:$24 sps:$4 sm:$0xff]   ;;  %v14116_v54 = vld [vmem:[%s18708_s5 + $0x8] ss:$24 sps:$4 sm:$0xff]  }
  0xf4   :  { %492 = vmatpush1.bf16.msra.mxu1 %v14100_v17  ;;  %v14105_v19 = vld [vmem:[%s18708_s5 + $0x27c] ss:$24 sps:$4 sm:$0xff]   ;;  %v14106_v21 = vld [vmem:[%s18708_s5 + $0x270] ss:$24 sps:$4 sm:$0xff]   ;;  %v14118_v30 = vld [vmem:[%s18708_s5 + $0xc] ss:$24 sps:$4 sm:$0xff]  }
  0xf5   :  { %493 = vmatprep.subr.bf16.mxu1 %v14101_v18  ;;  %v14107_v22 = vld [vmem:[%s18708_s5 + $0x2a4] ss:$24 sps:$4 sm:$0x1f]   ;;  %v14111_v24 = vld [vmem:[%s18708_s5 + $0x2a0] ss:$24 sps:$4 sm:$0x1f]  }
  0xf6   :  { %13836 = vmatpush3.bf16.msra.mxu0 %v220_v7  ;;  %v14109_v23 = vld [vmem:[%s18708_s5 + $0x2ac] ss:$24 sps:$4 sm:$0x1f]   ;;  %v14112_v25 = vld [vmem:[%s18708_s5 + $0x2a8] ss:$24 sps:$4 sm:$0x1f]  }
  0xf7   :  { %14065 = vmatprep.subr.msk.bf16.mxu0 %vm255_vm1, %v221_v9  ;;  %v474_v26 = vsel %vm255_vm1, %v14111_v24, 0  ;;  %v480_v27 = vsel %vm255_vm1, %v14112_v25, 0  ;;  %v14115_v29 = vld [vmem:[%s18708_s5 + $0x254] ss:$24 sps:$4 sm:$0xff]   ;;  %v14113_v53 = vld [vmem:[%s18708_s5 + $0x250] ss:$24 sps:$4 sm:$0xff]  }
  0xf8   :  { %494 = vmatpush1.bf16.msra.mxu1 %v14106_v21  ;;  %v14121_v58 = vld [vmem:[%s18708_s5 + $0x284] ss:$24 sps:$4 sm:$0xff]   ;;  %v14119_v61 = vld [vmem:[%s18708_s5 + $0x280] ss:$24 sps:$4 sm:$0xff]   ;;  %v14139_v9 = vld [vmem:[%s18708_s5 + $0x34] ss:$24 sps:$4 sm:$0xff]  }
  0xf9   :  { %12136 = vmatprep.subr.msk.bf16.mxu1 %vm255_vm1, %v14107_v22  ;;  %v14124_v59 = vld [vmem:[%s18708_s5 + $0x3c] ss:$24 sps:$4 sm:$0xff]   ;;  %v14122_v62 = vld [vmem:[%s18708_s5 + $0x38] ss:$24 sps:$4 sm:$0xff]   ;;  %v14136_v4 = vld [vmem:[%s18708_s5 + $0x48c] ss:$24 sps:$4 sm:$0xff]  }
  0xfa   :  { %13838 = vmatpush3.bf16.msra.mxu0 %v257_v10  ;;  %v14125_v63 = vld [vmem:[%s18708_s5 + $0x2b4] ss:$24 sps:$4 sm:$0x1f]   ;;  %v14129_v1 = vld [vmem:[%s18708_s5 + $0x2b0] ss:$24 sps:$4 sm:$0x1f]  }
  0xfb   :  { %542 = vmatprep.subr.bf16.mxu0 %v14099_v15  ;;  %v14127_v0 = vld [vmem:[%s18708_s5 + $0x6c] ss:$24 sps:$4 sm:$0x1f]   ;;  %v14130_v2 = vld [vmem:[%s18708_s5 + $0x68] ss:$24 sps:$4 sm:$0x1f]  }
  0xfc   :  { %496 = vmatpush1.bf16.msra.mxu1 %v474_v26  ;;  %v14133_v3 = vld [vmem:[%s18708_s5 + $0x4] ss:$24 sps:$4 sm:$0xff]   ;;  %v486_v5 = vsel %vm255_vm1, %v14129_v1, 0  ;;  %v740_v6 = vsel %vm255_vm1, %v14130_v2, 0  ;;  %v14131_v7 = vld [vmem:[%s18708_s5] ss:$24 sps:$4 sm:$0xff]  }
  0xfd   :  { %13840 = vmatmul.mubr.msk.bf16.vlgmr.msra.gmra.mrb[0].mxu0 %vm242_vm0, %v14092_v11  ;;  %593 = vmatprep.subr.bf16.mxu1 %v14115_v29  ;;  %v14134_v8 = vld [vmem:[%s18708_s5 + $0x488] ss:$24 sps:$4 sm:$0xff]   ;;  %v14142_v10 = vld [vmem:[%s18708_s5 + $0x4bc] ss:$24 sps:$4 sm:$0xff]   ;;  %v12222_v29 = vld [vmem:[%s18706_s4 + $0x58] sm:$0x3] }
  0xfe   :  { %13843 = vmatprep.mubr.msk.bf16.mxu0 %vm242_vm0, %v14093_v12  ;;  %543 = vmatpush1.bf16.msra.mxu0 %v14097_v16  ;;  %v14137_v11 = vld [vmem:[%s18708_s5 + $0x30] ss:$24 sps:$4 sm:$0xff]   ;;  %v14145_v14 = vld [vmem:[%s18708_s5 + $0x4ec] ss:$24 sps:$4 sm:$0x1f]   ;;  %v12218_v18 = vld [vmem:[%s18706_s4 + $0x38] sm:$0xff] }
  0xff   :  { %544 = vmatprep.subr.bf16.mxu0 %v14105_v19  ;;  %v14140_v12 = vld [vmem:[%s18708_s5 + $0x4b8] ss:$24 sps:$4 sm:$0xff]   ;;  %v14148_v16 = vld [vmem:[%s18708_s5 + $0x4e8] ss:$24 sps:$4 sm:$0x1f]  }
 0x100   :  { %v14147_v15 = vld [vmem:[%s18708_s5 + $0x60] ss:$24 sps:$4 sm:$0x1f]   ;;  %v12217_v17 = vld [vmem:[%s18706_s4 + $0x30] sm:$0xff]  ;;  %v1026_v21 = vsel %vm255_vm1, %v14148_v16, 0  ;;  %v12220_v24 = vld [vmem:[%s18706_s4 + $0x48] sm:$0xff] }
 0x101   :  { %v14151_v19 = vld [vmem:[%s18708_s5 + $0x14] ss:$24 sps:$4 sm:$0xff]   ;;  %v1215_v22 = vpack.c.bf16 %v12218_v18, %v12217_v17  ;;  %v14149_v25 = vld [vmem:[%s18708_s5 + $0x10] ss:$24 sps:$4 sm:$0xff]   ;;  %v14154_v26 = vld [vmem:[%s18708_s5 + $0x44] ss:$24 sps:$4 sm:$0xff]  }
 0x102   :  { %545 = vmatpush1.bf16.msra.mxu0 %v14103_v20  ;;  %v734_v20 = vsel %vm255_vm1, %v14147_v15, 0  ;;  %v14192_v1 = vld [vmem:[%s18708_s5 + $0xf0] ss:$24 sps:$4 sm:$0x1f]  }
 0x103   :  { %12139 = vmatprep.subr.msk.bf16.mxu0 %vm255_vm1, %v14109_v23  ;;  %v12219_v23 = vld [vmem:[%s18706_s4 + $0x40] sm:$0xff]  ;;  %v14193_v2 = vld [vmem:[%s18708_s5 + $0xf8] ss:$24 sps:$4 sm:$0x1f]  }
 0x105   :  { %13844 = vmatmul.mubr.msk.bf16.gmra.mrb[4].mxu0 %vm242_vm0, %v14094_v13  ;;  %v14143_v13 = vld [vmem:[%s18708_s5 + $0x64] ss:$24 sps:$4 sm:$0x1f]  }
 0x106   :  { %547 = vmatpush1.bf16.msra.mxu0 %v480_v27  ;;  %574 = vmatprep.mubr.bf16.mxu0 %v15880_v28  ;;  %v12221_v27 = vld [vmem:[%s18706_s4 + $0x50] sm:$0xff] }
 0x107   :  { %802 = vmatprep.subr.bf16.mxu0 %v14118_v30  ;;  %v14152_v30 = vld [vmem:[%s18708_s5 + $0x40] ss:$24 sps:$4 sm:$0xff]  }
 0x1d0   :  { %v13841_v31 = vpop.f32.mrb[0].mxu0 }
 0x1d1   :  { %v293_v32 = vpop.f32.mrb[1].mxu0 }
 0x1d2   :  { %v13842_v33 = vpop.f32.mrb[2].mxu0 }
 0x1d3   :  { %v16221_v34 = vpack.c.bf16 %v13842_v33, %v13841_v31  ;;  %v296_v35 = vpop.f32.mrb[3].mxu0  ;;  %v1216_v31 = vpack.c.bf16 %v12220_v24, %v12219_v23  ;;  %v14157_v33 = vld [vmem:[%s18708_s5 + $0x70] ss:$24 sps:$4 sm:$0x1f]  }
 0x1d4   :  { %v16223_v36 = vpack.c.bf16 %v296_v35, %v293_v32  ;;  %v14155_v32 = vld [vmem:[%s18708_s5 + $0x74] ss:$24 sps:$4 sm:$0x1f]   ;;  %v1217_v35 = vpack.c.bf16 %v12222_v29, %v12221_v27 }
 0x1d5   :  { %v367_v37 = vshrl.u32 %v16221_v34, 16  ;;  %v370_v38 = vshll.u32 %v16221_v34, 16 }
 0x1d7   :  { %v369_v44 = vrot.slane %v367_v37, 2  ;;  %v372_v46 = vrot.slane %v370_v38, 3  ;;  %v14160_v37 = vld [vmem:[%s18708_s5 + $0x484] ss:$24 sps:$4 sm:$0xff]   ;;  %v746_v38 = vsel %vm255_vm1, %v14157_v33, 0 }
 0x1d8   :  { %v13845_v39 = vpop.f32.mrb[4].mxu0 }
 0x1d9   :  { %v309_v40 = vpop.f32.mrb[5].mxu0  ;;  %v373_v57 = vor.u32 %v372_v46, %v369_v44  ;;  %v15554_v44 = vld [vmem:[%s18707_s10 + $0x8] sm:$0xff]   ;;  %v14166_v46 = vld [vmem:[%s18708_s5 + $0x4e0] ss:$24 sps:$4 sm:$0x1f]  }
 0x1da   :  { %v13846_v41 = vpop.f32.mrb[6].mxu0 }
 0x1db   :  { %v327_v42 = vpack.c.bf16 %v13846_v41, %v13845_v39  ;;  %v312_v43 = vpop.f32.mrb[7].mxu0  ;;  %v1219_v39 = vsel %vm255_vm1, %v1217_v35, 0  ;;  %v14158_v41 = vld [vmem:[%s18708_s5 + $0x480] ss:$24 sps:$4 sm:$0xff]  }
 0x1dc   :  { %v326_v45 = vpack.c.bf16 %v312_v43, %v309_v40  ;;  %v15553_v40 = vld [vmem:[%s18707_s10] sm:$0xff]   ;;  %v14161_v43 = vld [vmem:[%s18708_s5 + $0x4b0] ss:$24 sps:$4 sm:$0xff]  }
 0x1dd   :  { %v16227_v47 = vrot.slane %v327_v42, 5  ;;  %v14163_v42 = vld [vmem:[%s18708_s5 + $0x4b4] ss:$24 sps:$4 sm:$0xff]  }
 0x1de   :  { %v375_v48 = vshrl.u32 %v326_v45, 16  ;;  %v378_v49 = vshll.u32 %v326_v45, 16  ;;  %v926_v50 = vrot.slane %v326_v45, 5  ;;  %v14164_v45 = vld [vmem:[%s18708_s5 + $0x4e4] ss:$24 sps:$4 sm:$0x1f]  }
 0x1e0   :  { %v377_v51 = vrot.slane %v375_v48, 2  ;;  %v380_v52 = vrot.slane %v378_v49, 3  ;;  %v16237_v55 = vsel %vm925_vm2, %v926_v50, %v16227_v47  ;;  %v14169_v48 = vld [vmem:[%s18708_s5 + $0x494] ss:$24 sps:$4 sm:$0xff]   ;;  %v1020_v49 = vsel %vm255_vm1, %v14166_v46, 0  ;;  %v15556_v50 = vld [vmem:[%s18707_s10 + $0x18] sm:$0xff]  }
 0x1e1   :  { %v14197_v46 = vld [vmem:[%s18708_s5 + $0x2d8] ss:$24 sps:$4 sm:$0xff]  }
 0x1e2   :  { %v16239_v56 = vor.u32 %v380_v52, %v377_v51  ;;  %v14167_v51 = vld [vmem:[%s18708_s5 + $0x490] ss:$24 sps:$4 sm:$0xff]   ;;  %v14170_v52 = vld [vmem:[%s18708_s5 + $0x4c0] ss:$24 sps:$4 sm:$0xff]  }
 0x1e4   :  { %v382_v60 = vsel %vm365_vm3, %v373_v57, %v16239_v56  ;;  %v14178_v57 = vld [vmem:[%s18708_s5 + $0x94] ss:$24 sps:$4 sm:$0xff]  }
 0x1e5   :  { %12137 = vmatmul.mubr.msk.bf16.vlgmr.msra.gmra.mrb[0].mxu1 %vm242_vm0, %v382_v60  ;;  %12140 = vmatmul.mubr.msk.bf16.vlgmr.msra.gmra.mrb[8].mxu0 %vm242_vm0, %v382_v60 }
 0x1e6   :  { %594 = vmatpush1.bf16.msra.mxu1 %v14113_v53  ;;  %803 = vmatpush1.bf16.msra.mxu0 %v14116_v54  ;;  %v14173_v53 = vld [vmem:[%s18708_s5 + $0x4f4] ss:$24 sps:$4 sm:$0x1f]   ;;  %v14175_v54 = vld [vmem:[%s18708_s5 + $0x4f0] ss:$24 sps:$4 sm:$0x1f]  }
 0x1e7   :  { %533 = vmatprep.mubr.bf16.mxu1 %v15880_v28  ;;  %584 = vmatprep.mubr.bf16.mxu0 %v15880_v28 }
 0x1e8   :  { %595 = vmatprep.subr.bf16.mxu1 %v14121_v58  ;;  %804 = vmatprep.subr.bf16.mxu0 %v14124_v59  ;;  %v14181_v58 = vld [vmem:[%s18708_s5 + $0x9c] ss:$24 sps:$4 sm:$0xff]   ;;  %v14176_v59 = vld [vmem:[%s18708_s5 + $0x90] ss:$24 sps:$4 sm:$0xff]  }
 0x1ea   :  { %596 = vmatpush1.bf16.msra.mxu1 %v14119_v61  ;;  %805 = vmatpush1.bf16.msra.mxu0 %v14122_v62  ;;  %v14185_v61 = vld [vmem:[%s18708_s5 + $0xc8] ss:$24 sps:$4 sm:$0xff]   ;;  %v14187_v62 = vld [vmem:[%s18708_s5 + $0xcc] ss:$24 sps:$4 sm:$0xff]  }
 0x1eb   :  { %12142 = vmatprep.subr.msk.bf16.mxu1 %vm255_vm1, %v14125_v63  ;;  %12166 = vmatprep.subr.msk.bf16.mxu0 %vm255_vm1, %v14127_v0  ;;  %v14188_v63 = vld [vmem:[%s18708_s5 + $0xf4] ss:$24 sps:$4 sm:$0x1f]  }
 0x1ec   :  { %v14190_v0 = vld [vmem:[%s18708_s5 + $0xfc] ss:$24 sps:$4 sm:$0x1f]  }
 0x1ed   :  { %12138 = vmatmul.mubr.msk.bf16.gmra.mrb[4].mxu1 %vm242_vm0, %v16239_v56  ;;  %12141 = vmatmul.mubr.msk.bf16.gmra.mrb[12].mxu0 %vm242_vm0, %v16239_v56 }
 0x1ee   :  { %598 = vmatpush1.bf16.msra.mxu1 %v486_v5  ;;  %807 = vmatpush1.bf16.msra.mxu0 %v740_v6  ;;  %v14196_v5 = vld [vmem:[%s18708_s5 + $0xa4] ss:$24 sps:$4 sm:$0xff]  }
 0x1ef   :  { %625 = vmatprep.mubr.bf16.mxu1 %v15880_v28  ;;  %834 = vmatprep.mubr.bf16.mxu0 %v15880_v28  ;;  %v14199_v6 = vld [vmem:[%s18708_s5 + $0x2dc] ss:$24 sps:$4 sm:$0xff]  }
 0x1f0   :  { %751 = vmatprep.subr.bf16.mxu1 %v14133_v3  ;;  %1088 = vmatprep.subr.bf16.mxu0 %v14136_v4  ;;  %v1400_v3 = vsel %vm255_vm1, %v14192_v1, 0  ;;  %v1406_v4 = vsel %vm255_vm1, %v14193_v2, 0 }
 0x1f5   :  { %12143 = vmatmul.mubr.msk.bf16.vlgmr.msra.gmra.mrb[8].mxu1 %vm242_vm0, %v382_v60  ;;  %12167 = vmatmul.mubr.msk.bf16.vlgmr.msra.gmra.mrb[8].mxu0 %vm242_vm0, %v16223_v36  ;;  %v14184_v60 = vld [vmem:[%s18708_s5 + $0xc4] ss:$24 sps:$4 sm:$0xff]  }
 0x1f6   :  { %752 = vmatpush1.bf16.msra.mxu1 %v14131_v7  ;;  %1089 = vmatpush1.bf16.msra.mxu0 %v14134_v8 }
 0x1f7   :  { %635 = vmatprep.mubr.bf16.mxu1 %v15880_v28  ;;  %844 = vmatprep.mubr.bf16.mxu0 %v15880_v28 }
 0x1f8   :  { %753 = vmatprep.subr.bf16.mxu1 %v14139_v9  ;;  %1090 = vmatprep.subr.bf16.mxu0 %v14142_v10 }
 0x1fa   :  { %754 = vmatpush1.bf16.msra.mxu1 %v14137_v11  ;;  %1091 = vmatpush1.bf16.msra.mxu0 %v14140_v12 }
 0x1fb   :  { %12163 = vmatprep.subr.msk.bf16.mxu1 %vm255_vm1, %v14143_v13  ;;  %12211 = vmatprep.subr.msk.bf16.mxu0 %vm255_vm1, %v14145_v14 }
 0x1fd   :  { %12144 = vmatmul.mubr.msk.bf16.gmra.mrb[12].mxu1 %vm242_vm0, %v16239_v56  ;;  %12168 = vmatmul.mubr.msk.bf16.gmra.mrb[16].mxu0 %vm242_vm0, %v16221_v34  ;;  %v1032_v56 = vsel %vm255_vm1, %v14175_v54, 0 }
 0x1fe   :  { %756 = vmatpush1.bf16.msra.mxu1 %v734_v20  ;;  %1093 = vmatpush1.bf16.msra.mxu0 %v1026_v21 }
 0x1ff   :  { %783 = vmatprep.mubr.bf16.mxu1 %v15880_v28  ;;  %1120 = vmatprep.mubr.bf16.mxu0 %v15880_v28 }
 0x200   :  { %853 = vmatprep.subr.bf16.mxu1 %v14151_v19  ;;  %13847 = vmatprep.subr.bf16.mxu0 %v1215_v22 }
 0x205   :  { %12164 = vmatmul.mubr.msk.bf16.vlgmr.msra.gmra.mrb[0].mxu1 %vm242_vm0, %v16223_v36  ;;  %12212 = vmatmul.mubr.msk.bf16.vlgmr.msra.gmra.mrb[8].mxu0 %vm242_vm0, %v16237_v55 }
 0x206   :  { %854 = vmatpush1.bf16.msra.mxu1 %v14149_v25  ;;  %13848 = vmatpush3.bf16.msra.mxu0 %v1215_v22 }
 0x207   :  { %793 = vmatprep.mubr.bf16.mxu1 %v15880_v28  ;;  %1130 = vmatprep.mubr.bf16.mxu0 %v15880_v28 }
 0x208   :  { %855 = vmatprep.subr.bf16.mxu1 %v14154_v26  ;;  %13849 = vmatprep.subr.bf16.mxu0 %v1216_v31 }
 0x20a   :  { %856 = vmatpush1.bf16.msra.mxu1 %v14152_v30  ;;  %13850 = vmatpush3.bf16.msra.mxu0 %v1216_v31 }
 0x20b   :  { %12169 = vmatprep.subr.msk.bf16.mxu1 %vm255_vm1, %v14155_v32  ;;  %14066 = vmatprep.subr.msk.bf16.mxu0 %vm255_vm1, %v1217_v35 }
 0x20d   :  { %12165 = vmatmul.mubr.msk.bf16.gmra.mrb[16].mxu1 %vm242_vm0, %v16221_v34  ;;  %12213 = vmatmul.mubr.msk.bf16.gmra.mrb[20].mxu0 %vm242_vm0, %v16227_v47 }
 0x20e   :  { %858 = vmatpush1.bf16.msra.mxu1 %v746_v38  ;;  %13852 = vmatpush3.bf16.msra.mxu0 %v1219_v39 }
 0x20f   :  { %885 = vmatprep.mubr.bf16.mxu1 %v15880_v28  ;;  %13853 = vmatprep.mubr.msk.bf16.mxu0 %vm242_vm0, %v15553_v40 }
 0x210   :  { %1037 = vmatprep.subr.bf16.mxu1 %v14160_v37  ;;  %1468 = vmatprep.subr.bf16.mxu0 %v14181_v58 }
 0x215   :  { %12170 = vmatmul.mubr.msk.bf16.vlgmr.msra.gmra.mrb[8].mxu1 %vm242_vm0, %v16223_v36  ;;  %13854 = vmatmul.mubr.msk.bf16.vlgmr.msra.gmra.mrb[24].mxu0 %vm242_vm0, %v15554_v44  ;;  %v15555_v36 = vld [vmem:[%s18707_s10 + $0x10] sm:$0xff]  }
 0x216   :  { %1038 = vmatpush1.bf16.msra.mxu1 %v14158_v41  ;;  %895 = vmatprep.mubr.bf16.mxu1 %v15880_v28 }
 0x217   :  { %13857 = vmatprep.mubr.msk.bf16.mxu0 %vm242_vm0, %v15555_v36  ;;  %1039 = vmatprep.subr.bf16.mxu1 %v14163_v42 }
 0x21a   :  { %1040 = vmatpush1.bf16.msra.mxu1 %v14161_v43 }
 0x21b   :  { %12208 = vmatprep.subr.msk.bf16.mxu1 %vm255_vm1, %v14164_v45  ;;  %v14194_v45 = vld [vmem:[%s18708_s5 + $0xa0] ss:$24 sps:$4 sm:$0xff]  }
 0x21d   :  { %12171 = vmatmul.mubr.msk.bf16.gmra.mrb[20].mxu1 %vm242_vm0, %v16221_v34  ;;  %13858 = vmatmul.mubr.msk.bf16.gmra.mrb[28].mxu0 %vm242_vm0, %v15556_v50  ;;  %v14172_v34 = vld [vmem:[%s18708_s5 + $0x4c4] ss:$24 sps:$4 sm:$0xff]  }
 0x21e   :  { %1042 = vmatpush1.bf16.msra.mxu1 %v1020_v49  ;;  %1069 = vmatprep.mubr.bf16.mxu1 %v15880_v28  ;;  %v14202_v49 = vld [vmem:[%s18708_s5 + $0xd4] ss:$24 sps:$4 sm:$0xff]  }
 0x21f   :  { %1139 = vmatprep.subr.bf16.mxu1 %v14169_v48  ;;  %1500 = vmatprep.mubr.bf16.mxu0 %v15880_v28  ;;  %v14200_v48 = vld [vmem:[%s18708_s5 + $0xd0] ss:$24 sps:$4 sm:$0xff]   ;;  %v14205_v50 = vld [vmem:[%s18708_s5 + $0x30c] ss:$24 sps:$4 sm:$0xff]  }
 0x225   :  { %12209 = vmatmul.mubr.msk.bf16.vlgmr.msra.gmra.mrb[0].mxu1 %vm242_vm0, %v16237_v55 }
 0x226   :  { %1140 = vmatpush1.bf16.msra.mxu1 %v14167_v51  ;;  %1079 = vmatprep.mubr.bf16.mxu1 %v15880_v28  ;;  %v14203_v51 = vld [vmem:[%s18708_s5 + $0x308] ss:$24 sps:$4 sm:$0xff]  }
 0x227   :  { %1141 = vmatprep.subr.bf16.mxu1 %v14172_v34  ;;  %v14206_v34 = vld [vmem:[%s18708_s5 + $0x104] ss:$24 sps:$4 sm:$0x1f]  }
 0x22a   :  { %1142 = vmatpush1.bf16.msra.mxu1 %v14170_v52  ;;  %v14208_v52 = vld [vmem:[%s18708_s5 + $0x33c] ss:$24 sps:$4 sm:$0x1f]  }
 0x22b   :  { %12214 = vmatprep.subr.msk.bf16.mxu1 %vm255_vm1, %v14173_v53  ;;  %v14210_v53 = vld [vmem:[%s18708_s5 + $0x100] ss:$24 sps:$4 sm:$0x1f]  }
 0x22d   :  { %12210 = vmatmul.mubr.msk.bf16.gmra.mrb[24].mxu1 %vm242_vm0, %v16227_v47 }
 0x22e   :  { %1144 = vmatpush1.bf16.msra.mxu1 %v1032_v56  ;;  %1171 = vmatprep.mubr.bf16.mxu1 %v15880_v28 }
 0x22f   :  { %1417 = vmatprep.subr.bf16.mxu1 %v14178_v57  ;;  %v14211_v57 = vld [vmem:[%s18708_s5 + $0x338] ss:$24 sps:$4 sm:$0x1f]  }
 0x235   :  { %12215 = vmatmul.mubr.msk.bf16.vlgmr.msra.gmra.mrb[8].mxu1 %vm242_vm0, %v16237_v55  ;;  %v14179_v55 = vld [vmem:[%s18708_s5 + $0x98] ss:$24 sps:$4 sm:$0xff]  }
 0x236   :  { %1181 = vmatprep.mubr.bf16.mxu1 %v15880_v28  ;;  %1418 = vmatpush1.bf16.msra.mxu1 %v14176_v59 }
 0x237   :  { %1469 = vmatpush1.bf16.msra.mxu0 %v14179_v55  ;;  %1419 = vmatprep.subr.bf16.mxu1 %v14184_v60 }
 0x238   :  { %1470 = vmatprep.subr.bf16.mxu0 %v14187_v62 }
 0x23b   :  { %1471 = vmatpush1.bf16.msra.mxu0 %v14185_v61 }
 0x23c   :  { %12266 = vmatprep.subr.msk.bf16.mxu0 %vm255_vm1, %v14190_v0 }
 0x23d   :  { %12216 = vmatmul.mubr.msk.bf16.gmra.mrb[28].mxu1 %vm242_vm0, %v16227_v47  ;;  %v14182_v47 = vld [vmem:[%s18708_s5 + $0xc0] ss:$24 sps:$4 sm:$0xff]  }
 0x23e   :  { %1449 = vmatprep.mubr.bf16.mxu1 %v15880_v28  ;;  %1420 = vmatpush1.bf16.msra.mxu1 %v14182_v47 }
 0x23f   :  { %12263 = vmatprep.subr.msk.bf16.mxu1 %vm255_vm1, %v14188_v63  ;;  %1473 = vmatpush1.bf16.msra.mxu0 %v1406_v4  ;;  %v1412_v4 = vsel %vm255_vm1, %v14210_v53, 0  ;;  %v14233_v53 = vld [vmem:[%s18708_s5 + $0x310] ss:$24 sps:$4 sm:$0xff]  }
 0x240   :  { %1782 = vmatprep.subr.bf16.mxu0 %v14199_v6 }
 0x242   :  { %1422 = vmatpush1.bf16.msra.mxu1 %v1400_v3 }
 0x243   :  { %1519 = vmatprep.subr.bf16.mxu1 %v14196_v5  ;;  %v1720_v5 = vsel %vm255_vm1, %v14211_v57, 0 }
 0x2c0   :  { %v535_v7 = vpop.f32.mrb[4].mxu1  ;;  %v586_v8 = vpop.f32.mrb[12].mxu0 }
 0x2c1   :  { %v537_v9 = vpop.f32.mrb[5].mxu1  ;;  %v588_v10 = vpop.f32.mrb[13].mxu0 }
 0x2c2   :  { %v539_v11 = vpop.f32.mrb[6].mxu1  ;;  %v590_v12 = vpop.f32.mrb[14].mxu0 }
 0x2c3   :  { %v540_v13 = vpop.f32.mrb[7].mxu1  ;;  %v591_v14 = vpop.f32.mrb[15].mxu0 }
 0x2d0   :  { %v637_v15 = vpop.f32.mrb[12].mxu1  ;;  %v846_v16 = vpop.f32.mrb[16].mxu0 }
 0x2d1   :  { %v847_v17 = vadd.f32 %v846_v16, %v586_v8  ;;  %v639_v18 = vpop.f32.mrb[13].mxu1  ;;  %v848_v19 = vpop.f32.mrb[17].mxu0  ;;  %v14214_v8 = vld [vmem:[%s18708_s5 + $0x2d4] ss:$24 sps:$4 sm:$0xff]  }
 0x2d2   :  { %v849_v20 = vadd.f32 %v848_v19, %v588_v10  ;;  %v641_v21 = vpop.f32.mrb[14].mxu1  ;;  %v850_v22 = vpop.f32.mrb[18].mxu0  ;;  %v14212_v19 = vld [vmem:[%s18708_s5 + $0x2d0] ss:$24 sps:$4 sm:$0xff]  }
 0x2d3   :  { %v642_v23 = vpop.f32.mrb[15].mxu1  ;;  %v851_v24 = vpop.f32.mrb[19].mxu0  ;;  %v14218_v22 = vld [vmem:[%s18708_s5 + $0x300] ss:$24 sps:$4 sm:$0xff]  }
 0x2d4   :  { %v14220_v23 = vld [vmem:[%s18708_s5 + $0x304] ss:$24 sps:$4 sm:$0xff]  }
 0x2d5   :  { %v14223_v24 = vld [vmem:[%s18708_s5 + $0x54c] ss:$24 sps:$4 sm:$0xff]  }
 0x2e0   :  { %v795_v25 = vpop.f32.mrb[16].mxu1  ;;  %v1132_v26 = vpop.f32.mrb[20].mxu0 }
 0x2e1   :  { %v16504_v27 = vadd.f32 %v795_v25, %v535_v7  ;;  %v16506_v29 = vadd.f32 %v1132_v26, %v847_v17  ;;  %v797_v30 = vpop.f32.mrb[17].mxu1  ;;  %v1134_v31 = vpop.f32.mrb[21].mxu0  ;;  %v14221_v25 = vld [vmem:[%s18708_s5 + $0x548] ss:$24 sps:$4 sm:$0xff]  }
 0x2e2   :  { %v16508_v32 = vadd.f32 %v797_v30, %v537_v9  ;;  %v16510_v33 = vadd.f32 %v1134_v31, %v849_v20  ;;  %v799_v35 = vpop.f32.mrb[18].mxu1  ;;  %v1136_v37 = vpop.f32.mrb[22].mxu0  ;;  %v14217_v9 = vld [vmem:[%s18708_s5 + $0x51c] ss:$24 sps:$4 sm:$0xff]   ;;  %v14215_v20 = vld [vmem:[%s18708_s5 + $0x518] ss:$24 sps:$4 sm:$0xff]  }
 0x2e3   :  { %v800_v38 = vpop.f32.mrb[19].mxu1  ;;  %v1137_v39 = vpop.f32.mrb[23].mxu0  ;;  %v14224_v26 = vld [vmem:[%s18708_s5 + $0x334] ss:$24 sps:$4 sm:$0x1f]  }
 0x2e4   :  { %v14226_v30 = vld [vmem:[%s18708_s5 + $0x57c] ss:$24 sps:$4 sm:$0x1f]   ;;  %v14228_v31 = vld [vmem:[%s18708_s5 + $0x330] ss:$24 sps:$4 sm:$0x1f]  }
 0x2e5   :  { %v14229_v37 = vld [vmem:[%s18708_s5 + $0x578] ss:$24 sps:$4 sm:$0x1f]  }
 0x2e8   :  { %v13855_v40 = vpop.f32.mrb[24].mxu0 }
 0x2e9   :  { %v1255_v41 = vpop.f32.mrb[25].mxu0 }
 0x2ea   :  { %v13856_v42 = vpop.f32.mrb[26].mxu0 }
 0x2eb   :  { %v16512_v43 = vpack.c.bf16 %v13856_v42, %v13855_v40  ;;  %v1258_v44 = vpop.f32.mrb[27].mxu0  ;;  %v12362_v42 = vld [vmem:[%s18706_s4 + $0x60] sm:$0xff] }
 0x2ec   :  { %v16520_v36 = vpack.c.bf16 %v1258_v44, %v1255_v41  ;;  %v12363_v44 = vld [vmem:[%s18706_s4 + $0x68] sm:$0xff] }
 0x2ed   :  { %v1607_v58 = vshrl.u32 %v16512_v43, 16  ;;  %v1610_v60 = vshll.u32 %v16512_v43, 16 }
 0x2ee   :  { %12264 = vmatmul.mubr.msk.bf16.vlgmr.msra.gmra.mrb[0].mxu1 %vm242_vm0, %v16520_v36  ;;  %12267 = vmatmul.mubr.msk.bf16.vlgmr.msra.gmra.mrb[8].mxu0 %vm242_vm0, %v16520_v36 }
 0x2ef   :  { %1520 = vmatpush1.bf16.msra.mxu1 %v14194_v45  ;;  %1783 = vmatpush1.bf16.msra.mxu0 %v14197_v46  ;;  %v1609_v6 = vrot.slane %v1607_v58, 2  ;;  %v1612_v10 = vrot.slane %v1610_v60, 3  ;;  %v14232_v46 = vld [vmem:[%s18708_s5 + $0x2e4] ss:$24 sps:$4 sm:$0xff]  }
 0x2f0   :  { %v897_v54 = vpop.f32.mrb[20].mxu1  ;;  %v13859_v56 = vpop.f32.mrb[28].mxu0  ;;  %1459 = vmatprep.mubr.bf16.mxu1 %v15880_v28  ;;  %1510 = vmatprep.mubr.bf16.mxu0 %v15880_v28  ;;  %v14238_v58 = vld [vmem:[%s18708_s5 + $0x340] ss:$24 sps:$4 sm:$0x1f]  }
 0x2f1   :  { %v16553_v59 = vadd.f32 %v897_v54, %v637_v15  ;;  %v899_v55 = vpop.f32.mrb[21].mxu1  ;;  %v1271_v47 = vpop.f32.mrb[29].mxu0  ;;  %1521 = vmatprep.subr.bf16.mxu1 %v14202_v49  ;;  %1784 = vmatprep.subr.bf16.mxu0 %v14205_v50  ;;  %v12365_v49 = vld [vmem:[%s18706_s4 + $0x78] sm:$0xff]  ;;  %v14235_v50 = vld [vmem:[%s18708_s5 + $0x314] ss:$24 sps:$4 sm:$0xff]  }
 0x2f2   :  { %v16556_v61 = vadd.f32 %v899_v55, %v639_v18  ;;  %v901_v62 = vpop.f32.mrb[22].mxu1  ;;  %v13860_v63 = vpop.f32.mrb[30].mxu0  ;;  %v1613_v18 = vor.u32 %v1612_v10, %v1609_v6  ;;  %v14236_v54 = vld [vmem:[%s18708_s5 + $0x344] ss:$24 sps:$4 sm:$0x1f]   ;;  %v16727_v6 = vld [vmem:[%s18707_s10 + $0x10] sm:$0xff]  }
 0x2f3   :  { %v1289_v0 = vpack.c.bf16 %v13860_v63, %v13859_v56  ;;  %v902_v1 = vpop.f32.mrb[23].mxu1  ;;  %v1274_v2 = vpop.f32.mrb[31].mxu0  ;;  %1522 = vmatpush1.bf16.msra.mxu1 %v14200_v48  ;;  %1785 = vmatpush1.bf16.msra.mxu0 %v14203_v51  ;;  %v12364_v48 = vld [vmem:[%s18706_s4 + $0x70] sm:$0xff] }
 0x2f4   :  { %v1288_v3 = vpack.c.bf16 %v1274_v2, %v1271_v47  ;;  %12269 = vmatprep.subr.msk.bf16.mxu1 %vm255_vm1, %v14206_v34  ;;  %12311 = vmatprep.subr.msk.bf16.mxu0 %vm255_vm1, %v14208_v52  ;;  %v2213_v51 = vpack.c.bf16 %v12365_v49, %v12364_v48  ;;  %v12366_v34 = vld [vmem:[%s18706_s4 + $0x80] sm:$0xff]  ;;  %v12367_v52 = vld [vmem:[%s18706_s4 + $0x88] sm:$0x3] }
 0x2f5   :  { %v16562_v7 = vrot.slane %v1289_v0, 5  ;;  %v2214_v57 = vpack.c.bf16 %v12367_v52, %v12366_v34  ;;  %v1726_v0 = vsel %vm255_vm1, %v14238_v58, 0  ;;  %v14239_v2 = vld [vmem:[%s18708_s5 + $0x510] ss:$24 sps:$4 sm:$0xff]  }
 0x2f6   :  { %v1615_v11 = vshrl.u32 %v1288_v3, 16  ;;  %v1618_v12 = vshll.u32 %v1288_v3, 16  ;;  %v1923_v13 = vrot.slane %v1288_v3, 5  ;;  %12265 = vmatmul.mubr.msk.bf16.gmra.mrb[32].mxu1 %vm242_vm0, %v16512_v43  ;;  %12268 = vmatmul.mubr.msk.bf16.gmra.mrb[32].mxu0 %vm242_vm0, %v16512_v43  ;;  %v14244_v3 = vld [vmem:[%s18708_s5 + $0x544] ss:$24 sps:$4 sm:$0xff]  }
 0x2f7   :  { %1524 = vmatpush1.bf16.msra.mxu1 %v1412_v4  ;;  %1787 = vmatpush1.bf16.msra.mxu0 %v1720_v5  ;;  %v2216_v1 = vsel %vm255_vm1, %v2214_v57, 0  ;;  %v16716_v4 = vld [vmem:[%s18707_s10 + $0x8] sm:$0xff]   ;;  %v14242_v5 = vld [vmem:[%s18708_s5 + $0x540] ss:$24 sps:$4 sm:$0xff]  }
 0x2f8   :  { %v1617_v14 = vrot.slane %v1615_v11, 2  ;;  %v1620_v15 = vrot.slane %v1618_v12, 3  ;;  %1551 = vmatprep.mubr.bf16.mxu1 %v15880_v28  ;;  %1814 = vmatprep.mubr.bf16.mxu0 %v15880_v28  ;;  %v16578_v16 = vsel %vm925_vm2, %v1923_v13, %v16562_v7  ;;  %v14250_v11 = vld [vmem:[%s18708_s5 + $0x524] ss:$24 sps:$4 sm:$0xff]   ;;  %v14248_v13 = vld [vmem:[%s18708_s5 + $0x520] ss:$24 sps:$4 sm:$0xff]  }
 0x2f9   :  { %1731 = vmatprep.subr.bf16.mxu1 %v14214_v8  ;;  %2085 = vmatprep.subr.bf16.mxu0 %v14217_v9  ;;  %v14245_v8 = vld [vmem:[%s18708_s5 + $0x574] ss:$24 sps:$4 sm:$0x1f]   ;;  %v14247_v9 = vld [vmem:[%s18708_s5 + $0x570] ss:$24 sps:$4 sm:$0x1f]  }
 0x2fa   :  { %v16580_v17 = vor.u32 %v1620_v15, %v1617_v14  ;;  %v2017_v10 = vsel %vm255_vm1, %v14247_v9, 0  ;;  %v16747_v12 = vld [vmem:[%s18707_s10 + $0x18] sm:$0xff]   ;;  %v14253_v14 = vld [vmem:[%s18708_s5 + $0x554] ss:$24 sps:$4 sm:$0xff]   ;;  %v14251_v15 = vld [vmem:[%s18708_s5 + $0x550] ss:$24 sps:$4 sm:$0xff]  }
 0x2fc   :  { %v16590_v21 = vsel %vm365_vm3, %v1613_v18, %v16580_v17  ;;  %v14256_v18 = vld [vmem:[%s18708_s5 + $0x580] ss:$24 sps:$4 sm:$0x1f]  }
 0x2fe   :  { %12270 = vmatmul.mubr.msk.bf16.vlgmr.msra.gmra.mrb[8].mxu1 %vm242_vm0, %v16520_v36  ;;  %12312 = vmatmul.mubr.msk.bf16.vlgmr.msra.gmra.mrb[8].mxu0 %vm242_vm0, %v16590_v21  ;;  %v2212_v36 = vpack.c.bf16 %v12363_v44, %v12362_v42  ;;  %v14280_v42 = vld [vmem:[%s18708_s5 + $0x36c] ss:$24 sps:$4 sm:$0xff]  }
 0x2ff   :  { %1732 = vmatpush1.bf16.msra.mxu1 %v14212_v19  ;;  %2086 = vmatpush1.bf16.msra.mxu0 %v14215_v20  ;;  %v2029_v19 = vsel %vm255_vm1, %v14256_v18, 0  ;;  %v14259_v20 = vld [vmem:[%s18708_s5 + $0x124] ss:$24 sps:$4 sm:$0xff]   ;;  %v14275_v18 = vld [vmem:[%s18708_s5 + $0x130] ss:$24 sps:$4 sm:$0xff]  }
 0x300   :  { %v1081_v35 = vpop.f32.mrb[24].mxu1  ;;  %1561 = vmatprep.mubr.bf16.mxu1 %v15880_v28  ;;  %1824 = vmatprep.mubr.bf16.mxu0 %v15880_v28 }
 0x301   :  { %v16623_v38 = vadd.f32 %v1081_v35, %v16504_v27  ;;  %v1083_v39 = vpop.f32.mrb[25].mxu1  ;;  %1733 = vmatprep.subr.bf16.mxu1 %v14220_v23  ;;  %2087 = vmatprep.subr.bf16.mxu0 %v14223_v24  ;;  %v1714_v27 = vsel %vm255_vm1, %v14228_v31, 0  ;;  %v14265_v23 = vld [vmem:[%s18708_s5 + $0x154] ss:$24 sps:$4 sm:$0xff]   ;;  %v14266_v24 = vld [vmem:[%s18708_s5 + $0x158] ss:$24 sps:$4 sm:$0xff]  }
 0x302   :  { %v16626_v40 = vadd.f32 %v1083_v39, %v16508_v32  ;;  %v1085_v41 = vpop.f32.mrb[26].mxu1  ;;  %v2023_v32 = vsel %vm255_vm1, %v14229_v37, 0  ;;  %v14273_v31 = vld [vmem:[%s18708_s5 + $0x180] ss:$24 sps:$4 sm:$0x1f]  }
 0x303   :  { %v1086_v45 = vpop.f32.mrb[27].mxu1  ;;  %1734 = vmatpush1.bf16.msra.mxu1 %v14218_v22  ;;  %2088 = vmatpush1.bf16.msra.mxu0 %v14221_v25  ;;  %v14257_v22 = vld [vmem:[%s18708_s5 + $0x120] ss:$24 sps:$4 sm:$0xff]   ;;  %v14268_v25 = vld [vmem:[%s18708_s5 + $0x15c] ss:$24 sps:$4 sm:$0xff]   ;;  %v2397_v37 = vsel %vm255_vm1, %v14273_v31, 0 }
 0x304   :  { %12308 = vmatprep.subr.msk.bf16.mxu1 %vm255_vm1, %v14224_v26  ;;  %12356 = vmatprep.subr.msk.bf16.mxu0 %vm255_vm1, %v14226_v30  ;;  %v14269_v26 = vld [vmem:[%s18708_s5 + $0x184] ss:$24 sps:$4 sm:$0x1f]   ;;  %v14274_v35 = vld [vmem:[%s18708_s5 + $0x188] ss:$24 sps:$4 sm:$0x1f]  }
 0x305   :  { %v14271_v30 = vld [vmem:[%s18708_s5 + $0x18c] ss:$24 sps:$4 sm:$0x1f]   ;;  %v2403_v39 = vsel %vm255_vm1, %v14274_v35, 0 }
 0x306   :  { %12271 = vmatmul.mubr.msk.bf16.gmra.mrb[36].mxu1 %vm242_vm0, %v16512_v43  ;;  %12313 = vmatmul.mubr.msk.bf16.gmra.mrb[36].mxu0 %vm242_vm0, %v16580_v17  ;;  %v14230_v43 = vld [vmem:[%s18708_s5 + $0x2e0] ss:$24 sps:$4 sm:$0xff]   ;;  %v14277_v41 = vld [vmem:[%s18708_s5 + $0x134] ss:$24 sps:$4 sm:$0xff]  }
 0x307   :  { %1736 = vmatpush1.bf16.msra.mxu1 %v1714_v27  ;;  %2090 = vmatpush1.bf16.msra.mxu0 %v2023_v32  ;;  %v14292_v31 = vld [vmem:[%s18708_s5 + $0x3c8] ss:$24 sps:$4 sm:$0x1f]  }
 0x308   :  { %1763 = vmatprep.mubr.bf16.mxu1 %v15880_v28  ;;  %2117 = vmatprep.mubr.bf16.mxu0 %v15880_v28 }
 0x309   :  { %1833 = vmatprep.subr.bf16.mxu1 %v14232_v46  ;;  %13861 = vmatprep.subr.bf16.mxu0 %v2212_v36 }
 0x30e   :  { %12309 = vmatmul.mubr.msk.bf16.vlgmr.msra.gmra.mrb[0].mxu1 %vm242_vm0, %v16590_v21  ;;  %12357 = vmatmul.mubr.msk.bf16.vlgmr.msra.gmra.mrb[8].mxu0 %vm242_vm0, %v16578_v16 }
 0x30f   :  { %1834 = vmatpush1.bf16.msra.mxu1 %v14230_v43  ;;  %13862 = vmatpush3.bf16.msra.mxu0 %v2212_v36 }
 0x310   :  { %v1183_v56 = vpop.f32.mrb[28].mxu1  ;;  %1773 = vmatprep.mubr.bf16.mxu1 %v15880_v28  ;;  %2127 = vmatprep.mubr.bf16.mxu0 %v15880_v28 }
 0x311   :  { %v16681_v55 = vadd.f32 %v1183_v56, %v16553_v59  ;;  %v1185_v47 = vpop.f32.mrb[29].mxu1  ;;  %1835 = vmatprep.subr.bf16.mxu1 %v14235_v50  ;;  %13863 = vmatprep.subr.bf16.mxu0 %v2213_v51  ;;  %v14241_v59 = vld [vmem:[%s18708_s5 + $0x514] ss:$24 sps:$4 sm:$0xff]  }
 0x312   :  { %v16684_v60 = vadd.f32 %v1185_v47, %v16556_v61  ;;  %v1187_v62 = vpop.f32.mrb[30].mxu1  ;;  %v16701_v61 = vld [vmem:[%s18707_s10] sm:$0xff]  }
 0x313   :  { %v1188_v63 = vpop.f32.mrb[31].mxu1  ;;  %1836 = vmatpush1.bf16.msra.mxu1 %v14233_v53  ;;  %13864 = vmatpush3.bf16.msra.mxu0 %v2213_v51 }
 0x314   :  { %12314 = vmatprep.subr.msk.bf16.mxu1 %vm255_vm1, %v14236_v54  ;;  %14067 = vmatprep.subr.msk.bf16.mxu0 %vm255_vm1, %v2214_v57 }
 0x316   :  { %12310 = vmatmul.mubr.msk.bf16.gmra.mrb[40].mxu1 %vm242_vm0, %v16580_v17  ;;  %12358 = vmatmul.mubr.msk.bf16.gmra.mrb[40].mxu0 %vm242_vm0, %v16562_v7 }
 0x317   :  { %1838 = vmatpush1.bf16.msra.mxu1 %v1726_v0  ;;  %13866 = vmatpush3.bf16.msra.mxu0 %v2216_v1 }
 0x318   :  { %1865 = vmatprep.mubr.bf16.mxu1 %v15880_v28  ;;  %13867 = vmatprep.mubr.msk.bf16.mxu0 %vm242_vm0, %v16701_v61 }
 0x319   :  { %2034 = vmatprep.subr.bf16.mxu1 %v14241_v59 }
 0x31e   :  { %12315 = vmatmul.mubr.msk.bf16.vlgmr.msra.gmra.mrb[8].mxu1 %vm242_vm0, %v16590_v21  ;;  %13868 = vmatmul.mubr.msk.bf16.vlgmr.msra.gmra.mrb[44].mxu0 %vm242_vm0, %v16716_v4  ;;  %v14262_v21 = vld [vmem:[%s18708_s5 + $0x12c] ss:$24 sps:$4 sm:$0xff]  }
 0x31f   :  { %2035 = vmatpush1.bf16.msra.mxu1 %v14239_v2  ;;  %1875 = vmatprep.mubr.bf16.mxu1 %v15880_v28 }
 0x320   :  { %13871 = vmatprep.mubr.msk.bf16.mxu0 %vm242_vm0, %v16727_v6  ;;  %2036 = vmatprep.subr.bf16.mxu1 %v14244_v3 }
 0x321   :  { %2465 = vmatprep.subr.bf16.mxu0 %v14262_v21  ;;  %v14281_v21 = vld [vmem:[%s18708_s5 + $0x160] ss:$24 sps:$4 sm:$0xff]  }
 0x323   :  { %2037 = vmatpush1.bf16.msra.mxu1 %v14242_v5 }
 0x324   :  { %12353 = vmatprep.subr.msk.bf16.mxu1 %vm255_vm1, %v14245_v8 }
 0x326   :  { %12316 = vmatmul.mubr.msk.bf16.gmra.mrb[44].mxu1 %vm242_vm0, %v16580_v17  ;;  %13872 = vmatmul.mubr.msk.bf16.gmra.mrb[48].mxu0 %vm242_vm0, %v16747_v12  ;;  %v14254_v17 = vld [vmem:[%s18708_s5 + $0x584] ss:$24 sps:$4 sm:$0x1f]  }
 0x327   :  { %2039 = vmatpush1.bf16.msra.mxu1 %v2017_v10  ;;  %2066 = vmatprep.mubr.bf16.mxu1 %v15880_v28 }
 0x328   :  { %2136 = vmatprep.subr.bf16.mxu1 %v14250_v11  ;;  %2497 = vmatprep.mubr.bf16.mxu0 %v15880_v28 }
 0x32e   :  { %12354 = vmatmul.mubr.msk.bf16.vlgmr.msra.gmra.mrb[0].mxu1 %vm242_vm0, %v16578_v16 }
 0x32f   :  { %2137 = vmatpush1.bf16.msra.mxu1 %v14248_v13  ;;  %2076 = vmatprep.mubr.bf16.mxu1 %v15880_v28 }
 0x330   :  { %2138 = vmatprep.subr.bf16.mxu1 %v14253_v14 }
 0x333   :  { %2139 = vmatpush1.bf16.msra.mxu1 %v14251_v15 }
 0x334   :  { %12359 = vmatprep.subr.msk.bf16.mxu1 %vm255_vm1, %v14254_v17 }
 0x336   :  { %12355 = vmatmul.mubr.msk.bf16.gmra.mrb[48].mxu1 %vm242_vm0, %v16562_v7 }
 0x337   :  { %2141 = vmatpush1.bf16.msra.mxu1 %v2029_v19  ;;  %2168 = vmatprep.mubr.bf16.mxu1 %v15880_v28  ;;  %v14278_v19 = vld [vmem:[%s18708_s5 + $0x368] ss:$24 sps:$4 sm:$0xff]  }
 0x338   :  { %2414 = vmatprep.subr.bf16.mxu1 %v14259_v20 }
 0x33e   :  { %12360 = vmatmul.mubr.msk.bf16.vlgmr.msra.gmra.mrb[8].mxu1 %vm242_vm0, %v16578_v16  ;;  %v14260_v16 = vld [vmem:[%s18708_s5 + $0x128] ss:$24 sps:$4 sm:$0xff]  }
 0x33f   :  { %2178 = vmatprep.mubr.bf16.mxu1 %v15880_v28  ;;  %2415 = vmatpush1.bf16.msra.mxu1 %v14257_v22  ;;  %v14283_v22 = vld [vmem:[%s18708_s5 + $0x164] ss:$24 sps:$4 sm:$0xff]  }
 0x340   :  { %2466 = vmatpush1.bf16.msra.mxu0 %v14260_v16  ;;  %2416 = vmatprep.subr.bf16.mxu1 %v14265_v23  ;;  %v14286_v16 = vld [vmem:[%s18708_s5 + $0x39c] ss:$24 sps:$4 sm:$0xff]  }
 0x341   :  { %2467 = vmatprep.subr.bf16.mxu0 %v14268_v25  ;;  %v14287_v23 = vld [vmem:[%s18708_s5 + $0x194] ss:$24 sps:$4 sm:$0x1f]   ;;  %v14291_v25 = vld [vmem:[%s18708_s5 + $0x190] ss:$24 sps:$4 sm:$0x1f]  }
 0x344   :  { %2468 = vmatpush1.bf16.msra.mxu0 %v14266_v24  ;;  %v14289_v24 = vld [vmem:[%s18708_s5 + $0x3cc] ss:$24 sps:$4 sm:$0x1f]  }
 0x345   :  { %12411 = vmatprep.subr.msk.bf16.mxu0 %vm255_vm1, %v14271_v30 }
 0x346   :  { %12361 = vmatmul.mubr.msk.bf16.gmra.mrb[52].mxu1 %vm242_vm0, %v16562_v7  ;;  %v14263_v7 = vld [vmem:[%s18708_s5 + $0x150] ss:$24 sps:$4 sm:$0xff]  }
 0x347   :  { %2446 = vmatprep.mubr.bf16.mxu1 %v15880_v28  ;;  %2417 = vmatpush1.bf16.msra.mxu1 %v14263_v7  ;;  %v14284_v7 = vld [vmem:[%s18708_s5 + $0x398] ss:$24 sps:$4 sm:$0xff]  }
 0x348   :  { %12408 = vmatprep.subr.msk.bf16.mxu1 %vm255_vm1, %v14269_v26  ;;  %2470 = vmatpush1.bf16.msra.mxu0 %v2403_v39 }
 0x349   :  { %2779 = vmatprep.subr.bf16.mxu0 %v14280_v42 }
 0x34b   :  { %2419 = vmatpush1.bf16.msra.mxu1 %v2397_v37 }
 0x34c   :  { %2516 = vmatprep.subr.bf16.mxu1 %v14277_v41 }
 0x3c9   :  { %v1461_v44 = vpop.f32.mrb[32].mxu1  ;;  %v1512_v45 = vpop.f32.mrb[32].mxu0 }
 0x3ca   :  { %v1582_v27 = vadd.f32 %v1461_v44, %v16623_v38  ;;  %v1584_v32 = vadd.f32 %v1512_v45, %v16506_v29  ;;  %v1463_v46 = vpop.f32.mrb[33].mxu1  ;;  %v1514_v36 = vpop.f32.mrb[33].mxu0 }
 0x3cb   :  { %v1583_v48 = vadd.f32 %v1463_v46, %v16626_v40  ;;  %v1585_v49 = vadd.f32 %v1514_v36, %v16510_v33  ;;  %v1465_v43 = vpop.f32.mrb[34].mxu1  ;;  %v1516_v50 = vpop.f32.mrb[34].mxu0 }
 0x3cc   :  { %v1466_v51 = vpop.f32.mrb[35].mxu1  ;;  %v1517_v34 = vpop.f32.mrb[35].mxu0  ;;  %v2717_v43 = vsel %vm255_vm1, %v14292_v31, 0  ;;  %v12512_v31 = vld [vmem:[%s18706_s4 + $0xb8] sm:$0x3] }
 0x3cd   :  { %v14295_v34 = vld [vmem:[%s18708_s5 + $0x364] ss:$24 sps:$4 sm:$0xff]  }
 0x3d9   :  { %v1563_v52 = vpop.f32.mrb[36].mxu1  ;;  %v1826_v53 = vpop.f32.mrb[36].mxu0 }
 0x3da   :  { %v1586_v54 = vadd.f32 %v1563_v52, %v16681_v55  ;;  %v1898_v56 = vadd.f32 %v1826_v53, %v1584_v32  ;;  %v1565_v57 = vpop.f32.mrb[37].mxu1  ;;  %v1828_v58 = vpop.f32.mrb[37].mxu0  ;;  %v14298_v52 = vld [vmem:[%s18708_s5 + $0x5ac] ss:$24 sps:$4 sm:$0xff]  }
 0x3db   :  { %v1587_v38 = vadd.f32 %v1565_v57, %v16684_v60  ;;  %v1899_v29 = vadd.f32 %v1828_v58, %v1585_v49  ;;  %v1567_v47 = vpop.f32.mrb[38].mxu1  ;;  %v1830_v62 = vpop.f32.mrb[38].mxu0  ;;  %v2409_v49 = vsel %vm255_vm1, %v14291_v25, 0  ;;  %v14316_v25 = vld [vmem:[%s18708_s5 + $0x3a4] ss:$24 sps:$4 sm:$0xff]  }
 0x3dc   :  { %v1568_v63 = vpop.f32.mrb[39].mxu1  ;;  %v1831_v40 = vpop.f32.mrb[39].mxu0 }
 0x3dd   :  { %v14293_v63 = vld [vmem:[%s18708_s5 + $0x360] ss:$24 sps:$4 sm:$0xff]  }
 0x3de   :  { %v14296_v40 = vld [vmem:[%s18708_s5 + $0x5a8] ss:$24 sps:$4 sm:$0xff]  }
 0x3e9   :  { %v1775_v0 = vpop.f32.mrb[40].mxu1  ;;  %v2129_v33 = vpop.f32.mrb[40].mxu0 }
 0x3ea   :  { %v16834_v1 = vadd.f32 %v1775_v0, %v1582_v27  ;;  %v16836_v59 = vadd.f32 %v2129_v33, %v1898_v56  ;;  %v1777_v2 = vpop.f32.mrb[41].mxu1  ;;  %v2131_v3 = vpop.f32.mrb[41].mxu0  ;;  %v14299_v33 = vld [vmem:[%s18708_s5 + $0x390] ss:$24 sps:$4 sm:$0xff]  }
 0x3eb   :  { %v16838_v5 = vadd.f32 %v1777_v2, %v1583_v48  ;;  %v16840_v55 = vadd.f32 %v2131_v3, %v1899_v29  ;;  %v1779_v8 = vpop.f32.mrb[42].mxu1  ;;  %v2133_v9 = vpop.f32.mrb[42].mxu0  ;;  %v14301_v2 = vld [vmem:[%s18708_s5 + $0x394] ss:$24 sps:$4 sm:$0xff]  }
 0x3ec   :  { %v1780_v60 = vpop.f32.mrb[43].mxu1  ;;  %v2134_v10 = vpop.f32.mrb[43].mxu0  ;;  %v14304_v3 = vld [vmem:[%s18708_s5 + $0x5dc] ss:$24 sps:$4 sm:$0xff]   ;;  %v14302_v8 = vld [vmem:[%s18708_s5 + $0x5d8] ss:$24 sps:$4 sm:$0xff]  }
 0x3ed   :  { %v14305_v9 = vld [vmem:[%s18708_s5 + $0x3c4] ss:$24 sps:$4 sm:$0x1f]   ;;  %v14309_v10 = vld [vmem:[%s18708_s5 + $0x3c0] ss:$24 sps:$4 sm:$0x1f]  }
 0x3ee   :  { %v14307_v60 = vld [vmem:[%s18708_s5 + $0x60c] ss:$24 sps:$4 sm:$0x1f]  }
 0x3f1   :  { %v13869_v11 = vpop.f32.mrb[44].mxu0 }
 0x3f2   :  { %v2252_v13 = vpop.f32.mrb[45].mxu0 }
 0x3f3   :  { %v13870_v14 = vpop.f32.mrb[46].mxu0 }
 0x3f4   :  { %v16842_v15 = vpack.c.bf16 %v13870_v14, %v13869_v11  ;;  %v2255_v17 = vpop.f32.mrb[47].mxu0 }
 0x3f5   :  { %v16850_v20 = vpack.c.bf16 %v2255_v17, %v2252_v13  ;;  %v14310_v13 = vld [vmem:[%s18708_s5 + $0x608] ss:$24 sps:$4 sm:$0x1f]  }
 0x3f6   :  { %v2604_v35 = vshrl.u32 %v16842_v15, 16  ;;  %v2607_v42 = vshll.u32 %v16842_v15, 16 }
 0x3f7   :  { %12409 = vmatmul.mubr.msk.bf16.vlgmr.msra.gmra.mrb[0].mxu1 %vm242_vm0, %v16850_v20  ;;  %12412 = vmatmul.mubr.msk.bf16.vlgmr.msra.gmra.mrb[8].mxu0 %vm242_vm0, %v16850_v20 }
 0x3f8   :  { %2517 = vmatpush1.bf16.msra.mxu1 %v14275_v18  ;;  %2780 = vmatpush1.bf16.msra.mxu0 %v14278_v19  ;;  %v2606_v50 = vrot.slane %v2604_v35, 2  ;;  %v2609_v53 = vrot.slane %v2607_v42, 3  ;;  %v14314_v35 = vld [vmem:[%s18708_s5 + $0x3a0] ss:$24 sps:$4 sm:$0xff]  }
 0x3f9   :  { %v1877_v26 = vpop.f32.mrb[44].mxu1  ;;  %v13873_v30 = vpop.f32.mrb[48].mxu0  ;;  %2456 = vmatprep.mubr.bf16.mxu1 %v15880_v28  ;;  %2507 = vmatprep.mubr.bf16.mxu0 %v15880_v28 }
 0x3fa   :  { %v16883_v37 = vadd.f32 %v1877_v26, %v1586_v54  ;;  %v1879_v39 = vpop.f32.mrb[45].mxu1  ;;  %v2268_v41 = vpop.f32.mrb[49].mxu0  ;;  %2518 = vmatprep.subr.bf16.mxu1 %v14283_v22  ;;  %2781 = vmatprep.subr.bf16.mxu0 %v14286_v16  ;;  %v2610_v62 = vor.u32 %v2609_v53, %v2606_v50  ;;  %v14313_v16 = vld [vmem:[%s18708_s5 + $0x374] ss:$24 sps:$4 sm:$0xff]  }
 0x3fb   :  { %v16886_v44 = vadd.f32 %v1879_v39, %v1587_v38  ;;  %v1881_v45 = vpop.f32.mrb[46].mxu1  ;;  %v13874_v27 = vpop.f32.mrb[50].mxu0  ;;  %v14317_v39 = vld [vmem:[%s18708_s5 + $0x3d4] ss:$24 sps:$4 sm:$0x1f]  }
 0x3fc   :  { %v2286_v32 = vpack.c.bf16 %v13874_v27, %v13873_v30  ;;  %v1882_v46 = vpop.f32.mrb[47].mxu1  ;;  %v2271_v36 = vpop.f32.mrb[51].mxu0  ;;  %2519 = vmatpush1.bf16.msra.mxu1 %v14281_v21  ;;  %2782 = vmatpush1.bf16.msra.mxu0 %v14284_v7  ;;  %v12508_v21 = vld [vmem:[%s18706_s4 + $0x98] sm:$0xff]  ;;  %v12511_v30 = vld [vmem:[%s18706_s4 + $0xb0] sm:$0xff] }
 0x3fd   :  { %v2285_v48 = vpack.c.bf16 %v2271_v36, %v2268_v41  ;;  %12414 = vmatprep.subr.msk.bf16.mxu1 %vm255_vm1, %v14287_v23  ;;  %12456 = vmatprep.subr.msk.bf16.mxu0 %vm255_vm1, %v14289_v24  ;;  %v12509_v23 = vld [vmem:[%s18706_s4 + $0xa0] sm:$0xff]  ;;  %v12510_v24 = vld [vmem:[%s18706_s4 + $0xa8] sm:$0xff]  ;;  %v3211_v42 = vpack.c.bf16 %v12512_v31, %v12511_v30 }
 0x3fe   :  { %v16892_v51 = vrot.slane %v2286_v32, 5  ;;  %v3210_v26 = vpack.c.bf16 %v12510_v24, %v12509_v23  ;;  %v14319_v45 = vld [vmem:[%s18708_s5 + $0x3d0] ss:$24 sps:$4 sm:$0x1f]   ;;  %v14325_v50 = vld [vmem:[%s18708_s5 + $0x5d4] ss:$24 sps:$4 sm:$0xff]  }
 0x3ff   :  { %v2612_v54 = vshrl.u32 %v2285_v48, 16  ;;  %v2615_v56 = vshll.u32 %v2285_v48, 16  ;;  %v2920_v57 = vrot.slane %v2285_v48, 5  ;;  %12410 = vmatmul.mubr.msk.bf16.gmra.mrb[56].mxu1 %vm242_vm0, %v16842_v15  ;;  %12413 = vmatmul.mubr.msk.bf16.gmra.mrb[52].mxu0 %vm242_vm0, %v16842_v15  ;;  %v14331_v53 = vld [vmem:[%s18708_s5 + $0x5b4] ss:$24 sps:$4 sm:$0xff]  }
 0x400   :  { %2521 = vmatpush1.bf16.msra.mxu1 %v2409_v49  ;;  %2784 = vmatpush1.bf16.msra.mxu0 %v2717_v43  ;;  %v2723_v49 = vsel %vm255_vm1, %v14319_v45, 0  ;;  %v3213_v43 = vsel %vm255_vm1, %v3211_v42, 0 }
 0x401   :  { %v2614_v58 = vrot.slane %v2612_v54, 2  ;;  %v2617_v38 = vrot.slane %v2615_v56, 3  ;;  %2548 = vmatprep.mubr.bf16.mxu1 %v15880_v28  ;;  %2811 = vmatprep.mubr.bf16.mxu0 %v15880_v28  ;;  %v16908_v29 = vsel %vm925_vm2, %v2920_v57, %v16892_v51  ;;  %v14334_v54 = vld [vmem:[%s18708_s5 + $0x5e4] ss:$24 sps:$4 sm:$0xff]  }
 0x402   :  { %2728 = vmatprep.subr.bf16.mxu1 %v14295_v34  ;;  %3082 = vmatprep.subr.bf16.mxu0 %v14298_v52  ;;  %v14326_v34 = vld [vmem:[%s18708_s5 + $0x604] ss:$24 sps:$4 sm:$0x1f]   ;;  %v14328_v52 = vld [vmem:[%s18708_s5 + $0x600] ss:$24 sps:$4 sm:$0x1f]  }
 0x403   :  { %v16910_v47 = vor.u32 %v2617_v38, %v2614_v58  ;;  %v14335_v56 = vld [vmem:[%s18708_s5 + $0x614] ss:$24 sps:$4 sm:$0x1f]   ;;  %v14337_v57 = vld [vmem:[%s18708_s5 + $0x610] ss:$24 sps:$4 sm:$0x1f]  }
 0x404   :  { %v3026_v58 = vsel %vm255_vm1, %v14337_v57, 0  ;;  %v14340_v38 = vld [vmem:[%s18708_s5 + $0x1b4] ss:$24 sps:$4 sm:$0xff]  }
 0x405   :  { %v16920_v0 = vsel %vm365_vm3, %v2610_v62, %v16910_v47  ;;  %v14338_v62 = vld [vmem:[%s18708_s5 + $0x1b0] ss:$24 sps:$4 sm:$0xff]   ;;  %v14364_v57 = vld [vmem:[%s18708_s5 + $0x1f4] ss:$24 sps:$4 sm:$0xff]  }
 0x407   :  { %12415 = vmatmul.mubr.msk.bf16.vlgmr.msra.gmra.mrb[8].mxu1 %vm242_vm0, %v16850_v20  ;;  %12457 = vmatmul.mubr.msk.bf16.vlgmr.msra.gmra.mrb[8].mxu0 %vm242_vm0, %v16920_v0  ;;  %v12507_v20 = vld [vmem:[%s18706_s4 + $0x90] sm:$0xff] }
 0x408   :  { %2729 = vmatpush1.bf16.msra.mxu1 %v14293_v63  ;;  %3083 = vmatpush1.bf16.msra.mxu0 %v14296_v40  ;;  %v3209_v7 = vpack.c.bf16 %v12508_v21, %v12507_v20  ;;  %v14346_v63 = vld [vmem:[%s18708_s5 + $0x1e4] ss:$24 sps:$4 sm:$0xff]   ;;  %v14347_v40 = vld [vmem:[%s18708_s5 + $0x1e8] ss:$24 sps:$4 sm:$0xff]  }
 0x409   :  { %v2078_v11 = vpop.f32.mrb[48].mxu1  ;;  %2558 = vmatprep.mubr.bf16.mxu1 %v15880_v28  ;;  %2821 = vmatprep.mubr.bf16.mxu0 %v15880_v28 }
 0x40a   :  { %v16953_v14 = vadd.f32 %v2078_v11, %v16834_v1  ;;  %v2080_v17 = vpop.f32.mrb[49].mxu1  ;;  %2730 = vmatprep.subr.bf16.mxu1 %v14301_v2  ;;  %3084 = vmatprep.subr.bf16.mxu0 %v14304_v3  ;;  %v2711_v1 = vsel %vm255_vm1, %v14309_v10, 0  ;;  %v14352_v2 = vld [vmem:[%s18708_s5 + $0x21c] ss:$24 sps:$4 sm:$0x1f]  }
 0x40b   :  { %v16956_v18 = vadd.f32 %v2080_v17, %v16838_v5  ;;  %v2082_v19 = vpop.f32.mrb[50].mxu1  ;;  %v3020_v5 = vsel %vm255_vm1, %v14310_v13, 0  ;;  %v14354_v3 = vld [vmem:[%s18708_s5 + $0x210] ss:$24 sps:$4 sm:$0x1f]  }
 0x40c   :  { %v2083_v22 = vpop.f32.mrb[51].mxu1  ;;  %2731 = vmatpush1.bf16.msra.mxu1 %v14299_v33  ;;  %3085 = vmatpush1.bf16.msra.mxu0 %v14302_v8  ;;  %v14350_v33 = vld [vmem:[%s18708_s5 + $0x214] ss:$24 sps:$4 sm:$0x1f]   ;;  %v14358_v10 = vld [vmem:[%s18708_s5 + $0x1c4] ss:$24 sps:$4 sm:$0xff]  }
 0x40d   :  { %12453 = vmatprep.subr.msk.bf16.mxu1 %vm255_vm1, %v14305_v9  ;;  %12501 = vmatprep.subr.msk.bf16.mxu0 %vm255_vm1, %v14307_v60  ;;  %v14355_v8 = vld [vmem:[%s18708_s5 + $0x218] ss:$24 sps:$4 sm:$0x1f]   ;;  %v3394_v9 = vsel %vm255_vm1, %v14354_v3, 0  ;;  %v14361_v11 = vld [vmem:[%s18708_s5 + $0x3fc] ss:$24 sps:$4 sm:$0xff]  }
 0x40e   :  { %v3400_v60 = vsel %vm255_vm1, %v14355_v8, 0 }
 0x40f   :  { %12416 = vmatmul.mubr.msk.bf16.gmra.mrb[60].mxu1 %vm242_vm0, %v16842_v15  ;;  %12458 = vmatmul.mubr.msk.bf16.gmra.mrb[56].mxu0 %vm242_vm0, %v16910_v47  ;;  %v14311_v15 = vld [vmem:[%s18708_s5 + $0x370] ss:$24 sps:$4 sm:$0xff]  }
 0x410   :  { %2733 = vmatpush1.bf16.msra.mxu1 %v2711_v1  ;;  %3087 = vmatpush1.bf16.msra.mxu0 %v3020_v5 }
 0x411   :  { %2760 = vmatprep.mubr.bf16.mxu1 %v15880_v28  ;;  %3114 = vmatprep.mubr.bf16.mxu0 %v15880_v28 }
 0x412   :  { %2830 = vmatprep.subr.bf16.mxu1 %v14313_v16  ;;  %13875 = vmatprep.subr.bf16.mxu0 %v3209_v7 }
 0x417   :  { %12454 = vmatmul.mubr.msk.bf16.vlgmr.msra.gmra.mrb[0].mxu1 %vm242_vm0, %v16920_v0  ;;  %12502 = vmatmul.mubr.msk.bf16.vlgmr.msra.gmra.mrb[8].mxu0 %vm242_vm0, %v16908_v29 }
 0x418   :  { %2831 = vmatpush1.bf16.msra.mxu1 %v14311_v15  ;;  %13876 = vmatpush3.bf16.msra.mxu0 %v3209_v7 }
 0x419   :  { %v2180_v41 = vpop.f32.mrb[52].mxu1  ;;  %2770 = vmatprep.mubr.bf16.mxu1 %v15880_v28  ;;  %3124 = vmatprep.mubr.bf16.mxu0 %v15880_v28 }
 0x41a   :  { %v17011_v27 = vadd.f32 %v2180_v41, %v16883_v37  ;;  %v2182_v32 = vpop.f32.mrb[53].mxu1  ;;  %2832 = vmatprep.subr.bf16.mxu1 %v14316_v25  ;;  %13877 = vmatprep.subr.bf16.mxu0 %v3210_v26  ;;  %v14322_v37 = vld [vmem:[%s18708_s5 + $0x5a4] ss:$24 sps:$4 sm:$0xff]  }
 0x41b   :  { %v17014_v46 = vadd.f32 %v2182_v32, %v16886_v44  ;;  %v2184_v36 = vpop.f32.mrb[54].mxu1  ;;  %v14320_v44 = vld [vmem:[%s18708_s5 + $0x5a0] ss:$24 sps:$4 sm:$0xff]  }
 0x41c   :  { %v2185_v48 = vpop.f32.mrb[55].mxu1  ;;  %2833 = vmatpush1.bf16.msra.mxu1 %v14314_v35  ;;  %13878 = vmatpush3.bf16.msra.mxu0 %v3210_v26 }
 0x41d   :  { %12459 = vmatprep.subr.msk.bf16.mxu1 %vm255_vm1, %v14317_v39  ;;  %14068 = vmatprep.subr.msk.bf16.mxu0 %vm255_vm1, %v3211_v42 }
 0x41f   :  { %12455 = vmatmul.mubr.msk.bf16.gmra.mrb[64].mxu1 %vm242_vm0, %v16910_v47  ;;  %12503 = vmatmul.mubr.msk.bf16.gmra.mrb[60].mxu0 %vm242_vm0, %v16892_v51 }
 0x420   :  { %2835 = vmatpush1.bf16.msra.mxu1 %v2723_v49  ;;  %13880 = vmatpush3.bf16.msra.mxu0 %v3213_v43 }
 0x421   :  { %2862 = vmatprep.mubr.bf16.mxu1 %v15880_v28  ;;  %13881 = vmatprep.mubr.msk.bf16.mxu0 %vm242_vm0, %v16701_v61  ;;  %v14323_v61 = vld [vmem:[%s18708_s5 + $0x5d0] ss:$24 sps:$4 sm:$0xff]  }
 0x422   :  { %3031 = vmatprep.subr.bf16.mxu1 %v14322_v37 }
 0x427   :  { %12460 = vmatmul.mubr.msk.bf16.vlgmr.msra.gmra.mrb[8].mxu1 %vm242_vm0, %v16920_v0  ;;  %13882 = vmatmul.mubr.msk.bf16.vlgmr.msra.gmra.mrb[64].mxu0 %vm242_vm0, %v16716_v4  ;;  %v3014_v4 = vsel %vm255_vm1, %v14328_v52, 0  ;;  %v14349_v0 = vld [vmem:[%s18708_s5 + $0x1ec] ss:$24 sps:$4 sm:$0xff]  }
 0x428   :  { %3032 = vmatpush1.bf16.msra.mxu1 %v14320_v44  ;;  %2872 = vmatprep.mubr.bf16.mxu1 %v15880_v28 }
 0x429   :  { %13885 = vmatprep.mubr.msk.bf16.mxu0 %vm242_vm0, %v16727_v6  ;;  %3033 = vmatprep.subr.bf16.mxu1 %v14325_v50  ;;  %v14329_v6 = vld [vmem:[%s18708_s5 + $0x5b0] ss:$24 sps:$4 sm:$0xff]  }
 0x42c   :  { %3034 = vmatpush1.bf16.msra.mxu1 %v14323_v61 }
 0x42d   :  { %12498 = vmatprep.subr.msk.bf16.mxu1 %vm255_vm1, %v14326_v34 }
 0x42f   :  { %12461 = vmatmul.mubr.msk.bf16.gmra.mrb[68].mxu1 %vm242_vm0, %v16910_v47  ;;  %13886 = vmatmul.mubr.msk.bf16.gmra.mrb[68].mxu0 %vm242_vm0, %v16747_v12  ;;  %v14332_v12 = vld [vmem:[%s18708_s5 + $0x5e0] ss:$24 sps:$4 sm:$0xff]   ;;  %v14343_v47 = vld [vmem:[%s18708_s5 + $0x1bc] ss:$24 sps:$4 sm:$0xff]  }
 0x430   :  { %3036 = vmatpush1.bf16.msra.mxu1 %v3014_v4  ;;  %3063 = vmatprep.mubr.bf16.mxu1 %v15880_v28 }
 0x431   :  { %3133 = vmatprep.subr.bf16.mxu1 %v14331_v53  ;;  %3494 = vmatprep.mubr.bf16.mxu0 %v15880_v28 }
 0x432   :  { %3462 = vmatprep.subr.bf16.mxu0 %v14343_v47  ;;  %v14368_v47 = vld [vmem:[%s18708_s5 + $0x224] ss:$24 sps:$4 sm:$0x1f]  }
 0x437   :  { %12499 = vmatmul.mubr.msk.bf16.vlgmr.msra.gmra.mrb[0].mxu1 %vm242_vm0, %v16908_v29 }
 0x438   :  { %3134 = vmatpush1.bf16.msra.mxu1 %v14329_v6  ;;  %3073 = vmatprep.mubr.bf16.mxu1 %v15880_v28  ;;  %v14356_v6 = vld [vmem:[%s18708_s5 + $0x1c0] ss:$24 sps:$4 sm:$0xff]  }
 0x439   :  { %3135 = vmatprep.subr.bf16.mxu1 %v14334_v54  ;;  %v14359_v54 = vld [vmem:[%s18708_s5 + $0x3f8] ss:$24 sps:$4 sm:$0xff]  }
 0x43c   :  { %3136 = vmatpush1.bf16.msra.mxu1 %v14332_v12 }
 0x43d   :  { %12504 = vmatprep.subr.msk.bf16.mxu1 %vm255_vm1, %v14335_v56  ;;  %v14362_v56 = vld [vmem:[%s18708_s5 + $0x1f0] ss:$24 sps:$4 sm:$0xff]  }
 0x43f   :  { %12500 = vmatmul.mubr.msk.bf16.gmra.mrb[72].mxu1 %vm242_vm0, %v16892_v51 }
 0x440   :  { %3138 = vmatpush1.bf16.msra.mxu1 %v3026_v58  ;;  %3165 = vmatprep.mubr.bf16.mxu1 %v15880_v28  ;;  %v14367_v58 = vld [vmem:[%s18708_s5 + $0x42c] ss:$24 sps:$4 sm:$0xff]  }
 0x441   :  { %3411 = vmatprep.subr.bf16.mxu1 %v14340_v38  ;;  %v14365_v38 = vld [vmem:[%s18708_s5 + $0x428] ss:$24 sps:$4 sm:$0xff]  }
 0x447   :  { %12505 = vmatmul.mubr.msk.bf16.vlgmr.msra.gmra.mrb[8].mxu1 %vm242_vm0, %v16908_v29  ;;  %v14341_v29 = vld [vmem:[%s18708_s5 + $0x1b8] ss:$24 sps:$4 sm:$0xff]  }
 0x448   :  { %3175 = vmatprep.mubr.bf16.mxu1 %v15880_v28  ;;  %3412 = vmatpush1.bf16.msra.mxu1 %v14338_v62  ;;  %v14370_v62 = vld [vmem:[%s18708_s5 + $0x45c] ss:$24 sps:$4 sm:$0x1f]  }
 0x449   :  { %3463 = vmatpush1.bf16.msra.mxu0 %v14341_v29  ;;  %3413 = vmatprep.subr.bf16.mxu1 %v14346_v63  ;;  %v14372_v29 = vld [vmem:[%s18708_s5 + $0x220] ss:$24 sps:$4 sm:$0x1f]  }
 0x44a   :  { %3464 = vmatprep.subr.bf16.mxu0 %v14349_v0 }
 0x44d   :  { %3465 = vmatpush1.bf16.msra.mxu0 %v14347_v40  ;;  %v14373_v40 = vld [vmem:[%s18708_s5 + $0x458] ss:$24 sps:$4 sm:$0x1f]  }
 0x44e   :  { %12556 = vmatprep.subr.msk.bf16.mxu0 %vm255_vm1, %v14352_v2 }
 0x44f   :  { %12506 = vmatmul.mubr.msk.bf16.gmra.mrb[76].mxu1 %vm242_vm0, %v16892_v51  ;;  %v14344_v51 = vld [vmem:[%s18708_s5 + $0x1e0] ss:$24 sps:$4 sm:$0xff]  }
 0x450   :  { %3443 = vmatprep.mubr.bf16.mxu1 %v15880_v28  ;;  %3414 = vmatpush1.bf16.msra.mxu1 %v14344_v51 }
 0x451   :  { %12553 = vmatprep.subr.msk.bf16.mxu1 %vm255_vm1, %v14350_v33  ;;  %3467 = vmatpush1.bf16.msra.mxu0 %v3400_v60 }
 0x452   :  { %3776 = vmatprep.subr.bf16.mxu0 %v14361_v11 }
 0x454   :  { %3416 = vmatpush1.bf16.msra.mxu1 %v3394_v9 }
 0x455   :  { %3513 = vmatprep.subr.bf16.mxu1 %v14358_v10 }
 0x4d2   :  { %v2458_v13 = vpop.f32.mrb[56].mxu1  ;;  %v2509_v17 = vpop.f32.mrb[52].mxu0 }
 0x4d3   :  { %v2579_v19 = vadd.f32 %v2458_v13, %v16953_v14  ;;  %v2581_v20 = vadd.f32 %v2509_v17, %v16836_v59  ;;  %v2460_v21 = vpop.f32.mrb[57].mxu1  ;;  %v2511_v22 = vpop.f32.mrb[53].mxu0 }
 0x4d4   :  { %v2580_v1 = vadd.f32 %v2460_v21, %v16956_v18  ;;  %v2582_v5 = vadd.f32 %v2511_v22, %v16840_v55  ;;  %v2462_v16 = vpop.f32.mrb[58].mxu1  ;;  %v2513_v7 = vpop.f32.mrb[54].mxu0  ;;  %v3714_v21 = vsel %vm255_vm1, %v14373_v40, 0  ;;  %v14376_v22 = vld [vmem:[%s18708_s5 + $0x3f4] ss:$24 sps:$4 sm:$0xff]  }
 0x4d5   :  { %v2463_v23 = vpop.f32.mrb[59].mxu1  ;;  %v2514_v24 = vpop.f32.mrb[55].mxu0  ;;  %v14401_v40 = vld [vmem:[%s18708_s5 + $0x630] ss:$24 sps:$4 sm:$0xff]  }
 0x4e2   :  { %v2560_v15 = vpop.f32.mrb[60].mxu1  ;;  %v2823_v25 = vpop.f32.mrb[56].mxu0 }
 0x4e3   :  { %v2583_v26 = vadd.f32 %v2560_v15, %v17011_v27  ;;  %v2895_v30 = vadd.f32 %v2823_v25, %v2581_v20  ;;  %v2562_v31 = vpop.f32.mrb[61].mxu1  ;;  %v2825_v35 = vpop.f32.mrb[57].mxu0  ;;  %v3406_v20 = vsel %vm255_vm1, %v14372_v29, 0 }
 0x4e4   :  { %v2584_v14 = vadd.f32 %v2562_v31, %v17014_v46  ;;  %v2896_v59 = vadd.f32 %v2825_v35, %v2582_v5  ;;  %v2564_v39 = vpop.f32.mrb[62].mxu1  ;;  %v2827_v41 = vpop.f32.mrb[58].mxu0  ;;  %v17231_v31 = vld [vmem:[%s18708_s5 + $0x638] ss:$24 sps:$4 sm:$0xff]  }
 0x4e5   :  { %v2565_v42 = vpop.f32.mrb[63].mxu1  ;;  %v2828_v18 = vpop.f32.mrb[59].mxu0  ;;  %v17246_v39 = vld [vmem:[%s18708_s5 + $0x66c] ss:$24 sps:$4 sm:$0xff]   ;;  %v17254_v41 = vld [vmem:[%s18708_s5 + $0x668] ss:$24 sps:$4 sm:$0xff]  }
 0x4e6   :  { %v14386_v42 = vld [vmem:[%s18708_s5 + $0x454] ss:$24 sps:$4 sm:$0x1f]  }
 0x4e7   :  { %v17263_v18 = vld [vmem:[%s18708_s5 + $0x69c] ss:$24 sps:$4 sm:$0x1f]  }
 0x4f2   :  { %v2772_v45 = vpop.f32.mrb[64].mxu1  ;;  %v3126_v55 = vpop.f32.mrb[60].mxu0 }
 0x4f3   :  { %v17144_v32 = vadd.f32 %v2772_v45, %v2579_v19  ;;  %v17146_v36 = vadd.f32 %v3126_v55, %v2895_v30  ;;  %v2774_v48 = vpop.f32.mrb[65].mxu1  ;;  %v3128_v49 = vpop.f32.mrb[61].mxu0  ;;  %v14374_v30 = vld [vmem:[%s18708_s5 + $0x3f0] ss:$24 sps:$4 sm:$0xff]  }
 0x4f4   :  { %v17148_v43 = vadd.f32 %v2774_v48, %v2580_v1  ;;  %v17150_v27 = vadd.f32 %v3128_v49, %v2896_v59  ;;  %v2776_v37 = vpop.f32.mrb[66].mxu1  ;;  %v3130_v44 = vpop.f32.mrb[62].mxu0  ;;  %v17212_v1 = vld [vmem:[%s18708_s5 + $0x63c] ss:$24 sps:$4 sm:$0xff]  }
 0x4f5   :  { %v2777_v46 = vpop.f32.mrb[67].mxu1  ;;  %v3131_v50 = vpop.f32.mrb[63].mxu0  ;;  %v14382_v59 = vld [vmem:[%s18708_s5 + $0x424] ss:$24 sps:$4 sm:$0xff]  }
 0x4f6   :  { %v14390_v45 = vld [vmem:[%s18708_s5 + $0x450] ss:$24 sps:$4 sm:$0x1f]  }
 0x4f7   :  { %v14391_v48 = vld [vmem:[%s18708_s5 + $0x698] ss:$24 sps:$4 sm:$0x1f]  }
 0x4fa   :  { %v13883_v61 = vpop.f32.mrb[64].mxu0 }
 0x4fb   :  { %v3249_v34 = vpop.f32.mrb[65].mxu0 }
 0x4fc   :  { %v13884_v52 = vpop.f32.mrb[66].mxu0 }
 0x4fd   :  { %v17152_v4 = vpack.c.bf16 %v13884_v52, %v13883_v61  ;;  %v3252_v53 = vpop.f32.mrb[67].mxu0  ;;  %v4017_v61 = vsel %vm255_vm1, %v14391_v48, 0  ;;  %v17417_v48 = vld [vmem:[#allocation5] sm:$0x3f] }
 0x4fe   :  { %v3280_v12 = vpack.c.bf16 %v3252_v53, %v3249_v34  ;;  %v14394_v34 = vld [vmem:[%s18708_s5 + $0x404] ss:$24 sps:$4 sm:$0xff]   ;;  %v14397_v53 = vld [vmem:[%s18708_s5 + $0x434] ss:$24 sps:$4 sm:$0xff]  }
 0x4ff   :  { %v3601_v3 = vshrl.u32 %v17152_v4, 16  ;;  %v3604_v8 = vshll.u32 %v17152_v4, 16 }
 0x500   :  { %12554 = vmatmul.mubr.msk.bf16.vlgmr.msra.gmra.mrb[0].mxu1 %vm242_vm0, %v3280_v12  ;;  %12557 = vmatmul.mubr.msk.bf16.vlgmr.msra.gmra.mrb[8].mxu0 %vm242_vm0, %v3280_v12 }
 0x501   :  { %3514 = vmatpush1.bf16.msra.mxu1 %v14356_v6  ;;  %3777 = vmatpush1.bf16.msra.mxu0 %v14359_v54  ;;  %v3603_v5 = vrot.slane %v3601_v3, 2  ;;  %v3606_v16 = vrot.slane %v3604_v8, 3  ;;  %v14395_v54 = vld [vmem:[%s18708_s5 + $0x430] ss:$24 sps:$4 sm:$0xff]  }
 0x502   :  { %v2874_v51 = vpop.f32.mrb[68].mxu1  ;;  %v17183_v63 = vpop.f32.mrb[68].mxu0  ;;  %3453 = vmatprep.mubr.bf16.mxu1 %v15880_v28  ;;  %3504 = vmatprep.mubr.bf16.mxu0 %v15880_v28  ;;  %v14409_v3 = vld [vmem:[%s18708_s5 + $0x690] ss:$24 sps:$4 sm:$0x1f]  }
 0x503   :  { %v17190_v0 = vadd.f32 %v2874_v51, %v2583_v26  ;;  %v2876_v33 = vpop.f32.mrb[69].mxu1  ;;  %v3265_v2 = vpop.f32.mrb[69].mxu0  ;;  %3515 = vmatprep.subr.bf16.mxu1 %v14364_v57  ;;  %3778 = vmatprep.subr.bf16.mxu0 %v14367_v58  ;;  %v3607_v26 = vor.u32 %v3606_v16, %v3603_v5  ;;  %v14400_v57 = vld [vmem:[%s18708_s5 + $0x460] ss:$24 sps:$4 sm:$0x1f]   ;;  %v4011_v8 = vsel %vm255_vm1, %v14409_v3, 0 }
 0x504   :  { %v17194_v9 = vadd.f32 %v2876_v33, %v2584_v14  ;;  %v2878_v60 = vpop.f32.mrb[70].mxu1  ;;  %v17196_v10 = vpop.f32.mrb[70].mxu0  ;;  %v14380_v14 = vld [vmem:[%s18708_s5 + $0x420] ss:$24 sps:$4 sm:$0xff]   ;;  %v3720_v51 = vsel %vm255_vm1, %v14400_v57, 0 }
 0x505   :  { %v3283_v11 = vpack.c.bf16 %v17196_v10, %v17183_v63  ;;  %v2879_v13 = vpop.f32.mrb[71].mxu1  ;;  %v3268_v17 = vpop.f32.mrb[71].mxu0  ;;  %3516 = vmatpush1.bf16.msra.mxu1 %v14362_v56  ;;  %3779 = vmatpush1.bf16.msra.mxu0 %v14365_v38  ;;  %v14403_v63 = vld [vmem:[%s18708_s5 + $0x634] ss:$24 sps:$4 sm:$0xff]   ;;  %v14404_v33 = vld [vmem:[%s18708_s5 + $0x660] ss:$24 sps:$4 sm:$0xff]  }
 0x506   :  { %v17200_v19 = vpack.c.bf16 %v3268_v17, %v3265_v2  ;;  %12559 = vmatprep.subr.msk.bf16.mxu1 %vm255_vm1, %v14368_v47  ;;  %12601 = vmatprep.subr.msk.bf16.mxu0 %vm255_vm1, %v14370_v62  ;;  %v14407_v2 = vld [vmem:[%s18708_s5 + $0x694] ss:$24 sps:$4 sm:$0x1f]   ;;  %v14410_v60 = vld [vmem:[%s18708_s5 + $0x640] ss:$24 sps:$4 sm:$0xff]  }
 0x507   :  { %v14415_v10 = vld [vmem:[%s18708_s5 + $0x674] ss:$24 sps:$4 sm:$0xff]   ;;  %v14416_v13 = vld [vmem:[%s18708_s5 + $0x6a4] ss:$24 sps:$4 sm:$0x1f]  }
 0x508   :  { %v3609_v7 = vshrl.u32 %v17200_v19, 16  ;;  %v3612_v23 = vshll.u32 %v17200_v19, 16  ;;  %12555 = vmatmul.mubr.msk.bf16.gmra.mrb[80].mxu1 %vm242_vm0, %v17152_v4  ;;  %12558 = vmatmul.mubr.msk.bf16.gmra.mrb[72].mxu0 %vm242_vm0, %v17152_v4  ;;  %v3917_v52 = vrot.slane %v17200_v19, 5  ;;  %v14418_v17 = vld [vmem:[%s18708_s5 + $0x6a0] ss:$24 sps:$4 sm:$0x1f]  }
 0x509   :  { %3518 = vmatpush1.bf16.msra.mxu1 %v3406_v20  ;;  %3781 = vmatpush1.bf16.msra.mxu0 %v3714_v21  ;;  %v4023_v19 = vsel %vm255_vm1, %v14418_v17, 0 }
 0x50a   :  { %v3611_v24 = vrot.slane %v3609_v7, 2  ;;  %v3614_v15 = vrot.slane %v3612_v23, 3  ;;  %3545 = vmatprep.mubr.bf16.mxu1 %v15880_v28  ;;  %3808 = vmatprep.mubr.bf16.mxu0 %v15880_v28 }
 0x50b   :  { %3725 = vmatprep.subr.bf16.mxu1 %v14376_v22  ;;  %4079 = vmatprep.subr.bf16.mxu0 %v17212_v1 }
 0x50c   :  { %v17223_v25 = vor.u32 %v3614_v15, %v3611_v24 }
 0x50e   :  { %v17235_v35 = vsel %vm365_vm3, %v3607_v26, %v17223_v25 }
 0x510   :  { %12560 = vmatmul.mubr.msk.bf16.vlgmr.msra.gmra.mrb[8].mxu1 %vm242_vm0, %v3280_v12  ;;  %12602 = vmatmul.mubr.msk.bf16.vlgmr.msra.gmra.mrb[8].mxu0 %vm242_vm0, %v17235_v35  ;;  %v14398_v12 = vld [vmem:[%s18708_s5 + $0x464] ss:$24 sps:$4 sm:$0x1f]  }
 0x511   :  { %3726 = vmatpush1.bf16.msra.mxu1 %v14374_v30  ;;  %4080 = vmatpush1.bf16.msra.mxu0 %v17231_v31  ;;  %v4201_v30 = vlaneseq }
 0x512   :  { %v3075_v55 = vpop.f32.mrb[72].mxu1  ;;  %3555 = vmatprep.mubr.bf16.mxu1 %v15880_v28  ;;  %3818 = vmatprep.mubr.bf16.mxu0 %v15880_v28 }
 0x513   :  { %v17274_v49 = vadd.f32 %v3075_v55, %v17144_v32  ;;  %v3077_v37 = vpop.f32.mrb[73].mxu1  ;;  %3727 = vmatprep.subr.bf16.mxu1 %v14382_v59  ;;  %4081 = vmatprep.subr.bf16.mxu0 %v17246_v39  ;;  %v3708_v32 = vsel %vm255_vm1, %v14390_v45, 0 }
 0x514   :  { %v17278_v44 = vadd.f32 %v3077_v37, %v17148_v43  ;;  %v3079_v46 = vpop.f32.mrb[74].mxu1  ;;  %v17298_v43 = vrot.slane %v3283_v11, 5  ;;  %v14413_v11 = vld [vmem:[%s18708_s5 + $0x670] ss:$24 sps:$4 sm:$0xff]  }
 0x515   :  { %v3080_v50 = vpop.f32.mrb[75].mxu1  ;;  %3728 = vmatpush1.bf16.msra.mxu1 %v14380_v14  ;;  %4082 = vmatpush1.bf16.msra.mxu0 %v17254_v41 }
 0x516   :  { %12598 = vmatprep.subr.msk.bf16.mxu1 %vm255_vm1, %v14386_v42  ;;  %12646 = vmatprep.subr.msk.bf16.mxu0 %vm255_vm1, %v17263_v18  ;;  %v17309_v6 = vsel %vm925_vm2, %v3917_v52, %v17298_v43 }
 0x518   :  { %12561 = vmatmul.mubr.msk.bf16.gmra.mrb[84].mxu1 %vm242_vm0, %v17152_v4  ;;  %12603 = vmatmul.mubr.msk.bf16.gmra.mrb[76].mxu0 %vm242_vm0, %v17223_v25  ;;  %v14392_v4 = vld [vmem:[%s18708_s5 + $0x400] ss:$24 sps:$4 sm:$0xff]  }
 0x519   :  { %3730 = vmatpush1.bf16.msra.mxu1 %v3708_v32  ;;  %4084 = vmatpush1.bf16.msra.mxu0 %v4017_v61 }
 0x51a   :  { %3757 = vmatprep.mubr.bf16.mxu1 %v15880_v28  ;;  %4111 = vmatprep.mubr.bf16.mxu0 %v15880_v28 }
 0x51b   :  { %3827 = vmatprep.subr.bf16.mxu1 %v14394_v34 }
 0x520   :  { %12599 = vmatmul.mubr.msk.bf16.vlgmr.msra.gmra.mrb[0].mxu1 %vm242_vm0, %v17235_v35  ;;  %12647 = vmatmul.mubr.msk.bf16.vlgmr.msra.gmra.mrb[8].mxu0 %vm242_vm0, %v17309_v6 }
 0x521   :  { %3828 = vmatpush1.bf16.msra.mxu1 %v14392_v4  ;;  %3767 = vmatprep.mubr.bf16.mxu1 %v15880_v28 }
 0x522   :  { %v3177_v56 = vpop.f32.mrb[76].mxu1  ;;  %3829 = vmatprep.subr.bf16.mxu1 %v14397_v53  ;;  %4451 = vmatprep.mubr.bf16.mxu0 %v15880_v28 }
 0x523   :  { %v17327_v58 = vadd.f32 %v3177_v56, %v17190_v0  ;;  %v3179_v38 = vpop.f32.mrb[77].mxu1  ;;  %v14406_v0 = vld [vmem:[%s18708_s5 + $0x664] ss:$24 sps:$4 sm:$0xff]  }
 0x524   :  { %v17330_v47 = vadd.f32 %v3179_v38, %v17194_v9  ;;  %v3181_v62 = vpop.f32.mrb[78].mxu1  ;;  %v14412_v9 = vld [vmem:[%s18708_s5 + $0x644] ss:$24 sps:$4 sm:$0xff]   ;;  %s15884_s5 = smov [#allocation21]  }
 0x525   :  { %v3182_v29 = vpop.f32.mrb[79].mxu1  ;;  %3830 = vmatpush1.bf16.msra.mxu1 %v14395_v54 }
 0x526   :  { %12604 = vmatprep.subr.msk.bf16.mxu1 %vm255_vm1, %v14398_v12 }
 0x528   :  { %12600 = vmatmul.mubr.msk.bf16.gmra.mrb[88].mxu1 %vm242_vm0, %v17223_v25 }
 0x529   :  { %3832 = vmatpush1.bf16.msra.mxu1 %v3720_v51  ;;  %3859 = vmatprep.mubr.bf16.mxu1 %v15880_v28 }
 0x52a   :  { %4028 = vmatprep.subr.bf16.mxu1 %v14403_v63 }
 0x530   :  { %12605 = vmatmul.mubr.msk.bf16.vlgmr.msra.gmra.mrb[8].mxu1 %vm242_vm0, %v17235_v35 }
 0x531   :  { %4029 = vmatpush1.bf16.msra.mxu1 %v14401_v40  ;;  %3869 = vmatprep.mubr.bf16.mxu1 %v15880_v28 }
 0x532   :  { %4030 = vmatprep.subr.bf16.mxu1 %v14406_v0 }
 0x535   :  { %4031 = vmatpush1.bf16.msra.mxu1 %v14404_v33 }
 0x536   :  { %12643 = vmatprep.subr.msk.bf16.mxu1 %vm255_vm1, %v14407_v2 }
 0x538   :  { %12606 = vmatmul.mubr.msk.bf16.gmra.mrb[92].mxu1 %vm242_vm0, %v17223_v25 }
 0x539   :  { %4033 = vmatpush1.bf16.msra.mxu1 %v4011_v8  ;;  %4060 = vmatprep.mubr.bf16.mxu1 %v15880_v28 }
 0x53a   :  { %13895 = vmatprep.subr.bf16.mxu1 %v17212_v1 }
 0x540   :  { %12644 = vmatmul.mubr.msk.bf16.vlgmr.msra.gmra.mrb[0].mxu1 %vm242_vm0, %v17309_v6 }
 0x541   :  { %13898 = vmatpush1.bf16.msra.mxu1 %v17231_v31  ;;  %4070 = vmatprep.mubr.bf16.mxu1 %v15880_v28  ;;  %v17408_v31 = vshrl.u32 %v4201_v30, 7 }
 0x542   :  { %13896 = vmatprep.subr.bf16.mxu1 %v17246_v39 }
 0x543   :  { %v4211_v42 = vsub.s32 2, %v17408_v31 }
 0x545   :  { %13899 = vmatpush1.bf16.msra.mxu1 %v17254_v41  ;;  %v17423_v46 = vrot.slane %v17417_v48, %v4211_v42 }
 0x546   :  { %13897 = vmatprep.subr.msk.bf16.mxu1 %vm255_vm1, %v17263_v18 }
 0x548   :  { %12645 = vmatmul.mubr.msk.bf16.gmra.mrb[96].mxu1 %vm242_vm0, %v17298_v43 }
 0x549   :  { %13900 = vmatpush1.bf16.msra.mxu1 %v4017_v61  ;;  %4121 = vmatprep.mubr.bf16.mxu1 %v15880_v28 }
 0x54a   :  { %4130 = vmatprep.subr.bf16.mxu1 %v14412_v9 }
 0x550   :  { %12648 = vmatmul.mubr.msk.bf16.vlgmr.msra.gmra.mrb[100].mxu1 %vm242_vm0, %v17298_v43 }
 0x551   :  { %4131 = vmatpush1.bf16.msra.mxu1 %v14410_v60  ;;  %4162 = vmatprep.mubr.bf16.mxu1 %v15880_v28 }
 0x552   :  { %4132 = vmatprep.subr.bf16.mxu1 %v14415_v10 }
 0x555   :  { %4133 = vmatpush1.bf16.msra.mxu1 %v14413_v11 }
 0x556   :  { %12649 = vmatprep.subr.msk.bf16.mxu1 %vm255_vm1, %v14416_v13 }
 0x559   :  { %4135 = vmatpush1.bf16.msra.mxu1 %v4023_v19 }
 0x55c   :  { %12650 = vmatmul.mubr.msk.bf16.vlgmr.msra.gmra.mrb[8].mxu1 %vm242_vm0, %v17309_v6 }
 0x55d   :  { %4172 = vmatprep.mubr.bf16.mxu1 %v15880_v28 }
 0x564   :  { %12651 = vmatmul.mubr.msk.bf16.gmra.mrb[104].mxu1 %vm242_vm0, %v17298_v43 }
 0x5db   :  { %v3455_v20 = vpop.f32.mrb[80].mxu1  ;;  %v3506_v21 = vpop.f32.mrb[72].mxu0 }
 0x5dc   :  { %v3576_v22 = vadd.f32 %v3455_v20, %v17274_v49  ;;  %v3578_v1 = vadd.f32 %v3506_v21, %v17146_v36  ;;  %v3457_v5 = vpop.f32.mrb[81].mxu1  ;;  %v3508_v16 = vpop.f32.mrb[73].mxu0  ;;  %v4215_v49 = vsub.s32 3, %v17408_v31 }
 0x5dd   :  { %v3577_v7 = vadd.f32 %v3457_v5, %v17278_v44  ;;  %v3579_v23 = vadd.f32 %v3508_v16, %v17150_v27  ;;  %v3459_v24 = vpop.f32.mrb[82].mxu1  ;;  %v3510_v15 = vpop.f32.mrb[74].mxu0 }
 0x5de   :  { %v3460_v25 = vpop.f32.mrb[83].mxu1  ;;  %v3511_v26 = vpop.f32.mrb[75].mxu0  ;;  %v17426_v50 = vrot.slane %v17417_v48, %v4215_v49  ;;  %v17451_v24 = vsub.s32 0, %v17408_v31 }
 0x5df   :  { %v17456_v26 = vsub.s32 1, %v17408_v31 }
 0x5eb   :  { %v3557_v35 = vpop.f32.mrb[84].mxu1  ;;  %v3820_v14 = vpop.f32.mrb[76].mxu0 }
 0x5ec   :  { %v3580_v59 = vadd.f32 %v3557_v35, %v17327_v58  ;;  %v17411_v39 = vadd.f32 %v3820_v14, %v3578_v1  ;;  %v3559_v36 = vpop.f32.mrb[85].mxu1  ;;  %v3822_v41 = vpop.f32.mrb[77].mxu0  ;;  %v14449_v1 = vld [vmem:[#allocation7 + $0x4b8] ss:$12 sps:$4 sm:$0xff]  }
 0x5ed   :  { %v3581_v27 = vadd.f32 %v3559_v36, %v17330_v47  ;;  %v17415_v18 = vadd.f32 %v3822_v41, %v3579_v23  ;;  %v3561_v45 = vpop.f32.mrb[86].mxu1  ;;  %v3824_v55 = vpop.f32.mrb[78].mxu0  ;;  %13676 = vmatprep.subr.bf16.mxu1 %v14449_v1  ;;  %v14450_v35 = vld [vmem:[#allocation7 + $0x3f8] ss:$12 sps:$4 sm:$0xff]   ;;  %v14454_v36 = vld [vmem:[#allocation7 + $0x4d0] ss:$12 sps:$4 sm:$0xff]   ;;  %v4204_v41 = vrot.slane %v17417_v48, %v17451_v24 }
 0x5ee   :  { %v3562_v37 = vpop.f32.mrb[87].mxu1  ;;  %v3825_v44 = vpop.f32.mrb[79].mxu0  ;;  %13677 = vmatpush3.bf16.msra.mxu1 %v14450_v35  ;;  %v14455_v45 = vld [vmem:[#allocation7 + $0x410] ss:$12 sps:$4 sm:$0xff]   ;;  %v14459_v55 = vld [vmem:[#allocation7 + $0x4e8] ss:$12 sps:$4 sm:$0xff]  }
 0x5ef   :  { %13678 = vmatprep.subr.bf16.mxu1 %v14454_v36 }
 0x5f2   :  { %13679 = vmatpush3.bf16.msra.mxu1 %v14455_v45 }
 0x5f3   :  { %v4113_v32 = vpop.f32.mrb[8].mxu0  ;;  %13680 = vmatprep.subr.bf16.mxu1 %v14459_v55  ;;  %v4223_v55 = vsub.s32 5, %v17408_v31 }
 0x5f4   :  { %v4233_v61 = vadd.f32 %v17423_v46, %v4113_v32  ;;  %v4115_v34 = vpop.f32.mrb[9].mxu0 }
 0x5f5   :  { %v4234_v43 = vadd.f32 %v17426_v50, %v4115_v34  ;;  %v4117_v52 = vpop.f32.mrb[10].mxu0 }
 0x5f6   :  { %v4269_v4 = vmin.f32 %v4233_v61, 0.0  ;;  %v4239_v53 = vadd.f32 %v17423_v46, %v4117_v52  ;;  %v4119_v6 = vpop.f32.mrb[11].mxu0  ;;  %vm4251_vm4 = vcmp.gt.f32.partialorder %v4233_v61, 0.0 }
 0x5f7   :  { %v4270_v54 = vmin.f32 %v4234_v43, 0.0  ;;  %v4240_v12 = vadd.f32 %v17426_v50, %v4119_v6  ;;  %vm4252_vm6 = vcmp.gt.f32.partialorder %v4234_v43, 0.0 }
 0x5f8   :  { %v4289_v56 = vmul.f32 1.442695, %v4269_v4  ;;  %v4275_v57 = vmin.f32 %v4239_v53, 0.0  ;;  %vm4257_vm5 = vcmp.gt.f32.partialorder %v4239_v53, 0.0 }
 0x5f9   :  { %v4291_v58 = vmul.f32 1.442695, %v4270_v54  ;;  %v4276_v38 = vmin.f32 %v4240_v12, 0.0  ;;  %vm4258_vm7 = vcmp.gt.f32.partialorder %v4240_v12, 0.0 }
 0x5fa   :  { %15485 = vpow2.f32 %v4289_v56  ;;  %v4301_v47 = vmul.f32 1.442695, %v4275_v57 }
 0x5fb   :  { %15487 = vpow2.f32 %v4291_v58  ;;  %v4303_v62 = vmul.f32 1.442695, %v4276_v38  ;;  %v3769_v29 = vpop.f32.mrb[88].mxu1 }
 0x5fc   :  { %15489 = vpow2.f32 %v4301_v47  ;;  %v17432_v51 = vadd.f32 %v3769_v29, %v3576_v22  ;;  %v3771_v63 = vpop.f32.mrb[89].mxu1 }
 0x5fd   :  { %15491 = vpow2.f32 %v4303_v62  ;;  %v17434_v40 = vadd.f32 %v3771_v63, %v3577_v7  ;;  %v3773_v0 = vpop.f32.mrb[90].mxu1 }
 0x5fe   :  { %v3774_v33 = vpop.f32.mrb[91].mxu1 }
 0x604   :  { %v15486_v2 = vpop.eup %15485 }
 0x605   :  { %v15488_v3 = vpop.eup %15487  ;;  %v12654_v8 = vadd.f32 -1.0, %v15486_v2 }
 0x606   :  { %v15490_v9 = vpop.eup %15489  ;;  %v12655_v60 = vadd.f32 -1.0, %v15488_v3 }
 0x607   :  { %v15492_v10 = vpop.eup %15491  ;;  %v12660_v11 = vadd.f32 -1.0, %v15490_v9  ;;  %v17436_v17 = vsel %vm4251_vm4, %v4233_v61, %v12654_v8  ;;  %v14460_v61 = vld [vmem:[#allocation7 + $0x428] ss:$12 sps:$4 sm:$0xff]  }
 0x608   :  { %v12661_v13 = vadd.f32 -1.0, %v15492_v10  ;;  %v17442_v21 = vsel %vm4252_vm6, %v4234_v43, %v12655_v60  ;;  %13681 = vmatpush3.bf16.msra.mxu1 %v14460_v61 }
 0x609   :  { %v17438_v19 = vsel %vm4257_vm5, %v4239_v53, %v12660_v11 }
 0x60a   :  { %v4364_v20 = vpack.c.bf16 %v17438_v19, %v17436_v17  ;;  %v17444_v22 = vsel %vm4258_vm7, %v4240_v12, %v12661_v13 }
 0x60b   :  { %v3871_v5 = vpop.f32.mrb[92].mxu1  ;;  %v4365_v16 = vpack.c.bf16 %v17444_v22, %v17442_v21 }
 0x60c   :  { %v17448_v7 = vadd.f32 %v3871_v5, %v3580_v59  ;;  %v3873_v23 = vpop.f32.mrb[93].mxu1  ;;  %v4208_v59 = vrot.slane %v17417_v48, %v17456_v26 }
 0x60d   :  { %v17453_v15 = vadd.f32 %v3873_v23, %v3581_v27  ;;  %v3875_v25 = vpop.f32.mrb[94].mxu1 }
 0x60e   :  { %v3876_v14 = vpop.f32.mrb[95].mxu1 }
 0x613   :  { %v4062_v49 = vpop.f32.mrb[0].mxu1 }
 0x614   :  { %v4231_v27 = vadd.f32 %v4204_v41, %v4062_v49  ;;  %v4064_v37 = vpop.f32.mrb[1].mxu1 }
 0x615   :  { %v4232_v44 = vadd.f32 %v4208_v59, %v4064_v37  ;;  %v4066_v32 = vpop.f32.mrb[2].mxu1 }
 0x616   :  { %v4267_v34 = vmin.f32 %v4231_v27, 0.0  ;;  %v4237_v43 = vadd.f32 %v4204_v41, %v4066_v32  ;;  %v4068_v52 = vpop.f32.mrb[3].mxu1  ;;  %vm4249_vm8 = vcmp.gt.f32.partialorder %v4231_v27, 0.0 }
 0x617   :  { %v4268_v4 = vmin.f32 %v4232_v44, 0.0  ;;  %v4238_v53 = vadd.f32 %v4208_v59, %v4068_v52  ;;  %vm4250_vm9 = vcmp.gt.f32.partialorder %v4232_v44, 0.0 }
 0x618   :  { %v4285_v6 = vmul.f32 1.442695, %v4267_v34  ;;  %v4273_v54 = vmin.f32 %v4237_v43, 0.0  ;;  %vm4255_vm10 = vcmp.gt.f32.partialorder %v4237_v43, 0.0 }
 0x619   :  { %v4287_v12 = vmul.f32 1.442695, %v4268_v4  ;;  %v4274_v56 = vmin.f32 %v4238_v53, 0.0  ;;  %vm4256_vm11 = vcmp.gt.f32.partialorder %v4238_v53, 0.0 }
 0x61a   :  { %15493 = vpow2.f32 %v4285_v6  ;;  %v4297_v57 = vmul.f32 1.442695, %v4273_v54 }
 0x61b   :  { %15495 = vpow2.f32 %v4287_v12  ;;  %v4299_v58 = vmul.f32 1.442695, %v4274_v56  ;;  %v4072_v38 = vpop.f32.mrb[96].mxu1  ;;  %v4224_v12 = vrot.slane %v17417_v48, %v4223_v55 }
 0x61c   :  { %15497 = vpow2.f32 %v4297_v57  ;;  %v4193_v47 = vadd.f32 %v4072_v38, %v17432_v51  ;;  %v4074_v62 = vpop.f32.mrb[97].mxu1 }
 0x61d   :  { %15499 = vpow2.f32 %v4299_v58  ;;  %v4194_v29 = vadd.f32 %v4074_v62, %v17434_v40  ;;  %v4076_v63 = vpop.f32.mrb[98].mxu1  ;;  %v15881_v58 = vmov 65535  }
 0x61e   :  { %v4243_v0 = vadd.f32 %v4204_v41, %v4193_v47  ;;  %v4077_v33 = vpop.f32.mrb[99].mxu1  ;;  %v4219_v41 = vsub.s32 4, %v17408_v31 }
 0x61f   :  { %v17464_v2 = vadd.f32 %v4208_v59, %v4194_v29 }
 0x620   :  { %v4279_v3 = vmin.f32 %v4243_v0, 0.0  ;;  %vm4261_vm13 = vcmp.gt.f32.partialorder %v4243_v0, 0.0 }
 0x621   :  { %v4280_v8 = vmin.f32 %v17464_v2, 0.0  ;;  %vm4262_vm14 = vcmp.gt.f32.partialorder %v17464_v2, 0.0 }
 0x622   :  { %v4309_v9 = vmul.f32 1.442695, %v4279_v3 }
 0x623   :  { %v4311_v60 = vmul.f32 1.442695, %v4280_v8  ;;  %v4123_v10 = vpop.f32.mrb[100].mxu1 }
 0x624   :  { %v15494_v11 = vpop.eup %15493  ;;  %15501 = vpow2.f32 %v4309_v9  ;;  %v4195_v13 = vadd.f32 %v4123_v10, %v17411_v39  ;;  %v4125_v51 = vpop.f32.mrb[101].mxu1 }
 0x625   :  { %v15496_v1 = vpop.eup %15495  ;;  %v12652_v5 = vadd.f32 -1.0, %v15494_v11  ;;  %15503 = vpow2.f32 %v4311_v60  ;;  %v4196_v40 = vadd.f32 %v4125_v51, %v17415_v18  ;;  %v4127_v23 = vpop.f32.mrb[102].mxu1 }
 0x626   :  { %v15498_v25 = vpop.eup %15497  ;;  %v12653_v35 = vadd.f32 -1.0, %v15496_v1  ;;  %v17470_v14 = vadd.f32 %v17423_v46, %v4195_v13  ;;  %v4128_v36 = vpop.f32.mrb[103].mxu1 }
 0x627   :  { %v15500_v59 = vpop.eup %15499  ;;  %v12658_v45 = vadd.f32 -1.0, %v15498_v25  ;;  %v17474_v39 = vadd.f32 %v17426_v50, %v4196_v40  ;;  %v4339_v37 = vsel %vm4249_vm8, %v4231_v27, %v12652_v5  ;;  %v4220_v50 = vrot.slane %v17417_v48, %v4219_v41 }
 0x628   :  { %v12659_v18 = vadd.f32 -1.0, %v15500_v59  ;;  %v4281_v49 = vmin.f32 %v17470_v14, 0.0  ;;  %v4340_v52 = vsel %vm4250_vm9, %v4232_v44, %v12653_v35  ;;  %v4399_v44 = vsel %vm4397_vm12, 4294967295, %v15881_v58 }
 0x629   :  { %v4345_v32 = vsel %vm4255_vm10, %v4237_v43, %v12658_v45  ;;  %v4282_v46 = vmin.f32 %v17474_v39, 0.0  ;;  %v17492_v8 = vsel %vm925_vm2, %v4399_v44, 0  ;;  %vm4263_vm0 = vcmp.gt.f32.partialorder %v17470_v14, 0.0 }
 0x62a   :  { %v4362_v61 = vpack.c.bf16 %v4345_v32, %v4339_v37  ;;  %v4313_v34 = vmul.f32 1.442695, %v4281_v49  ;;  %v4346_v4 = vsel %vm4256_vm11, %v4238_v53, %v12659_v18  ;;  %v17507_v18 = vld [vmem:[%s18709_s28] sm:$0xff]   ;;  %vm4264_vm3 = vcmp.gt.f32.partialorder %v17474_v39, 0.0 }
 0x62b   :  { %v4315_v6 = vmul.f32 1.442695, %v4282_v46  ;;  %v4363_v54 = vpack.c.bf16 %v4346_v4, %v4340_v52  ;;  %vm4957_vm10 = vsmask.f32 2304  ;;  %vm5737_vm11 = vcmask 261120  }
 0x62c   :  { %15505 = vpow2.f32 %v4313_v34 }
 0x62d   :  { %15507 = vpow2.f32 %v4315_v6  ;;  %4419 = vmatprep.subr.bf16.mxu0 %v4363_v54 }
 0x62e   :  { %v15502_v56 = vpop.eup %15501  ;;  %4420 = vmatpush1.bf16.msra.mxu0 %v4362_v61 }
 0x62f   :  { %v15504_v27 = vpop.eup %15503  ;;  %v12664_v43 = vadd.f32 -1.0, %v15502_v56  ;;  %v4164_v57 = vpop.f32.mrb[8].mxu1 }
 0x630   :  { %v17483_v53 = vadd.f32 %v4220_v50, %v4164_v57  ;;  %v4166_v38 = vpop.f32.mrb[9].mxu1  ;;  %v12665_v47 = vadd.f32 -1.0, %v15504_v27 }
 0x631   :  { %v4351_v62 = vsel %vm4261_vm13, %v4243_v0, %v12664_v43  ;;  %v17485_v29 = vadd.f32 %v4224_v12, %v4166_v38  ;;  %v4168_v63 = vpop.f32.mrb[10].mxu1 }
 0x632   :  { %v4271_v48 = vmin.f32 %v17483_v53, 0.0  ;;  %v17489_v33 = vadd.f32 %v4220_v50, %v4168_v63  ;;  %v4170_v3 = vpop.f32.mrb[11].mxu1  ;;  %v4368_v9 = vpack.c.bf16 %v4351_v62, %v4351_v62  ;;  %v4352_v0 = vsel %vm4262_vm14, %v17464_v2, %v12665_v47 }
 0x633   :  { %v4272_v60 = vmin.f32 %v17485_v29, 0.0  ;;  %v17495_v10 = vadd.f32 %v4224_v12, %v4170_v3  ;;  %v4369_v51 = vpack.c.bf16 %v4352_v0, %v4352_v0  ;;  %vm4253_vm4 = vcmp.gt.f32.partialorder %v17483_v53, 0.0 }
 0x634   :  { %v4293_v11 = vmul.f32 1.442695, %v4271_v48  ;;  %v4277_v13 = vmin.f32 %v17489_v33, 0.0  ;;  %v4402_v2 = vand.u32 %v17492_v8, %v4368_v9  ;;  %vm4259_vm5 = vcmp.gt.f32.partialorder %v17489_v33, 0.0 }
 0x635   :  { %v4295_v1 = vmul.f32 1.442695, %v4272_v60  ;;  %v4278_v5 = vmin.f32 %v17495_v10, 0.0  ;;  %v4405_v25 = vand.u32 %v17492_v8, %v4369_v51  ;;  %vm4254_vm6 = vcmp.gt.f32.partialorder %v17485_v29, 0.0 }
 0x636   :  { %v15506_v40 = vpop.eup %15505  ;;  %15509 = vpow2.f32 %v4293_v11  ;;  %v4305_v23 = vmul.f32 1.442695, %v4277_v13  ;;  %vm4260_vm7 = vcmp.gt.f32.partialorder %v17495_v10, 0.0  ;;  %v14421_v48 = vld [vmem:[%s18709_s28 + $0x10] ss:$0 sps:$4 sm:$0x11]  }
 0x637   :  { %v15508_v35 = vpop.eup %15507  ;;  %v12666_v36 = vadd.f32 -1.0, %v15506_v40  ;;  %15511 = vpow2.f32 %v4295_v1  ;;  %v4307_v41 = vmul.f32 1.442695, %v4278_v5  ;;  %v4174_v59 = vpop.f32.mrb[104].mxu1  ;;  %4421 = vmatprep.subr.bf16.mxu0 %v4405_v25  ;;  %v14424_v13 = vld [vmem:[#allocation7 + $0x3f4] ss:$12 sps:$4 sm:$0xff]  }
 0x638   :  { %15513 = vpow2.f32 %v4305_v23  ;;  %v4197_v45 = vadd.f32 %v4174_v59, %v17448_v7  ;;  %v4176_v55 = vpop.f32.mrb[105].mxu1  ;;  %v12667_v49 = vadd.f32 -1.0, %v15508_v35  ;;  %4422 = vmatpush1.bf16.msra.mxu0 %v4402_v2  ;;  %v14422_v1 = vld [vmem:[#allocation7 + $0x3f0] ss:$12 sps:$4 sm:$0xff]   ;;  %v14427_v5 = vld [vmem:[#allocation7 + $0x40c] ss:$12 sps:$4 sm:$0xff]  }
 0x639   :  { %v4353_v37 = vsel %vm4263_vm0, %v17470_v14, %v12666_v36  ;;  %15515 = vpow2.f32 %v4307_v41  ;;  %v4198_v32 = vadd.f32 %v4176_v55, %v17453_v15  ;;  %v4178_v46 = vpop.f32.mrb[106].mxu1  ;;  %4480 = vmatprep.subr.bf16.mxu0 %v4365_v16  ;;  %v14425_v40 = vld [vmem:[#allocation7 + $0x408] ss:$12 sps:$4 sm:$0xff]   ;;  %v14428_v23 = vld [vmem:[#allocation7 + $0x420] ss:$12 sps:$4 sm:$0xff]  }
 0x63a   :  { %v4247_v61 = vadd.f32 %v4220_v50, %v4197_v45  ;;  %v4179_v34 = vpop.f32.mrb[107].mxu1  ;;  %v4354_v7 = vsel %vm4264_vm3, %v17474_v39, %v12667_v49  ;;  %v4370_v52 = vpack.c.bf16 %v4353_v37, %v4353_v37  ;;  %v14420_v50 = vld [vmem:[%s18709_s28 + $0x8] sm:$0xff]   ;;  %v14433_v25 = vld [vmem:[#allocation7 + $0x43c] ss:$12 sps:$4 sm:$0xff]   ;;  %v14439_v59 = vld [vmem:[#allocation7 + $0x46c] ss:$12 sps:$4 sm:$0xff]  }
 0x63b   :  { %v4248_v4 = vadd.f32 %v4224_v12, %v4198_v32  ;;  %v4371_v6 = vpack.c.bf16 %v4354_v7, %v4354_v7  ;;  %12673 = vmatmul.mubr.msk.bf16.vlgmr.msra.gmra.mrb[80].mxu0 %vm4387_vm15, %v17507_v18  ;;  %v14431_v35 = vld [vmem:[#allocation7 + $0x438] ss:$12 sps:$4 sm:$0xff]   ;;  %v14436_v36 = vld [vmem:[#allocation7 + $0x454] ss:$12 sps:$4 sm:$0xff]   ;;  %v14434_v41 = vld [vmem:[#allocation7 + $0x450] ss:$12 sps:$4 sm:$0xff]  }
 0x63c   :  { %v4283_v54 = vmin.f32 %v4247_v61, 0.0  ;;  %4481 = vmatpush1.bf16.msra.mxu0 %v4364_v20  ;;  %4461 = vmatprep.mubr.bf16.mxu0 %v15880_v28  ;;  %v4408_v16 = vand.u32 %v17492_v8, %v4370_v52  ;;  %vm4265_vm9 = vcmp.gt.f32.partialorder %v4247_v61, 0.0  ;;  %v14437_v2 = vld [vmem:[#allocation7 + $0x468] ss:$12 sps:$4 sm:$0xff]   ;;  %v14442_v45 = vld [vmem:[#allocation7 + $0x484] ss:$12 sps:$4 sm:$0xff]  }
 0x63d   :  { %v4284_v14 = vmin.f32 %v4248_v4, 0.0  ;;  %v4411_v15 = vand.u32 %v17492_v8, %v4371_v6  ;;  %vm4266_vm8 = vcmp.gt.f32.partialorder %v4248_v4, 0.0  ;;  %v14440_v55 = vld [vmem:[#allocation7 + $0x480] ss:$12 sps:$4 sm:$0xff]   ;;  %v14443_v49 = vld [vmem:[#allocation7 + $0x498] ss:$12 sps:$4 sm:$0xff]  }
 0x63e   :  { %v4317_v21 = vmul.f32 1.442695, %v4283_v54  ;;  %v14448_v37 = vld [vmem:[#allocation7 + $0x4b4] ss:$12 sps:$4 sm:$0xff]   ;;  %v14446_v32 = vld [vmem:[#allocation7 + $0x4b0] ss:$12 sps:$4 sm:$0xff]  }
 0x63f   :  { %v4319_v22 = vmul.f32 1.442695, %v4284_v14  ;;  %4482 = vmatprep.subr.bf16.mxu0 %v4411_v15  ;;  %v14453_v46 = vld [vmem:[#allocation7 + $0x4cc] ss:$12 sps:$4 sm:$0xff]   ;;  %v14458_v34 = vld [vmem:[#allocation7 + $0x4e4] ss:$12 sps:$4 sm:$0xff]  }
 0x640   :  { %v15510_v39 = vpop.eup %15509  ;;  %15517 = vpow2.f32 %v4317_v21  ;;  %4483 = vmatpush1.bf16.msra.mxu0 %v4408_v16  ;;  %v14464_v7 = vld [vmem:[#allocation7 + $0x500] ss:$12 sps:$4 sm:$0xff]   ;;  %v14463_v6 = vld [vmem:[#allocation7 + $0x4fc] ss:$12 sps:$4 sm:$0xff]   ;;  %v14469_v54 = vld [vmem:[#allocation7 + $0x518] ss:$12 sps:$4 sm:$0xff]  }
 0x641   :  { %v15512_v12 = vpop.eup %15511  ;;  %v12656_v56 = vadd.f32 -1.0, %v15510_v39  ;;  %15519 = vpow2.f32 %v4319_v22  ;;  %v14465_v52 = vld [vmem:[#allocation7 + $0x440] ss:$12 sps:$4 sm:$0xff]   ;;  %13682 = vmatprep.subr.bf16.mxu1 %v14464_v7  ;;  %v14470_v14 = vld [vmem:[#allocation7 + $0x458] ss:$12 sps:$4 sm:$0xff]  }
 0x642   :  { %v15514_v17 = vpop.eup %15513  ;;  %v12657_v19 = vadd.f32 -1.0, %v15512_v12  ;;  %13683 = vmatpush3.bf16.msra.mxu1 %v14465_v52  ;;  %v14461_v15 = vld [vmem:[#allocation7 + $0x4f8] ss:$12 sps:$4 sm:$0xff]   ;;  %v14468_v21 = vld [vmem:[#allocation7 + $0x514] ss:$12 sps:$4 sm:$0xff]  }
 0x643   :  { %v15516_v20 = vpop.eup %15515  ;;  %v12662_v27 = vadd.f32 -1.0, %v15514_v17  ;;  %12674 = vmatmul.mubr.msk.bf16.gmra.mrb[84].mxu0 %vm4387_vm15, %v14420_v50  ;;  %v4343_v57 = vsel %vm4253_vm4, %v17483_v53, %v12656_v56  ;;  %13684 = vmatprep.subr.bf16.mxu1 %v14469_v54  ;;  %v14474_v22 = vld [vmem:[#allocation7 + $0x530] ss:$12 sps:$4 sm:$0xff]   ;;  %v14479_v12 = vld [vmem:[#allocation7 + $0x548] ss:$12 sps:$4 sm:$0xff]  }
 0x644   :  { %v12663_v43 = vadd.f32 -1.0, %v15516_v20  ;;  %4471 = vmatprep.mubr.bf16.mxu0 %v15880_v28  ;;  %v4344_v47 = vsel %vm4254_vm6, %v17485_v29, %v12657_v19  ;;  %v14475_v16 = vld [vmem:[#allocation7 + $0x470] ss:$12 sps:$4 sm:$0xff]   ;;  %v14480_v56 = vld [vmem:[#allocation7 + $0x488] ss:$12 sps:$4 sm:$0xff]   ;;  %vm8130_vm6 = vcmask 89088  }
 0x645   :  { %v4349_v44 = vsel %vm4259_vm5, %v17489_v33, %v12662_v27  ;;  %v14466_v39 = vld [vmem:[#allocation7 + $0x510] ss:$12 sps:$4 sm:$0xff]   ;;  %v14471_v17 = vld [vmem:[#allocation7 + $0x528] ss:$12 sps:$4 sm:$0xff]   ;;  %v14484_v20 = vld [vmem:[#allocation7 + $0x560] ss:$12 sps:$4 sm:$0xff]  }
 0x646   :  { %v4366_v38 = vpack.c.bf16 %v4349_v44, %v4343_v57  ;;  %v4350_v62 = vsel %vm4260_vm7, %v17495_v10, %v12663_v43  ;;  %13685 = vmatpush3.bf16.msra.mxu1 %v14470_v14  ;;  %v14478_v19 = vld [vmem:[#allocation7 + $0x544] ss:$12 sps:$4 sm:$0xff]   ;;  %v14485_v27 = vld [vmem:[#allocation7 + $0x4a0] ss:$12 sps:$4 sm:$0xff]   ;;  %v14483_v57 = vld [vmem:[#allocation7 + $0x55c] ss:$12 sps:$4 sm:$0xff]  }
 0x647   :  { %v4367_v63 = vpack.c.bf16 %v4350_v62, %v4344_v47  ;;  %13686 = vmatprep.subr.bf16.mxu1 %v14474_v22  ;;  %v14476_v43 = vld [vmem:[#allocation7 + $0x540] ss:$12 sps:$4 sm:$0xff]   ;;  %v14489_v44 = vld [vmem:[#allocation7 + $0x638] ss:$12 sps:$4 sm:$0xff]   ;;  %v14486_v52 = vld [vmem:[#allocation7 + $0x570] ss:$12 sps:$4 sm:$0xff]  }
 0x648   :  { %v14488_v47 = vld [vmem:[#allocation7 + $0x574] ss:$12 sps:$4 sm:$0xff]  }
 0x649   :  { %4541 = vmatprep.subr.bf16.mxu0 %v4367_v63 }
 0x64a   :  { %v15518_v53 = vpop.eup %15517  ;;  %13687 = vmatpush3.bf16.msra.mxu1 %v14475_v16 }
 0x64b   :  { %v15520_v3 = vpop.eup %15519  ;;  %v12668_v9 = vadd.f32 -1.0, %v15518_v53  ;;  %12675 = vmatmul.mubr.msk.bf16.gmra.mrb[88].mxu0 %vm4387_vm15, %v14421_v48  ;;  %13688 = vmatprep.subr.bf16.mxu1 %v14479_v12  ;;  %v14494_v12 = vld [vmem:[#allocation7 + $0x650] ss:$12 sps:$4 sm:$0xff]  }
 0x64c   :  { %v12669_v33 = vadd.f32 -1.0, %v15520_v3  ;;  %4512 = vmatprep.mubr.bf16.mxu0 %v15880_v28 }
 0x64d   :  { %v4355_v29 = vsel %vm4265_vm9, %v4247_v61, %v12668_v9  ;;  %v14451_v61 = vld [vmem:[#allocation7 + $0x4c8] ss:$12 sps:$4 sm:$0xff]   ;;  %vm9875_vm9 = vcmask 780288  }
 0x64e   :  { %v4356_v60 = vsel %vm4266_vm8, %v4248_v4, %v12669_v33  ;;  %v4372_v10 = vpack.c.bf16 %v4355_v29, %v4355_v29  ;;  %v14456_v4 = vld [vmem:[#allocation7 + $0x4e0] ss:$12 sps:$4 sm:$0xff]   ;;  %13689 = vmatpush3.bf16.msra.mxu1 %v14480_v56  ;;  %vm9364_vm8 = vcmask 48128  }
 0x64f   :  { %v4373_v0 = vpack.c.bf16 %v4356_v60, %v4356_v60  ;;  %13690 = vmatprep.subr.bf16.mxu1 %v14484_v20  ;;  %v14491_v20 = vld [vmem:[#allocation7 + $0x588] ss:$12 sps:$4 sm:$0xff]  }
 0x650   :  { %v4414_v51 = vand.u32 %v17492_v8, %v4372_v10 }
 0x651   :  { %v4417_v11 = vand.u32 %v17492_v8, %v4373_v0  ;;  %v14430_v8 = vld [vmem:[#allocation7 + $0x424] ss:$12 sps:$4 sm:$0xff]  }
 0x652   :  { %13691 = vmatpush3.bf16.msra.mxu1 %v14485_v27  ;;  %v14495_v27 = vld [vmem:[#allocation7 + $0x590] ss:$12 sps:$4 sm:$0xff]  }
 0x653   :  { %12676 = vmatmul.mubr.msk.bf16.vlgmr.msra.gmra.mrb[92].mxu0 %vm4387_vm15, %v17507_v18  ;;  %13698 = vmatprep.subr.bf16.mxu1 %v14489_v44 }
 0x654   :  { %4542 = vmatpush1.bf16.msra.mxu0 %v4366_v38  ;;  %4522 = vmatprep.mubr.bf16.mxu0 %v15880_v28  ;;  %v14481_v38 = vld [vmem:[#allocation7 + $0x558] ss:$12 sps:$4 sm:$0xff]  }
 0x655   :  { %4543 = vmatprep.subr.bf16.mxu0 %v4417_v11 }
 0x658   :  { %4544 = vmatpush1.bf16.msra.mxu0 %v4414_v51 }
 0x659   :  { %5741 = vmatprep.subr.bf16.mxu0 %v14424_v13 }
 0x65b   :  { %12677 = vmatmul.mubr.msk.bf16.gmra.mrb[96].mxu0 %vm4387_vm15, %v14420_v50 }
 0x65c   :  { %4532 = vmatprep.mubr.bf16.mxu0 %v15880_v28 }
 0x663   :  { %12678 = vmatmul.mubr.msk.bf16.gmra.mrb[100].mxu0 %vm4387_vm15, %v14421_v48 }
 0x664   :  { %4573 = vmatprep.mubr.bf16.mxu0 %v15880_v28 }
 0x66b   :  { %12679 = vmatmul.mubr.msk.bf16.vlgmr.msra.gmra.mrb[104].mxu0 %vm4387_vm15, %v17507_v18  ;;  %v14445_v18 = vld [vmem:[#allocation7 + $0x49c] ss:$12 sps:$4 sm:$0xff]  }
 0x66c   :  { %4583 = vmatprep.mubr.bf16.mxu0 %v15880_v28  ;;  %5742 = vmatpush1.bf16.msra.mxu0 %v14422_v1 }
 0x66d   :  { %5743 = vmatprep.subr.bf16.mxu0 %v14427_v5 }
 0x670   :  { %5744 = vmatpush1.bf16.msra.mxu0 %v14425_v40 }
 0x671   :  { %5745 = vmatprep.subr.bf16.mxu0 %v14430_v8 }
 0x673   :  { %12680 = vmatmul.mubr.msk.bf16.gmra.mrb[108].mxu0 %vm4387_vm15, %v14420_v50  ;;  %v14473_v50 = vld [vmem:[#allocation7 + $0x52c] ss:$12 sps:$4 sm:$0xff]  }
 0x674   :  { %4593 = vmatprep.mubr.bf16.mxu0 %v15880_v28  ;;  %5746 = vmatpush1.bf16.msra.mxu0 %v14428_v23 }
 0x675   :  { %5747 = vmatprep.subr.bf16.mxu0 %v14433_v25 }
 0x678   :  { %5748 = vmatpush1.bf16.msra.mxu0 %v14431_v35 }
 0x679   :  { %5749 = vmatprep.subr.bf16.mxu0 %v14436_v36 }
 0x67b   :  { %12681 = vmatmul.mubr.msk.bf16.gmra.mrb[112].mxu0 %vm4387_vm15, %v14421_v48  ;;  %vm8137_vm15 = vcmask 1045504  }
 0x67c   :  { %5750 = vmatpush1.bf16.msra.mxu0 %v14434_v41 }
 0x67d   :  { %5751 = vmatprep.subr.bf16.mxu0 %v14439_v59 }
 0x680   :  { %5752 = vmatpush1.bf16.msra.mxu0 %v14437_v2 }
 0x681   :  { %5753 = vmatprep.subr.bf16.mxu0 %v14442_v45 }
 0x684   :  { %5754 = vmatpush1.bf16.msra.mxu0 %v14440_v55 }
 0x685   :  { %5755 = vmatprep.subr.bf16.mxu0 %v14445_v18 }
 0x688   :  { %5756 = vmatpush1.bf16.msra.mxu0 %v14443_v49 }
 0x689   :  { %5757 = vmatprep.subr.bf16.mxu0 %v14448_v37 }
 0x68c   :  { %5758 = vmatpush1.bf16.msra.mxu0 %v14446_v32 }
 0x68d   :  { %5759 = vmatprep.subr.bf16.mxu0 %v14453_v46 }
 0x690   :  { %5760 = vmatpush1.bf16.msra.mxu0 %v14451_v61 }
 0x691   :  { %5761 = vmatprep.subr.bf16.mxu0 %v14458_v34 }
 0x694   :  { %5762 = vmatpush1.bf16.msra.mxu0 %v14456_v4 }
 0x695   :  { %5763 = vmatprep.subr.bf16.mxu0 %v14463_v6 }
 0x698   :  { %5764 = vmatpush1.bf16.msra.mxu0 %v14461_v15  ;;  %v14490_v15 = vld [vmem:[#allocation7 + $0x578] ss:$12 sps:$4 sm:$0xff]  }
 0x699   :  { %5765 = vmatprep.subr.bf16.mxu0 %v14468_v21 }
 0x69c   :  { %5766 = vmatpush1.bf16.msra.mxu0 %v14466_v39 }
 0x69d   :  { %5767 = vmatprep.subr.bf16.mxu0 %v14473_v50  ;;  %v14493_v50 = vld [vmem:[#allocation7 + $0x58c] ss:$12 sps:$4 sm:$0xff]  }
 0x6a0   :  { %5768 = vmatpush1.bf16.msra.mxu0 %v14471_v17 }
 0x6a1   :  { %5769 = vmatprep.subr.bf16.mxu0 %v14478_v19 }
 0x6a4   :  { %5770 = vmatpush1.bf16.msra.mxu0 %v14476_v43  ;;  %v14498_v43 = vld [vmem:[#allocation7 + $0x5a4] ss:$12 sps:$4 sm:$0xff]  }
 0x6a5   :  { %5771 = vmatprep.subr.bf16.mxu0 %v14483_v57  ;;  %v14499_v57 = vld [vmem:[#allocation7 + $0x668] ss:$12 sps:$4 sm:$0xff]  }
 0x6a8   :  { %5772 = vmatpush1.bf16.msra.mxu0 %v14481_v38 }
 0x6a9   :  { %5784 = vmatprep.subr.bf16.mxu0 %v14488_v47 }
 0x70e   :  { %v4453_v62 = vpop.f32.mrb[80].mxu0 }
 0x70f   :  { %v4455_v63 = vpop.f32.mrb[81].mxu0 }
 0x710   :  { %v4457_v48 = vpop.f32.mrb[82].mxu0 }
 0x711   :  { %v17557_v53 = vpack.c.bf16 %v4457_v48, %v4453_v62  ;;  %v4459_v3 = vpop.f32.mrb[83].mxu0  ;;  %v14496_v62 = vld [vmem:[#allocation7 + $0x5a0] ss:$12 sps:$4 sm:$0xff]  }
 0x712   :  { %v17559_v9 = vpack.c.bf16 %v4459_v3, %v4455_v63  ;;  %v14500_v63 = vld [vmem:[#allocation7 + $0x5a8] ss:$12 sps:$4 sm:$0xff]  }
 0x713   :  { %v4959_v11 = vshrl.u32 %v17557_v53, 16  ;;  %v4962_v13 = vshll.u32 %v17557_v53, 16 }
 0x714   :  { %v4976_v29 = vshrl.u32 %v17559_v9, 16  ;;  %v4979_v0 = vshll.u32 %v17559_v9, 16 }
 0x715   :  { %v4961_v41 = vrot.slane %v4959_v11, 5  ;;  %v4964_v59 = vrot.slane %v4962_v13, 6  ;;  %v14508_v11 = vld [vmem:[#allocation7 + $0x5d4] ss:$12 sps:$4 sm:$0xff]   ;;  %v14509_v13 = vld [vmem:[#allocation7 + $0x698] ss:$12 sps:$4 sm:$0xff]  }
 0x716   :  { %v4463_v33 = vpop.f32.mrb[84].mxu0  ;;  %v4978_v35 = vrot.slane %v4976_v29, 5  ;;  %v4981_v36 = vrot.slane %v4979_v0, 6  ;;  %v14501_v0 = vld [vmem:[#allocation7 + $0x5b8] ss:$12 sps:$4 sm:$0xff]  }
 0x717   :  { %v4465_v60 = vpop.f32.mrb[85].mxu0  ;;  %v4965_v14 = vor.u32 %v4964_v59, %v4961_v41  ;;  %v14513_v41 = vld [vmem:[#allocation7 + $0x5ec] ss:$12 sps:$4 sm:$0xff]   ;;  %v14514_v59 = vld [vmem:[#allocation7 + $0x6b0] ss:$12 sps:$4 sm:$0xff]  }
 0x718   :  { %v4467_v10 = vpop.f32.mrb[86].mxu0  ;;  %v4982_v34 = vor.u32 %v4981_v36, %v4978_v35 }
 0x719   :  { %v4608_v51 = vpack.c.bf16 %v4467_v10, %v4463_v33  ;;  %v4469_v1 = vpop.f32.mrb[87].mxu0  ;;  %v14503_v33 = vld [vmem:[#allocation7 + $0x5bc] ss:$12 sps:$4 sm:$0xff]   ;;  %v14505_v10 = vld [vmem:[#allocation7 + $0x5c0] ss:$12 sps:$4 sm:$0xff]  }
 0x71a   :  { %v4609_v5 = vpack.c.bf16 %v4469_v1, %v4465_v60  ;;  %v14504_v60 = vld [vmem:[#allocation7 + $0x680] ss:$12 sps:$4 sm:$0xff]  }
 0x71b   :  { %v4967_v40 = vshrl.u32 %v4608_v51, 16  ;;  %v4970_v8 = vshll.u32 %v4608_v51, 16  ;;  %v7101_v6 = vrot.slane %v4608_v51, 3 }
 0x71c   :  { %v4984_v23 = vshrl.u32 %v4609_v5, 16  ;;  %v4987_v25 = vshll.u32 %v4609_v5, 16  ;;  %v7104_v22 = vrot.slane %v4609_v5, 3 }
 0x71d   :  { %v4969_v2 = vrot.slane %v4967_v40, 5  ;;  %v4972_v45 = vrot.slane %v4970_v8, 6 }
 0x71e   :  { %v4986_v55 = vrot.slane %v4984_v23, 5  ;;  %v4989_v18 = vrot.slane %v4987_v25, 6  ;;  %v4473_v49 = vpop.f32.mrb[88].mxu0  ;;  %v14506_v23 = vld [vmem:[#allocation7 + $0x5d0] ss:$12 sps:$4 sm:$0xff]  }
 0x71f   :  { %v4973_v37 = vor.u32 %v4972_v45, %v4969_v2  ;;  %v4614_v32 = vpack.c.bf16 %v4473_v49, %v4473_v49  ;;  %v4475_v46 = vpop.f32.mrb[89].mxu0  ;;  %v14510_v25 = vld [vmem:[#allocation7 + $0x5d8] ss:$12 sps:$4 sm:$0xff]  }
 0x720   :  { %v4615_v61 = vpack.c.bf16 %v4475_v46, %v4475_v46  ;;  %v4990_v7 = vor.u32 %v4989_v18, %v4986_v55  ;;  %v4477_v4 = vpop.f32.mrb[90].mxu0  ;;  %v14511_v18 = vld [vmem:[#allocation7 + $0x5e8] ss:$12 sps:$4 sm:$0xff]   ;;  %v14515_v46 = vld [vmem:[#allocation7 + $0x5f0] ss:$12 sps:$4 sm:$0xff]  }
 0x721   :  { %v7102_v54 = vrot.slane %v4614_v32, 3  ;;  %v4478_v21 = vpop.f32.mrb[91].mxu0  ;;  %v4974_v56 = vsel %vm4957_vm10, %v4965_v14, %v4973_v37 }
 0x722   :  { %v7105_v16 = vrot.slane %v4615_v61, 3  ;;  %v4991_v39 = vsel %vm4957_vm10, %v4982_v34, %v4990_v7 }
 0x723   :  { %5773 = vmatprep.mubr.bf16.mxu0 %v4991_v39  ;;  %5902 = vmatprep.mubr.bf16.mxu1 %v4991_v39  ;;  %v17568_v17 = vsel %vm255_vm1, %v7101_v6, %v7102_v54  ;;  %v14519_v54 = vld [vmem:[#allocation7 + $0x6c8] ss:$12 sps:$4 sm:$0xff]  }
 0x724   :  { %5774 = vmatmul.mubr.bf16.vlgmr.msra.gmra.mrb[116].mxu0 %v4974_v56  ;;  %5903 = vmatmul.mubr.bf16.vlgmr.msra.gmra.mrb[108].mxu1 %v4974_v56  ;;  %v17571_v19 = vsel %vm255_vm1, %v7104_v22, %v7105_v16  ;;  %v14516_v22 = vld [vmem:[#allocation7 + $0x600] ss:$12 sps:$4 sm:$0xff]   ;;  %v14520_v56 = vld [vmem:[#allocation7 + $0x608] ss:$12 sps:$4 sm:$0xff]  }
 0x725   :  { %5785 = vmatpush1.bf16.msra.mxu0 %v14486_v52  ;;  %13699 = vmatpush3.bf16.msra.mxu1 %v14490_v15  ;;  %v14518_v52 = vld [vmem:[#allocation7 + $0x604] ss:$12 sps:$4 sm:$0xff]  }
 0x726   :  { %5786 = vmatprep.subr.bf16.mxu0 %v14493_v50  ;;  %13700 = vmatprep.subr.bf16.mxu1 %v14494_v12  ;;  %v4514_v44 = vpop.f32.mrb[92].mxu0 }
 0x727   :  { %v4516_v38 = vpop.f32.mrb[93].mxu0 }
 0x728   :  { %v4518_v47 = vpop.f32.mrb[94].mxu0 }
 0x729   :  { %5787 = vmatpush1.bf16.msra.mxu0 %v14491_v20  ;;  %13701 = vmatpush3.bf16.msra.mxu1 %v14495_v27  ;;  %v17573_v48 = vpack.c.bf16 %v4518_v47, %v4514_v44  ;;  %v4520_v3 = vpop.f32.mrb[95].mxu0 }
 0x72a   :  { %5788 = vmatprep.subr.bf16.mxu0 %v14498_v43  ;;  %13702 = vmatprep.subr.bf16.mxu1 %v14499_v57  ;;  %v17575_v29 = vpack.c.bf16 %v4520_v3, %v4516_v38  ;;  %v14524_v3 = vld [vmem:[#allocation7 + $0x6e0] ss:$12 sps:$4 sm:$0xff]  }
 0x72b   :  { %v4993_v49 = vshrl.u32 %v17573_v48, 16  ;;  %v4996_v61 = vshll.u32 %v17573_v48, 16 }
 0x72c   :  { %v5010_v51 = vshrl.u32 %v17575_v29, 16  ;;  %v5013_v1 = vshll.u32 %v17575_v29, 16 }
 0x72d   :  { %5789 = vmatpush1.bf16.msra.mxu0 %v14496_v62  ;;  %13703 = vmatpush3.bf16.msra.mxu1 %v14500_v63  ;;  %v4995_v50 = vrot.slane %v4993_v49, 5  ;;  %v4998_v57 = vrot.slane %v4996_v61, 6  ;;  %v14523_v63 = vld [vmem:[#allocation7 + $0x61c] ss:$12 sps:$4 sm:$0xff]  }
 0x72e   :  { %5790 = vmatprep.subr.bf16.mxu0 %v14503_v33  ;;  %13704 = vmatprep.subr.bf16.mxu1 %v14504_v60  ;;  %v4524_v5 = vpop.f32.mrb[96].mxu0  ;;  %v5012_v45 = vrot.slane %v5010_v51, 5  ;;  %v5015_v55 = vrot.slane %v5013_v1, 6  ;;  %v14525_v51 = vld [vmem:[#allocation7 + $0x620] ss:$12 sps:$4 sm:$0xff]  }
 0x72f   :  { %v4526_v40 = vpop.f32.mrb[97].mxu0  ;;  %v4999_v1 = vor.u32 %v4998_v57, %v4995_v50  ;;  %v14541_v57 = vld [vmem:[#allocation7 + $0x740] ss:$12 sps:$4 sm:$0xff]  }
 0x730   :  { %v4528_v8 = vpop.f32.mrb[98].mxu0  ;;  %v5016_v14 = vor.u32 %v5015_v55, %v5012_v45  ;;  %v14530_v55 = vld [vmem:[#allocation7 + $0x648] ss:$12 sps:$4 sm:$0xff]  }
 0x731   :  { %5791 = vmatpush1.bf16.msra.mxu0 %v14501_v0  ;;  %13705 = vmatpush3.bf16.msra.mxu1 %v14505_v10  ;;  %v4610_v35 = vpack.c.bf16 %v4528_v8, %v4524_v5  ;;  %v4530_v36 = vpop.f32.mrb[99].mxu0  ;;  %v14528_v5 = vld [vmem:[#allocation7 + $0x634] ss:$12 sps:$4 sm:$0xff]  }
 0x732   :  { %5792 = vmatprep.subr.bf16.mxu0 %v14508_v11  ;;  %13706 = vmatprep.subr.bf16.mxu1 %v14509_v13  ;;  %v4611_v2 = vpack.c.bf16 %v4530_v36, %v4526_v40  ;;  %v14521_v13 = vld [vmem:[#allocation7 + $0x618] ss:$12 sps:$4 sm:$0xff]  }
 0x733   :  { %v5001_v34 = vshrl.u32 %v4610_v35, 16  ;;  %v5004_v7 = vshll.u32 %v4610_v35, 16  ;;  %v7107_v21 = vrot.slane %v4610_v35, 3  ;;  %v14529_v36 = vld [vmem:[#allocation7 + $0x6f8] ss:$12 sps:$4 sm:$0xff]  }
 0x734   :  { %v5018_v37 = vshrl.u32 %v4611_v2, 16  ;;  %v5021_v32 = vshll.u32 %v4611_v2, 16  ;;  %v7110_v12 = vrot.slane %v4611_v2, 3  ;;  %v14532_v2 = vld [vmem:[#allocation7 + $0x64c] ss:$12 sps:$4 sm:$0xff]  }
 0x735   :  { %5793 = vmatpush1.bf16.msra.mxu0 %v14506_v23  ;;  %13707 = vmatpush3.bf16.msra.mxu1 %v14510_v25  ;;  %v5003_v44 = vrot.slane %v5001_v34, 5  ;;  %v5006_v38 = vrot.slane %v5004_v7, 6  ;;  %v14526_v25 = vld [vmem:[#allocation7 + $0x630] ss:$12 sps:$4 sm:$0xff]  }
 0x736   :  { %5794 = vmatprep.subr.bf16.mxu0 %v14513_v41  ;;  %13708 = vmatprep.subr.bf16.mxu1 %v14514_v59  ;;  %v5020_v4 = vrot.slane %v5018_v37, 5  ;;  %v5023_v6 = vrot.slane %v5021_v32, 6  ;;  %v4534_v15 = vpop.f32.mrb[100].mxu0  ;;  %v14536_v32 = vld [vmem:[#allocation7 + $0x664] ss:$12 sps:$4 sm:$0xff]  }
 0x737   :  { %v4616_v16 = vpack.c.bf16 %v4534_v15, %v4534_v15  ;;  %v4536_v39 = vpop.f32.mrb[101].mxu0  ;;  %v5007_v11 = vor.u32 %v5006_v38, %v5003_v44 }
 0x738   :  { %v5024_v20 = vor.u32 %v5023_v6, %v5020_v4  ;;  %v4617_v27 = vpack.c.bf16 %v4536_v39, %v4536_v39  ;;  %v4538_v43 = vpop.f32.mrb[102].mxu0  ;;  %v14537_v6 = vld [vmem:[#allocation7 + $0x728] ss:$12 sps:$4 sm:$0xff]  }
 0x739   :  { %5795 = vmatpush1.bf16.msra.mxu0 %v14511_v18  ;;  %13709 = vmatpush3.bf16.msra.mxu1 %v14515_v46  ;;  %v7108_v47 = vrot.slane %v4616_v16, 3  ;;  %v4539_v62 = vpop.f32.mrb[103].mxu0  ;;  %v17589_v35 = vsel %vm4957_vm10, %v4999_v1, %v5007_v11  ;;  %v14533_v18 = vld [vmem:[#allocation7 + $0x710] ss:$12 sps:$4 sm:$0xff]   ;;  %v14538_v43 = vld [vmem:[#allocation7 + $0x678] ss:$12 sps:$4 sm:$0xff]  }
 0x73a   :  { %5796 = vmatprep.subr.bf16.mxu0 %v14518_v52  ;;  %13710 = vmatprep.subr.bf16.mxu1 %v14519_v54  ;;  %v5025_v33 = vsel %vm4957_vm10, %v5016_v14, %v5024_v20  ;;  %v7111_v60 = vrot.slane %v4617_v27, 3  ;;  %v14534_v52 = vld [vmem:[#allocation7 + $0x660] ss:$12 sps:$4 sm:$0xff]  }
 0x73b   :  { %5943 = vmatprep.mubr.bf16.mxu1 %v5025_v33  ;;  %5816 = vmatprep.mubr.bf16.mxu0 %v5025_v33  ;;  %v17583_v0 = vsel %vm255_vm1, %v7107_v21, %v7108_v47  ;;  %v14544_v62 = vld [vmem:[#allocation7 + $0x694] ss:$12 sps:$4 sm:$0xff]  }
 0x73c   :  { %v17586_v10 = vsel %vm255_vm1, %v7110_v12, %v7111_v60 }
 0x73d   :  { %5797 = vmatpush1.bf16.msra.mxu0 %v14516_v22  ;;  %13711 = vmatpush3.bf16.msra.mxu1 %v14520_v56  ;;  %v14540_v22 = vld [vmem:[#allocation7 + $0x67c] ss:$12 sps:$4 sm:$0xff]  }
 0x73e   :  { %5798 = vmatprep.subr.bf16.mxu0 %v14523_v63  ;;  %13712 = vmatprep.subr.bf16.mxu1 %v14524_v3  ;;  %v4575_v40 = vpop.f32.mrb[104].mxu0 }
 0x73f   :  { %v4577_v8 = vpop.f32.mrb[105].mxu0 }
 0x740   :  { %v4579_v23 = vpop.f32.mrb[106].mxu0 }
 0x741   :  { %5799 = vmatpush1.bf16.msra.mxu0 %v14521_v13  ;;  %13713 = vmatpush3.bf16.msra.mxu1 %v14525_v51  ;;  %v17591_v41 = vpack.c.bf16 %v4579_v23, %v4575_v40  ;;  %v4581_v59 = vpop.f32.mrb[107].mxu0 }
 0x742   :  { %5800 = vmatprep.subr.bf16.mxu0 %v14528_v5  ;;  %5952 = vmatprep.subr.bf16.mxu1 %v15880_v28  ;;  %v17594_v45 = vpack.c.bf16 %v4581_v59, %v4577_v8 }
 0x743   :  { %v5027_v49 = vshrl.u32 %v17591_v41, 16  ;;  %v5030_v37 = vshll.u32 %v17591_v41, 16 }
 0x744   :  { %5944 = vmatmul.mubr.bf16.vlgmr.msra.gmra.mrb[112].mxu1 %v17589_v35  ;;  %v5044_v46 = vshrl.u32 %v17594_v45, 16  ;;  %v5047_v61 = vshll.u32 %v17594_v45, 16 }
 0x745   :  { %5801 = vmatpush1.bf16.msra.mxu0 %v14526_v25  ;;  %5953 = vmatpush1.bf16.msra.mxu1 %v14529_v36  ;;  %v5029_v54 = vrot.slane %v5027_v49, 5  ;;  %v5032_v14 = vrot.slane %v5030_v37, 6  ;;  %v14542_v25 = vld [vmem:[#allocation7 + $0x690] ss:$12 sps:$4 sm:$0xff]   ;;  %v14545_v36 = vld [vmem:[#allocation7 + $0x758] ss:$12 sps:$4 sm:$0xff]  }
 0x746   :  { %5802 = vmatprep.subr.bf16.mxu0 %v14532_v2  ;;  %5954 = vmatprep.subr.bf16.mxu1 %v15880_v28  ;;  %v4585_v34 = vpop.f32.mrb[108].mxu0  ;;  %v5046_v16 = vrot.slane %v5044_v46, 5  ;;  %v5049_v39 = vrot.slane %v5047_v61, 6  ;;  %v14546_v61 = vld [vmem:[#allocation7 + $0x6a8] ss:$12 sps:$4 sm:$0xff]  }
 0x747   :  { %v4587_v7 = vpop.f32.mrb[109].mxu0  ;;  %v5033_v47 = vor.u32 %v5032_v14, %v5029_v54  ;;  %v14554_v54 = vld [vmem:[#allocation7 + $0x6d8] ss:$12 sps:$4 sm:$0xff]   ;;  %v14557_v14 = vld [vmem:[#allocation7 + $0x7a0] ss:$12 sps:$4 sm:$0xff]  }
 0x748   :  { %v4589_v4 = vpop.f32.mrb[110].mxu0  ;;  %v5050_v33 = vor.u32 %v5049_v39, %v5046_v16  ;;  %v14564_v16 = vld [vmem:[#allocation7 + $0x70c] ss:$12 sps:$4 sm:$0xff]   ;;  %v14562_v39 = vld [vmem:[#allocation7 + $0x708] ss:$12 sps:$4 sm:$0xff]  }
 0x749   :  { %5803 = vmatpush1.bf16.msra.mxu0 %v14530_v55  ;;  %5955 = vmatpush1.bf16.msra.mxu1 %v14533_v18  ;;  %v4612_v15 = vpack.c.bf16 %v4589_v4, %v4585_v34  ;;  %v4591_v21 = vpop.f32.mrb[111].mxu0  ;;  %v14548_v18 = vld [vmem:[#allocation7 + $0x6ac] ss:$12 sps:$4 sm:$0xff]   ;;  %v14549_v34 = vld [vmem:[#allocation7 + $0x770] ss:$12 sps:$4 sm:$0xff]  }
 0x74a   :  { %5804 = vmatprep.subr.bf16.mxu0 %v14536_v32  ;;  %5956 = vmatprep.subr.bf16.mxu1 %v15880_v28  ;;  %v4613_v50 = vpack.c.bf16 %v4591_v21, %v4587_v7  ;;  %v14552_v7 = vld [vmem:[#allocation7 + $0x6c4] ss:$12 sps:$4 sm:$0xff]   ;;  %v14553_v4 = vld [vmem:[#allocation7 + $0x788] ss:$12 sps:$4 sm:$0xff]  }
 0x74b   :  { %v5035_v12 = vshrl.u32 %v4612_v15, 16  ;;  %v5038_v56 = vshll.u32 %v4612_v15, 16  ;;  %v7113_v13 = vrot.slane %v4612_v15, 3  ;;  %v14560_v15 = vld [vmem:[#allocation7 + $0x6f4] ss:$12 sps:$4 sm:$0xff]  }
 0x74c   :  { %v5052_v20 = vshrl.u32 %v4613_v50, 16  ;;  %v5055_v27 = vshll.u32 %v4613_v50, 16  ;;  %v7116_v40 = vrot.slane %v4613_v50, 3  ;;  %v14558_v21 = vld [vmem:[#allocation7 + $0x6f0] ss:$12 sps:$4 sm:$0xff]  }
 0x74d   :  { %5805 = vmatpush1.bf16.msra.mxu0 %v14534_v52  ;;  %5957 = vmatpush1.bf16.msra.mxu1 %v14537_v6  ;;  %v5037_v44 = vrot.slane %v5035_v12, 5  ;;  %v5040_v38 = vrot.slane %v5038_v56, 6  ;;  %v14550_v52 = vld [vmem:[#allocation7 + $0x6c0] ss:$12 sps:$4 sm:$0xff]   ;;  %v14556_v6 = vld [vmem:[#allocation7 + $0x6dc] ss:$12 sps:$4 sm:$0xff]  }
 0x74e   :  { %5806 = vmatprep.subr.bf16.mxu0 %v14540_v22  ;;  %5958 = vmatprep.subr.bf16.mxu1 %v15880_v28  ;;  %v5054_v63 = vrot.slane %v5052_v20, 5  ;;  %v5057_v3 = vrot.slane %v5055_v27, 6  ;;  %v4595_v60 = vpop.f32.mrb[112].mxu0  ;;  %v14561_v22 = vld [vmem:[#allocation7 + $0x7b8] ss:$12 sps:$4 sm:$0xff]  }
 0x74f   :  { %v5041_v11 = vor.u32 %v5040_v38, %v5037_v44  ;;  %v4618_v51 = vpack.c.bf16 %v4595_v60, %v4595_v60  ;;  %v4597_v1 = vpop.f32.mrb[113].mxu0  ;;  %v14565_v50 = vld [vmem:[#allocation7 + $0x7d0] ss:$12 sps:$4 sm:$0xff]   ;;  %v14569_v56 = vld [vmem:[#allocation7 + $0xc8] ss:$12 sps:$4 sm:$0xff]  }
 0x750   :  { %v5058_v5 = vor.u32 %v5057_v3, %v5054_v63  ;;  %v4619_v8 = vpack.c.bf16 %v4597_v1, %v4597_v1  ;;  %v4599_v23 = vpop.f32.mrb[114].mxu0  ;;  %v14568_v12 = vld [vmem:[#allocation7 + $0x724] ss:$12 sps:$4 sm:$0xff]   ;;  %v14566_v20 = vld [vmem:[#allocation7 + $0x720] ss:$12 sps:$4 sm:$0xff]  }
 0x751   :  { %5807 = vmatpush1.bf16.msra.mxu0 %v14538_v43  ;;  %5959 = vmatpush1.bf16.msra.mxu1 %v14541_v57  ;;  %v17605_v59 = vsel %vm4957_vm10, %v5033_v47, %v5041_v11  ;;  %v7114_v2 = vrot.slane %v4618_v51, 3  ;;  %v4600_v55 = vpop.f32.mrb[115].mxu0  ;;  %v14570_v27 = vld [vmem:[#allocation7 + $0x8] ss:$12 sps:$4 sm:$0xff]   ;;  %v14574_v57 = vld [vmem:[#allocation7 + $0xe0] ss:$12 sps:$4 sm:$0xff]  }
 0x752   :  { %5808 = vmatprep.subr.bf16.mxu0 %v14544_v62  ;;  %5960 = vmatprep.subr.bf16.mxu1 %v15880_v28  ;;  %v5059_v49 = vsel %vm4957_vm10, %v5050_v33, %v5058_v5  ;;  %v7117_v37 = vrot.slane %v4619_v8, 3  ;;  %v14573_v43 = vld [vmem:[#allocation7 + $0x73c] ss:$12 sps:$4 sm:$0xff]   ;;  %v14575_v44 = vld [vmem:[#allocation7 + $0x20] ss:$12 sps:$4 sm:$0xff]  }
 0x753   :  { %12809 = vmatprep.mubr.msk.bf16.mxu1 %vm5737_vm11, %v5059_v49  ;;  %v17611_v32 = vsel %vm255_vm1, %v7113_v13, %v7114_v2  ;;  %v14578_v38 = vld [vmem:[#allocation7 + $0x754] ss:$12 sps:$4 sm:$0xff]   ;;  %v14579_v47 = vld [vmem:[#allocation7 + $0xf8] ss:$12 sps:$4 sm:$0xff]   ;;  %v14576_v62 = vld [vmem:[#allocation7 + $0x750] ss:$12 sps:$4 sm:$0xff]  }
 0x754   :  { %v17614_v46 = vsel %vm255_vm1, %v7116_v40, %v7117_v37  ;;  %v14580_v63 = vld [vmem:[#allocation7 + $0x38] ss:$12 sps:$4 sm:$0xff]   ;;  %v14584_v33 = vld [vmem:[#allocation7 + $0x110] ss:$12 sps:$4 sm:$0xff]   ;;  %v14581_v60 = vld [vmem:[#allocation7 + $0x768] ss:$12 sps:$4 sm:$0xff]  }
 0x755   :  { %5809 = vmatpush1.bf16.msra.mxu0 %v14542_v25  ;;  %5961 = vmatpush1.bf16.msra.mxu1 %v14545_v36  ;;  %v14583_v3 = vld [vmem:[#allocation7 + $0x76c] ss:$12 sps:$4 sm:$0xff]   ;;  %v14585_v11 = vld [vmem:[#allocation7 + $0x50] ss:$12 sps:$4 sm:$0xff]   ;;  %v14589_v51 = vld [vmem:[#allocation7 + $0x128] ss:$12 sps:$4 sm:$0xff]  }
 0x756   :  { %5810 = vmatprep.subr.bf16.mxu0 %v14548_v18  ;;  %5962 = vmatprep.subr.bf16.mxu1 %v15880_v28  ;;  %v14588_v13 = vld [vmem:[#allocation7 + $0x784] ss:$12 sps:$4 sm:$0xff]   ;;  %v14586_v1 = vld [vmem:[#allocation7 + $0x780] ss:$12 sps:$4 sm:$0xff]   ;;  %v14590_v5 = vld [vmem:[#allocation7 + $0x68] ss:$12 sps:$4 sm:$0xff]  }
 0x757   :  { %v14593_v40 = vld [vmem:[#allocation7 + $0x79c] ss:$12 sps:$4 sm:$0xff]   ;;  %v14594_v8 = vld [vmem:[#allocation7 + $0x140] ss:$12 sps:$4 sm:$0xff]   ;;  %v14591_v23 = vld [vmem:[#allocation7 + $0x798] ss:$12 sps:$4 sm:$0xff]  }
 0x758   :  { %v14595_v25 = vld [vmem:[#allocation7 + $0x80] ss:$12 sps:$4 sm:$0xff]   ;;  %v14599_v2 = vld [vmem:[#allocation7 + $0x158] ss:$12 sps:$4 sm:$0xff]   ;;  %v14596_v55 = vld [vmem:[#allocation7 + $0x7b0] ss:$12 sps:$4 sm:$0xff]  }
 0x759   :  { %5811 = vmatpush1.bf16.msra.mxu0 %v14546_v61  ;;  %5963 = vmatpush1.bf16.msra.mxu1 %v14549_v34  ;;  %v14598_v36 = vld [vmem:[#allocation7 + $0x7b4] ss:$12 sps:$4 sm:$0xff]   ;;  %v14600_v18 = vld [vmem:[#allocation7 + $0x98] ss:$12 sps:$4 sm:$0xff]   ;;  %v14604_v37 = vld [vmem:[#allocation7 + $0x170] ss:$12 sps:$4 sm:$0xff]  }
 0x75a   :  { %5812 = vmatprep.subr.bf16.mxu0 %v14552_v7  ;;  %5964 = vmatprep.subr.bf16.mxu1 %v15880_v28  ;;  %v14601_v61 = vld [vmem:[#allocation7 + $0x7c8] ss:$12 sps:$4 sm:$0xff]   ;;  %v14605_v34 = vld [vmem:[#allocation7 + $0xb0] ss:$12 sps:$4 sm:$0xff]  }
 0x75b   :  { %v14608_v7 = vld [vmem:[#allocation7 + $0x4] ss:$12 sps:$4 sm:$0xff]  }
 0x75d   :  { %5813 = vmatpush1.bf16.msra.mxu0 %v14550_v52  ;;  %5965 = vmatpush1.bf16.msra.mxu1 %v14553_v4  ;;  %v14609_v52 = vld [vmem:[#allocation7 + $0x248] ss:$12 sps:$4 sm:$0xff]   ;;  %v14606_v4 = vld [vmem:[#allocation7] ss:$12 sps:$4 sm:$0xff]  }
 0x75e   :  { %5814 = vmatprep.subr.bf16.mxu0 %v14556_v6  ;;  %5966 = vmatprep.subr.bf16.mxu1 %v15880_v28  ;;  %v14610_v6 = vld [vmem:[#allocation7 + $0x188] ss:$12 sps:$4 sm:$0xff]  }
 0x761   :  { %5815 = vmatpush1.bf16.msra.mxu0 %v14554_v54  ;;  %5967 = vmatpush1.bf16.msra.mxu1 %v14557_v14  ;;  %v14613_v54 = vld [vmem:[#allocation7 + $0x1c] ss:$12 sps:$4 sm:$0xff]   ;;  %v14614_v14 = vld [vmem:[#allocation7 + $0x260] ss:$12 sps:$4 sm:$0xff]  }
 0x762   :  { %5827 = vmatprep.subr.bf16.mxu0 %v14560_v15  ;;  %5968 = vmatprep.subr.bf16.mxu1 %v15880_v28  ;;  %v14611_v15 = vld [vmem:[#allocation7 + $0x18] ss:$12 sps:$4 sm:$0xff]  }
 0x764   :  { %5817 = vmatmul.mubr.bf16.vlgmr.msra.gmra.mrb[116].mxu0 %v17589_v35  ;;  %v14571_v35 = vld [vmem:[#allocation7 + $0x738] ss:$12 sps:$4 sm:$0xff]  }
 0x765   :  { %5828 = vmatpush1.bf16.msra.mxu0 %v14558_v21  ;;  %5969 = vmatpush1.bf16.msra.mxu1 %v14561_v22  ;;  %v14615_v21 = vld [vmem:[#allocation7 + $0x1a0] ss:$12 sps:$4 sm:$0xff]  }
 0x766   :  { %5829 = vmatprep.subr.bf16.mxu0 %v14564_v16  ;;  %5970 = vmatprep.subr.bf16.mxu1 %v15880_v28  ;;  %v14618_v22 = vld [vmem:[#allocation7 + $0x34] ss:$12 sps:$4 sm:$0xff]   ;;  %v14619_v16 = vld [vmem:[#allocation7 + $0x278] ss:$12 sps:$4 sm:$0xff]  }
 0x767   :  { %12808 = vmatprep.mubr.msk.bf16.mxu0 %vm5737_vm11, %v5059_v49  ;;  %v14603_v49 = vld [vmem:[#allocation7 + $0x7cc] ss:$12 sps:$4 sm:$0xff]  }
 0x769   :  { %5830 = vmatpush1.bf16.msra.mxu0 %v14562_v39  ;;  %5971 = vmatpush1.bf16.msra.mxu1 %v14565_v50  ;;  %v14616_v39 = vld [vmem:[#allocation7 + $0x30] ss:$12 sps:$4 sm:$0xff]   ;;  %v14620_v50 = vld [vmem:[#allocation7 + $0x1b8] ss:$12 sps:$4 sm:$0xff]  }
 0x76a   :  { %5831 = vmatprep.subr.bf16.mxu0 %v14568_v12  ;;  %13720 = vmatprep.subr.bf16.mxu1 %v14569_v56  ;;  %v14624_v12 = vld [vmem:[#allocation7 + $0x290] ss:$12 sps:$4 sm:$0xff]   ;;  %v14621_v56 = vld [vmem:[#allocation7 + $0x48] ss:$12 sps:$4 sm:$0xff]  }
 0x76c   :  { %5985 = vmatmul.mubr.bf16.vlgmr.msra.gmra.mrb[116].mxu1 %v17605_v59 }
 0x76d   :  { %5832 = vmatpush1.bf16.msra.mxu0 %v14566_v20  ;;  %13721 = vmatpush3.bf16.msra.mxu1 %v14570_v27  ;;  %v14628_v20 = vld [vmem:[#allocation7 + $0x64] ss:$12 sps:$4 sm:$0xff]   ;;  %v14629_v27 = vld [vmem:[#allocation7 + $0x2a8] ss:$12 sps:$4 sm:$0xff]  }
 0x76e   :  { %6828 = vmatprep.mubr.bf16.mxu1 %v17559_v9  ;;  %5833 = vmatprep.subr.bf16.mxu0 %v14573_v43  ;;  %v14626_v43 = vld [vmem:[#allocation7 + $0x60] ss:$12 sps:$4 sm:$0xff]  }
 0x76f   :  { %13722 = vmatprep.subr.bf16.mxu1 %v14574_v57  ;;  %v14630_v57 = vld [vmem:[#allocation7 + $0x1e8] ss:$12 sps:$4 sm:$0xff]  }
 0x771   :  { %5834 = vmatpush1.bf16.msra.mxu0 %v14571_v35  ;;  %13723 = vmatpush3.bf16.msra.mxu1 %v14575_v44  ;;  %v14633_v35 = vld [vmem:[#allocation7 + $0x7c] ss:$12 sps:$4 sm:$0xff]   ;;  %v14634_v44 = vld [vmem:[#allocation7 + $0x2c0] ss:$12 sps:$4 sm:$0xff]  }
 0x772   :  { %5835 = vmatprep.subr.bf16.mxu0 %v14578_v38  ;;  %13724 = vmatprep.subr.bf16.mxu1 %v14579_v47  ;;  %v14631_v38 = vld [vmem:[#allocation7 + $0x78] ss:$12 sps:$4 sm:$0xff]   ;;  %v14635_v47 = vld [vmem:[#allocation7 + $0x200] ss:$12 sps:$4 sm:$0xff]  }
 0x775   :  { %5836 = vmatpush1.bf16.msra.mxu0 %v14576_v62  ;;  %13725 = vmatpush3.bf16.msra.mxu1 %v14580_v63  ;;  %v14638_v62 = vld [vmem:[#allocation7 + $0x94] ss:$12 sps:$4 sm:$0xff]   ;;  %v14639_v63 = vld [vmem:[#allocation7 + $0x2d8] ss:$12 sps:$4 sm:$0xff]  }
 0x776   :  { %5837 = vmatprep.subr.bf16.mxu0 %v14583_v3  ;;  %13726 = vmatprep.subr.bf16.mxu1 %v14584_v33  ;;  %v14636_v3 = vld [vmem:[#allocation7 + $0x90] ss:$12 sps:$4 sm:$0xff]   ;;  %v14640_v33 = vld [vmem:[#allocation7 + $0x218] ss:$12 sps:$4 sm:$0xff]  }
 0x779   :  { %5838 = vmatpush1.bf16.msra.mxu0 %v14581_v60  ;;  %13727 = vmatpush3.bf16.msra.mxu1 %v14585_v11  ;;  %v14643_v60 = vld [vmem:[#allocation7 + $0xac] ss:$12 sps:$4 sm:$0xff]   ;;  %v14644_v11 = vld [vmem:[#allocation7 + $0x2f0] ss:$12 sps:$4 sm:$0xff]  }
 0x77a   :  { %5839 = vmatprep.subr.bf16.mxu0 %v14588_v13  ;;  %13728 = vmatprep.subr.bf16.mxu1 %v14589_v51  ;;  %v14641_v13 = vld [vmem:[#allocation7 + $0xa8] ss:$12 sps:$4 sm:$0xff]   ;;  %v14645_v51 = vld [vmem:[#allocation7 + $0x230] ss:$12 sps:$4 sm:$0xff]  }
 0x77d   :  { %5840 = vmatpush1.bf16.msra.mxu0 %v14586_v1  ;;  %13729 = vmatpush3.bf16.msra.mxu1 %v14590_v5  ;;  %v14648_v1 = vld [vmem:[#allocation7 + $0xc4] ss:$12 sps:$4 sm:$0xff]   ;;  %v14646_v5 = vld [vmem:[#allocation7 + $0xc0] ss:$12 sps:$4 sm:$0xff]  }
 0x77e   :  { %5841 = vmatprep.subr.bf16.mxu0 %v14593_v40  ;;  %13730 = vmatprep.subr.bf16.mxu1 %v14594_v8  ;;  %v14649_v40 = vld [vmem:[#allocation7 + $0x308] ss:$12 sps:$4 sm:$0xff]  }
 0x77f   :  { %v14652_v8 = vld [vmem:[#allocation7 + $0xdc] ss:$12 sps:$4 sm:$0xff]  }
 0x781   :  { %5842 = vmatpush1.bf16.msra.mxu0 %v14591_v23  ;;  %13731 = vmatpush3.bf16.msra.mxu1 %v14595_v25  ;;  %v14650_v23 = vld [vmem:[#allocation7 + $0xd8] ss:$12 sps:$4 sm:$0xff]   ;;  %v14653_v25 = vld [vmem:[#allocation7 + $0x320] ss:$12 sps:$4 sm:$0xff]  }
 0x782   :  { %5843 = vmatprep.subr.bf16.mxu0 %v14598_v36  ;;  %13732 = vmatprep.subr.bf16.mxu1 %v14599_v2  ;;  %v14656_v36 = vld [vmem:[#allocation7 + $0xf4] ss:$12 sps:$4 sm:$0xff]   ;;  %v14654_v2 = vld [vmem:[#allocation7 + $0xf0] ss:$12 sps:$4 sm:$0xff]  }
 0x785   :  { %5844 = vmatpush1.bf16.msra.mxu0 %v14596_v55  ;;  %13733 = vmatpush3.bf16.msra.mxu1 %v14600_v18  ;;  %v14657_v55 = vld [vmem:[#allocation7 + $0x338] ss:$12 sps:$4 sm:$0xff]  }
 0x786   :  { %5845 = vmatprep.subr.bf16.mxu0 %v14603_v49  ;;  %13734 = vmatprep.subr.bf16.mxu1 %v14604_v37  ;;  %v14660_v18 = vld [vmem:[#allocation7 + $0x10c] ss:$12 sps:$4 sm:$0xff]   ;;  %v14658_v49 = vld [vmem:[#allocation7 + $0x108] ss:$12 sps:$4 sm:$0xff]   ;;  %v14661_v37 = vld [vmem:[#allocation7 + $0x350] ss:$12 sps:$4 sm:$0xff]  }
 0x789   :  { %5846 = vmatpush1.bf16.msra.mxu0 %v14601_v61  ;;  %13735 = vmatpush3.bf16.msra.mxu1 %v14605_v34  ;;  %v14664_v61 = vld [vmem:[#allocation7 + $0x124] ss:$12 sps:$4 sm:$0xff]   ;;  %v14662_v34 = vld [vmem:[#allocation7 + $0x120] ss:$12 sps:$4 sm:$0xff]  }
 0x78a   :  { %6667 = vmatprep.subr.bf16.mxu0 %v14608_v7  ;;  %13742 = vmatprep.subr.bf16.mxu1 %v14609_v52  ;;  %v14665_v7 = vld [vmem:[#allocation7 + $0x368] ss:$12 sps:$4 sm:$0xff]  }
 0x78b   :  { %v14668_v52 = vld [vmem:[#allocation7 + $0x13c] ss:$12 sps:$4 sm:$0xff]  }
 0x78c   :  { %5860 = vmatmul.mubr.bf16.vlgmr.msra.gmra.mrb[116].mxu0 %v17605_v59  ;;  %6829 = vmatmul.mubr.bf16.vlgmr.msra.gmra.mrb[120].mxu1 %v17557_v53  ;;  %v14623_v59 = vld [vmem:[#allocation7 + $0x4c] ss:$12 sps:$4 sm:$0xff]  }
 0x78d   :  { %6668 = vmatpush1.bf16.msra.mxu0 %v14606_v4  ;;  %6699 = vmatprep.mubr.bf16.mxu0 %v17559_v9  ;;  %v14625_v9 = vld [vmem:[#allocation7 + $0x1d0] ss:$12 sps:$4 sm:$0xff]   ;;  %v14666_v4 = vld [vmem:[#allocation7 + $0x138] ss:$12 sps:$4 sm:$0xff]  }
 0x78e   :  { %13743 = vmatpush3.bf16.msra.mxu1 %v14610_v6  ;;  %6869 = vmatprep.mubr.bf16.mxu1 %v17575_v29  ;;  %v14669_v6 = vld [vmem:[#allocation7 + $0x380] ss:$12 sps:$4 sm:$0xff]  }
 0x78f   :  { %6669 = vmatprep.subr.bf16.mxu0 %v14613_v54  ;;  %13744 = vmatprep.subr.bf16.mxu1 %v14614_v14  ;;  %v14672_v54 = vld [vmem:[#allocation7 + $0x154] ss:$12 sps:$4 sm:$0xff]   ;;  %v14670_v14 = vld [vmem:[#allocation7 + $0x150] ss:$12 sps:$4 sm:$0xff]  }
 0x791   :  { %6670 = vmatpush1.bf16.msra.mxu0 %v14611_v15  ;;  %v14673_v15 = vld [vmem:[#allocation7 + $0x398] ss:$12 sps:$4 sm:$0xff]  }
 0x792   :  { %13745 = vmatpush3.bf16.msra.mxu1 %v14615_v21  ;;  %6671 = vmatprep.subr.bf16.mxu0 %v14618_v22  ;;  %v14676_v21 = vld [vmem:[#allocation7 + $0x16c] ss:$12 sps:$4 sm:$0xff]   ;;  %v14674_v22 = vld [vmem:[#allocation7 + $0x168] ss:$12 sps:$4 sm:$0xff]  }
 0x793   :  { %13746 = vmatprep.subr.bf16.mxu1 %v14619_v16  ;;  %v14677_v16 = vld [vmem:[#allocation7 + $0x3b0] ss:$12 sps:$4 sm:$0xff]  }
 0x795   :  { %6672 = vmatpush1.bf16.msra.mxu0 %v14616_v39  ;;  %v14680_v39 = vld [vmem:[#allocation7 + $0x184] ss:$12 sps:$4 sm:$0xff]  }
 0x796   :  { %13747 = vmatpush3.bf16.msra.mxu1 %v14620_v50  ;;  %6673 = vmatprep.subr.bf16.mxu0 %v14623_v59  ;;  %v14678_v50 = vld [vmem:[#allocation7 + $0x180] ss:$12 sps:$4 sm:$0xff]   ;;  %v14681_v59 = vld [vmem:[#allocation7 + $0x3c8] ss:$12 sps:$4 sm:$0xff]  }
 0x797   :  { %13748 = vmatprep.subr.bf16.mxu1 %v14624_v12  ;;  %v14684_v12 = vld [vmem:[#allocation7 + $0x19c] ss:$12 sps:$4 sm:$0xff]  }
 0x799   :  { %6674 = vmatpush1.bf16.msra.mxu0 %v14621_v56  ;;  %v14682_v56 = vld [vmem:[#allocation7 + $0x198] ss:$12 sps:$4 sm:$0xff]  }
 0x79a   :  { %13749 = vmatpush3.bf16.msra.mxu1 %v14625_v9  ;;  %6675 = vmatprep.subr.bf16.mxu0 %v14628_v20  ;;  %v14685_v9 = vld [vmem:[#allocation7 + $0x3e0] ss:$12 sps:$4 sm:$0xff]  }
 0x79b   :  { %13750 = vmatprep.subr.bf16.mxu1 %v14629_v27  ;;  %v14688_v20 = vld [vmem:[#allocation7 + $0x1b4] ss:$12 sps:$4 sm:$0xff]  }
 0x79c   :  { %v14689_v27 = vld [vmem:[#allocation7 + $0x8a8] ss:$12 sps:$4 sm:$0xff]  }
 0x79d   :  { %6676 = vmatpush1.bf16.msra.mxu0 %v14626_v43  ;;  %v14686_v43 = vld [vmem:[#allocation7 + $0x1b0] ss:$12 sps:$4 sm:$0xff]  }
 0x79e   :  { %13751 = vmatpush3.bf16.msra.mxu1 %v14630_v57  ;;  %6677 = vmatprep.subr.bf16.mxu0 %v14633_v35  ;;  %v14690_v57 = vld [vmem:[#allocation7 + $0x7e8] ss:$12 sps:$4 sm:$0xff]   ;;  %v14693_v35 = vld [vmem:[#allocation7 + $0x1cc] ss:$12 sps:$4 sm:$0xff]  }
 0x79f   :  { %13752 = vmatprep.subr.bf16.mxu1 %v14634_v44  ;;  %v14694_v44 = vld [vmem:[#allocation7 + $0x8c0] ss:$12 sps:$4 sm:$0xff]  }
 0x7a1   :  { %6678 = vmatpush1.bf16.msra.mxu0 %v14631_v38  ;;  %v14698_v38 = vld [vmem:[#allocation7 + $0x1e4] ss:$12 sps:$4 sm:$0xff]  }
 0x7a2   :  { %13753 = vmatpush3.bf16.msra.mxu1 %v14635_v47  ;;  %6679 = vmatprep.subr.bf16.mxu0 %v14638_v62  ;;  %v14699_v47 = vld [vmem:[#allocation7 + $0x8d8] ss:$12 sps:$4 sm:$0xff]   ;;  %v14696_v62 = vld [vmem:[#allocation7 + $0x1e0] ss:$12 sps:$4 sm:$0xff]  }
 0x7a3   :  { %13754 = vmatprep.subr.bf16.mxu1 %v14639_v63  ;;  %v14700_v63 = vld [vmem:[#allocation7 + $0x818] ss:$12 sps:$4 sm:$0xff]  }
 0x7a5   :  { %6680 = vmatpush1.bf16.msra.mxu0 %v14636_v3  ;;  %v14703_v3 = vld [vmem:[#allocation7 + $0x1fc] ss:$12 sps:$4 sm:$0xff]  }
 0x7a6   :  { %13755 = vmatpush3.bf16.msra.mxu1 %v14640_v33  ;;  %6681 = vmatprep.subr.bf16.mxu0 %v14643_v60  ;;  %v14704_v33 = vld [vmem:[#allocation7 + $0x8f0] ss:$12 sps:$4 sm:$0xff]   ;;  %v14701_v60 = vld [vmem:[#allocation7 + $0x1f8] ss:$12 sps:$4 sm:$0xff]  }
 0x7a7   :  { %13756 = vmatprep.subr.bf16.mxu1 %v14644_v11  ;;  %v14705_v11 = vld [vmem:[#allocation7 + $0x830] ss:$12 sps:$4 sm:$0xff]  }
 0x7a9   :  { %6682 = vmatpush1.bf16.msra.mxu0 %v14641_v13  ;;  %v14708_v13 = vld [vmem:[#allocation7 + $0x214] ss:$12 sps:$4 sm:$0xff]  }
 0x7aa   :  { %13757 = vmatpush3.bf16.msra.mxu1 %v14645_v51  ;;  %6683 = vmatprep.subr.bf16.mxu0 %v14648_v1  ;;  %v14709_v51 = vld [vmem:[#allocation7 + $0x908] ss:$12 sps:$4 sm:$0xff]   ;;  %v14706_v1 = vld [vmem:[#allocation7 + $0x210] ss:$12 sps:$4 sm:$0xff]  }
 0x7ab   :  { %6878 = vmatprep.subr.bf16.mxu1 %v15880_v28 }
 0x7ad   :  { %6870 = vmatmul.mubr.bf16.vlgmr.msra.gmra.mrb[124].mxu1 %v17573_v48  ;;  %6684 = vmatpush1.bf16.msra.mxu0 %v14646_v5  ;;  %v14710_v5 = vld [vmem:[#allocation7 + $0x848] ss:$12 sps:$4 sm:$0xff]  }
 0x7ae   :  { %6879 = vmatpush1.bf16.msra.mxu1 %v14649_v40  ;;  %12937 = vmatprep.mubr.msk.bf16.mxu1 %vm5737_vm11, %v17594_v45  ;;  %v14713_v40 = vld [vmem:[#allocation7 + $0x22c] ss:$12 sps:$4 sm:$0xff]  }
 0x7af   :  { %6685 = vmatprep.subr.bf16.mxu0 %v14652_v8  ;;  %6880 = vmatprep.subr.bf16.mxu1 %v15880_v28  ;;  %v14714_v8 = vld [vmem:[#allocation7 + $0x920] ss:$12 sps:$4 sm:$0xff]  }
 0x7b1   :  { %6686 = vmatpush1.bf16.msra.mxu0 %v14650_v23  ;;  %v14711_v23 = vld [vmem:[#allocation7 + $0x228] ss:$12 sps:$4 sm:$0xff]  }
 0x7b2   :  { %6881 = vmatpush1.bf16.msra.mxu1 %v14653_v25  ;;  %6687 = vmatprep.subr.bf16.mxu0 %v14656_v36  ;;  %v14715_v25 = vld [vmem:[#allocation7 + $0x860] ss:$12 sps:$4 sm:$0xff]   ;;  %v14718_v36 = vld [vmem:[#allocation7 + $0x244] ss:$12 sps:$4 sm:$0xff]  }
 0x7b3   :  { %6882 = vmatprep.subr.bf16.mxu1 %v15880_v28 }
 0x7b5   :  { %6688 = vmatpush1.bf16.msra.mxu0 %v14654_v2  ;;  %v14719_v2 = vld [vmem:[#allocation7 + $0x938] ss:$12 sps:$4 sm:$0xff]  }
 0x7b6   :  { %6883 = vmatpush1.bf16.msra.mxu1 %v14657_v55  ;;  %6689 = vmatprep.subr.bf16.mxu0 %v14660_v18  ;;  %v14716_v55 = vld [vmem:[#allocation7 + $0x240] ss:$12 sps:$4 sm:$0xff]   ;;  %v14720_v18 = vld [vmem:[#allocation7 + $0x878] ss:$12 sps:$4 sm:$0xff]  }
 0x7b7   :  { %6884 = vmatprep.subr.bf16.mxu1 %v15880_v28 }
 0x7b9   :  { %6690 = vmatpush1.bf16.msra.mxu0 %v14658_v49  ;;  %v14723_v49 = vld [vmem:[#allocation7 + $0x25c] ss:$12 sps:$4 sm:$0xff]  }
 0x7ba   :  { %6885 = vmatpush1.bf16.msra.mxu1 %v14661_v37  ;;  %6691 = vmatprep.subr.bf16.mxu0 %v14664_v61  ;;  %v14724_v37 = vld [vmem:[#allocation7 + $0x950] ss:$12 sps:$4 sm:$0xff]   ;;  %v14721_v61 = vld [vmem:[#allocation7 + $0x258] ss:$12 sps:$4 sm:$0xff]  }
 0x7bb   :  { %6886 = vmatprep.subr.bf16.mxu1 %v15880_v28 }
 0x7bd   :  { %6692 = vmatpush1.bf16.msra.mxu0 %v14662_v34  ;;  %v14725_v34 = vld [vmem:[#allocation7 + $0x890] ss:$12 sps:$4 sm:$0xff]  }
 0x7be   :  { %6887 = vmatpush1.bf16.msra.mxu1 %v14665_v7  ;;  %6693 = vmatprep.subr.bf16.mxu0 %v14668_v52  ;;  %v14728_v7 = vld [vmem:[#allocation7 + $0x274] ss:$12 sps:$4 sm:$0xff]  }
 0x7bf   :  { %6888 = vmatprep.subr.bf16.mxu1 %v15880_v28  ;;  %v14729_v52 = vld [vmem:[#allocation7 + $0xa28] ss:$12 sps:$4 sm:$0xff]  }
 0x7c1   :  { %6694 = vmatpush1.bf16.msra.mxu0 %v14666_v4  ;;  %v14726_v4 = vld [vmem:[#allocation7 + $0x270] ss:$12 sps:$4 sm:$0xff]  }
 0x7c2   :  { %6889 = vmatpush1.bf16.msra.mxu1 %v14669_v6  ;;  %6695 = vmatprep.subr.bf16.mxu0 %v14672_v54  ;;  %v14730_v6 = vld [vmem:[#allocation7 + $0x968] ss:$12 sps:$4 sm:$0xff]   ;;  %v14733_v54 = vld [vmem:[#allocation7 + $0x28c] ss:$12 sps:$4 sm:$0xff]  }
 0x7c3   :  { %6890 = vmatprep.subr.bf16.mxu1 %v15880_v28 }
 0x7c5   :  { %6696 = vmatpush1.bf16.msra.mxu0 %v14670_v14  ;;  %v14734_v14 = vld [vmem:[#allocation7 + $0xa40] ss:$12 sps:$4 sm:$0xff]  }
 0x7c6   :  { %6891 = vmatpush1.bf16.msra.mxu1 %v14673_v15  ;;  %6697 = vmatprep.subr.bf16.mxu0 %v14676_v21  ;;  %v14731_v15 = vld [vmem:[#allocation7 + $0x288] ss:$12 sps:$4 sm:$0xff]   ;;  %v14735_v21 = vld [vmem:[#allocation7 + $0x980] ss:$12 sps:$4 sm:$0xff]  }
 0x7c7   :  { %6892 = vmatprep.subr.bf16.mxu1 %v15880_v28 }
 0x7c9   :  { %6698 = vmatpush1.bf16.msra.mxu0 %v14674_v22  ;;  %v14738_v22 = vld [vmem:[#allocation7 + $0x2a4] ss:$12 sps:$4 sm:$0xff]  }
 0x7ca   :  { %6893 = vmatpush1.bf16.msra.mxu1 %v14677_v16  ;;  %6710 = vmatprep.subr.bf16.mxu0 %v14680_v39  ;;  %v14739_v39 = vld [vmem:[#allocation7 + $0xa58] ss:$12 sps:$4 sm:$0xff]  }
 0x7cb   :  { %6894 = vmatprep.subr.bf16.mxu1 %v15880_v28 }
 0x7cc   :  { %6700 = vmatmul.mubr.bf16.vlgmr.msra.gmra.mrb[116].mxu0 %v17557_v53  ;;  %v14691_v53 = vld [vmem:[#allocation7 + $0x1c8] ss:$12 sps:$4 sm:$0xff]  }
 0x7cd   :  { %6711 = vmatpush1.bf16.msra.mxu0 %v14678_v50  ;;  %6742 = vmatprep.mubr.bf16.mxu0 %v17575_v29  ;;  %v14695_v29 = vld [vmem:[#allocation7 + $0x800] ss:$12 sps:$4 sm:$0xff]  }
 0x7ce   :  { %6895 = vmatpush1.bf16.msra.mxu1 %v14681_v59  ;;  %6712 = vmatprep.subr.bf16.mxu0 %v14684_v12 }
 0x7cf   :  { %6896 = vmatprep.subr.bf16.mxu1 %v15880_v28 }
 0x7d1   :  { %6713 = vmatpush1.bf16.msra.mxu0 %v14682_v56  ;;  %v14736_v56 = vld [vmem:[#allocation7 + $0x2a0] ss:$12 sps:$4 sm:$0xff]  }
 0x7d2   :  { %6897 = vmatpush1.bf16.msra.mxu1 %v14685_v9  ;;  %6714 = vmatprep.subr.bf16.mxu0 %v14688_v20  ;;  %v14740_v20 = vld [vmem:[#allocation7 + $0x998] ss:$12 sps:$4 sm:$0xff]  }
 0x7d3   :  { %13764 = vmatprep.subr.bf16.mxu1 %v14689_v27  ;;  %v14743_v27 = vld [vmem:[#allocation7 + $0x2bc] ss:$12 sps:$4 sm:$0xff]  }
 0x7d5   :  { %6911 = vmatmul.mubr.bf16.vlgmr.msra.gmra.mrb[128].mxu1 %v17591_v41  ;;  %6715 = vmatpush1.bf16.msra.mxu0 %v14686_v43 }
 0x7d6   :  { %13765 = vmatpush3.bf16.msra.mxu1 %v14690_v57  ;;  %7960 = vmatprep.mubr.bf16.mxu1 %v17571_v19  ;;  %v14744_v57 = vld [vmem:[#allocation7 + $0xa70] ss:$12 sps:$4 sm:$0xff]  }
 0x7d7   :  { %6716 = vmatprep.subr.bf16.mxu0 %v14693_v35  ;;  %13766 = vmatprep.subr.bf16.mxu1 %v14694_v44  ;;  %v14741_v35 = vld [vmem:[#allocation7 + $0x2b8] ss:$12 sps:$4 sm:$0xff]   ;;  %v14745_v44 = vld [vmem:[#allocation7 + $0x9b0] ss:$12 sps:$4 sm:$0xff]  }
 0x7d9   :  { %6717 = vmatpush1.bf16.msra.mxu0 %v14691_v53  ;;  %v14748_v53 = vld [vmem:[#allocation7 + $0x2d4] ss:$12 sps:$4 sm:$0xff]  }
 0x7da   :  { %13767 = vmatpush3.bf16.msra.mxu1 %v14695_v29  ;;  %6718 = vmatprep.subr.bf16.mxu0 %v14698_v38  ;;  %v14749_v29 = vld [vmem:[#allocation7 + $0xa88] ss:$12 sps:$4 sm:$0xff]   ;;  %v14746_v38 = vld [vmem:[#allocation7 + $0x2d0] ss:$12 sps:$4 sm:$0xff]  }
 0x7db   :  { %13768 = vmatprep.subr.bf16.mxu1 %v14699_v47  ;;  %v14750_v47 = vld [vmem:[#allocation7 + $0x9c8] ss:$12 sps:$4 sm:$0xff]  }
 0x7dd   :  { %6719 = vmatpush1.bf16.msra.mxu0 %v14696_v62  ;;  %v14753_v62 = vld [vmem:[#allocation7 + $0x2ec] ss:$12 sps:$4 sm:$0xff]  }
 0x7de   :  { %13769 = vmatpush3.bf16.msra.mxu1 %v14700_v63  ;;  %6720 = vmatprep.subr.bf16.mxu0 %v14703_v3  ;;  %v14754_v63 = vld [vmem:[#allocation7 + $0xaa0] ss:$12 sps:$4 sm:$0xff]   ;;  %v14751_v3 = vld [vmem:[#allocation7 + $0x2e8] ss:$12 sps:$4 sm:$0xff]  }
 0x7df   :  { %13770 = vmatprep.subr.bf16.mxu1 %v14704_v33  ;;  %v14755_v33 = vld [vmem:[#allocation7 + $0x9e0] ss:$12 sps:$4 sm:$0xff]  }
 0x7e1   :  { %6721 = vmatpush1.bf16.msra.mxu0 %v14701_v60  ;;  %v14758_v60 = vld [vmem:[#allocation7 + $0x304] ss:$12 sps:$4 sm:$0xff]  }
 0x7e2   :  { %13771 = vmatpush3.bf16.msra.mxu1 %v14705_v11  ;;  %6722 = vmatprep.subr.bf16.mxu0 %v14708_v13  ;;  %v14759_v11 = vld [vmem:[#allocation7 + $0xab8] ss:$12 sps:$4 sm:$0xff]   ;;  %v14756_v13 = vld [vmem:[#allocation7 + $0x300] ss:$12 sps:$4 sm:$0xff]  }
 0x7e3   :  { %13772 = vmatprep.subr.bf16.mxu1 %v14709_v51  ;;  %v14760_v51 = vld [vmem:[#allocation7 + $0x9f8] ss:$12 sps:$4 sm:$0xff]  }
 0x7e5   :  { %6723 = vmatpush1.bf16.msra.mxu0 %v14706_v1  ;;  %v14763_v1 = vld [vmem:[#allocation7 + $0x31c] ss:$12 sps:$4 sm:$0xff]  }
 0x7e6   :  { %13773 = vmatpush3.bf16.msra.mxu1 %v14710_v5  ;;  %6724 = vmatprep.subr.bf16.mxu0 %v14713_v40  ;;  %v14764_v5 = vld [vmem:[#allocation7 + $0xad0] ss:$12 sps:$4 sm:$0xff]   ;;  %v14761_v40 = vld [vmem:[#allocation7 + $0x318] ss:$12 sps:$4 sm:$0xff]  }
 0x7e7   :  { %13774 = vmatprep.subr.bf16.mxu1 %v14714_v8  ;;  %v14765_v8 = vld [vmem:[#allocation7 + $0xa10] ss:$12 sps:$4 sm:$0xff]  }
 0x7e9   :  { %6725 = vmatpush1.bf16.msra.mxu0 %v14711_v23  ;;  %v14768_v23 = vld [vmem:[#allocation7 + $0x334] ss:$12 sps:$4 sm:$0xff]  }
 0x7ea   :  { %13775 = vmatpush3.bf16.msra.mxu1 %v14715_v25  ;;  %6726 = vmatprep.subr.bf16.mxu0 %v14718_v36  ;;  %v14766_v25 = vld [vmem:[#allocation7 + $0x330] ss:$12 sps:$4 sm:$0xff]   ;;  %v14769_v36 = vld [vmem:[#allocation7 + $0xae8] ss:$12 sps:$4 sm:$0xff]  }
 0x7eb   :  { %13776 = vmatprep.subr.bf16.mxu1 %v14719_v2  ;;  %v14772_v2 = vld [vmem:[#allocation7 + $0x34c] ss:$12 sps:$4 sm:$0xff]  }
 0x7ed   :  { %6727 = vmatpush1.bf16.msra.mxu0 %v14716_v55  ;;  %v14776_v55 = vld [vmem:[#allocation7 + $0x364] ss:$12 sps:$4 sm:$0xff]  }
 0x7ee   :  { %13777 = vmatpush3.bf16.msra.mxu1 %v14720_v18  ;;  %6728 = vmatprep.subr.bf16.mxu0 %v14723_v49 }
 0x7ef   :  { %13778 = vmatprep.subr.bf16.mxu1 %v14724_v37 }
 0x7f1   :  { %6729 = vmatpush1.bf16.msra.mxu0 %v14721_v61 }
 0x7f2   :  { %13779 = vmatpush3.bf16.msra.mxu1 %v14725_v34  ;;  %6730 = vmatprep.subr.bf16.mxu0 %v14728_v7  ;;  %v14774_v34 = vld [vmem:[#allocation7 + $0x360] ss:$12 sps:$4 sm:$0xff]  }
 0x7f3   :  { %13786 = vmatprep.subr.bf16.mxu1 %v14729_v52  ;;  %v14777_v52 = vld [vmem:[#allocation7 + $0xb18] ss:$12 sps:$4 sm:$0xff]  }
 0x7f5   :  { %7961 = vmatmul.mubr.bf16.vlgmr.msra.gmra.mrb[132].mxu1 %v17568_v17  ;;  %6731 = vmatpush1.bf16.msra.mxu0 %v14726_v4  ;;  %v14780_v4 = vld [vmem:[#allocation7 + $0x37c] ss:$12 sps:$4 sm:$0xff]  }
 0x7f6   :  { %13787 = vmatpush3.bf16.msra.mxu1 %v14730_v6  ;;  %8001 = vmatprep.mubr.bf16.mxu1 %v17586_v10 }
 0x7f7   :  { %v13692_v16 = vpop.f32.mrb[108].mxu1  ;;  %6732 = vmatprep.subr.bf16.mxu0 %v14733_v54  ;;  %13788 = vmatprep.subr.bf16.mxu1 %v14734_v14  ;;  %v14778_v14 = vld [vmem:[#allocation7 + $0x378] ss:$12 sps:$4 sm:$0xff]  }
 0x7f8   :  { %v13693_v50 = vpop.f32.mrb[109].mxu1 }
 0x7f9   :  { %v17648_v59 = vadd.f32 %v13693_v50, %v13692_v16  ;;  %6733 = vmatpush1.bf16.msra.mxu0 %v14731_v15  ;;  %v13695_v12 = vpop.f32.mrb[110].mxu1  ;;  %v14782_v16 = vld [vmem:[#allocation7 + $0x390] ss:$12 sps:$4 sm:$0xff]   ;;  %v14788_v50 = vld [vmem:[#allocation7 + $0x3ac] ss:$12 sps:$4 sm:$0xff]  }
 0x7fa   :  { %13789 = vmatpush3.bf16.msra.mxu1 %v14735_v21  ;;  %v13696_v9 = vpop.f32.mrb[111].mxu1  ;;  %6734 = vmatprep.subr.bf16.mxu0 %v14738_v22  ;;  %v14781_v21 = vld [vmem:[#allocation7 + $0xb30] ss:$12 sps:$4 sm:$0xff]   ;;  %v14784_v22 = vld [vmem:[#allocation7 + $0x394] ss:$12 sps:$4 sm:$0xff]  }
 0x7fb   :  { %v17650_v43 = vadd.f32 %v13696_v9, %v13695_v12  ;;  %13790 = vmatprep.subr.bf16.mxu1 %v14739_v39  ;;  %v14785_v39 = vld [vmem:[#allocation7 + $0xb48] ss:$12 sps:$4 sm:$0xff]   ;;  %v14789_v12 = vld [vmem:[#allocation7 + $0xb60] ss:$12 sps:$4 sm:$0xff]  }
 0x7fc   :  { %v14790_v9 = vld [vmem:[#allocation7 + $0x3c0] ss:$12 sps:$4 sm:$0xff]  }
 0x7fd   :  { %6735 = vmatpush1.bf16.msra.mxu0 %v14736_v56  ;;  %v14792_v56 = vld [vmem:[#allocation7 + $0x3c4] ss:$12 sps:$4 sm:$0xff]  }
 0x7fe   :  { %13791 = vmatpush3.bf16.msra.mxu1 %v14740_v20  ;;  %6736 = vmatprep.subr.bf16.mxu0 %v14743_v27  ;;  %v14793_v20 = vld [vmem:[#allocation7 + $0xb78] ss:$12 sps:$4 sm:$0xff]   ;;  %v14796_v27 = vld [vmem:[#allocation7 + $0x3dc] ss:$12 sps:$4 sm:$0xff]  }
 0x7ff   :  { %13792 = vmatprep.subr.bf16.mxu1 %v14744_v57  ;;  %v14797_v57 = vld [vmem:[#allocation7 + $0xb90] ss:$12 sps:$4 sm:$0xff]  }
 0x801   :  { %6737 = vmatpush1.bf16.msra.mxu0 %v14741_v35  ;;  %v14800_v35 = vld [vmem:[#allocation7 + $0x7e4] ss:$12 sps:$4 sm:$0xff]  }
 0x802   :  { %13793 = vmatpush3.bf16.msra.mxu1 %v14745_v44  ;;  %6738 = vmatprep.subr.bf16.mxu0 %v14748_v53  ;;  %v14798_v44 = vld [vmem:[#allocation7 + $0x7e0] ss:$12 sps:$4 sm:$0xff]   ;;  %v14801_v53 = vld [vmem:[#allocation7 + $0xba8] ss:$12 sps:$4 sm:$0xff]  }
 0x803   :  { %13794 = vmatprep.subr.bf16.mxu1 %v14749_v29  ;;  %v14804_v29 = vld [vmem:[#allocation7 + $0x7fc] ss:$12 sps:$4 sm:$0xff]  }
 0x805   :  { %6739 = vmatpush1.bf16.msra.mxu0 %v14746_v38  ;;  %v14802_v38 = vld [vmem:[#allocation7 + $0x7f8] ss:$12 sps:$4 sm:$0xff]  }
 0x806   :  { %13795 = vmatpush3.bf16.msra.mxu1 %v14750_v47  ;;  %6740 = vmatprep.subr.bf16.mxu0 %v14753_v62  ;;  %v14805_v47 = vld [vmem:[#allocation7 + $0xbc0] ss:$12 sps:$4 sm:$0xff]  }
 0x807   :  { %13796 = vmatprep.subr.bf16.mxu1 %v14754_v63  ;;  %v14808_v62 = vld [vmem:[#allocation7 + $0x814] ss:$12 sps:$4 sm:$0xff]   ;;  %v14806_v63 = vld [vmem:[#allocation7 + $0x810] ss:$12 sps:$4 sm:$0xff]  }
 0x809   :  { %6741 = vmatpush1.bf16.msra.mxu0 %v14751_v3  ;;  %v14811_v3 = vld [vmem:[#allocation7 + $0x82c] ss:$12 sps:$4 sm:$0xff]  }
 0x80a   :  { %13797 = vmatpush3.bf16.msra.mxu1 %v14755_v33  ;;  %6753 = vmatprep.subr.bf16.mxu0 %v14758_v60  ;;  %v14809_v33 = vld [vmem:[#allocation7 + $0x828] ss:$12 sps:$4 sm:$0xff]  }
 0x80b   :  { %13798 = vmatprep.subr.bf16.mxu1 %v14759_v11 }
 0x80c   :  { %6743 = vmatmul.mubr.bf16.vlgmr.msra.gmra.mrb[116].mxu0 %v17573_v48  ;;  %v14770_v48 = vld [vmem:[#allocation7 + $0x348] ss:$12 sps:$4 sm:$0xff]  }
 0x80d   :  { %6754 = vmatpush1.bf16.msra.mxu0 %v14756_v13  ;;  %12936 = vmatprep.mubr.msk.bf16.mxu0 %vm5737_vm11, %v17594_v45  ;;  %v14773_v45 = vld [vmem:[#allocation7 + $0xb00] ss:$12 sps:$4 sm:$0xff]  }
 0x80e   :  { %13799 = vmatpush3.bf16.msra.mxu1 %v14760_v51  ;;  %6755 = vmatprep.subr.bf16.mxu0 %v14763_v1  ;;  %v14812_v51 = vld [vmem:[#allocation7 + $0x840] ss:$12 sps:$4 sm:$0xff]  }
 0x80f   :  { %13800 = vmatprep.subr.bf16.mxu1 %v14764_v5  ;;  %v14817_v5 = vld [vmem:[#allocation7 + $0x85c] ss:$12 sps:$4 sm:$0xff]  }
 0x811   :  { %6756 = vmatpush1.bf16.msra.mxu0 %v14761_v40 }
 0x812   :  { %13801 = vmatpush3.bf16.msra.mxu1 %v14765_v8  ;;  %6757 = vmatprep.subr.bf16.mxu0 %v14768_v23  ;;  %v14815_v8 = vld [vmem:[#allocation7 + $0x858] ss:$12 sps:$4 sm:$0xff]   ;;  %v14820_v23 = vld [vmem:[#allocation7 + $0x874] ss:$12 sps:$4 sm:$0xff]  }
 0x813   :  { %8010 = vmatprep.subr.bf16.mxu1 %v15880_v28 }
 0x815   :  { %8002 = vmatmul.mubr.bf16.vlgmr.msra.gmra.mrb[136].mxu1 %v17583_v0  ;;  %6758 = vmatpush1.bf16.msra.mxu0 %v14766_v25  ;;  %v14818_v25 = vld [vmem:[#allocation7 + $0x870] ss:$12 sps:$4 sm:$0xff]  }
 0x816   :  { %8011 = vmatpush1.bf16.msra.mxu1 %v14769_v36  ;;  %13065 = vmatprep.mubr.msk.bf16.mxu1 %vm5737_vm11, %v17614_v46  ;;  %v14823_v36 = vld [vmem:[#allocation7 + $0x88c] ss:$12 sps:$4 sm:$0xff]  }
 0x817   :  { %v13714_v18 = vpop.f32.mrb[112].mxu1  ;;  %6759 = vmatprep.subr.bf16.mxu0 %v14772_v2  ;;  %8012 = vmatprep.subr.bf16.mxu1 %v15880_v28  ;;  %v14821_v2 = vld [vmem:[#allocation7 + $0x888] ss:$12 sps:$4 sm:$0xff]  }
 0x818   :  { %v13715_v49 = vpop.f32.mrb[113].mxu1 }
 0x819   :  { %v13716_v37 = vadd.f32 %v13715_v49, %v13714_v18  ;;  %v13717_v61 = vpop.f32.mrb[114].mxu1  ;;  %6760 = vmatpush1.bf16.msra.mxu0 %v14770_v48  ;;  %v14826_v48 = vld [vmem:[#allocation7 + $0x8a4] ss:$12 sps:$4 sm:$0xff]   ;;  %v14832_v49 = vld [vmem:[#allocation7 + $0x8d4] ss:$12 sps:$4 sm:$0xff]  }
 0x81a   :  { %8013 = vmatpush1.bf16.msra.mxu1 %v14773_v45  ;;  %v13718_v7 = vpop.f32.mrb[115].mxu1  ;;  %6761 = vmatprep.subr.bf16.mxu0 %v14776_v55  ;;  %v14824_v45 = vld [vmem:[#allocation7 + $0x8a0] ss:$12 sps:$4 sm:$0xff]   ;;  %v14829_v55 = vld [vmem:[#allocation7 + $0x8bc] ss:$12 sps:$4 sm:$0xff]  }
 0x81b   :  { %v13719_v6 = vadd.f32 %v13718_v7, %v13717_v61  ;;  %8014 = vmatprep.subr.bf16.mxu1 %v15880_v28  ;;  %v17662_v54 = vadd.f32 %v13716_v37, %v17648_v59  ;;  %v14786_v59 = vld [vmem:[#allocation7 + $0x3a8] ss:$12 sps:$4 sm:$0xff]   ;;  %v14827_v18 = vld [vmem:[#allocation7 + $0x8b8] ss:$12 sps:$4 sm:$0xff]   ;;  %v14830_v37 = vld [vmem:[#allocation7 + $0x8d0] ss:$12 sps:$4 sm:$0xff]  }
 0x81c   :  { %v14835_v61 = vld [vmem:[#allocation7 + $0x8ec] ss:$12 sps:$4 sm:$0xff]   ;;  %v14838_v7 = vld [vmem:[#allocation7 + $0x904] ss:$12 sps:$4 sm:$0xff]  }
 0x81d   :  { %6762 = vmatpush1.bf16.msra.mxu0 %v14774_v34  ;;  %v17665_v15 = vadd.f32 %v13719_v6, %v17650_v43  ;;  %v14794_v43 = vld [vmem:[#allocation7 + $0x3d8] ss:$12 sps:$4 sm:$0xff]   ;;  %v14833_v34 = vld [vmem:[#allocation7 + $0x8e8] ss:$12 sps:$4 sm:$0xff]  }
 0x81e   :  { %8015 = vmatpush1.bf16.msra.mxu1 %v14777_v52  ;;  %6763 = vmatprep.subr.bf16.mxu0 %v14780_v4 }
 0x81f   :  { %8016 = vmatprep.subr.bf16.mxu1 %v15880_v28 }
 0x821   :  { %6764 = vmatpush1.bf16.msra.mxu0 %v14778_v14  ;;  %v14836_v14 = vld [vmem:[#allocation7 + $0x900] ss:$12 sps:$4 sm:$0xff]  }
 0x822   :  { %8017 = vmatpush1.bf16.msra.mxu1 %v14781_v21  ;;  %6765 = vmatprep.subr.bf16.mxu0 %v14784_v22  ;;  %v14841_v21 = vld [vmem:[#allocation7 + $0x91c] ss:$12 sps:$4 sm:$0xff]  }
 0x823   :  { %8018 = vmatprep.subr.bf16.mxu1 %v15880_v28 }
 0x825   :  { %6766 = vmatpush1.bf16.msra.mxu0 %v14782_v16 }
 0x826   :  { %8019 = vmatpush1.bf16.msra.mxu1 %v14785_v39  ;;  %6767 = vmatprep.subr.bf16.mxu0 %v14788_v50  ;;  %v14839_v50 = vld [vmem:[#allocation7 + $0x918] ss:$12 sps:$4 sm:$0xff]  }
 0x827   :  { %8020 = vmatprep.subr.bf16.mxu1 %v15880_v28 }
 0x829   :  { %6768 = vmatpush1.bf16.msra.mxu0 %v14786_v59  ;;  %v14844_v59 = vld [vmem:[#allocation7 + $0x934] ss:$12 sps:$4 sm:$0xff]  }
 0x82a   :  { %8021 = vmatpush1.bf16.msra.mxu1 %v14789_v12  ;;  %6769 = vmatprep.subr.bf16.mxu0 %v14792_v56  ;;  %v14842_v12 = vld [vmem:[#allocation7 + $0x930] ss:$12 sps:$4 sm:$0xff]   ;;  %v14847_v56 = vld [vmem:[#allocation7 + $0x94c] ss:$12 sps:$4 sm:$0xff]  }
 0x82b   :  { %8022 = vmatprep.subr.bf16.mxu1 %v15880_v28 }
 0x82d   :  { %6770 = vmatpush1.bf16.msra.mxu0 %v14790_v9  ;;  %v14845_v9 = vld [vmem:[#allocation7 + $0x948] ss:$12 sps:$4 sm:$0xff]  }
 0x82e   :  { %8023 = vmatpush1.bf16.msra.mxu1 %v14793_v20  ;;  %6771 = vmatprep.subr.bf16.mxu0 %v14796_v27  ;;  %v14850_v20 = vld [vmem:[#allocation7 + $0x964] ss:$12 sps:$4 sm:$0xff]   ;;  %v14848_v27 = vld [vmem:[#allocation7 + $0x960] ss:$12 sps:$4 sm:$0xff]  }
 0x82f   :  { %8024 = vmatprep.subr.bf16.mxu1 %v15880_v28 }
 0x831   :  { %6772 = vmatpush1.bf16.msra.mxu0 %v14794_v43  ;;  %v14853_v43 = vld [vmem:[#allocation7 + $0x97c] ss:$12 sps:$4 sm:$0xff]  }
 0x832   :  { %8025 = vmatpush1.bf16.msra.mxu1 %v14797_v57  ;;  %7799 = vmatprep.subr.bf16.mxu0 %v14800_v35  ;;  %v14851_v57 = vld [vmem:[#allocation7 + $0x978] ss:$12 sps:$4 sm:$0xff]   ;;  %v14856_v35 = vld [vmem:[#allocation7 + $0x994] ss:$12 sps:$4 sm:$0xff]  }
 0x833   :  { %8026 = vmatprep.subr.bf16.mxu1 %v15880_v28 }
 0x834   :  { %6786 = vmatmul.mubr.bf16.vlgmr.msra.gmra.mrb[116].mxu0 %v17591_v41  ;;  %v14814_v41 = vld [vmem:[#allocation7 + $0x844] ss:$12 sps:$4 sm:$0xff]  }
 0x835   :  { %7800 = vmatpush1.bf16.msra.mxu0 %v14798_v44  ;;  %7831 = vmatprep.mubr.bf16.mxu0 %v17571_v19  ;;  %v14854_v44 = vld [vmem:[#allocation7 + $0x990] ss:$12 sps:$4 sm:$0xff]  }
 0x836   :  { %8027 = vmatpush1.bf16.msra.mxu1 %v14801_v53  ;;  %7801 = vmatprep.subr.bf16.mxu0 %v14804_v29  ;;  %v14859_v53 = vld [vmem:[#allocation7 + $0x9ac] ss:$12 sps:$4 sm:$0xff]   ;;  %v14857_v29 = vld [vmem:[#allocation7 + $0x9a8] ss:$12 sps:$4 sm:$0xff]  }
 0x837   :  { %8028 = vmatprep.subr.bf16.mxu1 %v15880_v28 }
 0x839   :  { %7802 = vmatpush1.bf16.msra.mxu0 %v14802_v38  ;;  %v14862_v38 = vld [vmem:[#allocation7 + $0x9c4] ss:$12 sps:$4 sm:$0xff]  }
 0x83a   :  { %8029 = vmatpush1.bf16.msra.mxu1 %v14805_v47  ;;  %7803 = vmatprep.subr.bf16.mxu0 %v14808_v62 }
 0x83d   :  { %8043 = vmatmul.mubr.bf16.vlgmr.msra.gmra.mrb[140].mxu1 %v17611_v32  ;;  %7804 = vmatpush1.bf16.msra.mxu0 %v14806_v63  ;;  %v14860_v63 = vld [vmem:[#allocation7 + $0x9c0] ss:$12 sps:$4 sm:$0xff]  }
 0x83e   :  { %7805 = vmatprep.subr.bf16.mxu0 %v14811_v3  ;;  %8181 = vmatprep.mubr.bf16.mxu1 %v15880_v28 }
 0x83f   :  { %v5986_v19 = vpop.f32.mrb[116].mxu1 }
 0x840   :  { %v5987_v60 = vadd.f32 %v5986_v19, %v17662_v54  ;;  %v5988_v11 = vpop.f32.mrb[117].mxu1 }
 0x841   :  { %v5989_v13 = vpop.f32.mrb[118].mxu1  ;;  %7806 = vmatpush1.bf16.msra.mxu0 %v14809_v33  ;;  %v14865_v33 = vld [vmem:[#allocation7 + $0x9dc] ss:$12 sps:$4 sm:$0xff]   ;;  %v14868_v11 = vld [vmem:[#allocation7 + $0x9f4] ss:$12 sps:$4 sm:$0xff]  }
 0x842   :  { %v5990_v1 = vadd.f32 %v5989_v13, %v17665_v15  ;;  %7807 = vmatprep.subr.bf16.mxu0 %v14814_v41  ;;  %v5991_v40 = vpop.f32.mrb[119].mxu1 }
 0x843   :  { %v14874_v40 = vld [vmem:[#allocation7 + $0xa24] ss:$12 sps:$4 sm:$0xff]  }
 0x845   :  { %7808 = vmatpush1.bf16.msra.mxu0 %v14812_v51  ;;  %v14866_v51 = vld [vmem:[#allocation7 + $0x9f0] ss:$12 sps:$4 sm:$0xff]  }
 0x846   :  { %7809 = vmatprep.subr.bf16.mxu0 %v14817_v5  ;;  %v14869_v5 = vld [vmem:[#allocation7 + $0xa08] ss:$12 sps:$4 sm:$0xff]  }
 0x849   :  { %7810 = vmatpush1.bf16.msra.mxu0 %v14815_v8  ;;  %v14872_v8 = vld [vmem:[#allocation7 + $0xa20] ss:$12 sps:$4 sm:$0xff]  }
 0x84a   :  { %7811 = vmatprep.subr.bf16.mxu0 %v14820_v23  ;;  %v14877_v23 = vld [vmem:[#allocation7 + $0xa3c] ss:$12 sps:$4 sm:$0xff]  }
 0x84d   :  { %7812 = vmatpush1.bf16.msra.mxu0 %v14818_v25  ;;  %v14875_v25 = vld [vmem:[#allocation7 + $0xa38] ss:$12 sps:$4 sm:$0xff]  }
 0x84e   :  { %7813 = vmatprep.subr.bf16.mxu0 %v14823_v36  ;;  %v14880_v36 = vld [vmem:[#allocation7 + $0xa54] ss:$12 sps:$4 sm:$0xff]  }
 0x851   :  { %7814 = vmatpush1.bf16.msra.mxu0 %v14821_v2  ;;  %v14878_v2 = vld [vmem:[#allocation7 + $0xa50] ss:$12 sps:$4 sm:$0xff]  }
 0x852   :  { %7815 = vmatprep.subr.bf16.mxu0 %v14826_v48  ;;  %v14883_v48 = vld [vmem:[#allocation7 + $0xa6c] ss:$12 sps:$4 sm:$0xff]  }
 0x855   :  { %7816 = vmatpush1.bf16.msra.mxu0 %v14824_v45  ;;  %v14881_v45 = vld [vmem:[#allocation7 + $0xa68] ss:$12 sps:$4 sm:$0xff]  }
 0x856   :  { %7817 = vmatprep.subr.bf16.mxu0 %v14829_v55  ;;  %v14886_v55 = vld [vmem:[#allocation7 + $0xa84] ss:$12 sps:$4 sm:$0xff]  }
 0x859   :  { %7818 = vmatpush1.bf16.msra.mxu0 %v14827_v18  ;;  %v14884_v18 = vld [vmem:[#allocation7 + $0xa80] ss:$12 sps:$4 sm:$0xff]  }
 0x85a   :  { %7819 = vmatprep.subr.bf16.mxu0 %v14832_v49  ;;  %v14889_v49 = vld [vmem:[#allocation7 + $0xa9c] ss:$12 sps:$4 sm:$0xff]  }
 0x85d   :  { %7820 = vmatpush1.bf16.msra.mxu0 %v14830_v37  ;;  %v14887_v37 = vld [vmem:[#allocation7 + $0xa98] ss:$12 sps:$4 sm:$0xff]  }
 0x85e   :  { %7821 = vmatprep.subr.bf16.mxu0 %v14835_v61  ;;  %v14892_v61 = vld [vmem:[#allocation7 + $0xab4] ss:$12 sps:$4 sm:$0xff]  }
 0x85f   :  { %v13736_v52 = vpop.f32.mrb[120].mxu1 }
 0x860   :  { %v13737_v4 = vpop.f32.mrb[121].mxu1 }
 0x861   :  { %v13738_v6 = vadd.f32 %v13737_v4, %v13736_v52  ;;  %v13739_v54 = vpop.f32.mrb[122].mxu1  ;;  %7822 = vmatpush1.bf16.msra.mxu0 %v14833_v34  ;;  %v14890_v4 = vld [vmem:[#allocation7 + $0xab0] ss:$12 sps:$4 sm:$0xff]  }
 0x862   :  { %v13740_v15 = vpop.f32.mrb[123].mxu1  ;;  %7823 = vmatprep.subr.bf16.mxu0 %v14838_v7 }
 0x863   :  { %v6831_v22 = vadd.f32 %v13738_v6, %v5987_v60  ;;  %v13741_v16 = vadd.f32 %v13740_v15, %v13739_v54  ;;  %v14863_v60 = vld [vmem:[#allocation7 + $0x9d8] ss:$12 sps:$4 sm:$0xff]  }
 0x864   :  { %v14895_v54 = vld [vmem:[#allocation7 + $0xacc] ss:$12 sps:$4 sm:$0xff]  }
 0x865   :  { %v6834_v39 = vadd.f32 %v13741_v16, %v5990_v1  ;;  %7824 = vmatpush1.bf16.msra.mxu0 %v14836_v14  ;;  %v14871_v1 = vld [vmem:[#allocation7 + $0xa0c] ss:$12 sps:$4 sm:$0xff]  }
 0x866   :  { %7825 = vmatprep.subr.bf16.mxu0 %v14841_v21  ;;  %v14893_v21 = vld [vmem:[#allocation7 + $0xac8] ss:$12 sps:$4 sm:$0xff]   ;;  %v14896_v16 = vld [vmem:[#allocation7 + $0xae0] ss:$12 sps:$4 sm:$0xff]  }
 0x869   :  { %7826 = vmatpush1.bf16.msra.mxu0 %v14839_v50  ;;  %v14899_v50 = vld [vmem:[#allocation7 + $0xaf8] ss:$12 sps:$4 sm:$0xff]  }
 0x86a   :  { %7827 = vmatprep.subr.bf16.mxu0 %v14844_v59  ;;  %v14904_v59 = vld [vmem:[#allocation7 + $0xb14] ss:$12 sps:$4 sm:$0xff]  }
 0x86d   :  { %7828 = vmatpush1.bf16.msra.mxu0 %v14842_v12  ;;  %v14902_v12 = vld [vmem:[#allocation7 + $0xb10] ss:$12 sps:$4 sm:$0xff]  }
 0x86e   :  { %7829 = vmatprep.subr.bf16.mxu0 %v14847_v56  ;;  %v14907_v56 = vld [vmem:[#allocation7 + $0xb2c] ss:$12 sps:$4 sm:$0xff]  }
 0x871   :  { %7830 = vmatpush1.bf16.msra.mxu0 %v14845_v9  ;;  %v14905_v9 = vld [vmem:[#allocation7 + $0xb28] ss:$12 sps:$4 sm:$0xff]  }
 0x872   :  { %7842 = vmatprep.subr.bf16.mxu0 %v14850_v20  ;;  %v14910_v20 = vld [vmem:[#allocation7 + $0xb44] ss:$12 sps:$4 sm:$0xff]  }
 0x874   :  { %7832 = vmatmul.mubr.bf16.vlgmr.msra.gmra.mrb[116].mxu0 %v17568_v17 }
 0x875   :  { %7843 = vmatpush1.bf16.msra.mxu0 %v14848_v27  ;;  %7874 = vmatprep.mubr.bf16.mxu0 %v17586_v10  ;;  %v14908_v27 = vld [vmem:[#allocation7 + $0xb40] ss:$12 sps:$4 sm:$0xff]  }
 0x876   :  { %7844 = vmatprep.subr.bf16.mxu0 %v14853_v43  ;;  %v14913_v43 = vld [vmem:[#allocation7 + $0xb5c] ss:$12 sps:$4 sm:$0xff]  }
 0x879   :  { %7845 = vmatpush1.bf16.msra.mxu0 %v14851_v57  ;;  %v14916_v57 = vld [vmem:[#allocation7 + $0xb74] ss:$12 sps:$4 sm:$0xff]  }
 0x87a   :  { %7846 = vmatprep.subr.bf16.mxu0 %v14856_v35 }
 0x87d   :  { %7847 = vmatpush1.bf16.msra.mxu0 %v14854_v44  ;;  %v14914_v44 = vld [vmem:[#allocation7 + $0xb70] ss:$12 sps:$4 sm:$0xff]  }
 0x87e   :  { %7848 = vmatprep.subr.bf16.mxu0 %v14859_v53 }
 0x880   :  { %v13758_v47 = vpop.f32.mrb[124].mxu1 }
 0x881   :  { %v13759_v62 = vpop.f32.mrb[125].mxu1  ;;  %7849 = vmatpush1.bf16.msra.mxu0 %v14857_v29 }
 0x882   :  { %v13760_v3 = vadd.f32 %v13759_v62, %v13758_v47  ;;  %v13761_v17 = vpop.f32.mrb[126].mxu1  ;;  %7850 = vmatprep.subr.bf16.mxu0 %v14862_v38  ;;  %v14919_v38 = vld [vmem:[#allocation7 + $0xb8c] ss:$12 sps:$4 sm:$0xff]  }
 0x883   :  { %v13762_v10 = vpop.f32.mrb[127].mxu1 }
 0x884   :  { %v13763_v41 = vadd.f32 %v13762_v10, %v13761_v17  ;;  %v6872_v19 = vadd.f32 %v13760_v3, %v6831_v22  ;;  %v14898_v22 = vld [vmem:[#allocation7 + $0xae4] ss:$12 sps:$4 sm:$0xff]   ;;  %v14920_v17 = vld [vmem:[#allocation7 + $0xba0] ss:$12 sps:$4 sm:$0xff]  }
 0x885   :  { %7851 = vmatpush1.bf16.msra.mxu0 %v14860_v63  ;;  %v14917_v63 = vld [vmem:[#allocation7 + $0xb88] ss:$12 sps:$4 sm:$0xff]   ;;  %v14922_v3 = vld [vmem:[#allocation7 + $0xba4] ss:$12 sps:$4 sm:$0xff]  }
 0x886   :  { %7852 = vmatprep.subr.bf16.mxu0 %v14865_v33  ;;  %v6875_v13 = vadd.f32 %v13763_v41, %v6834_v39  ;;  %v14901_v39 = vld [vmem:[#allocation7 + $0xafc] ss:$12 sps:$4 sm:$0xff]   ;;  %v14923_v10 = vld [vmem:[#allocation7 + $0xbb8] ss:$12 sps:$4 sm:$0xff]  }
 0x887   :  { %v14925_v33 = vld [vmem:[#allocation7 + $0xbbc] ss:$12 sps:$4 sm:$0xff]  }
 0x889   :  { %7853 = vmatpush1.bf16.msra.mxu0 %v14863_v60 }
 0x88a   :  { %7854 = vmatprep.subr.bf16.mxu0 %v14868_v11 }
 0x88d   :  { %7855 = vmatpush1.bf16.msra.mxu0 %v14866_v51 }
 0x88e   :  { %7856 = vmatprep.subr.bf16.mxu0 %v14871_v1 }
 0x891   :  { %7857 = vmatpush1.bf16.msra.mxu0 %v14869_v5 }
 0x892   :  { %7858 = vmatprep.subr.bf16.mxu0 %v14874_v40  ;;  %v8057_v40 = vld [vmem:[#allocation8] sm:$0x7] }
 0x895   :  { %7859 = vmatpush1.bf16.msra.mxu0 %v14872_v8 }
 0x896   :  { %7860 = vmatprep.subr.bf16.mxu0 %v14877_v23 }
 0x899   :  { %7861 = vmatpush1.bf16.msra.mxu0 %v14875_v25  ;;  %v8070_v25 = vrot.slane %v8057_v40, %v4211_v42 }
 0x89a   :  { %7862 = vmatprep.subr.bf16.mxu0 %v14880_v36 }
 0x89d   :  { %7863 = vmatpush1.bf16.msra.mxu0 %v14878_v2 }
 0x89e   :  { %7864 = vmatprep.subr.bf16.mxu0 %v14883_v48 }
 0x8a1   :  { %7865 = vmatpush1.bf16.msra.mxu0 %v14881_v45 }
 0x8a2   :  { %7866 = vmatprep.subr.bf16.mxu0 %v14886_v55 }
 0x8a5   :  { %7867 = vmatpush1.bf16.msra.mxu0 %v14884_v18 }
 0x8a6   :  { %7868 = vmatprep.subr.bf16.mxu0 %v14889_v49 }
 0x8a8   :  { %v6912_v34 = vpop.f32.mrb[128].mxu1 }
 0x8a9   :  { %v17682_v7 = vadd.f32 %v6912_v34, %v6872_v19  ;;  %v6914_v52 = vpop.f32.mrb[129].mxu1  ;;  %7869 = vmatpush1.bf16.msra.mxu0 %v14887_v37 }
 0x8aa   :  { %v6915_v6 = vpop.f32.mrb[130].mxu1  ;;  %7870 = vmatprep.subr.bf16.mxu0 %v14892_v61 }
 0x8ab   :  { %v17684_v14 = vadd.f32 %v6915_v6, %v6875_v13  ;;  %v6917_v15 = vpop.f32.mrb[131].mxu1 }
 0x8ad   :  { %7871 = vmatpush1.bf16.msra.mxu0 %v14890_v4 }
 0x8ae   :  { %7872 = vmatprep.subr.bf16.mxu0 %v14895_v54 }
 0x8b1   :  { %7873 = vmatpush1.bf16.msra.mxu0 %v14893_v21 }
 0x8b2   :  { %7885 = vmatprep.subr.bf16.mxu0 %v14898_v22  ;;  %v14972_v22 = vld [vmem:[%s18671_s9 + $0x104] ss:$8 sps:$4 sm:$0xff]  }
 0x8b4   :  { %7875 = vmatmul.mubr.bf16.vlgmr.msra.gmra.mrb[116].mxu0 %v17583_v0  ;;  %v14911_v0 = vld [vmem:[#allocation7 + $0xb58] ss:$12 sps:$4 sm:$0xff]  }
 0x8b5   :  { %7886 = vmatpush1.bf16.msra.mxu0 %v14896_v16  ;;  %13064 = vmatprep.mubr.msk.bf16.mxu0 %vm5737_vm11, %v17614_v46  ;;  %v8062_v16 = vrot.slane %v8057_v40, %v17451_v24  ;;  %vm11848_vm11 = vcmp.lt.s32.totalorder %v4201_v30, 256 }
 0x8b6   :  { %7887 = vmatprep.subr.bf16.mxu0 %v14901_v39  ;;  %v8066_v39 = vrot.slane %v8057_v40, %v17456_v26 }
 0x8b9   :  { %7888 = vmatpush1.bf16.msra.mxu0 %v14899_v50 }
 0x8ba   :  { %7889 = vmatprep.subr.bf16.mxu0 %v14904_v59 }
 0x8bd   :  { %7890 = vmatpush1.bf16.msra.mxu0 %v14902_v12 }
 0x8be   :  { %7891 = vmatprep.subr.bf16.mxu0 %v14907_v56 }
 0x8c1   :  { %7892 = vmatpush1.bf16.msra.mxu0 %v14905_v9 }
 0x8c2   :  { %7893 = vmatprep.subr.bf16.mxu0 %v14910_v20 }
 0x8c5   :  { %7894 = vmatpush1.bf16.msra.mxu0 %v14908_v27 }
 0x8c6   :  { %7895 = vmatprep.subr.bf16.mxu0 %v14913_v43 }
 0x8c8   :  { %v13780_v46 = vpop.f32.mrb[132].mxu1 }
 0x8c9   :  { %v13781_v35 = vpop.f32.mrb[133].mxu1  ;;  %7896 = vmatpush1.bf16.msra.mxu0 %v14911_v0 }
 0x8ca   :  { %v13782_v53 = vadd.f32 %v13781_v35, %v13780_v46  ;;  %v13783_v29 = vpop.f32.mrb[134].mxu1  ;;  %7897 = vmatprep.subr.bf16.mxu0 %v14916_v57 }
 0x8cb   :  { %v13784_v47 = vpop.f32.mrb[135].mxu1 }
 0x8cc   :  { %v13785_v62 = vadd.f32 %v13784_v47, %v13783_v29 }
 0x8cd   :  { %7898 = vmatpush1.bf16.msra.mxu0 %v14914_v44 }
 0x8ce   :  { %7899 = vmatprep.subr.bf16.mxu0 %v14919_v38 }
 0x8d1   :  { %7900 = vmatpush1.bf16.msra.mxu0 %v14917_v63 }
 0x8d2   :  { %7901 = vmatprep.subr.bf16.mxu0 %v14922_v3 }
 0x8d5   :  { %7902 = vmatpush1.bf16.msra.mxu0 %v14920_v17 }
 0x8d6   :  { %7903 = vmatprep.subr.bf16.mxu0 %v14925_v33 }
 0x8d9   :  { %7904 = vmatpush1.bf16.msra.mxu0 %v14923_v10 }
 0x8da   :  { %8921 = vmatprep.subr.bf16.mxu0 %v14972_v22  ;;  %v14955_v22 = vld [vmem:[%s18671_s9 + $0x1f0] ss:$8 sps:$4 sm:$0xff]  }
 0x8dc   :  { %7918 = vmatmul.mubr.bf16.vlgmr.msra.gmra.mrb[116].mxu0 %v17611_v32 }
 0x8dd   :  { %8953 = vmatprep.mubr.bf16.mxu0 %v15880_v28 }
 0x8e8   :  { %v13802_v41 = vpop.f32.mrb[136].mxu1 }
 0x8e9   :  { %v13803_v19 = vpop.f32.mrb[137].mxu1 }
 0x8ea   :  { %v13804_v60 = vadd.f32 %v13803_v19, %v13802_v41  ;;  %v13805_v11 = vpop.f32.mrb[138].mxu1  ;;  %v8138_v19 = vsel %vm255_vm1, 4294967295, %v15881_v58  ;;  %v14930_v58 = vld [vmem:[%s18671_s9 + $0x164] ss:$8 sps:$4 sm:$0xff]   ;;  %vm8571_vm1 = vcmask 785408  }
 0x8eb   :  { %v13806_v13 = vpop.f32.mrb[139].mxu1  ;;  %v8139_v40 = vsel %vm8137_vm15, %v8138_v19, 0 }
 0x8ec   :  { %v13807_v51 = vadd.f32 %v13806_v13, %v13805_v11  ;;  %v8004_v1 = vadd.f32 %v13804_v60, %v13782_v53 }
 0x8ee   :  { %v8007_v5 = vadd.f32 %v13807_v51, %v13785_v62 }
 0x910   :  { %v8044_v8 = vpop.f32.mrb[140].mxu1 }
 0x911   :  { %v8045_v23 = vadd.f32 %v8044_v8, %v8004_v1  ;;  %v8046_v36 = vpop.f32.mrb[141].mxu1 }
 0x912   :  { %v8047_v2 = vpop.f32.mrb[142].mxu1  ;;  %v14926_v36 = vld [vmem:[%s18670_s8] sm:$0xff]  }
 0x913   :  { %v8053_v32 = vadd.f32 %v8045_v23, %v17682_v7  ;;  %v8048_v48 = vadd.f32 %v8047_v2, %v8007_v5  ;;  %v8049_v45 = vpop.f32.mrb[143].mxu1  ;;  %v14927_v2 = vld [vmem:[%s18670_s8 + $0x8] ss:$0 sps:$4 sm:$0x11]  }
 0x914   :  { %v14931_v45 = vld [vmem:[%s18671_s9 + $0x170] ss:$8 sps:$4 sm:$0xff]  }
 0x915   :  { %v8076_v55 = vadd.f32 %v8070_v25, %v8053_v32  ;;  %v8056_v18 = vadd.f32 %v8048_v48, %v17684_v14  ;;  %v14970_v14 = vld [vmem:[%s18671_s9 + $0x100] ss:$8 sps:$4 sm:$0xff]   ;;  %v14933_v48 = vld [vmem:[%s18671_s9 + $0x174] ss:$8 sps:$4 sm:$0xff]  }
 0x916   :  { %8922 = vmatpush1.bf16.msra.mxu0 %v14970_v14  ;;  %v14928_v32 = vld [vmem:[%s18671_s9 + $0x160] ss:$8 sps:$4 sm:$0xff]   ;;  %v14957_v14 = vld [vmem:[%s18671_s9 + $0x1f4] ss:$8 sps:$4 sm:$0xff]  }
 0x917   :  { %v8088_v49 = vmin.f32 %v8076_v55, 0.0  ;;  %v8079_v37 = vadd.f32 %v8070_v25, %v8056_v18  ;;  %vm8082_vm13 = vcmp.gt.f32.partialorder %v8076_v55, 0.0  ;;  %v14934_v18 = vld [vmem:[%s18671_s9 + $0x180] ss:$8 sps:$4 sm:$0xff]  }
 0x919   :  { %v8096_v61 = vmul.f32 1.442695, %v8088_v49  ;;  %v8091_v34 = vmin.f32 %v8079_v37, 0.0  ;;  %vm8085_vm14 = vcmp.gt.f32.partialorder %v8079_v37, 0.0  ;;  %v14939_v49 = vld [vmem:[%s18671_s9 + $0x194] ss:$8 sps:$4 sm:$0xff]  }
 0x91b   :  { %15521 = vpow2.f32 %v8096_v61  ;;  %v8102_v52 = vmul.f32 1.442695, %v8091_v34  ;;  %v14942_v61 = vld [vmem:[%s18671_s9 + $0x1a4] ss:$8 sps:$4 sm:$0xff]   ;;  %v14940_v34 = vld [vmem:[%s18671_s9 + $0x1a0] ss:$8 sps:$4 sm:$0xff]  }
 0x91d   :  { %15523 = vpow2.f32 %v8102_v52  ;;  %v14945_v52 = vld [vmem:[%s18671_s9 + $0x1b4] ss:$8 sps:$4 sm:$0xff]  }
 0x925   :  { %v15522_v4 = vpop.eup %15521 }
 0x926   :  { %v13068_v6 = vadd.f32 -1.0, %v15522_v4  ;;  %v14943_v4 = vld [vmem:[%s18671_s9 + $0x1b0] ss:$8 sps:$4 sm:$0xff]  }
 0x927   :  { %v15524_v54 = vpop.eup %15523 }
 0x928   :  { %v13071_v42 = vadd.f32 -1.0, %v15524_v54  ;;  %v8112_v15 = vsel %vm8082_vm13, %v8076_v55, %v13068_v6  ;;  %v14936_v55 = vld [vmem:[%s18671_s9 + $0x184] ss:$8 sps:$4 sm:$0xff]   ;;  %v14946_v54 = vld [vmem:[%s18671_s9 + $0x1c0] ss:$8 sps:$4 sm:$0xff]   ;;  %vm12033_vm13 = vcmask 49152  }
 0x929   :  { %v14948_v6 = vld [vmem:[%s18671_s9 + $0x1c4] ss:$8 sps:$4 sm:$0xff]  }
 0x92a   :  { %v8115_v7 = vsel %vm8085_vm14, %v8079_v37, %v13071_v42  ;;  %v14937_v37 = vld [vmem:[%s18671_s9 + $0x190] ss:$8 sps:$4 sm:$0xff]   ;;  %v14951_v42 = vld [vmem:[%s18671_s9 + $0x1d4] ss:$8 sps:$4 sm:$0xff]   ;;  %vm12035_vm14 = vcmask 40960  }
 0x92b   :  { %v8121_v21 = vpack.c.bf16 %v8115_v7, %v8112_v15  ;;  %v14949_v15 = vld [vmem:[%s18671_s9 + $0x1d0] ss:$8 sps:$4 sm:$0xff]   ;;  %v14954_v7 = vld [vmem:[%s18671_s9 + $0x1e4] ss:$8 sps:$4 sm:$0xff]  }
 0x92d   :  { %v8147_v25 = vand.u32 %v8139_v40, %v8121_v21  ;;  %v14952_v21 = vld [vmem:[%s18671_s9 + $0x1e0] ss:$8 sps:$4 sm:$0xff]  }
 0x9af   :  { %v7919_v50 = vpop.f32.mrb[116].mxu0 }
 0x9b0   :  { %v8074_v59 = vadd.f32 %v8062_v16, %v7919_v50  ;;  %v7921_v12 = vpop.f32.mrb[117].mxu0  ;;  %v14963_v50 = vld [vmem:[%s18671_s9 + $0x214] ss:$8 sps:$4 sm:$0xff]  }
 0x9b1   :  { %v8075_v56 = vadd.f32 %v8066_v39, %v7921_v12  ;;  %v7923_v9 = vpop.f32.mrb[118].mxu0  ;;  %v14966_v12 = vld [vmem:[%s18671_s9 + $0x224] ss:$8 sps:$4 sm:$0xff]  }
 0x9b2   :  { %v8086_v20 = vmin.f32 %v8074_v59, 0.0  ;;  %v8077_v27 = vadd.f32 %v8062_v16, %v7923_v9  ;;  %v7925_v43 = vpop.f32.mrb[119].mxu0  ;;  %vm8080_vm0 = vcmp.gt.f32.partialorder %v8074_v59, 0.0  ;;  %v14960_v16 = vld [vmem:[%s18671_s9 + $0x204] ss:$8 sps:$4 sm:$0xff]  }
 0x9b3   :  { %v8087_v0 = vmin.f32 %v8075_v56, 0.0  ;;  %v8078_v57 = vadd.f32 %v8066_v39, %v7925_v43  ;;  %vm8081_vm4 = vcmp.gt.f32.partialorder %v8075_v56, 0.0  ;;  %v14958_v39 = vld [vmem:[%s18671_s9 + $0x200] ss:$8 sps:$4 sm:$0xff]   ;;  %v14969_v9 = vld [vmem:[%s18671_s9 + $0x234] ss:$8 sps:$4 sm:$0xff]  }
 0x9b4   :  { %v8092_v46 = vmul.f32 1.442695, %v8086_v20  ;;  %v8089_v35 = vmin.f32 %v8077_v27, 0.0  ;;  %vm8083_vm3 = vcmp.gt.f32.partialorder %v8077_v27, 0.0  ;;  %v14967_v20 = vld [vmem:[%s18671_s9 + $0x230] ss:$8 sps:$4 sm:$0xff]  }
 0x9b5   :  { %v8094_v44 = vmul.f32 1.442695, %v8087_v0  ;;  %v8090_v53 = vmin.f32 %v8078_v57, 0.0  ;;  %vm8084_vm5 = vcmp.gt.f32.partialorder %v8078_v57, 0.0  ;;  %v14973_v43 = vld [vmem:[%s18671_s9 + $0x240] ss:$8 sps:$4 sm:$0xff]  }
 0x9b6   :  { %15525 = vpow2.f32 %v8092_v46  ;;  %v8098_v29 = vmul.f32 1.442695, %v8089_v35  ;;  %v14978_v0 = vld [vmem:[%s18671_s9 + $0x114] ss:$8 sps:$4 sm:$0xff]   ;;  %v14979_v35 = vld [vmem:[%s18671_s9 + $0x250] ss:$8 sps:$4 sm:$0xff]  }
 0x9b7   :  { %15527 = vpow2.f32 %v8094_v44  ;;  %v8100_v38 = vmul.f32 1.442695, %v8090_v53  ;;  %8923 = vmatprep.subr.bf16.mxu0 %v14978_v0  ;;  %v14981_v46 = vld [vmem:[%s18671_s9 + $0x254] ss:$8 sps:$4 sm:$0xff]   ;;  %v14984_v44 = vld [vmem:[%s18671_s9 + $0x124] ss:$8 sps:$4 sm:$0xff]  }
 0x9b8   :  { %15529 = vpow2.f32 %v8098_v29  ;;  %v14982_v53 = vld [vmem:[%s18671_s9 + $0x120] ss:$8 sps:$4 sm:$0xff]   ;;  %v14987_v29 = vld [vmem:[%s18671_s9 + $0x264] ss:$8 sps:$4 sm:$0xff]   ;;  %v15024_v0 = vld [vmem:[%s18671_s9 + $0x2f0] ss:$8 sps:$4 sm:$0xff]  }
 0x9b9   :  { %15531 = vpow2.f32 %v8100_v38  ;;  %v14990_v38 = vld [vmem:[%s18671_s9 + $0x134] ss:$8 sps:$4 sm:$0xff]  }
 0x9c0   :  { %v15526_v47 = vpop.eup %15525 }
 0x9c1   :  { %v15528_v62 = vpop.eup %15527  ;;  %v13066_v63 = vadd.f32 -1.0, %v15526_v47  ;;  %v14988_v47 = vld [vmem:[%s18671_s9 + $0x130] ss:$8 sps:$4 sm:$0xff]  }
 0x9c2   :  { %v15530_v3 = vpop.eup %15529  ;;  %v13067_v17 = vadd.f32 -1.0, %v15528_v62  ;;  %v14996_v62 = vld [vmem:[%s18671_s9 + $0x144] ss:$8 sps:$4 sm:$0xff]  }
 0x9c3   :  { %v15532_v33 = vpop.eup %15531  ;;  %v13069_v10 = vadd.f32 -1.0, %v15530_v3  ;;  %v8110_v60 = vsel %vm8080_vm0, %v8074_v59, %v13066_v63  ;;  %v14961_v59 = vld [vmem:[%s18671_s9 + $0x210] ss:$8 sps:$4 sm:$0xff]   ;;  %v14994_v63 = vld [vmem:[%s18671_s9 + $0x140] ss:$8 sps:$4 sm:$0xff]  }
 0x9c4   :  { %v13070_v41 = vadd.f32 -1.0, %v15532_v33  ;;  %v8111_v13 = vsel %vm8081_vm4, %v8075_v56, %v13067_v17  ;;  %v14964_v56 = vld [vmem:[%s18671_s9 + $0x220] ss:$8 sps:$4 sm:$0xff]   ;;  %v15002_v3 = vld [vmem:[%s18671_s9 + $0x154] ss:$8 sps:$4 sm:$0xff]  }
 0x9c5   :  { %v8113_v11 = vsel %vm8083_vm3, %v8077_v27, %v13069_v10  ;;  %v14975_v27 = vld [vmem:[%s18671_s9 + $0x244] ss:$8 sps:$4 sm:$0xff]   ;;  %v15000_v17 = vld [vmem:[%s18671_s9 + $0x150] ss:$8 sps:$4 sm:$0xff]  }
 0x9c6   :  { %v8119_v51 = vpack.c.bf16 %v8113_v11, %v8110_v60  ;;  %v8114_v1 = vsel %vm8084_vm5, %v8078_v57, %v13070_v41  ;;  %v14976_v57 = vld [vmem:[%s18671_s9 + $0x110] ss:$8 sps:$4 sm:$0xff]   ;;  %v15008_v33 = vld [vmem:[%s18671_s9 + $0x2c4] ss:$8 sps:$4 sm:$0xff]  }
 0x9c7   :  { %v8120_v5 = vpack.c.bf16 %v8114_v1, %v8111_v13  ;;  %8924 = vmatpush1.bf16.msra.mxu0 %v14976_v57  ;;  %v14985_v1 = vld [vmem:[%s18671_s9 + $0x260] ss:$8 sps:$4 sm:$0xff]   ;;  %v15029_v57 = vld [vmem:[%s18671_s9 + $0x14] ss:$8 sps:$4 sm:$0xff]  }
 0x9c8   :  { %v8141_v23 = vand.u32 %v8139_v40, %v8119_v51  ;;  %8925 = vmatprep.subr.bf16.mxu0 %v14984_v44  ;;  %v15030_v44 = vld [vmem:[%s18671_s9 + $0x300] ss:$8 sps:$4 sm:$0xff]  }
 0x9c9   :  { %v8144_v8 = vand.u32 %v8139_v40, %v8120_v5  ;;  %v14993_v40 = vld [vmem:[%s18671_s9 + $0x274] ss:$8 sps:$4 sm:$0xff]  }
 0x9cb   :  { %8149 = vmatprep.subr.bf16.mxu1 %v8144_v8  ;;  %8926 = vmatpush1.bf16.msra.mxu0 %v14982_v53  ;;  %v15035_v53 = vld [vmem:[%s18671_s9 + $0x24] ss:$8 sps:$4 sm:$0xff]  }
 0x9cc   :  { %8150 = vmatpush1.bf16.msra.mxu1 %v8141_v23  ;;  %8927 = vmatprep.subr.bf16.mxu0 %v14990_v38  ;;  %v15033_v38 = vld [vmem:[%s18671_s9 + $0x20] ss:$8 sps:$4 sm:$0xff]  }
 0x9cd   :  { %13889 = vmatprep.subr.bf16.mxu1 %v8147_v25 }
 0x9cf   :  { %13074 = vmatmul.mubr.msk.bf16.vlgmr.msra.gmra.mrb[144].mxu1 %vm8130_vm6, %v14926_v36  ;;  %8928 = vmatpush1.bf16.msra.mxu0 %v14988_v47  ;;  %v15036_v47 = vld [vmem:[%s18671_s9 + $0x310] ss:$8 sps:$4 sm:$0xff]  }
 0x9d0   :  { %13890 = vmatpush3.bf16.msra.mxu1 %v8147_v25  ;;  %8191 = vmatprep.mubr.bf16.mxu1 %v15880_v28 }
 0x9d1   :  { %8575 = vmatprep.subr.bf16.mxu1 %v14930_v58  ;;  %8929 = vmatprep.subr.bf16.mxu0 %v14996_v62  ;;  %v15041_v62 = vld [vmem:[%s18671_s9 + $0x34] ss:$8 sps:$4 sm:$0xff]  }
 0x9d3   :  { %8930 = vmatpush1.bf16.msra.mxu0 %v14994_v63  ;;  %v15044_v63 = vld [vmem:[%s18671_s9 + $0x324] ss:$8 sps:$4 sm:$0xff]  }
 0x9d4   :  { %8931 = vmatprep.subr.bf16.mxu0 %v15002_v3  ;;  %v15039_v3 = vld [vmem:[%s18671_s9 + $0x30] ss:$8 sps:$4 sm:$0xff]  }
 0x9d7   :  { %13075 = vmatmul.mubr.msk.bf16.gmra.mrb[148].mxu1 %vm8130_vm6, %v14927_v2  ;;  %8932 = vmatpush1.bf16.msra.mxu0 %v15000_v17  ;;  %v15042_v17 = vld [vmem:[%s18671_s9 + $0x320] ss:$8 sps:$4 sm:$0xff]  }
 0x9d8   :  { %13891 = vmatprep.mubr.msk.bf16.mxu1 %vm8130_vm6, %v14926_v36  ;;  %9245 = vmatprep.subr.bf16.mxu0 %v15008_v33  ;;  %v14991_v36 = vld [vmem:[%s18671_s9 + $0x270] ss:$8 sps:$4 sm:$0xff]   ;;  %v15047_v33 = vld [vmem:[%s18671_s9 + $0x44] ss:$8 sps:$4 sm:$0xff]  }
 0x9df   :  { %13892 = vmatmul.mubr.msk.bf16.vlgmr.msra.gmra.mrb[152].mxu1 %vm8130_vm6, %v14927_v2 }
 0x9e0   :  { %8576 = vmatpush1.bf16.msra.mxu1 %v14928_v32  ;;  %v14999_v32 = vld [vmem:[%s18671_s9 + $0x284] ss:$8 sps:$4 sm:$0xff]  }
 0x9e1   :  { %8577 = vmatprep.subr.bf16.mxu1 %v14933_v48 }
 0x9e4   :  { %8578 = vmatpush1.bf16.msra.mxu1 %v14931_v45 }
 0x9e5   :  { %8579 = vmatprep.subr.bf16.mxu1 %v14936_v55  ;;  %v14997_v55 = vld [vmem:[%s18671_s9 + $0x280] ss:$8 sps:$4 sm:$0xff]  }
 0x9e8   :  { %8580 = vmatpush1.bf16.msra.mxu1 %v14934_v18 }
 0x9e9   :  { %8581 = vmatprep.subr.bf16.mxu1 %v14939_v49  ;;  %v15005_v49 = vld [vmem:[%s18671_s9 + $0x294] ss:$8 sps:$4 sm:$0xff]  }
 0x9ec   :  { %8582 = vmatpush1.bf16.msra.mxu1 %v14937_v37 }
 0x9ed   :  { %8583 = vmatprep.subr.bf16.mxu1 %v14942_v61 }
 0x9f0   :  { %8584 = vmatpush1.bf16.msra.mxu1 %v14940_v34 }
 0x9f1   :  { %8585 = vmatprep.subr.bf16.mxu1 %v14945_v52 }
 0x9f4   :  { %8586 = vmatpush1.bf16.msra.mxu1 %v14943_v4  ;;  %v15003_v4 = vld [vmem:[%s18671_s9 + $0x290] ss:$8 sps:$4 sm:$0xff]  }
 0x9f5   :  { %8587 = vmatprep.subr.bf16.mxu1 %v14948_v6 }
 0x9f8   :  { %8588 = vmatpush1.bf16.msra.mxu1 %v14946_v54  ;;  %v15006_v54 = vld [vmem:[%s18671_s9 + $0x2c0] ss:$8 sps:$4 sm:$0xff]  }
 0x9f9   :  { %8589 = vmatprep.subr.bf16.mxu1 %v14951_v42 }
 0x9fc   :  { %8590 = vmatpush1.bf16.msra.mxu1 %v14949_v15 }
 0x9fd   :  { %8591 = vmatprep.subr.bf16.mxu1 %v14954_v7  ;;  %v15011_v7 = vld [vmem:[%s18671_s9 + $0x2a4] ss:$8 sps:$4 sm:$0xff]  }
 0xa00   :  { %8592 = vmatpush1.bf16.msra.mxu1 %v14952_v21  ;;  %v15014_v21 = vld [vmem:[%s18671_s9 + $0x2d4] ss:$8 sps:$4 sm:$0xff]  }
 0xa01   :  { %8593 = vmatprep.subr.bf16.mxu1 %v14957_v14 }
 0xa04   :  { %8594 = vmatpush1.bf16.msra.mxu1 %v14955_v22  ;;  %v15009_v22 = vld [vmem:[%s18671_s9 + $0x2a0] ss:$8 sps:$4 sm:$0xff]  }
 0xa05   :  { %8595 = vmatprep.subr.bf16.mxu1 %v14960_v16  ;;  %v15012_v16 = vld [vmem:[%s18671_s9 + $0x2d0] ss:$8 sps:$4 sm:$0xff]  }
 0xa08   :  { %8596 = vmatpush1.bf16.msra.mxu1 %v14958_v39  ;;  %v15017_v39 = vld [vmem:[%s18671_s9 + $0x2b4] ss:$8 sps:$4 sm:$0xff]  }
 0xa09   :  { %8597 = vmatprep.subr.bf16.mxu1 %v14963_v50  ;;  %v15020_v50 = vld [vmem:[%s18671_s9 + $0x2e4] ss:$8 sps:$4 sm:$0xff]  }
 0xa0c   :  { %8598 = vmatpush1.bf16.msra.mxu1 %v14961_v59 }
 0xa0d   :  { %8599 = vmatprep.subr.bf16.mxu1 %v14966_v12  ;;  %v15015_v12 = vld [vmem:[%s18671_s9 + $0x2b0] ss:$8 sps:$4 sm:$0xff]  }
 0xa10   :  { %8600 = vmatpush1.bf16.msra.mxu1 %v14964_v56  ;;  %v15018_v56 = vld [vmem:[%s18671_s9 + $0x2e0] ss:$8 sps:$4 sm:$0xff]  }
 0xa11   :  { %8601 = vmatprep.subr.bf16.mxu1 %v14969_v9  ;;  %v15023_v9 = vld [vmem:[%s18671_s9 + $0x4] ss:$8 sps:$4 sm:$0xff]  }
 0xa14   :  { %8602 = vmatpush1.bf16.msra.mxu1 %v14967_v20  ;;  %v15026_v20 = vld [vmem:[%s18671_s9 + $0x2f4] ss:$8 sps:$4 sm:$0xff]  }
 0xa15   :  { %8603 = vmatprep.subr.bf16.mxu1 %v14975_v27  ;;  %v15021_v27 = vld [vmem:[%s18671_s9] ss:$8 sps:$4 sm:$0xff]  }
 0xa18   :  { %8604 = vmatpush1.bf16.msra.mxu1 %v14973_v43 }
 0xa19   :  { %8605 = vmatprep.subr.bf16.mxu1 %v14981_v46  ;;  %v15032_v46 = vld [vmem:[%s18671_s9 + $0x304] ss:$8 sps:$4 sm:$0xff]  }
 0xa1c   :  { %8606 = vmatpush1.bf16.msra.mxu1 %v14979_v35  ;;  %v15027_v35 = vld [vmem:[%s18671_s9 + $0x10] ss:$8 sps:$4 sm:$0xff]  }
 0xa1d   :  { %8616 = vmatprep.subr.bf16.mxu1 %v14987_v29  ;;  %v15038_v29 = vld [vmem:[%s18671_s9 + $0x314] ss:$8 sps:$4 sm:$0xff]  }
 0xaa2   :  { %v8183_v10 = vpop.f32.mrb[144].mxu1 }
 0xaa3   :  { %v8185_v41 = vpop.f32.mrb[145].mxu1 }
 0xaa4   :  { %v8187_v19 = vpop.f32.mrb[146].mxu1 }
 0xaa5   :  { %v17844_v60 = vpack.c.bf16 %v8187_v19, %v8183_v10  ;;  %v8189_v11 = vpop.f32.mrb[147].mxu1  ;;  %v15050_v10 = vld [vmem:[%s18671_s9 + $0x334] ss:$8 sps:$4 sm:$0xff]   ;;  %v15048_v19 = vld [vmem:[%s18671_s9 + $0x330] ss:$8 sps:$4 sm:$0xff]  }
 0xaa6   :  { %v17846_v13 = vpack.c.bf16 %v8189_v11, %v8185_v41  ;;  %v15045_v41 = vld [vmem:[%s18671_s9 + $0x40] ss:$8 sps:$4 sm:$0xff]   ;;  %v15053_v11 = vld [vmem:[%s18671_s9 + $0x54] ss:$8 sps:$4 sm:$0xff]  }
 0xaa7   :  { %v8346_v5 = vrot.slane %v17844_v60, 3 }
 0xaa8   :  { %v8347_v51 = vrot.slane %v17846_v13, 3  ;;  %v9014_v48 = vrot.slane %v17846_v13, 6 }
 0xaaa   :  { %v17856_v8 = vpop.f32.mrb[148].mxu1  ;;  %8607 = vmatprep.mubr.bf16.mxu1 %v8347_v51  ;;  %v15051_v51 = vld [vmem:[%s18671_s9 + $0x50] ss:$8 sps:$4 sm:$0xff]  }
 0xaab   :  { %v8195_v23 = vpop.f32.mrb[149].mxu1  ;;  %8608 = vmatmul.mubr.bf16.vlgmr.msra.gmra.mrb[156].mxu1 %v8346_v5  ;;  %v15059_v5 = vld [vmem:[%s18671_s9 + $0x64] ss:$8 sps:$4 sm:$0xff]  }
 0xaac   :  { %v8252_v25 = vpack.c.bf16 %v8195_v23, %v8195_v23  ;;  %8617 = vmatpush1.bf16.msra.mxu1 %v14985_v1  ;;  %v8197_v58 = vpop.f32.mrb[150].mxu1  ;;  %8648 = vmatprep.mubr.bf16.mxu1 %v15880_v28  ;;  %v15054_v1 = vld [vmem:[%s18671_s9 + $0x340] ss:$8 sps:$4 sm:$0xff]  }
 0xaad   :  { %8618 = vmatprep.subr.bf16.mxu1 %v14993_v40  ;;  %v8198_v2 = vpop.f32.mrb[151].mxu1  ;;  %v15062_v40 = vld [vmem:[%s18671_s9 + $0x354] ss:$8 sps:$4 sm:$0xff]   ;;  %v15057_v23 = vld [vmem:[%s18671_s9 + $0x60] ss:$8 sps:$4 sm:$0xff]  }
 0xaae   :  { %v9015_v45 = vrot.slane %v8252_v25, 6  ;;  %v15060_v25 = vld [vmem:[%s18671_s9 + $0x350] ss:$8 sps:$4 sm:$0xff]   ;;  %v15068_v58 = vld [vmem:[%s18671_s9 + $0x364] ss:$8 sps:$4 sm:$0xff]  }
 0xaaf   :  { %v15063_v2 = vld [vmem:[%s18671_s9 + $0x70] ss:$8 sps:$4 sm:$0xff]  }
 0xab0   :  { %8619 = vmatpush1.bf16.msra.mxu1 %v14991_v36  ;;  %v9016_v18 = vsel %vm4397_vm12, %v9014_v48, %v9015_v45  ;;  %v15065_v36 = vld [vmem:[%s18671_s9 + $0x74] ss:$8 sps:$4 sm:$0xff]   ;;  %v15071_v48 = vld [vmem:[%s18671_s9 + $0x84] ss:$8 sps:$4 sm:$0xff]  }
 0xab1   :  { %8620 = vmatprep.subr.bf16.mxu1 %v14999_v32  ;;  %v15066_v32 = vld [vmem:[%s18671_s9 + $0x360] ss:$8 sps:$4 sm:$0xff]   ;;  %v15074_v45 = vld [vmem:[%s18671_s9 + $0x374] ss:$8 sps:$4 sm:$0xff]  }
 0xab2   :  { %v13893_v37 = vpop.f32.mrb[152].mxu1 }
 0xab3   :  { %v8253_v61 = vpack.c.bf16 %v13893_v37, %v13893_v37  ;;  %v8234_v34 = vpop.f32.mrb[153].mxu1  ;;  %v15080_v37 = vld [vmem:[%s18671_s9 + $0x384] ss:$8 sps:$4 sm:$0xff]  }
 0xab4   :  { %8621 = vmatpush1.bf16.msra.mxu1 %v14997_v55  ;;  %v13894_v52 = vpop.f32.mrb[154].mxu1  ;;  %v15069_v55 = vld [vmem:[%s18671_s9 + $0x80] ss:$8 sps:$4 sm:$0xff]  }
 0xab5   :  { %v8237_v6 = vpop.f32.mrb[155].mxu1  ;;  %8622 = vmatprep.subr.bf16.mxu1 %v15005_v49  ;;  %v9018_v42 = vrot.slane %v8253_v61, 6  ;;  %v15077_v49 = vld [vmem:[%s18671_s9 + $0x94] ss:$8 sps:$4 sm:$0xff]   ;;  %v15075_v61 = vld [vmem:[%s18671_s9 + $0x90] ss:$8 sps:$4 sm:$0xff]  }
 0xab6   :  { %v8250_v15 = vpack.c.bf16 %v8237_v6, %v8234_v34  ;;  %v15078_v34 = vld [vmem:[%s18671_s9 + $0x380] ss:$8 sps:$4 sm:$0xff]   ;;  %v15083_v52 = vld [vmem:[%s18671_s9 + $0xa4] ss:$8 sps:$4 sm:$0xff]  }
 0xab7   :  { %v15081_v6 = vld [vmem:[%s18671_s9 + $0xa0] ss:$8 sps:$4 sm:$0xff]  }
 0xab8   :  { %v9017_v14 = vrot.slane %v8250_v15, 6  ;;  %8623 = vmatpush1.bf16.msra.mxu1 %v15003_v4  ;;  %13211 = vmatmul.mubr.msk.bf16.vlgmr.msra.gmra.mrb[120].mxu0 %vm8571_vm1, %v8250_v15  ;;  %v8348_v43 = vrot.slane %v8250_v15, 3  ;;  %v15086_v4 = vld [vmem:[%s18671_s9 + $0x394] ss:$8 sps:$4 sm:$0xff]   ;;  %v15092_v15 = vld [vmem:[%s18671_s9 + $0x3a4] ss:$8 sps:$4 sm:$0xff]  }
 0xab9   :  { %9246 = vmatpush1.bf16.msra.mxu0 %v15006_v54  ;;  %9277 = vmatprep.mubr.bf16.mxu0 %v9016_v18  ;;  %v15072_v18 = vld [vmem:[%s18671_s9 + $0x370] ss:$8 sps:$4 sm:$0xff]  }
 0xaba   :  { %8624 = vmatprep.subr.bf16.mxu1 %v15011_v7  ;;  %9247 = vmatprep.subr.bf16.mxu0 %v15014_v21  ;;  %v17899_v59 = vsel %vm4397_vm12, %v9017_v14, %v9018_v42  ;;  %v15084_v54 = vld [vmem:[%s18671_s9 + $0x390] ss:$8 sps:$4 sm:$0xff]   ;;  %v15089_v42 = vld [vmem:[%s18671_s9 + $0xb4] ss:$8 sps:$4 sm:$0xff]   ;;  %v15090_v21 = vld [vmem:[%s18671_s9 + $0x3a0] ss:$8 sps:$4 sm:$0xff]  }
 0xabb   :  { %v15087_v7 = vld [vmem:[%s18671_s9 + $0xb0] ss:$8 sps:$4 sm:$0xff]   ;;  %v15095_v14 = vld [vmem:[%s18671_s9 + $0xc4] ss:$8 sps:$4 sm:$0xff]  }
 0xabc   :  { %8625 = vmatpush1.bf16.msra.mxu1 %v15009_v22  ;;  %v15098_v22 = vld [vmem:[%s18671_s9 + $0x3b4] ss:$8 sps:$4 sm:$0xff]  }
 0xabd   :  { %9248 = vmatpush1.bf16.msra.mxu0 %v15012_v16  ;;  %8626 = vmatprep.subr.bf16.mxu1 %v15017_v39  ;;  %v8251_v16 = vpack.c.bf16 %v17856_v8, %v17856_v8  ;;  %v15093_v39 = vld [vmem:[%s18671_s9 + $0xc0] ss:$8 sps:$4 sm:$0xff]   ;;  %v15099_v8 = vld [vmem:[%s18671_s9 + $0xd0] ss:$8 sps:$4 sm:$0xff]  }
 0xabe   :  { %9249 = vmatprep.subr.bf16.mxu0 %v15020_v50  ;;  %v15096_v50 = vld [vmem:[%s18671_s9 + $0x3b0] ss:$8 sps:$4 sm:$0xff]  }
 0xac0   :  { %8627 = vmatpush1.bf16.msra.mxu1 %v15015_v12  ;;  %v15101_v12 = vld [vmem:[%s18671_s9 + $0xd4] ss:$8 sps:$4 sm:$0xff]  }
 0xac1   :  { %9250 = vmatpush1.bf16.msra.mxu0 %v15018_v56  ;;  %8880 = vmatprep.subr.bf16.mxu1 %v15023_v9  ;;  %v9012_v56 = vrot.slane %v8251_v16, 6  ;;  %v9011_v9 = vrot.slane %v17844_v60, 6 }
 0xac2   :  { %9251 = vmatprep.subr.bf16.mxu0 %v15026_v20  ;;  %v15104_v20 = vld [vmem:[%s18671_s9 + $0xe4] ss:$8 sps:$4 sm:$0xff]  }
 0xac3   :  { %13166 = vmatmul.mubr.msk.bf16.vlgmr.msra.gmra.mrb[160].mxu1 %vm8571_vm1, %v8348_v43  ;;  %v15102_v43 = vld [vmem:[%s18671_s9 + $0xe0] ss:$8 sps:$4 sm:$0xff]  }
 0xac4   :  { %8881 = vmatpush1.bf16.msra.mxu1 %v15021_v27  ;;  %8912 = vmatprep.mubr.bf16.mxu1 %v17846_v13  ;;  %v15056_v13 = vld [vmem:[%s18671_s9 + $0x344] ss:$8 sps:$4 sm:$0xff]   ;;  %v9013_v27 = vsel %vm4397_vm12, %v9011_v9, %v9012_v56 }
 0xac5   :  { %9252 = vmatpush1.bf16.msra.mxu0 %v15024_v0  ;;  %8882 = vmatprep.subr.bf16.mxu1 %v15029_v57  ;;  %v15107_v0 = vld [vmem:[%s18671_s9 + $0xf4] ss:$8 sps:$4 sm:$0xff]   ;;  %v15105_v57 = vld [vmem:[%s18671_s9 + $0xf0] ss:$8 sps:$4 sm:$0xff]  }
 0xac6   :  { %9253 = vmatprep.subr.bf16.mxu0 %v15032_v46  ;;  %v15110_v46 = vld [vmem:[%s18671_s9 + $0x3c4] ss:$8 sps:$4 sm:$0xff]  }
 0xac8   :  { %8883 = vmatpush1.bf16.msra.mxu1 %v15027_v35  ;;  %v15108_v35 = vld [vmem:[%s18671_s9 + $0x3c0] ss:$8 sps:$4 sm:$0xff]  }
 0xac9   :  { %9254 = vmatpush1.bf16.msra.mxu0 %v15030_v44  ;;  %8884 = vmatprep.subr.bf16.mxu1 %v15035_v53  ;;  %v15113_v44 = vld [vmem:[%s18671_s9 + $0x3d4] ss:$8 sps:$4 sm:$0xff]   ;;  %v15111_v53 = vld [vmem:[%s18671_s9 + $0x3d0] ss:$8 sps:$4 sm:$0xff]  }
 0xaca   :  { %9255 = vmatprep.subr.bf16.mxu0 %v15038_v29  ;;  %v15116_v29 = vld [vmem:[%s18671_s9 + $0x3e4] ss:$8 sps:$4 sm:$0xff]  }
 0xacc   :  { %8885 = vmatpush1.bf16.msra.mxu1 %v15033_v38  ;;  %v15114_v38 = vld [vmem:[%s18671_s9 + $0x3e0] ss:$8 sps:$4 sm:$0xff]  }
 0xacd   :  { %9256 = vmatpush1.bf16.msra.mxu0 %v15036_v47  ;;  %8886 = vmatprep.subr.bf16.mxu1 %v15041_v62  ;;  %v15117_v47 = vld [vmem:[%s18671_s9 + $0x3f0] ss:$8 sps:$4 sm:$0xff]   ;;  %v15122_v62 = vld [vmem:[%s18671_s9 + $0x404] ss:$8 sps:$4 sm:$0xff]  }
 0xace   :  { %9257 = vmatprep.subr.bf16.mxu0 %v15044_v63  ;;  %v15120_v63 = vld [vmem:[%s18671_s9 + $0x400] ss:$8 sps:$4 sm:$0xff]  }
 0xad0   :  { %8887 = vmatpush1.bf16.msra.mxu1 %v15039_v3  ;;  %v15125_v3 = vld [vmem:[%s18671_s9 + $0x414] ss:$8 sps:$4 sm:$0xff]  }
 0xad1   :  { %9258 = vmatpush1.bf16.msra.mxu0 %v15042_v17  ;;  %8888 = vmatprep.subr.bf16.mxu1 %v15047_v33  ;;  %v15123_v17 = vld [vmem:[%s18671_s9 + $0x410] ss:$8 sps:$4 sm:$0xff]  }
 0xad2   :  { %9259 = vmatprep.subr.bf16.mxu0 %v15050_v10 }
 0xad4   :  { %8889 = vmatpush1.bf16.msra.mxu1 %v15045_v41 }
 0xad5   :  { %9260 = vmatpush1.bf16.msra.mxu0 %v15048_v19  ;;  %8890 = vmatprep.subr.bf16.mxu1 %v15053_v11 }
 0xad6   :  { %9261 = vmatprep.subr.bf16.mxu0 %v15056_v13 }
 0xad8   :  { %8891 = vmatpush1.bf16.msra.mxu1 %v15051_v51 }
 0xad9   :  { %9262 = vmatpush1.bf16.msra.mxu0 %v15054_v1  ;;  %8892 = vmatprep.subr.bf16.mxu1 %v15059_v5  ;;  %v15127_v5 = vld [vmem:[#allocation11] sm:$0xff]  }
 0xada   :  { %9263 = vmatprep.subr.bf16.mxu0 %v15062_v40  ;;  %v15128_v40 = vld [vmem:[#allocation11 + $0x8] sm:$0xff]  }
 0xadc   :  { %8893 = vmatpush1.bf16.msra.mxu1 %v15057_v23  ;;  %v15130_v23 = vld [vmem:[#allocation11 + $0x10] sm:$0xff]  }
 0xadd   :  { %9264 = vmatpush1.bf16.msra.mxu0 %v15060_v25  ;;  %8894 = vmatprep.subr.bf16.mxu1 %v15065_v36 }
 0xade   :  { %9265 = vmatprep.subr.bf16.mxu0 %v15068_v58 }
 0xae0   :  { %8895 = vmatpush1.bf16.msra.mxu1 %v15063_v2 }
 0xae1   :  { %9266 = vmatpush1.bf16.msra.mxu0 %v15066_v32  ;;  %8896 = vmatprep.subr.bf16.mxu1 %v15071_v48  ;;  %v15132_v32 = vld [vmem:[#allocation11 + $0x18] sm:$0xff]  }
 0xae2   :  { %9267 = vmatprep.subr.bf16.mxu0 %v15074_v45  ;;  %v15134_v45 = vld [vmem:[#allocation11 + $0x20] sm:$0xff]  }
 0xae4   :  { %8897 = vmatpush1.bf16.msra.mxu1 %v15069_v55  ;;  %v15136_v55 = vld [vmem:[#allocation11 + $0x28] sm:$0xff]  }
 0xae5   :  { %9268 = vmatpush1.bf16.msra.mxu0 %v15072_v18  ;;  %8898 = vmatprep.subr.bf16.mxu1 %v15077_v49  ;;  %v15138_v18 = vld [vmem:[#allocation11 + $0x30] sm:$0xff]   ;;  %v15140_v49 = vld [vmem:[#allocation11 + $0x38] sm:$0xff]  }
 0xae6   :  { %9269 = vmatprep.subr.bf16.mxu0 %v15080_v37  ;;  %v15142_v37 = vld [vmem:[#allocation11 + $0x40] sm:$0xff]  }
 0xae8   :  { %8899 = vmatpush1.bf16.msra.mxu1 %v15075_v61  ;;  %v15144_v61 = vld [vmem:[#allocation11 + $0x48] sm:$0xff]  }
 0xae9   :  { %9270 = vmatpush1.bf16.msra.mxu0 %v15078_v34  ;;  %8900 = vmatprep.subr.bf16.mxu1 %v15083_v52 }
 0xaea   :  { %9271 = vmatprep.subr.bf16.mxu0 %v15086_v4 }
 0xaec   :  { %8901 = vmatpush1.bf16.msra.mxu1 %v15081_v6 }
 0xaed   :  { %9272 = vmatpush1.bf16.msra.mxu0 %v15084_v54  ;;  %8902 = vmatprep.subr.bf16.mxu1 %v15089_v42 }
 0xaee   :  { %9273 = vmatprep.subr.bf16.mxu0 %v15092_v15 }
 0xaf0   :  { %8903 = vmatpush1.bf16.msra.mxu1 %v15087_v7 }
 0xaf1   :  { %9274 = vmatpush1.bf16.msra.mxu0 %v15090_v21  ;;  %8904 = vmatprep.subr.bf16.mxu1 %v15095_v14 }
 0xaf2   :  { %9275 = vmatprep.subr.bf16.mxu0 %v15098_v22 }
 0xaf4   :  { %8905 = vmatpush1.bf16.msra.mxu1 %v15093_v39  ;;  %v9329_v39 = vld [vmem:[#allocation10] sm:$0x3] }
 0xaf5   :  { %9276 = vmatpush1.bf16.msra.mxu0 %v15096_v50  ;;  %8906 = vmatprep.subr.bf16.mxu1 %v15101_v12  ;;  %v9334_v56 = vrot.slane %v9329_v39, %v17451_v24 }
 0xaf6   :  { %9675 = vmatprep.subr.bf16.mxu0 %v15880_v28 }
 0xaf8   :  { %8907 = vmatpush1.bf16.msra.mxu1 %v15099_v8  ;;  %9278 = vmatmul.mubr.bf16.vlgmr.msra.gmra.mrb[124].mxu0 %v9013_v27 }
 0xaf9   :  { %8908 = vmatprep.subr.bf16.mxu1 %v15104_v20  ;;  %9676 = vmatpush1.bf16.msra.mxu0 %v15127_v5  ;;  %v9338_v20 = vrot.slane %v9329_v39, %v17456_v26  ;;  %v15137_v5 = vld [vmem:[#allocation11 + $0x80] sm:$0xff]   ;;  %v15152_v39 = vld [vmem:[#allocation11 + $0xc8] sm:$0xff]  }
 0xafa   :  { %9677 = vmatprep.subr.bf16.mxu0 %v15880_v28 }
 0xafc   :  { %8909 = vmatpush1.bf16.msra.mxu1 %v15102_v43 }
 0xafd   :  { %8910 = vmatprep.subr.bf16.mxu1 %v15107_v0  ;;  %9678 = vmatpush1.bf16.msra.mxu0 %v15128_v40  ;;  %v15139_v40 = vld [vmem:[#allocation11 + $0x88] sm:$0xff]  }
 0xafe   :  { %9679 = vmatprep.subr.bf16.mxu0 %v15880_v28 }
 0xb00   :  { %8911 = vmatpush1.bf16.msra.mxu1 %v15105_v57 }
 0xb01   :  { %9286 = vmatprep.subr.bf16.mxu1 %v15110_v46  ;;  %9680 = vmatpush1.bf16.msra.mxu0 %v15130_v23  ;;  %v15141_v23 = vld [vmem:[#allocation11 + $0x90] sm:$0xff]  }
 0xb02   :  { %9681 = vmatprep.subr.bf16.mxu0 %v15880_v28 }
 0xb03   :  { %8913 = vmatmul.mubr.bf16.vlgmr.msra.gmra.mrb[164].mxu1 %v17844_v60  ;;  %v15119_v60 = vld [vmem:[%s18671_s9 + $0x3f4] ss:$8 sps:$4 sm:$0xff]   ;;  %s12056_s9 = sshll.u32 %s15883_s27, 4  ;;  %s12057_s9 = int_to_ptr.vmem [resolvable:$true] %s12056_s9 }
 0xb04   :  { %9287 = vmatpush1.bf16.msra.mxu1 %v15108_v35  ;;  %9318 = vmatprep.mubr.bf16.mxu1 %v15880_v28  ;;  %s15803_s30 = scalar_lea.vmem %s12057_s9, 32  ;;  %p15808_p5 = scmp.lt.s32.totalorder %s12057_s9, %s12057_s9 }
 0xb05   :  { %9288 = vmatprep.subr.bf16.mxu1 %v15113_v44  ;;  %9682 = vmatpush1.bf16.msra.mxu0 %v15132_v32  ;;  %v15149_v32 = vld [vmem:[#allocation11 + $0xb0] sm:$0xff]   ;;  %p15804_p4 = scmp.ne.s32.totalorder %s12057_s9, %s15803_s30  ;;  %p15809_p6 = scmp.lt.s32.totalorder %s15803_s30, %s15803_s30 }
 0xb06   :  { %9683 = vmatprep.subr.bf16.mxu0 %v15880_v28 }
 0xb07   :  { %p15810_p7 = por %p15809_p6, %p15808_p5 }
 0xb08   :  { %9289 = vmatpush1.bf16.msra.mxu1 %v15111_v53 }
 0xb09   :  { %9290 = vmatprep.subr.bf16.mxu1 %v15116_v29  ;;  %9684 = vmatpush1.bf16.msra.mxu0 %v15134_v45  ;;  %p15811_p8 = pnand %p15810_p7, %p15804_p4 }
 0xb0a   :  { %9685 = vmatprep.subr.bf16.mxu0 %v15880_v28 }
 0xb0c   :  { %9291 = vmatpush1.bf16.msra.mxu1 %v15114_v38 }
 0xb0d   :  { %9292 = vmatprep.subr.bf16.mxu1 %v15119_v60  ;;  %9686 = vmatpush1.bf16.msra.mxu0 %v15136_v55 }
 0xb0e   :  { %9687 = vmatprep.subr.bf16.mxu0 %v15880_v28 }
 0xb10   :  { %9293 = vmatpush1.bf16.msra.mxu1 %v15117_v47 }
 0xb11   :  { %9294 = vmatprep.subr.bf16.mxu1 %v15122_v62  ;;  %9688 = vmatpush1.bf16.msra.mxu0 %v15138_v18 }
 0xb12   :  { %9689 = vmatprep.subr.bf16.mxu0 %v15880_v28 }
 0xb14   :  { %9295 = vmatpush1.bf16.msra.mxu1 %v15120_v63 }
 0xb15   :  { %9296 = vmatprep.subr.bf16.mxu1 %v15125_v3  ;;  %9690 = vmatpush1.bf16.msra.mxu0 %v15140_v49 }
 0xb16   :  { %9691 = vmatprep.subr.bf16.mxu0 %v15880_v28 }
 0xb18   :  { %9297 = vmatpush1.bf16.msra.mxu1 %v15123_v17 }
 0xb19   :  { %9692 = vmatpush1.bf16.msra.mxu0 %v15142_v37 }
 0xb1a   :  { %9693 = vmatprep.subr.bf16.mxu0 %v15880_v28 }
 0xb1b   :  { %13300 = vmatmul.mubr.msk.bf16.vlgmr.msra.gmra.mrb[168].mxu1 %vm8571_vm1, %v17899_v59 }
 0xb1c   :  { %9406 = vmatprep.mubr.bf16.mxu1 %v15880_v28 }
 0xb1d   :  { %9694 = vmatpush1.bf16.msra.mxu0 %v15144_v61 }
 0xb1e   :  { %9695 = vmatprep.subr.bf16.mxu0 %v15880_v28 }
 0xb7e   :  { %v8609_v33 = vpop.f32.mrb[156].mxu1 }
 0xb7f   :  { %v8611_v10 = vpop.f32.mrb[157].mxu1 }
 0xb80   :  { %v8613_v41 = vpop.f32.mrb[158].mxu1 }
 0xb81   :  { %v8614_v19 = vpop.f32.mrb[159].mxu1 }
 0xb82   :  { %v15126_v19 = vld [vmem:[%s18673_s11] sm:$0x1f]   ;;  %s12070_s11 = sshll.u32 %s15884_s5, 4  ;;  %s12071_s11 = int_to_ptr.vmem [resolvable:$true] %s12070_s11 }
 0xb8b   :  { %v8955_v11 = vpop.f32.mrb[120].mxu0 }
 0xb8c   :  { %v8957_v13 = vpop.f32.mrb[121].mxu0 }
 0xb8d   :  { %v8959_v51 = vpop.f32.mrb[122].mxu0 }
 0xb8e   :  { %v8960_v1 = vpop.f32.mrb[123].mxu0  ;;  %v15133_v51 = vld [vmem:[#allocation11 + $0x70] sm:$0xff]  }
 0xb8f   :  { %v15135_v1 = vld [vmem:[#allocation11 + $0x78] sm:$0xff]  }
 0xb96   :  { %v8650_v59 = vpop.f32.mrb[160].mxu1 }
 0xb97   :  { %v8651_v25 = vadd.f32 %v8650_v59, %v8609_v33  ;;  %v8652_v36 = vpop.f32.mrb[161].mxu1  ;;  %v15143_v59 = vld [vmem:[#allocation11 + $0x98] sm:$0xff]  }
 0xb98   :  { %v8653_v58 = vadd.f32 %v8652_v36, %v8611_v10  ;;  %v8654_v2 = vpop.f32.mrb[162].mxu1  ;;  %v15146_v36 = vld [vmem:[#allocation11 + $0x50] sm:$0xff]  }
 0xb99   :  { %v8655_v48 = vpop.f32.mrb[163].mxu1  ;;  %9696 = vmatpush1.bf16.msra.mxu0 %v15146_v36  ;;  %v15148_v2 = vld [vmem:[#allocation11 + $0x58] sm:$0xff]   ;;  %v15201_v36 = vld [vmem:[%s18676_s14 + $0xc] ss:$24 sps:$4 sm:$0xff]  }
 0xb9a   :  { %9697 = vmatprep.subr.bf16.mxu0 %v15880_v28  ;;  %v15150_v48 = vld [vmem:[#allocation11 + $0xb8] sm:$0xff]  }
 0xb9d   :  { %9698 = vmatpush1.bf16.msra.mxu0 %v15148_v2 }
 0xbcb   :  { %v9279_v34 = vpop.f32.mrb[124].mxu0 }
 0xbcc   :  { %v9281_v52 = vpop.f32.mrb[125].mxu0 }
 0xbcd   :  { %v9283_v4 = vpop.f32.mrb[126].mxu0 }
 0xbce   :  { %v9284_v6 = vpop.f32.mrb[127].mxu0 }
 0xbd6   :  { %v8914_v54 = vpop.f32.mrb[164].mxu1 }
 0xbd7   :  { %v8915_v42 = vadd.f32 %v8914_v54, %v8651_v25  ;;  %v8916_v15 = vpop.f32.mrb[165].mxu1  ;;  %v15145_v25 = vld [vmem:[#allocation11 + $0xa0] sm:$0xff]  }
 0xbd8   :  { %v8917_v7 = vadd.f32 %v8916_v15, %v8653_v58  ;;  %v8918_v21 = vpop.f32.mrb[166].mxu1  ;;  %v15147_v58 = vld [vmem:[#allocation11 + $0xa8] sm:$0xff]  }
 0xbd9   :  { %v8956_v14 = vadd.f32 %v8955_v11, %v8915_v42  ;;  %v8919_v22 = vpop.f32.mrb[167].mxu1  ;;  %v15129_v11 = vld [vmem:[#allocation11 + $0x60] sm:$0xff]  }
 0xbda   :  { %v8958_v16 = vadd.f32 %v8957_v13, %v8917_v7  ;;  %v15131_v13 = vld [vmem:[#allocation11 + $0x68] sm:$0xff]  }
 0xbee   :  { %v9320_v50 = vpop.f32.mrb[168].mxu1 }
 0xbef   :  { %v9321_v12 = vadd.f32 %v9320_v50, %v9279_v34  ;;  %v9322_v8 = vpop.f32.mrb[169].mxu1  ;;  %v15153_v50 = vld [vmem:[#allocation11 + $0xd0] sm:$0xff]  }
 0xbf0   :  { %v9323_v9 = vadd.f32 %v9322_v8, %v9281_v52  ;;  %v9324_v27 = vpop.f32.mrb[170].mxu1  ;;  %v15156_v8 = vld [vmem:[#allocation11 + $0xe8] sm:$0xff]  }
 0xbf1   :  { %v9327_v43 = vadd.f32 %v9321_v12, %v8956_v14  ;;  %v9325_v0 = vpop.f32.mrb[171].mxu1  ;;  %v15151_v14 = vld [vmem:[#allocation11 + $0xc0] sm:$0xff]   ;;  %v15154_v12 = vld [vmem:[#allocation11 + $0xd8] sm:$0xff]  }
 0xbf2   :  { %v9328_v57 = vadd.f32 %v9323_v9, %v8958_v16  ;;  %v15157_v9 = vld [vmem:[#allocation11 + $0xf0] sm:$0xff]   ;;  %v15159_v27 = vld [vmem:[#allocation11 + $0x100] sm:$0xff]  }
 0xbf3   :  { %v9341_v46 = vadd.f32 %v9334_v56, %v9327_v43  ;;  %v15155_v56 = vld [vmem:[#allocation11 + $0xe0] sm:$0xff]   ;;  %v15160_v43 = vld [vmem:[#allocation11 + $0x108] sm:$0xff]   ;;  %v15161_v0 = vld [vmem:[#allocation11 + $0x110] sm:$0xff]  }
 0xbf4   :  { %v9342_v35 = vadd.f32 %v9338_v20, %v9328_v57  ;;  %v15158_v20 = vld [vmem:[#allocation11 + $0xf8] sm:$0xff]  }
 0xbf5   :  { %v9345_v44 = vmin.f32 %v9341_v46, 0.0  ;;  %vm9343_vm12 = vcmp.gt.f32.partialorder %v9341_v46, 0.0  ;;  %v15162_v57 = vld [vmem:[#allocation11 + $0x118] sm:$0xff]  }
 0xbf6   :  { %v9346_v53 = vmin.f32 %v9342_v35, 0.0  ;;  %vm9344_vm7 = vcmp.gt.f32.partialorder %v9342_v35, 0.0 }
 0xbf7   :  { %v9347_v29 = vmul.f32 1.442695, %v9345_v44  ;;  %v15168_v44 = vld [vmem:[%s18676_s14 + $0x14] ss:$24 sps:$4 sm:$0xff]  }
 0xbf8   :  { %v9349_v38 = vmul.f32 1.442695, %v9346_v53  ;;  %v15163_v53 = vld [vmem:[%s18676_s14] ss:$24 sps:$4 sm:$0xff]  }
 0xbf9   :  { %15533 = vpow2.f32 %v9347_v29  ;;  %v15166_v29 = vld [vmem:[%s18676_s14 + $0x10] ss:$24 sps:$4 sm:$0xff]  }
 0xbfa   :  { %15535 = vpow2.f32 %v9349_v38  ;;  %v15171_v38 = vld [vmem:[%s18676_s14 + $0x34] ss:$24 sps:$4 sm:$0xff]  }
 0xc03   :  { %v15534_v60 = vpop.eup %15533 }
 0xc04   :  { %v15536_v47 = vpop.eup %15535  ;;  %v13301_v62 = vadd.f32 -1.0, %v15534_v60  ;;  %v15174_v60 = vld [vmem:[%s18676_s14 + $0x44] ss:$24 sps:$4 sm:$0xff]  }
 0xc05   :  { %v13302_v63 = vadd.f32 -1.0, %v15536_v47  ;;  %v15169_v47 = vld [vmem:[%s18676_s14 + $0x30] ss:$24 sps:$4 sm:$0xff]  }
 0xc06   :  { %v9353_v3 = vsel %vm9343_vm12, %v9341_v46, %v13301_v62  ;;  %v15172_v62 = vld [vmem:[%s18676_s14 + $0x40] ss:$24 sps:$4 sm:$0xff]  }
 0xc07   :  { %v9354_v17 = vsel %vm9344_vm7, %v9342_v35, %v13302_v63  ;;  %v9357_v33 = vpack.c.bf16 %v9353_v3, %v9353_v3  ;;  %v15165_v35 = vld [vmem:[%s18676_s14 + $0x4] ss:$24 sps:$4 sm:$0xff]   ;;  %v15180_v3 = vld [vmem:[%s18676_s14 + $0x74] ss:$24 sps:$4 sm:$0xff]  }
 0xc08   :  { %v9358_v10 = vpack.c.bf16 %v9354_v17, %v9354_v17  ;;  %10098 = vmatprep.subr.bf16.mxu0 %v15165_v35  ;;  %v15177_v63 = vld [vmem:[%s18676_s14 + $0x64] ss:$24 sps:$4 sm:$0xff]   ;;  %v15175_v17 = vld [vmem:[%s18676_s14 + $0x60] ss:$24 sps:$4 sm:$0xff]  }
 0xc09   :  { %v9369_v41 = vsel %vm925_vm2, %v9357_v33, 0  ;;  %v15178_v33 = vld [vmem:[%s18676_s14 + $0x70] ss:$24 sps:$4 sm:$0xff]   ;;  %v15222_v35 = vld [vmem:[%s18676_s14 + $0x1bc] ss:$24 sps:$4 sm:$0xff]  }
 0xc0a   :  { %13304 = vmatprep.subr.msk.bf16.mxu1 %vm925_vm2, %v9358_v10  ;;  %vm9557_vm2 = vcmask 523264   ;;  %v15183_v10 = vld [vmem:[%s18676_s14 + $0x94] ss:$24 sps:$4 sm:$0xff]  }
 0xc0b   :  { %9375 = vmatpush1.bf16.msra.mxu1 %v9369_v41  ;;  %v15186_v41 = vld [vmem:[%s18676_s14 + $0xa4] ss:$24 sps:$4 sm:$0xff]  }
 0xc0c   :  { %9561 = vmatprep.subr.bf16.mxu1 %v15880_v28 }
 0xc0e   :  { %13305 = vmatmul.mubr.msk.bf16.vlgmr.msra.gmra.mrb[172].mxu1 %vm9364_vm8, %v15126_v19  ;;  %v15181_v19 = vld [vmem:[%s18676_s14 + $0x90] ss:$24 sps:$4 sm:$0xff]  }
 0xc0f   :  { %9562 = vmatpush1.bf16.msra.mxu1 %v15129_v11  ;;  %v15184_v11 = vld [vmem:[%s18676_s14 + $0xa0] ss:$24 sps:$4 sm:$0xff]  }
 0xc10   :  { %9563 = vmatprep.subr.bf16.mxu1 %v15880_v28 }
 0xc13   :  { %9564 = vmatpush1.bf16.msra.mxu1 %v15131_v13  ;;  %v15189_v13 = vld [vmem:[%s18676_s14 + $0xc4] ss:$24 sps:$4 sm:$0xff]  }
 0xc14   :  { %9565 = vmatprep.subr.bf16.mxu1 %v15880_v28 }
 0xc17   :  { %9566 = vmatpush1.bf16.msra.mxu1 %v15133_v51  ;;  %v15192_v51 = vld [vmem:[%s18676_s14 + $0xd4] ss:$24 sps:$4 sm:$0xff]  }
 0xc18   :  { %9567 = vmatprep.subr.bf16.mxu1 %v15880_v28 }
 0xc1b   :  { %9568 = vmatpush1.bf16.msra.mxu1 %v15135_v1  ;;  %v15187_v1 = vld [vmem:[%s18676_s14 + $0xc0] ss:$24 sps:$4 sm:$0xff]  }
 0xc1c   :  { %9569 = vmatprep.subr.bf16.mxu1 %v15880_v28 }
 0xc1f   :  { %9570 = vmatpush1.bf16.msra.mxu1 %v15137_v5  ;;  %v15190_v5 = vld [vmem:[%s18676_s14 + $0xd0] ss:$24 sps:$4 sm:$0xff]  }
 0xc20   :  { %9571 = vmatprep.subr.bf16.mxu1 %v15880_v28 }
 0xc23   :  { %9572 = vmatpush1.bf16.msra.mxu1 %v15139_v40  ;;  %v15195_v40 = vld [vmem:[%s18676_s14 + $0xf4] ss:$24 sps:$4 sm:$0xff]  }
 0xc24   :  { %9573 = vmatprep.subr.bf16.mxu1 %v15880_v28 }
 0xc27   :  { %9574 = vmatpush1.bf16.msra.mxu1 %v15141_v23  ;;  %v15198_v23 = vld [vmem:[%s18676_s14 + $0x104] ss:$24 sps:$4 sm:$0xff]  }
 0xc28   :  { %9575 = vmatprep.subr.bf16.mxu1 %v15880_v28 }
 0xc2b   :  { %9576 = vmatpush1.bf16.msra.mxu1 %v15143_v59  ;;  %v15193_v59 = vld [vmem:[%s18676_s14 + $0xf0] ss:$24 sps:$4 sm:$0xff]  }
 0xc2c   :  { %9577 = vmatprep.subr.bf16.mxu1 %v15880_v28 }
 0xc2f   :  { %9578 = vmatpush1.bf16.msra.mxu1 %v15145_v25  ;;  %v15196_v25 = vld [vmem:[%s18676_s14 + $0x100] ss:$24 sps:$4 sm:$0xff]  }
 0xc30   :  { %9579 = vmatprep.subr.bf16.mxu1 %v15880_v28 }
 0xc33   :  { %9580 = vmatpush1.bf16.msra.mxu1 %v15147_v58  ;;  %v15204_v58 = vld [vmem:[%s18676_s14 + $0x12c] ss:$24 sps:$4 sm:$0xff]  }
 0xc34   :  { %9581 = vmatprep.subr.bf16.mxu1 %v15880_v28 }
 0xc37   :  { %9582 = vmatpush1.bf16.msra.mxu1 %v15149_v32 }
 0xc38   :  { %9583 = vmatprep.subr.bf16.mxu1 %v15880_v28 }
 0xc3b   :  { %9584 = vmatpush1.bf16.msra.mxu1 %v15150_v48 }
 0xc3c   :  { %9820 = vmatprep.subr.bf16.mxu1 %v15880_v28 }
 0xce1   :  { %v9408_v45 = vpop.f32.mrb[172].mxu1 }
 0xce2   :  { %v9410_v55 = vpop.f32.mrb[173].mxu1 }
 0xce3   :  { %v9412_v18 = vpop.f32.mrb[174].mxu1 }
 0xce4   :  { %v9417_v49 = vpack.c.bf16 %v9412_v18, %v9408_v45  ;;  %v9414_v37 = vpop.f32.mrb[175].mxu1 }
 0xce5   :  { %v9418_v61 = vpack.c.bf16 %v9414_v37, %v9410_v55 }
 0xce6   :  { %v9469_v34 = vshrl.u32 %v9417_v49, 16  ;;  %v9472_v52 = vshll.u32 %v9417_v49, 16  ;;  %v9742_v46 = vrot.slane %v9417_v49, 3 }
 0xce7   :  { %v9477_v4 = vshrl.u32 %v9418_v61, 16  ;;  %v9480_v6 = vshll.u32 %v9418_v61, 16  ;;  %13331 = vmatprep.mubr.msk.bf16.mxu0 %vm9557_vm2, %v9418_v61  ;;  %v9743_v16 = vrot.slane %v9418_v61, 3 }
 0xce8   :  { %v9471_v54 = vrot.slane %v9469_v34, 1  ;;  %v9474_v42 = vrot.slane %v9472_v52, 2  ;;  %9708 = vmatmul.mubr.bf16.vlgmr.msra.gmra.mrb[128].mxu0 %v9417_v49  ;;  %v13345_v52 = vld [vmem:[#allocation13] ss:$0 sm:$0xff] }
 0xce9   :  { %v9479_v15 = vrot.slane %v9477_v4, 1  ;;  %v9482_v7 = vrot.slane %v9480_v6, 2  ;;  %10130 = vmatprep.mubr.bf16.mxu0 %v15880_v28  ;;  %10099 = vmatpush1.bf16.msra.mxu0 %v15163_v53  ;;  %v15220_v53 = vld [vmem:[%s18676_s14 + $0x1b8] ss:$24 sps:$4 sm:$0xff]  }
 0xcea   :  { %v9475_v22 = vor.u32 %v9474_v42, %v9471_v54  ;;  %10100 = vmatprep.subr.bf16.mxu0 %v15171_v38  ;;  %v15228_v38 = vld [vmem:[%s18676_s14 + $0x1ec] ss:$24 sps:$4 sm:$0xff]  }
 0xceb   :  { %v9483_v21 = vor.u32 %v9482_v7, %v9479_v15 }
 0xced   :  { %13318 = vmatprep.mubr.msk.bf16.mxu1 %vm9557_vm2, %v9483_v21  ;;  %10101 = vmatpush1.bf16.msra.mxu0 %v15169_v47  ;;  %v15226_v47 = vld [vmem:[%s18676_s14 + $0x1e8] ss:$24 sps:$4 sm:$0xff]  }
 0xcee   :  { %9594 = vmatmul.mubr.bf16.vlgmr.msra.gmra.mrb[176].mxu1 %v9475_v22  ;;  %10102 = vmatprep.subr.bf16.mxu0 %v15177_v63  ;;  %v15234_v63 = vld [vmem:[%s18676_s14 + $0x21c] ss:$24 sps:$4 sm:$0xff]  }
 0xcef   :  { %9821 = vmatpush1.bf16.msra.mxu1 %v15151_v14  ;;  %13344 = vmatprep.mubr.msk.bf16.mxu1 %vm9557_vm2, %v9743_v16 }
 0xcf0   :  { %9822 = vmatprep.subr.bf16.mxu1 %v15880_v28 }
 0xcf1   :  { %10103 = vmatpush1.bf16.msra.mxu0 %v15175_v17  ;;  %v15232_v17 = vld [vmem:[%s18676_s14 + $0x218] ss:$24 sps:$4 sm:$0xff]  }
 0xcf2   :  { %10104 = vmatprep.subr.bf16.mxu0 %v15183_v10  ;;  %v15240_v10 = vld [vmem:[%s18676_s14 + $0x244] ss:$24 sps:$4 sm:$0xff]  }
 0xcf3   :  { %9823 = vmatpush1.bf16.msra.mxu1 %v15152_v39  ;;  %v15199_v39 = vld [vmem:[%s18676_s14 + $0x8] ss:$24 sps:$4 sm:$0xff]  }
 0xcf4   :  { %9824 = vmatprep.subr.bf16.mxu1 %v15880_v28 }
 0xcf5   :  { %10105 = vmatpush1.bf16.msra.mxu0 %v15181_v19  ;;  %v15238_v19 = vld [vmem:[%s18676_s14 + $0x240] ss:$24 sps:$4 sm:$0xff]  }
 0xcf6   :  { %10106 = vmatprep.subr.bf16.mxu0 %v15189_v13  ;;  %v15243_v13 = vld [vmem:[%s18676_s14 + $0x154] ss:$24 sps:$4 sm:$0xff]  }
 0xcf7   :  { %9825 = vmatpush1.bf16.msra.mxu1 %v15153_v50  ;;  %v15202_v50 = vld [vmem:[%s18676_s14 + $0x128] ss:$24 sps:$4 sm:$0xff]  }
 0xcf8   :  { %9826 = vmatprep.subr.bf16.mxu1 %v15880_v28 }
 0xcf9   :  { %10107 = vmatpush1.bf16.msra.mxu0 %v15187_v1  ;;  %v15241_v1 = vld [vmem:[%s18676_s14 + $0x150] ss:$24 sps:$4 sm:$0xff]  }
 0xcfa   :  { %10108 = vmatprep.subr.bf16.mxu0 %v15195_v40  ;;  %v15249_v40 = vld [vmem:[%s18676_s14 + $0x184] ss:$24 sps:$4 sm:$0xff]  }
 0xcfb   :  { %9827 = vmatpush1.bf16.msra.mxu1 %v15154_v12 }
 0xcfc   :  { %9828 = vmatprep.subr.bf16.mxu1 %v15880_v28 }
 0xcfd   :  { %10109 = vmatpush1.bf16.msra.mxu0 %v15193_v59  ;;  %v15247_v59 = vld [vmem:[%s18676_s14 + $0x180] ss:$24 sps:$4 sm:$0xff]  }
 0xcfe   :  { %10139 = vmatprep.subr.bf16.mxu0 %v15201_v36  ;;  %v15255_v36 = vld [vmem:[%s18676_s14 + $0x1b4] ss:$24 sps:$4 sm:$0xff]  }
 0xcff   :  { %9829 = vmatpush1.bf16.msra.mxu1 %v15155_v56  ;;  %v15207_v56 = vld [vmem:[%s18676_s14 + $0x3c] ss:$24 sps:$4 sm:$0xff]  }
 0xd00   :  { %9830 = vmatprep.subr.bf16.mxu1 %v15880_v28 }
 0xd03   :  { %9831 = vmatpush1.bf16.msra.mxu1 %v15156_v8  ;;  %v15210_v8 = vld [vmem:[%s18676_s14 + $0x15c] ss:$24 sps:$4 sm:$0xff]  }
 0xd04   :  { %9832 = vmatprep.subr.bf16.mxu1 %v15880_v28 }
 0xd07   :  { %9833 = vmatpush1.bf16.msra.mxu1 %v15157_v9  ;;  %v15205_v9 = vld [vmem:[%s18676_s14 + $0x38] ss:$24 sps:$4 sm:$0xff]  }
 0xd08   :  { %9834 = vmatprep.subr.bf16.mxu1 %v15880_v28 }
 0xd0b   :  { %9835 = vmatpush1.bf16.msra.mxu1 %v15158_v20  ;;  %v15208_v20 = vld [vmem:[%s18676_s14 + $0x158] ss:$24 sps:$4 sm:$0xff]  }
 0xd0c   :  { %9836 = vmatprep.subr.bf16.mxu1 %v15880_v28 }
 0xd0f   :  { %9837 = vmatpush1.bf16.msra.mxu1 %v15159_v27  ;;  %v15213_v27 = vld [vmem:[%s18676_s14 + $0x6c] ss:$24 sps:$4 sm:$0xff]  }
 0xd10   :  { %9838 = vmatprep.subr.bf16.mxu1 %v15880_v28 }
 0xd13   :  { %9839 = vmatpush1.bf16.msra.mxu1 %v15160_v43  ;;  %v15216_v43 = vld [vmem:[%s18676_s14 + $0x18c] ss:$24 sps:$4 sm:$0xff]  }
 0xd14   :  { %9840 = vmatprep.subr.bf16.mxu1 %v15880_v28 }
 0xd17   :  { %9841 = vmatpush1.bf16.msra.mxu1 %v15161_v0  ;;  %v15211_v0 = vld [vmem:[%s18676_s14 + $0x68] ss:$24 sps:$4 sm:$0xff]  }
 0xd18   :  { %9842 = vmatprep.subr.bf16.mxu1 %v15880_v28 }
 0xd1b   :  { %9843 = vmatpush1.bf16.msra.mxu1 %v15162_v57  ;;  %v15214_v57 = vld [vmem:[%s18676_s14 + $0x188] ss:$24 sps:$4 sm:$0xff]  }
 0xd1c   :  { %10180 = vmatprep.subr.bf16.mxu1 %v15168_v44  ;;  %v15217_v44 = vld [vmem:[%s18676_s14 + $0x98] ss:$24 sps:$4 sm:$0xff]  }
 0xd1e   :  { %9853 = vmatmul.mubr.bf16.vlgmr.msra.gmra.mrb[180].mxu1 %v9742_v46  ;;  %v15219_v46 = vld [vmem:[%s18676_s14 + $0x9c] ss:$24 sps:$4 sm:$0xff]  }
 0xd1f   :  { %10212 = vmatprep.mubr.bf16.mxu1 %v15880_v28  ;;  %10181 = vmatpush1.bf16.msra.mxu1 %v15166_v29  ;;  %v15225_v29 = vld [vmem:[%s18676_s14 + $0xcc] ss:$24 sps:$4 sm:$0xff]  }
 0xd20   :  { %10182 = vmatprep.subr.bf16.mxu1 %v15174_v60  ;;  %v15223_v60 = vld [vmem:[%s18676_s14 + $0xc8] ss:$24 sps:$4 sm:$0xff]  }
 0xd23   :  { %10183 = vmatpush1.bf16.msra.mxu1 %v15172_v62  ;;  %v15231_v62 = vld [vmem:[%s18676_s14 + $0xfc] ss:$24 sps:$4 sm:$0xff]  }
 0xd24   :  { %10184 = vmatprep.subr.bf16.mxu1 %v15180_v3  ;;  %v15229_v3 = vld [vmem:[%s18676_s14 + $0xf8] ss:$24 sps:$4 sm:$0xff]  }
 0xd27   :  { %10185 = vmatpush1.bf16.msra.mxu1 %v15178_v33  ;;  %v15237_v33 = vld [vmem:[%s18676_s14 + $0x124] ss:$24 sps:$4 sm:$0xff]  }
 0xd28   :  { %10186 = vmatprep.subr.bf16.mxu1 %v15186_v41  ;;  %v15235_v41 = vld [vmem:[%s18676_s14 + $0x120] ss:$24 sps:$4 sm:$0xff]  }
 0xd2b   :  { %10187 = vmatpush1.bf16.msra.mxu1 %v15184_v11 }
 0xd2c   :  { %10188 = vmatprep.subr.bf16.mxu1 %v15192_v51  ;;  %v15246_v51 = vld [vmem:[%s18676_s14 + $0x274] ss:$24 sps:$4 sm:$0xff]  }
 0xd2f   :  { %10189 = vmatpush1.bf16.msra.mxu1 %v15190_v5  ;;  %v15244_v5 = vld [vmem:[%s18676_s14 + $0x270] ss:$24 sps:$4 sm:$0xff]  }
 0xd30   :  { %10190 = vmatprep.subr.bf16.mxu1 %v15198_v23  ;;  %v15252_v23 = vld [vmem:[%s18676_s14 + $0x2a4] ss:$24 sps:$4 sm:$0xff]  }
 0xd33   :  { %10191 = vmatpush1.bf16.msra.mxu1 %v15196_v25  ;;  %v15250_v25 = vld [vmem:[%s18676_s14 + $0x2a0] ss:$24 sps:$4 sm:$0xff]  }
 0xd34   :  { %10532 = vmatprep.subr.bf16.mxu1 %v15204_v58  ;;  %v15258_v58 = vld [vmem:[%s18676_s14 + $0x2d4] ss:$24 sps:$4 sm:$0xff]  }
 0xdbb   :  { %v9709_v2 = vpop.f32.mrb[128].mxu0 }
 0xdbc   :  { %v9711_v32 = vpop.f32.mrb[129].mxu0 }
 0xdbd   :  { %v9712_v48 = vpop.f32.mrb[130].mxu0  ;;  %v15256_v32 = vld [vmem:[%s18676_s14 + $0x2d0] ss:$24 sps:$4 sm:$0xff]  }
 0xdbe   :  { %v9713_v45 = vpop.f32.mrb[131].mxu0  ;;  %v15261_v48 = vld [vmem:[%s18676_s14 + $0x1e4] ss:$24 sps:$4 sm:$0xff]  }
 0xdbf   :  { %v15264_v45 = vld [vmem:[%s18676_s14 + $0x304] ss:$24 sps:$4 sm:$0xff]  }
 0xdc1   :  { %v9595_v55 = vpop.f32.mrb[176].mxu1 }
 0xdc2   :  { %v9710_v18 = vadd.f32 %v9709_v2, %v9595_v55  ;;  %v9597_v49 = vpop.f32.mrb[177].mxu1  ;;  %v15253_v2 = vld [vmem:[%s18676_s14 + $0x1b0] ss:$24 sps:$4 sm:$0xff]   ;;  %v15259_v55 = vld [vmem:[%s18676_s14 + $0x1e0] ss:$24 sps:$4 sm:$0xff]  }
 0xdc3   :  { %v9598_v37 = vpop.f32.mrb[178].mxu1  ;;  %v15267_v49 = vld [vmem:[%s18676_s14 + $0x214] ss:$24 sps:$4 sm:$0xff]  }
 0xdc4   :  { %v9599_v61 = vpop.f32.mrb[179].mxu1  ;;  %v15270_v37 = vld [vmem:[%s18676_s14 + $0x334] ss:$24 sps:$4 sm:$0xff]  }
 0xdc5   :  { %v15265_v61 = vld [vmem:[%s18676_s14 + $0x210] ss:$24 sps:$4 sm:$0xff]  }
 0xdf1   :  { %v9854_v34 = vpop.f32.mrb[180].mxu1 }
 0xdf2   :  { %v9860_v4 = vadd.f32 %v9854_v34, %v9710_v18  ;;  %v9856_v6 = vpop.f32.mrb[181].mxu1  ;;  %v15262_v18 = vld [vmem:[%s18676_s14 + $0x300] ss:$24 sps:$4 sm:$0xff]   ;;  %v15268_v34 = vld [vmem:[%s18676_s14 + $0x330] ss:$24 sps:$4 sm:$0xff]  }
 0xdf3   :  { %v9857_v54 = vpop.f32.mrb[182].mxu1  ;;  %v15271_v6 = vld [vmem:[%s18676_s14 + $0x130] ss:$24 sps:$4 sm:$0xff]  }
 0xdf4   :  { %v9868_v42 = vadd.f32 %v13345_v52, %v9860_v4  ;;  %v9858_v15 = vpop.f32.mrb[183].mxu1  ;;  %v15273_v52 = vld [vmem:[%s18676_s14 + $0x134] ss:$24 sps:$4 sm:$0xff]   ;;  %v15274_v54 = vld [vmem:[%s18676_s14 + $0x250] ss:$24 sps:$4 sm:$0xff]  }
 0xdf5   :  { %v15276_v4 = vld [vmem:[%s18676_s14 + $0x254] ss:$24 sps:$4 sm:$0xff]   ;;  %v15279_v15 = vld [vmem:[%s18676_s14 + $0x164] ss:$24 sps:$4 sm:$0xff]  }
 0xdf6   :  { %v9870_v7 = vmin.f32 %v9868_v42, 0.0  ;;  %vm9869_vm10 = vcmp.gt.f32.partialorder %v9868_v42, 0.0 }
 0xdf8   :  { %v9871_v21 = vmul.f32 1.442695, %v9870_v7  ;;  %v15282_v7 = vld [vmem:[%s18676_s14 + $0x284] ss:$24 sps:$4 sm:$0xff]  }
 0xdfa   :  { %15537 = vpow2.f32 %v9871_v21  ;;  %v15277_v21 = vld [vmem:[%s18676_s14 + $0x160] ss:$24 sps:$4 sm:$0xff]  }
 0xe04   :  { %v15538_v14 = vpop.eup %15537 }
 0xe05   :  { %v13346_v22 = vadd.f32 -1.0, %v15538_v14  ;;  %v15280_v14 = vld [vmem:[%s18676_s14 + $0x280] ss:$24 sps:$4 sm:$0xff]  }
 0xe07   :  { %v9874_v16 = vsel %vm9869_vm10, %v9868_v42, %v13346_v22  ;;  %v15285_v22 = vld [vmem:[%s18676_s14 + $0x194] ss:$24 sps:$4 sm:$0xff]  }
 0xe08   :  { %v18260_v12 = vpack.c.bf16 %v9874_v16, %v9874_v16  ;;  %9876 = vst.msk [vmem:[#allocation21] sm:$0x7] %vm9875_vm9, %v9874_v16  ;;  %v15288_v16 = vld [vmem:[%s18676_s14 + $0x2b4] ss:$24 sps:$4 sm:$0xff]  }
 0xe0a   :  { %13383 = vmatmul.mubr.msk.bf16.vlgmr.msra.gmra.mrb[132].mxu0 %vm8571_vm1, %v18260_v12  ;;  %13385 = vmatmul.mubr.msk.bf16.vlgmr.msra.gmra.mrb[184].mxu1 %vm8571_vm1, %v18260_v12  ;;  %v18341_v11 = vshrl.u32 %v18260_v12, 16  ;;  %v18422_v42 = vrot.slane %v18260_v12, 1 }
 0xe0b   :  { %10140 = vmatpush1.bf16.msra.mxu0 %v15199_v39  ;;  %10533 = vmatpush1.bf16.msra.mxu1 %v15202_v50  ;;  %v15283_v39 = vld [vmem:[%s18676_s14 + $0x190] ss:$24 sps:$4 sm:$0xff]  }
 0xe0c   :  { %10141 = vmatprep.subr.bf16.mxu0 %v15207_v56  ;;  %10534 = vmatprep.subr.bf16.mxu1 %v15210_v8  ;;  %v15286_v50 = vld [vmem:[%s18676_s14 + $0x2b0] ss:$24 sps:$4 sm:$0xff]   ;;  %v15294_v56 = vld [vmem:[%s18676_s14 + $0x2e4] ss:$24 sps:$4 sm:$0xff]   ;;  %v15289_v8 = vld [vmem:[%s18676_s14 + $0x1c0] ss:$24 sps:$4 sm:$0xff]  }
 0xe0d   :  { %10171 = vmatprep.mubr.bf16.mxu0 %v15880_v28  ;;  %10564 = vmatprep.mubr.bf16.mxu1 %v15880_v28 }
 0xe0f   :  { %10142 = vmatpush1.bf16.msra.mxu0 %v15205_v9  ;;  %10535 = vmatpush1.bf16.msra.mxu1 %v15208_v20  ;;  %v15292_v9 = vld [vmem:[%s18676_s14 + $0x2e0] ss:$24 sps:$4 sm:$0xff]   ;;  %v15297_v20 = vld [vmem:[%s18676_s14 + $0x1f4] ss:$24 sps:$4 sm:$0xff]  }
 0xe10   :  { %10143 = vmatprep.subr.bf16.mxu0 %v15213_v27  ;;  %10536 = vmatprep.subr.bf16.mxu1 %v15216_v43  ;;  %v15300_v27 = vld [vmem:[%s18676_s14 + $0x314] ss:$24 sps:$4 sm:$0xff]   ;;  %v15295_v43 = vld [vmem:[%s18676_s14 + $0x1f0] ss:$24 sps:$4 sm:$0xff]  }
 0xe13   :  { %10144 = vmatpush1.bf16.msra.mxu0 %v15211_v0  ;;  %10537 = vmatpush1.bf16.msra.mxu1 %v15214_v57  ;;  %v15298_v0 = vld [vmem:[%s18676_s14 + $0x310] ss:$24 sps:$4 sm:$0xff]   ;;  %v15303_v57 = vld [vmem:[%s18676_s14 + $0x224] ss:$24 sps:$4 sm:$0xff]  }
 0xe14   :  { %10145 = vmatprep.subr.bf16.mxu0 %v15219_v46  ;;  %10538 = vmatprep.subr.bf16.mxu1 %v15222_v35  ;;  %v15306_v46 = vld [vmem:[%s18676_s14 + $0x344] ss:$24 sps:$4 sm:$0xff]   ;;  %v18484_v35 = vld [vmem:[#allocation2] sm:$0x3] }
 0xe17   :  { %10146 = vmatpush1.bf16.msra.mxu0 %v15217_v44  ;;  %10539 = vmatpush1.bf16.msra.mxu1 %v15220_v53  ;;  %v15301_v44 = vld [vmem:[%s18676_s14 + $0x220] ss:$24 sps:$4 sm:$0xff]  }
 0xe18   :  { %10147 = vmatprep.subr.bf16.mxu0 %v15225_v29  ;;  %10540 = vmatprep.subr.bf16.mxu1 %v15228_v38  ;;  %v15304_v53 = vld [vmem:[%s18676_s14 + $0x340] ss:$24 sps:$4 sm:$0xff]   ;;  %v15309_v29 = vld [vmem:[%s18676_s14 + $0x24c] ss:$24 sps:$4 sm:$0xff]  }
 0xe19   :  { %v15333_v38 = vld [vmem:[#allocation14 + $0xc] ss:$24 sps:$4 sm:$0xff]  }
 0xe1b   :  { %10148 = vmatpush1.bf16.msra.mxu0 %v15223_v60  ;;  %10541 = vmatpush1.bf16.msra.mxu1 %v15226_v47  ;;  %v11065_v60 = vrot.slane %v18484_v35, %v17456_v26  ;;  %v15307_v47 = vld [vmem:[%s18676_s14 + $0x248] ss:$24 sps:$4 sm:$0xff]  }
 0xe1c   :  { %10149 = vmatprep.subr.bf16.mxu0 %v15231_v62  ;;  %10542 = vmatprep.subr.bf16.mxu1 %v15234_v63  ;;  %v15312_v62 = vld [vmem:[%s18676_s14 + $0x27c] ss:$24 sps:$4 sm:$0xff]   ;;  %v15331_v63 = vld [vmem:[#allocation14 + $0x8] ss:$24 sps:$4 sm:$0xff]  }
 0xe1f   :  { %10150 = vmatpush1.bf16.msra.mxu0 %v15229_v3  ;;  %10543 = vmatpush1.bf16.msra.mxu1 %v15232_v17  ;;  %v15339_v3 = vld [vmem:[#allocation14 + $0x3c] ss:$24 sps:$4 sm:$0xff]   ;;  %v18503_v17 = vpack.c.bf16 %v11065_v60, %v11065_v60 }
 0xe20   :  { %10491 = vmatprep.subr.bf16.mxu0 %v15237_v33  ;;  %10884 = vmatprep.subr.bf16.mxu1 %v15240_v10  ;;  %v15310_v33 = vld [vmem:[%s18676_s14 + $0x278] ss:$24 sps:$4 sm:$0xff]   ;;  %v15315_v10 = vld [vmem:[%s18676_s14 + $0x2ac] ss:$24 sps:$4 sm:$0xff]  }
 0xe21   :  { %v15378_v60 = vld [vmem:[#allocation14 + $0x1b4] ss:$24 sps:$4 sm:$0xff]  }
 0xe22   :  { %13384 = vmatmul.mubr.msk.bf16.vlgmr.msra.gmra.mrb[136].mxu0 %vm8571_vm1, %v18260_v12  ;;  %13459 = vmatmul.mubr.msk.bf16.vlgmr.msra.gmra.mrb[188].mxu1 %vm8571_vm1, %v18341_v11  ;;  %v15291_v12 = vld [vmem:[%s18676_s14 + $0x1c4] ss:$24 sps:$4 sm:$0xff]  }
 0xe23   :  { %10492 = vmatpush1.bf16.msra.mxu0 %v15235_v41  ;;  %10885 = vmatpush1.bf16.msra.mxu1 %v15238_v19  ;;  %v15337_v41 = vld [vmem:[#allocation14 + $0x38] ss:$24 sps:$4 sm:$0xff]   ;;  %v15345_v19 = vld [vmem:[#allocation14 + $0x6c] ss:$24 sps:$4 sm:$0xff]  }
 0xe24   :  { %10493 = vmatprep.subr.bf16.mxu0 %v15243_v13  ;;  %10886 = vmatprep.subr.bf16.mxu1 %v15246_v51  ;;  %v15343_v13 = vld [vmem:[#allocation14 + $0x68] ss:$24 sps:$4 sm:$0xff]   ;;  %v15351_v51 = vld [vmem:[#allocation14 + $0x9c] ss:$24 sps:$4 sm:$0xff]  }
 0xe25   :  { %10523 = vmatprep.mubr.bf16.mxu0 %v15880_v28  ;;  %10916 = vmatprep.mubr.bf16.mxu1 %v15880_v28 }
 0xe27   :  { %10494 = vmatpush1.bf16.msra.mxu0 %v15241_v1  ;;  %10887 = vmatpush1.bf16.msra.mxu1 %v15244_v5  ;;  %v15316_v1 = vld [vmem:[%s18676_s14 + $0x2d8] ss:$24 sps:$4 sm:$0xff]   ;;  %v15321_v5 = vld [vmem:[%s18676_s14 + $0x30c] ss:$24 sps:$4 sm:$0xff]  }
 0xe28   :  { %10495 = vmatprep.subr.bf16.mxu0 %v15249_v40  ;;  %10888 = vmatprep.subr.bf16.mxu1 %v15252_v23  ;;  %v15349_v40 = vld [vmem:[#allocation14 + $0x98] ss:$24 sps:$4 sm:$0xff]   ;;  %v15357_v23 = vld [vmem:[#allocation14 + $0xcc] ss:$24 sps:$4 sm:$0xff]  }
 0xe2b   :  { %10496 = vmatpush1.bf16.msra.mxu0 %v15247_v59  ;;  %10889 = vmatpush1.bf16.msra.mxu1 %v15250_v25  ;;  %v15319_v59 = vld [vmem:[%s18676_s14 + $0x308] ss:$24 sps:$4 sm:$0xff]   ;;  %v15324_v25 = vld [vmem:[%s18676_s14 + $0x33c] ss:$24 sps:$4 sm:$0xff]  }
 0xe2c   :  { %10497 = vmatprep.subr.bf16.mxu0 %v15255_v36  ;;  %10890 = vmatprep.subr.bf16.mxu1 %v15258_v58  ;;  %v15355_v36 = vld [vmem:[#allocation14 + $0xc8] ss:$24 sps:$4 sm:$0xff]   ;;  %v15363_v58 = vld [vmem:[#allocation14 + $0xfc] ss:$24 sps:$4 sm:$0xff]  }
 0xe2f   :  { %10498 = vmatpush1.bf16.msra.mxu0 %v15253_v2  ;;  %10891 = vmatpush1.bf16.msra.mxu1 %v15256_v32  ;;  %v15322_v2 = vld [vmem:[%s18676_s14 + $0x338] ss:$24 sps:$4 sm:$0xff]   ;;  %v15327_v32 = vld [vmem:[#allocation14 + $0x4] ss:$24 sps:$4 sm:$0xff]  }
 0xe30   :  { %10499 = vmatprep.subr.bf16.mxu0 %v15261_v48  ;;  %10892 = vmatprep.subr.bf16.mxu1 %v15264_v45  ;;  %v15361_v48 = vld [vmem:[#allocation14 + $0xf8] ss:$24 sps:$4 sm:$0xff]   ;;  %v15369_v45 = vld [vmem:[#allocation14 + $0x12c] ss:$24 sps:$4 sm:$0xff]  }
 0xe33   :  { %10500 = vmatpush1.bf16.msra.mxu0 %v15259_v55  ;;  %10893 = vmatpush1.bf16.msra.mxu1 %v15262_v18  ;;  %v15325_v55 = vld [vmem:[#allocation14] ss:$24 sps:$4 sm:$0xff]   ;;  %v15330_v18 = vld [vmem:[#allocation14 + $0x34] ss:$24 sps:$4 sm:$0xff]  }
 0xe34   :  { %10501 = vmatprep.subr.bf16.mxu0 %v15267_v49  ;;  %10894 = vmatprep.subr.bf16.mxu1 %v15270_v37  ;;  %v15367_v49 = vld [vmem:[#allocation14 + $0x128] ss:$24 sps:$4 sm:$0xff]   ;;  %v15375_v37 = vld [vmem:[#allocation14 + $0x15c] ss:$24 sps:$4 sm:$0xff]  }
 0xe37   :  { %10502 = vmatpush1.bf16.msra.mxu0 %v15265_v61  ;;  %10895 = vmatpush1.bf16.msra.mxu1 %v15268_v34  ;;  %v15328_v61 = vld [vmem:[#allocation14 + $0x30] ss:$24 sps:$4 sm:$0xff]   ;;  %v15336_v34 = vld [vmem:[#allocation14 + $0x64] ss:$24 sps:$4 sm:$0xff]  }
 0xe38   :  { %10573 = vmatprep.subr.bf16.mxu0 %v15273_v52  ;;  %10966 = vmatprep.subr.bf16.mxu1 %v15276_v4  ;;  %v15373_v52 = vld [vmem:[#allocation14 + $0x158] ss:$24 sps:$4 sm:$0xff]   ;;  %v15381_v4 = vld [vmem:[#allocation14 + $0x18c] ss:$24 sps:$4 sm:$0xff]  }
 0xe3a   :  { %13458 = vmatmul.mubr.msk.bf16.vlgmr.msra.gmra.mrb[140].mxu0 %vm8571_vm1, %v18341_v11  ;;  %13533 = vmatmul.mubr.msk.bf16.vlgmr.msra.gmra.mrb[192].mxu1 %vm8571_vm1, %v18422_v42 }
 0xe3b   :  { %10574 = vmatpush1.bf16.msra.mxu0 %v15271_v6  ;;  %10967 = vmatpush1.bf16.msra.mxu1 %v15274_v54  ;;  %v15334_v6 = vld [vmem:[#allocation14 + $0x60] ss:$24 sps:$4 sm:$0xff]   ;;  %v15342_v54 = vld [vmem:[#allocation14 + $0x94] ss:$24 sps:$4 sm:$0xff]  }
 0xe3c   :  { %10575 = vmatprep.subr.bf16.mxu0 %v15279_v15  ;;  %10968 = vmatprep.subr.bf16.mxu1 %v15282_v7  ;;  %v15379_v15 = vld [vmem:[#allocation14 + $0x188] ss:$24 sps:$4 sm:$0xff]   ;;  %v15387_v7 = vld [vmem:[#allocation14 + $0x1bc] ss:$24 sps:$4 sm:$0xff]  }
 0xe3d   :  { %10605 = vmatprep.mubr.bf16.mxu0 %v15880_v28  ;;  %10998 = vmatprep.mubr.bf16.mxu1 %v15880_v28 }
 0xe3f   :  { %10576 = vmatpush1.bf16.msra.mxu0 %v15277_v21  ;;  %10969 = vmatpush1.bf16.msra.mxu1 %v15280_v14  ;;  %v15348_v21 = vld [vmem:[#allocation14 + $0xc4] ss:$24 sps:$4 sm:$0xff]   ;;  %v15385_v14 = vld [vmem:[#allocation14 + $0x1b8] ss:$24 sps:$4 sm:$0xff]  }
 0xe40   :  { %10577 = vmatprep.subr.bf16.mxu0 %v15285_v22  ;;  %10970 = vmatprep.subr.bf16.mxu1 %v15288_v16  ;;  %v15393_v22 = vld [vmem:[#allocation14 + $0x1ec] ss:$24 sps:$4 sm:$0xff]   ;;  %v15346_v16 = vld [vmem:[#allocation14 + $0xc0] ss:$24 sps:$4 sm:$0xff]  }
 0xe43   :  { %10578 = vmatpush1.bf16.msra.mxu0 %v15283_v39  ;;  %10971 = vmatpush1.bf16.msra.mxu1 %v15286_v50  ;;  %v15354_v39 = vld [vmem:[#allocation14 + $0xf4] ss:$24 sps:$4 sm:$0xff]   ;;  %v15391_v50 = vld [vmem:[#allocation14 + $0x1e8] ss:$24 sps:$4 sm:$0xff]  }
 0xe44   :  { %10579 = vmatprep.subr.bf16.mxu0 %v15291_v12  ;;  %10972 = vmatprep.subr.bf16.mxu1 %v15294_v56  ;;  %v15399_v12 = vld [vmem:[#allocation14 + $0x21c] ss:$24 sps:$4 sm:$0xff]   ;;  %v15352_v56 = vld [vmem:[#allocation14 + $0xf0] ss:$24 sps:$4 sm:$0xff]  }
 0xe47   :  { %10580 = vmatpush1.bf16.msra.mxu0 %v15289_v8  ;;  %10973 = vmatpush1.bf16.msra.mxu1 %v15292_v9  ;;  %v15360_v8 = vld [vmem:[#allocation14 + $0x124] ss:$24 sps:$4 sm:$0xff]   ;;  %v15397_v9 = vld [vmem:[#allocation14 + $0x218] ss:$24 sps:$4 sm:$0xff]  }
 0xe48   :  { %10581 = vmatprep.subr.bf16.mxu0 %v15297_v20  ;;  %10974 = vmatprep.subr.bf16.mxu1 %v15300_v27  ;;  %v15405_v20 = vld [vmem:[#allocation14 + $0x24c] ss:$24 sps:$4 sm:$0xff]   ;;  %v15358_v27 = vld [vmem:[#allocation14 + $0x120] ss:$24 sps:$4 sm:$0xff]  }
 0xe4b   :  { %10582 = vmatpush1.bf16.msra.mxu0 %v15295_v43  ;;  %10975 = vmatpush1.bf16.msra.mxu1 %v15298_v0  ;;  %v15366_v43 = vld [vmem:[#allocation14 + $0x154] ss:$24 sps:$4 sm:$0xff]   ;;  %v15403_v0 = vld [vmem:[#allocation14 + $0x248] ss:$24 sps:$4 sm:$0xff]  }
 0xe4c   :  { %10583 = vmatprep.subr.bf16.mxu0 %v15303_v57  ;;  %10976 = vmatprep.subr.bf16.mxu1 %v15306_v46  ;;  %v15411_v57 = vld [vmem:[#allocation14 + $0x27c] ss:$24 sps:$4 sm:$0xff]   ;;  %v15364_v46 = vld [vmem:[#allocation14 + $0x150] ss:$24 sps:$4 sm:$0xff]  }
 0xe4f   :  { %10584 = vmatpush1.bf16.msra.mxu0 %v15301_v44  ;;  %10977 = vmatpush1.bf16.msra.mxu1 %v15304_v53  ;;  %v15372_v44 = vld [vmem:[#allocation14 + $0x184] ss:$24 sps:$4 sm:$0xff]   ;;  %v15409_v53 = vld [vmem:[#allocation14 + $0x278] ss:$24 sps:$4 sm:$0xff]  }
 0xe50   :  { %10925 = vmatprep.subr.bf16.mxu0 %v15309_v29  ;;  %11687 = vmatprep.subr.bf16.mxu1 %v15333_v38  ;;  %v15417_v29 = vld [vmem:[#allocation14 + $0x2ac] ss:$24 sps:$4 sm:$0xff]   ;;  %v15370_v38 = vld [vmem:[#allocation14 + $0x180] ss:$24 sps:$4 sm:$0xff]  }
 0xe52   :  { %13460 = vmatmul.mubr.msk.bf16.vlgmr.msra.gmra.mrb[144].mxu0 %vm8571_vm1, %v18341_v11  ;;  %13535 = vmatmul.mubr.msk.bf16.vlgmr.msra.gmra.mrb[196].mxu1 %vm8571_vm1, %v18422_v42  ;;  %v15313_v11 = vld [vmem:[%s18676_s14 + $0x2a8] ss:$24 sps:$4 sm:$0xff]  }
 0xe53   :  { %10926 = vmatpush1.bf16.msra.mxu0 %v15307_v47  ;;  %10957 = vmatprep.mubr.bf16.mxu0 %v15880_v28  ;;  %v15318_v28 = vld [vmem:[%s18676_s14 + $0x2dc] ss:$24 sps:$4 sm:$0xff]   ;;  %v15415_v47 = vld [vmem:[#allocation14 + $0x2a8] ss:$24 sps:$4 sm:$0xff]  }
 0xe54   :  { %10927 = vmatprep.subr.bf16.mxu0 %v15312_v62  ;;  %11688 = vmatpush1.bf16.msra.mxu1 %v15331_v63  ;;  %v15423_v62 = vld [vmem:[#allocation14 + $0x2dc] ss:$24 sps:$4 sm:$0xff]   ;;  %v15376_v63 = vld [vmem:[#allocation14 + $0x1b0] ss:$24 sps:$4 sm:$0xff]  }
 0xe55   :  { %11689 = vmatprep.subr.bf16.mxu1 %v15339_v3  ;;  %11719 = vmatprep.mubr.bf16.mxu1 %v18503_v17  ;;  %v11061_v3 = vrot.slane %v18484_v35, %v17451_v24 }
 0xe57   :  { %10928 = vmatpush1.bf16.msra.mxu0 %v15310_v33  ;;  %v15384_v33 = vld [vmem:[#allocation14 + $0x1e4] ss:$24 sps:$4 sm:$0xff]  }
 0xe58   :  { %10929 = vmatprep.subr.bf16.mxu0 %v15315_v10  ;;  %11690 = vmatpush1.bf16.msra.mxu1 %v15337_v41  ;;  %v15421_v10 = vld [vmem:[#allocation14 + $0x2d8] ss:$24 sps:$4 sm:$0xff]  }
 0xe59   :  { %11691 = vmatprep.subr.bf16.mxu1 %v15345_v19  ;;  %v15382_v41 = vld [vmem:[#allocation14 + $0x1e0] ss:$24 sps:$4 sm:$0xff]   ;;  %v18543_v19 = vpack.c.bf16 %v11061_v3, %v11061_v3  ;;  %v15468_v3 = vld [vmem:[#allocation14 + $0x2e4] ss:$24 sps:$4 sm:$0xff]  }
 0xe5b   :  { %10930 = vmatpush1.bf16.msra.mxu0 %v15313_v11  ;;  %v15390_v11 = vld [vmem:[#allocation14 + $0x214] ss:$24 sps:$4 sm:$0xff]  }
 0xe5c   :  { %10931 = vmatprep.subr.bf16.mxu0 %v15318_v28  ;;  %11692 = vmatpush1.bf16.msra.mxu1 %v15343_v13  ;;  %v15388_v28 = vld [vmem:[#allocation14 + $0x210] ss:$24 sps:$4 sm:$0xff]   ;;  %v15396_v13 = vld [vmem:[#allocation14 + $0x244] ss:$24 sps:$4 sm:$0xff]  }
 0xe5d   :  { %11693 = vmatprep.subr.bf16.mxu1 %v15351_v51  ;;  %v15394_v51 = vld [vmem:[#allocation14 + $0x240] ss:$24 sps:$4 sm:$0xff]  }
 0xe5f   :  { %10932 = vmatpush1.bf16.msra.mxu0 %v15316_v1  ;;  %v15402_v1 = vld [vmem:[#allocation14 + $0x274] ss:$24 sps:$4 sm:$0xff]  }
 0xe60   :  { %10933 = vmatprep.subr.bf16.mxu0 %v15321_v5  ;;  %11694 = vmatpush1.bf16.msra.mxu1 %v15349_v40  ;;  %v15400_v5 = vld [vmem:[#allocation14 + $0x270] ss:$24 sps:$4 sm:$0xff]   ;;  %v15408_v40 = vld [vmem:[#allocation14 + $0x2a4] ss:$24 sps:$4 sm:$0xff]  }
 0xe61   :  { %11695 = vmatprep.subr.bf16.mxu1 %v15357_v23  ;;  %v15406_v23 = vld [vmem:[#allocation14 + $0x2a0] ss:$24 sps:$4 sm:$0xff]  }
 0xe63   :  { %10934 = vmatpush1.bf16.msra.mxu0 %v15319_v59  ;;  %v15414_v59 = vld [vmem:[#allocation14 + $0x2d4] ss:$24 sps:$4 sm:$0xff]  }
 0xe64   :  { %10935 = vmatprep.subr.bf16.mxu0 %v15324_v25  ;;  %11696 = vmatpush1.bf16.msra.mxu1 %v15355_v36  ;;  %v15412_v25 = vld [vmem:[#allocation14 + $0x2d0] ss:$24 sps:$4 sm:$0xff]   ;;  %v15420_v36 = vld [vmem:[#allocation14 + $0x14] ss:$24 sps:$4 sm:$0xff]  }
 0xe65   :  { %11697 = vmatprep.subr.bf16.mxu1 %v15363_v58  ;;  %v15418_v58 = vld [vmem:[#allocation14 + $0x10] ss:$24 sps:$4 sm:$0xff]  }
 0xe67   :  { %10936 = vmatpush1.bf16.msra.mxu0 %v15322_v2  ;;  %v15426_v2 = vld [vmem:[#allocation14 + $0x44] ss:$24 sps:$4 sm:$0xff]  }
 0xe68   :  { %11646 = vmatprep.subr.bf16.mxu0 %v15327_v32  ;;  %11698 = vmatpush1.bf16.msra.mxu1 %v15361_v48  ;;  %v15424_v32 = vld [vmem:[#allocation14 + $0x40] ss:$24 sps:$4 sm:$0xff]   ;;  %v15429_v48 = vld [vmem:[#allocation14 + $0x74] ss:$24 sps:$4 sm:$0xff]  }
 0xe69   :  { %11699 = vmatprep.subr.bf16.mxu1 %v15369_v45  ;;  %v15427_v45 = vld [vmem:[#allocation14 + $0x70] ss:$24 sps:$4 sm:$0xff]  }
 0xe6a   :  { %13534 = vmatmul.mubr.msk.bf16.vlgmr.msra.gmra.mrb[148].mxu0 %vm8571_vm1, %v18422_v42  ;;  %v15340_v42 = vld [vmem:[#allocation14 + $0x90] ss:$24 sps:$4 sm:$0xff]  }
 0xe6b   :  { %11647 = vmatpush1.bf16.msra.mxu0 %v15325_v55  ;;  %11678 = vmatprep.mubr.bf16.mxu0 %v18503_v17  ;;  %v15432_v55 = vld [vmem:[#allocation14 + $0xa4] ss:$24 sps:$4 sm:$0xff]  }
 0xe6c   :  { %11648 = vmatprep.subr.bf16.mxu0 %v15330_v18  ;;  %11700 = vmatpush1.bf16.msra.mxu1 %v15367_v49  ;;  %v15430_v18 = vld [vmem:[#allocation14 + $0xa0] ss:$24 sps:$4 sm:$0xff]   ;;  %v15435_v49 = vld [vmem:[#allocation14 + $0xd4] ss:$24 sps:$4 sm:$0xff]  }
 0xe6d   :  { %11701 = vmatprep.subr.bf16.mxu1 %v15375_v37  ;;  %v15433_v37 = vld [vmem:[#allocation14 + $0xd0] ss:$24 sps:$4 sm:$0xff]  }
 0xe6f   :  { %11649 = vmatpush1.bf16.msra.mxu0 %v15328_v61  ;;  %v15438_v61 = vld [vmem:[#allocation14 + $0x104] ss:$24 sps:$4 sm:$0xff]  }
 0xe70   :  { %11650 = vmatprep.subr.bf16.mxu0 %v15336_v34  ;;  %11702 = vmatpush1.bf16.msra.mxu1 %v15373_v52  ;;  %v15436_v34 = vld [vmem:[#allocation14 + $0x100] ss:$24 sps:$4 sm:$0xff]   ;;  %v15441_v52 = vld [vmem:[#allocation14 + $0x134] ss:$24 sps:$4 sm:$0xff]  }
 0xe71   :  { %11703 = vmatprep.subr.bf16.mxu1 %v15381_v4  ;;  %v15444_v4 = vld [vmem:[#allocation14 + $0x164] ss:$24 sps:$4 sm:$0xff]  }
 0xe73   :  { %11651 = vmatpush1.bf16.msra.mxu0 %v15334_v6  ;;  %v15442_v6 = vld [vmem:[#allocation14 + $0x160] ss:$24 sps:$4 sm:$0xff]  }
 0xe74   :  { %11652 = vmatprep.subr.bf16.mxu0 %v15342_v54  ;;  %11704 = vmatpush1.bf16.msra.mxu1 %v15379_v15  ;;  %v15447_v54 = vld [vmem:[#allocation14 + $0x194] ss:$24 sps:$4 sm:$0xff]   ;;  %v15445_v15 = vld [vmem:[#allocation14 + $0x190] ss:$24 sps:$4 sm:$0xff]  }
 0xe75   :  { %11705 = vmatprep.subr.bf16.mxu1 %v15387_v7  ;;  %v15450_v7 = vld [vmem:[#allocation14 + $0x1c4] ss:$24 sps:$4 sm:$0xff]  }
 0xe77   :  { %11653 = vmatpush1.bf16.msra.mxu0 %v15340_v42  ;;  %v15448_v42 = vld [vmem:[#allocation14 + $0x1c0] ss:$24 sps:$4 sm:$0xff]  }
 0xe78   :  { %11654 = vmatprep.subr.bf16.mxu0 %v15348_v21  ;;  %11706 = vmatpush1.bf16.msra.mxu1 %v15385_v14  ;;  %v15453_v21 = vld [vmem:[#allocation14 + $0x1f4] ss:$24 sps:$4 sm:$0xff]   ;;  %v15451_v14 = vld [vmem:[#allocation14 + $0x1f0] ss:$24 sps:$4 sm:$0xff]  }
 0xe79   :  { %11707 = vmatprep.subr.bf16.mxu1 %v15393_v22  ;;  %v15456_v22 = vld [vmem:[#allocation14 + $0x224] ss:$24 sps:$4 sm:$0xff]  }
 0xe7b   :  { %11655 = vmatpush1.bf16.msra.mxu0 %v15346_v16  ;;  %v15454_v16 = vld [vmem:[#allocation14 + $0x220] ss:$24 sps:$4 sm:$0xff]  }
 0xe7c   :  { %11656 = vmatprep.subr.bf16.mxu0 %v15354_v39  ;;  %11708 = vmatpush1.bf16.msra.mxu1 %v15391_v50  ;;  %v15459_v39 = vld [vmem:[#allocation14 + $0x254] ss:$24 sps:$4 sm:$0xff]   ;;  %v15882_v50 = vmov 1966171168  }
 0xe7d   :  { %11709 = vmatprep.subr.bf16.mxu1 %v15399_v12  ;;  %v10231_v12 = vunpack.c.l.s4 %v15882_v50 }
 0xe7f   :  { %11657 = vmatpush1.bf16.msra.mxu0 %v15352_v56  ;;  %v15457_v56 = vld [vmem:[#allocation14 + $0x250] ss:$24 sps:$4 sm:$0xff]  }
 0xe80   :  { %11658 = vmatprep.subr.bf16.mxu0 %v15360_v8  ;;  %11710 = vmatpush1.bf16.msra.mxu1 %v15397_v9  ;;  %v15462_v8 = vld [vmem:[#allocation14 + $0x284] ss:$24 sps:$4 sm:$0xff]   ;;  %v10232_v9 = vunpack.c.0.s8 %v10231_v12 }
 0xe81   :  { %11711 = vmatprep.subr.bf16.mxu1 %v15405_v20  ;;  %v15460_v20 = vld [vmem:[#allocation14 + $0x280] ss:$24 sps:$4 sm:$0xff]  }
 0xe83   :  { %11659 = vmatpush1.bf16.msra.mxu0 %v15358_v27  ;;  %v15465_v27 = vld [vmem:[#allocation14 + $0x2b4] ss:$24 sps:$4 sm:$0xff]  }
 0xe84   :  { %11660 = vmatprep.subr.bf16.mxu0 %v15366_v43  ;;  %11712 = vmatpush1.bf16.msra.mxu1 %v15403_v0  ;;  %v18549_v43 = vsub.s32 %v10232_v9, %v17408_v31 }
 0xe85   :  { %11713 = vmatprep.subr.bf16.mxu1 %v15411_v57 }
 0xe87   :  { %11661 = vmatpush1.bf16.msra.mxu0 %v15364_v46 }
 0xe88   :  { %11662 = vmatprep.subr.bf16.mxu0 %v15372_v44  ;;  %11714 = vmatpush1.bf16.msra.mxu1 %v15409_v53 }
 0xe89   :  { %11715 = vmatprep.subr.bf16.mxu1 %v15417_v29 }
 0xe8b   :  { %11663 = vmatpush1.bf16.msra.mxu0 %v15370_v38 }
 0xe8c   :  { %11664 = vmatprep.subr.bf16.mxu0 %v15378_v60  ;;  %11716 = vmatpush1.bf16.msra.mxu1 %v15415_v47  ;;  %v15463_v47 = vld [vmem:[#allocation14 + $0x2b0] ss:$24 sps:$4 sm:$0xff]  }
 0xe8d   :  { %11717 = vmatprep.subr.bf16.mxu1 %v15423_v62 }
 0xe8f   :  { %11665 = vmatpush1.bf16.msra.mxu0 %v15376_v63 }
 0xe90   :  { %11666 = vmatprep.subr.bf16.mxu0 %v15384_v33  ;;  %11718 = vmatpush1.bf16.msra.mxu1 %v15421_v10 }
 0xe93   :  { %11667 = vmatpush1.bf16.msra.mxu0 %v15382_v41  ;;  %11720 = vmatmul.mubr.bf16.vlgmr.msra.gmra.mrb[200].mxu1 %v18543_v19  ;;  %v15466_v41 = vld [vmem:[#allocation14 + $0x2e0] ss:$24 sps:$4 sm:$0xff]  }
 0xe94   :  { %11668 = vmatprep.subr.bf16.mxu0 %v15390_v11 }
 0xe97   :  { %11669 = vmatpush1.bf16.msra.mxu0 %v15388_v28 }
 0xe98   :  { %11670 = vmatprep.subr.bf16.mxu0 %v15396_v13 }
 0xe9b   :  { %11671 = vmatpush1.bf16.msra.mxu0 %v15394_v51 }
 0xe9c   :  { %11672 = vmatprep.subr.bf16.mxu0 %v15402_v1 }
 0xe9f   :  { %11673 = vmatpush1.bf16.msra.mxu0 %v15400_v5 }
 0xea0   :  { %11674 = vmatprep.subr.bf16.mxu0 %v15408_v40 }
 0xea3   :  { %11675 = vmatpush1.bf16.msra.mxu0 %v15406_v23 }
 0xea4   :  { %11676 = vmatprep.subr.bf16.mxu0 %v15414_v59 }
 0xea7   :  { %11677 = vmatpush1.bf16.msra.mxu0 %v15412_v25 }
 0xea8   :  { %11728 = vmatprep.subr.bf16.mxu0 %v15420_v36 }
 0xeaa   :  { %11679 = vmatmul.mubr.bf16.vlgmr.msra.gmra.mrb[152].mxu0 %v18543_v19 }
 0xeab   :  { %11729 = vmatpush1.bf16.msra.mxu0 %v15418_v58  ;;  %11760 = vmatprep.mubr.bf16.mxu0 %v18503_v17  ;;  %v15439_v17 = vld [vmem:[#allocation14 + $0x130] ss:$24 sps:$4 sm:$0xff]  }
 0xeac   :  { %11730 = vmatprep.subr.bf16.mxu0 %v15426_v2 }
 0xeaf   :  { %11731 = vmatpush1.bf16.msra.mxu0 %v15424_v32 }
 0xeb0   :  { %11732 = vmatprep.subr.bf16.mxu0 %v15429_v48 }
 0xeb3   :  { %11733 = vmatpush1.bf16.msra.mxu0 %v15427_v45 }
 0xeb4   :  { %11734 = vmatprep.subr.bf16.mxu0 %v15432_v55 }
 0xeb7   :  { %11735 = vmatpush1.bf16.msra.mxu0 %v15430_v18 }
 0xeb8   :  { %11736 = vmatprep.subr.bf16.mxu0 %v15435_v49 }
 0xebb   :  { %11737 = vmatpush1.bf16.msra.mxu0 %v15433_v37 }
 0xebc   :  { %11738 = vmatprep.subr.bf16.mxu0 %v15438_v61 }
 0xebf   :  { %11739 = vmatpush1.bf16.msra.mxu0 %v15436_v34 }
 0xec0   :  { %11740 = vmatprep.subr.bf16.mxu0 %v15441_v52 }
 0xec3   :  { %11741 = vmatpush1.bf16.msra.mxu0 %v15439_v17 }
 0xec4   :  { %11742 = vmatprep.subr.bf16.mxu0 %v15444_v4 }
 0xec7   :  { %11743 = vmatpush1.bf16.msra.mxu0 %v15442_v6 }
 0xec8   :  { %11744 = vmatprep.subr.bf16.mxu0 %v15447_v54 }
 0xecb   :  { %11745 = vmatpush1.bf16.msra.mxu0 %v15445_v15 }
 0xecc   :  { %11746 = vmatprep.subr.bf16.mxu0 %v15450_v7 }
 0xecf   :  { %11747 = vmatpush1.bf16.msra.mxu0 %v15448_v42 }
 0xed0   :  { %11748 = vmatprep.subr.bf16.mxu0 %v15453_v21 }
 0xed3   :  { %11749 = vmatpush1.bf16.msra.mxu0 %v15451_v14 }
 0xed4   :  { %11750 = vmatprep.subr.bf16.mxu0 %v15456_v22 }
 0xed7   :  { %11751 = vmatpush1.bf16.msra.mxu0 %v15454_v16 }
 0xed8   :  { %11752 = vmatprep.subr.bf16.mxu0 %v15459_v39 }
 0xedb   :  { %11753 = vmatpush1.bf16.msra.mxu0 %v15457_v56 }
 0xedc   :  { %11754 = vmatprep.subr.bf16.mxu0 %v15462_v8 }
 0xedd   :  { %v10132_v0 = vpop.f32.mrb[132].mxu0  ;;  %v10214_v57 = vpop.f32.mrb[184].mxu1 }
 0xede   :  { %v10134_v46 = vpop.f32.mrb[133].mxu0  ;;  %v10216_v44 = vpop.f32.mrb[185].mxu1 }
 0xedf   :  { %v10227_v53 = vcombine.low %v10132_v0, %v10134_v46  ;;  %v10229_v29 = vcombine.low %v10214_v57, %v10216_v44  ;;  %11755 = vmatpush1.bf16.msra.mxu0 %v15460_v20  ;;  %v10136_v38 = vpop.f32.mrb[134].mxu0  ;;  %v10218_v60 = vpop.f32.mrb[186].mxu1  ;;  %v9877_v20 = vld [vmem:[#allocation16] sm:$0x3f] }
 0xee0   :  { %v10137_v62 = vpop.f32.mrb[135].mxu0  ;;  %v10219_v63 = vpop.f32.mrb[187].mxu1  ;;  %11756 = vmatprep.subr.bf16.mxu0 %v15465_v27 }
 0xee1   :  { %v10236_v33 = vrot.slane %v10227_v53, %v18549_v43  ;;  %v10250_v10 = vrot.slane %v10229_v29, %v18549_v43 }
 0xee3   :  { %v10265_v31 = vrot.slane %v10250_v10, %v18549_v43  ;;  %11757 = vmatpush1.bf16.msra.mxu0 %v15463_v47 }
 0xee4   :  { %11758 = vmatprep.subr.bf16.mxu0 %v15468_v3 }
 0xee7   :  { %11759 = vmatpush1.bf16.msra.mxu0 %v15466_v41  ;;  %v15470_v41 = vld [vmem:[%s18680_s18] sm:$0xff]  }
 0xeea   :  { %11761 = vmatmul.mubr.bf16.vlgmr.msra.gmra.mrb[156].mxu0 %v18543_v19 }
 0xef5   :  { %v10173_v11 = vpop.f32.mrb[136].mxu0  ;;  %v10566_v28 = vpop.f32.mrb[188].mxu1 }
 0xef6   :  { %v10175_v13 = vpop.f32.mrb[137].mxu0  ;;  %v10568_v51 = vpop.f32.mrb[189].mxu1 }
 0xef7   :  { %v10228_v1 = vcombine.low %v10173_v11, %v10175_v13  ;;  %v10621_v5 = vcombine.low %v10566_v28, %v10568_v51  ;;  %v10177_v40 = vpop.f32.mrb[138].mxu0  ;;  %v10570_v23 = vpop.f32.mrb[190].mxu1  ;;  %v15471_v11 = vld [vmem:[%s18680_s18 + $0x48] sm:$0xff]   ;;  %v15473_v13 = vld [vmem:[%s18680_s18 + $0x50] sm:$0xff]  }
 0xef8   :  { %v10178_v59 = vpop.f32.mrb[139].mxu0  ;;  %v10571_v25 = vpop.f32.mrb[191].mxu1  ;;  %v15472_v28 = vld [vmem:[%s18680_s18 + $0x8] sm:$0xff]  }
 0xef9   :  { %v10243_v36 = vrot.slane %v10228_v1, %v18549_v43  ;;  %v10636_v58 = vrot.slane %v10621_v5, %v18549_v43  ;;  %v15474_v1 = vld [vmem:[%s18680_s18 + $0x10] sm:$0xff]   ;;  %v15475_v25 = vld [vmem:[%s18680_s18 + $0x58] sm:$0xff]  }
 0xefb   :  { %v10251_v2 = vcombine.low %v10236_v33, %v10243_v36 }
 0xefd   :  { %v10258_v32 = vrot.slane %v10251_v2, %v18549_v43  ;;  %v15477_v2 = vld [vmem:[%s18680_s18 + $0x60] sm:$0xff]  }
 0xeff   :  { %v10266_v48 = vcombine.low %v10258_v32, %v10265_v31  ;;  %v15469_v31 = vld [vmem:[%s18680_s18 + $0x40] sm:$0xff]  }
 0xf00   :  { %13811 = vmatprep.subr.bf16.mxu1 %v15469_v31  ;;  %v15478_v32 = vld [vmem:[%s18680_s18 + $0x20] sm:$0xff]  }
 0xf01   :  { %v10268_v57 = vadd.f32 %v10266_v48, %v9877_v20  ;;  %13812 = vmatpush3.bf16.msra.mxu1 %v15470_v41  ;;  %v15479_v48 = vld [vmem:[%s18680_s18 + $0x68] sm:$0xff]  }
 0xf02   :  { %13813 = vmatprep.subr.bf16.mxu1 %v15471_v11 }
 0xf05   :  { %13814 = vmatpush3.bf16.msra.mxu1 %v15472_v28 }
 0xf06   :  { %13815 = vmatprep.subr.bf16.mxu1 %v15473_v13 }
 0xf09   :  { %13816 = vmatpush3.bf16.msra.mxu1 %v15474_v1 }
 0xf0a   :  { %13817 = vmatprep.subr.bf16.mxu1 %v15475_v25 }
 0xf0d   :  { %v10525_v45 = vpop.f32.mrb[140].mxu0  ;;  %v10918_v19 = vpop.f32.mrb[192].mxu1 }
 0xf0e   :  { %v10527_v55 = vpop.f32.mrb[141].mxu0  ;;  %v10920_v18 = vpop.f32.mrb[193].mxu1 }
 0xf0f   :  { %v10620_v49 = vcombine.low %v10525_v45, %v10527_v55  ;;  %v11013_v37 = vcombine.low %v10918_v19, %v10920_v18  ;;  %v10529_v61 = vpop.f32.mrb[142].mxu0  ;;  %v10922_v34 = vpop.f32.mrb[194].mxu1  ;;  %v15480_v45 = vld [vmem:[%s18680_s18 + $0x28] sm:$0xff]   ;;  %v15481_v19 = vld [vmem:[%s18680_s18 + $0x70] sm:$0xff]   ;;  %v15483_v18 = vld [vmem:[%s18680_s18 + $0x78] sm:$0xff]  }
 0xf10   :  { %v10530_v52 = vpop.f32.mrb[143].mxu0  ;;  %v10923_v17 = vpop.f32.mrb[195].mxu1  ;;  %v15482_v55 = vld [vmem:[%s18680_s18 + $0x30] sm:$0xff]  }
 0xf11   :  { %v10629_v4 = vrot.slane %v10620_v49, %v18549_v43  ;;  %v11022_v6 = vrot.slane %v11013_v37, %v18549_v43  ;;  %v15484_v49 = vld [vmem:[%s18680_s18 + $0x38] sm:$0xff]  }
 0xf13   :  { %v10644_v54 = vcombine.low %v10629_v4, %v10636_v58  ;;  %v15476_v58 = vld [vmem:[%s18680_s18 + $0x18] sm:$0xff]  }
 0xf14   :  { %13818 = vmatpush3.bf16.msra.mxu1 %v15476_v58 }
 0xf15   :  { %v10651_v15 = vrot.slane %v10644_v54, %v18549_v43  ;;  %13819 = vmatprep.subr.bf16.mxu1 %v15477_v2 }
 0xf18   :  { %13820 = vmatpush3.bf16.msra.mxu1 %v15478_v32 }
 0xf19   :  { %13821 = vmatprep.subr.bf16.mxu1 %v15479_v48 }
 0xf1c   :  { %13822 = vmatpush3.bf16.msra.mxu1 %v15480_v45 }
 0xf1d   :  { %13823 = vmatprep.subr.bf16.mxu1 %v15481_v19 }
 0xf20   :  { %13824 = vmatpush3.bf16.msra.mxu1 %v15482_v55 }
 0xf21   :  { %13825 = vmatprep.subr.bf16.mxu1 %v15483_v18 }
 0xf24   :  { %13826 = vmatpush3.bf16.msra.mxu1 %v15484_v49 }
 0xf25   :  { %v10607_v7 = vpop.f32.mrb[144].mxu0  ;;  %v11000_v42 = vpop.f32.mrb[196].mxu1 }
 0xf26   :  { %v10609_v21 = vpop.f32.mrb[145].mxu0  ;;  %v11002_v14 = vpop.f32.mrb[197].mxu1 }
 0xf27   :  { %v10622_v22 = vcombine.low %v10607_v7, %v10609_v21  ;;  %v11015_v16 = vcombine.low %v11000_v42, %v11002_v14  ;;  %v10611_v39 = vpop.f32.mrb[146].mxu0  ;;  %v11004_v50 = vpop.f32.mrb[198].mxu1 }
 0xf28   :  { %v10612_v12 = vpop.f32.mrb[147].mxu0  ;;  %v11005_v56 = vpop.f32.mrb[199].mxu1  ;;  %v11056_v39 = vld [vmem:[#allocation17] sm:$0x3f] }
 0xf29   :  { %v10643_v8 = vrot.slane %v10622_v22, %v18549_v43  ;;  %v11036_v9 = vrot.slane %v11015_v16, %v18549_v43 }
 0xf2b   :  { %v10658_v27 = vrot.slane %v10643_v8, %v18549_v43  ;;  %v11051_v0 = vrot.slane %v11036_v9, %v18549_v43 }
 0xf2d   :  { %v10659_v46 = vcombine.low %v10651_v15, %v10658_v27 }
 0xf2f   :  { %v10661_v44 = vadd.f32 %v10659_v46, %v10268_v57 }
 0xf3d   :  { %v10959_v53 = vpop.f32.mrb[148].mxu0 }
 0xf3e   :  { %v10961_v29 = vpop.f32.mrb[149].mxu0 }
 0xf3f   :  { %v11014_v38 = vcombine.low %v10959_v53, %v10961_v29  ;;  %v10963_v60 = vpop.f32.mrb[150].mxu0 }
 0xf40   :  { %v10964_v47 = vpop.f32.mrb[151].mxu0 }
 0xf41   :  { %v11029_v62 = vrot.slane %v11014_v38, %v18549_v43 }
 0xf43   :  { %v11037_v63 = vcombine.low %v11022_v6, %v11029_v62 }
 0xf45   :  { %v11044_v3 = vrot.slane %v11037_v63, %v18549_v43 }
 0xf47   :  { %v11052_v33 = vcombine.low %v11044_v3, %v11051_v0 }
 0xf49   :  { %v18567_v10 = vadd.f32 %v11052_v33, %v10661_v44 }
 0xf4b   :  { %v11824_v56 = vrot.slane %v18567_v10, 2  ;;  %v11838_v47 = vrot.slane %v18567_v10, 4 }
 0xf66   :  { %v11721_v51 = vpop.f32.mrb[200].mxu1 }
 0xf67   :  { %v11723_v5 = vpop.f32.mrb[201].mxu1 }
 0xf68   :  { %v11776_v40 = vcombine.low %v11721_v51, %v11723_v5  ;;  %v11725_v23 = vpop.f32.mrb[202].mxu1 }
 0xf69   :  { %v11726_v59 = vpop.f32.mrb[203].mxu1 }
 0xf6a   :  { %v11791_v36 = vrot.slane %v11776_v40, %v18549_v43  ;;  %v11896_v40 = vld [vmem:[#allocation19] sm:$0x1] }
 0xf7d   :  { %v11680_v37 = vpop.f32.mrb[152].mxu0 }
 0xf7e   :  { %v11682_v61 = vpop.f32.mrb[153].mxu0 }
 0xf7f   :  { %v11775_v34 = vcombine.low %v11680_v37, %v11682_v61  ;;  %v11684_v52 = vpop.f32.mrb[154].mxu0 }
 0xf80   :  { %v11685_v17 = vpop.f32.mrb[155].mxu0 }
 0xf81   :  { %v11784_v4 = vrot.slane %v11775_v34, %v18549_v43 }
 0xf83   :  { %v11799_v6 = vcombine.low %v11784_v4, %v11791_v36 }
 0xf85   :  { %v11806_v54 = vrot.slane %v11799_v6, %v18549_v43 }
 0xfbd   :  { %v11762_v15 = vpop.f32.mrb[156].mxu0 }
 0xfbe   :  { %v11764_v7 = vpop.f32.mrb[157].mxu0 }
 0xfbf   :  { %v11777_v42 = vcombine.low %v11762_v15, %v11764_v7  ;;  %v11766_v21 = vpop.f32.mrb[158].mxu0 }
 0xfc0   :  { %v11767_v14 = vpop.f32.mrb[159].mxu0 }
 0xfc1   :  { %v11798_v22 = vrot.slane %v11777_v42, %v18549_v43 }
 0xfc3   :  { %v11813_v16 = vrot.slane %v11798_v22, %v18549_v43 }
 0xfc5   :  { %v11814_v50 = vcombine.low %v11806_v54, %v11813_v16 }
 0xfc7   :  { %v11816_v12 = vadd.f32 %v11814_v50, %v11056_v39 }
 0xfc9   :  { %v11817_v8 = vadd.f32 %v11816_v12, %v18567_v10  ;;  %v11827_v9 = vrot.slane %v11816_v12, 2  ;;  %v11835_v38 = vrot.slane %v11816_v12, 4 }
 0xfcb   :  { %v11818_v20 = vsub.f32 0.0, %v11817_v8  ;;  %v11829_v27 = vadd.f32 %v11827_v9, %v11824_v56 }
 0xfcd   :  { %v11819_v0 = vmul.f32 1.442695, %v11818_v20  ;;  %v11830_v57 = vsub.f32 0.0, %v11829_v27 }
 0xfcf   :  { %15539 = vpow2.f32 %v11819_v0  ;;  %v11831_v46 = vmul.f32 1.442695, %v11830_v57 }
 0xfd1   :  { %15541 = vpow2.f32 %v11831_v46 }
 0xfd9   :  { %v15540_v44 = vpop.eup %15539 }
 0xfda   :  { %v11821_v53 = vadd.f32 1.0, %v15540_v44 }
 0xfdb   :  { %v15542_v29 = vpop.eup %15541 }
 0xfdc   :  { %15543 = vrcp.f32 %v11821_v53  ;;  %v11833_v43 = vadd.f32 1.0, %v15542_v29 }
 0xfde   :  { %15545 = vrcp.f32 %v11833_v43 }
 0xfe6   :  { %v15544_v60 = vpop.eup %15543 }
 0xfe7   :  { %v11837_v62 = vmul.f32 %v15544_v60, %v11835_v38 }
 0xfe8   :  { %v15546_v3 = vpop.eup %15545 }
 0xfe9   :  { %v11840_v63 = vadd.f32 %v11838_v47, %v11837_v62  ;;  %v11842_v33 = vsub.f32 1.0, %v15546_v3  ;;  %v11844_v11 = vmul.f32 %v15546_v3, %v18484_v35 }
 0xfeb   :  { %15547 = vtanh.f32 %v11840_v63 }
 0xff5   :  { %v15548_v31 = vpop.eup %15547 }
 0xff6   :  { %v11843_v41 = vmul.f32 %v15548_v31, %v11842_v33 }
 0xff8   :  { %v11845_v28 = vadd.f32 %v11844_v11, %v11843_v41 }
 0xffa   :  { %v11859_v13 = vrot.slane %v11845_v28, %v17456_v26  ;;  %v11855_v51 = vrot.slane %v11845_v28, %v17451_v24  ;;  %11850 = vst.msk [vmem:[#allocation20] sm:$0x3] %vm11848_vm11, %v11845_v28 }
 0xffc   :  { %v11863_v1 = vpack.c.bf16 %v11859_v13, %v11859_v13  ;;  %v11862_v10 = vpack.c.bf16 %v11855_v51, %v11855_v51 }
 0xffe   :  { %12025 = vmatprep.mubr.bf16.mxu1 %v11863_v1 }
 0xfff   :  { %12026 = vmatmul.mubr.bf16.vlgmr.msra.gmra.mrb[204].mxu1 %v11862_v10 }
0x10d2   :  { %v13827_v5 = vpop.f32.mrb[204].mxu1 }
0x10d3   :  { %v13828_v23 = vpop.f32.mrb[205].mxu1 }
0x10d4   :  { %v13829_v59 = vadd.f32 %v13828_v23, %v13827_v5  ;;  %v13830_v25 = vpop.f32.mrb[206].mxu1 }
0x10d5   :  { %v13831_v36 = vpop.f32.mrb[207].mxu1 }
0x10d6   :  { %v12028_v35 = vadd.f32 %v13829_v59, %v11896_v40 }
0x10d8   :  { %12034 = vst.msk [vmem:[%s18684_s22] sm:$0x1] %vm12033_vm13, %v12028_v35  ;;  %v12036_v30 = vsel %vm12035_vm14, %v12028_v35, -inf }
0x10d9   :  { %12037 = vmax.xlane.f32.xlu0 %v12036_v30 }
0x1166   :  { %v12038_v24 = vpop.xlane.xlu0 %12037 }
0x1167   :  { %v12039_v26 = vsub.f32 %v12028_v35, %v12038_v24 }
0x1169   :  { %v12040_v58 = vmul.f32 1.442695, %v12039_v26 }
0x116b   :  { %15549 = vpow2.f32 %v12040_v58 }
0x1175   :  { %v15550_v2 = vpop.eup %15549 }
0x1176   :  { %v12042_v32 = vsel %vm12035_vm14, %v15550_v2, 0.0 }
0x1177   :  { %12043 = vadd.xlane.f32.xlu0 %v12042_v32 }
0x1178   :  { %15814 = shalt.err (!%p15811_p8)
}
0x1179   :  { %s15815_s8 = scalar_lea.hbm %s18682_s20, 32 }
0x117a   :  { %p15816_p9 = scmp.ne.s32.totalorder %s18682_s20, %s15815_s8  ;;  %p15819_p10 = scmp.lt.u32.totalorder %s15815_s8, %s18682_s20 }
0x117c   :  { %p15821_p11 = pnand %p15819_p10, %p15816_p9 }
0x117e   :  { %15824 = shalt.err (!%p15821_p11)
}
0x117f   :  { %12059 = dma.vmem_to_hbm [thread:$0]  %s12057_s9, 32, %s18682_s20, [#allocation4]  }
0x1180   :  { %s15825_s16 = scalar_lea.vmem %s12071_s11, 64  ;;  %p15830_p13 = scmp.lt.s32.totalorder %s12071_s11, %s12071_s11 }
0x1181   :  { %p15826_p12 = scmp.ne.s32.totalorder %s12071_s11, %s15825_s16  ;;  %p15831_p0 = scmp.lt.s32.totalorder %s15825_s16, %s15825_s16 }
0x1183   :  { %p15832_p1 = por %p15831_p0, %p15830_p13 }
0x1185   :  { %p15833_p2 = pnand %p15832_p1, %p15826_p12 }
0x1187   :  { %15836 = shalt.err (!%p15833_p2)
}
0x1188   :  { %s15837_s24 = scalar_lea.hbm %s18685_s23, 64 }
0x1189   :  { %p15838_p3 = scmp.ne.s32.totalorder %s18685_s23, %s15837_s24  ;;  %p15841_p4 = scmp.lt.u32.totalorder %s15837_s24, %s18685_s23 }
0x118b   :  { %p15843_p5 = pnand %p15841_p4, %p15838_p3 }
0x118d   :  { %15846 = shalt.err (!%p15843_p5)
}
0x118e   :  { %12073 = dma.vmem_to_hbm [thread:$0]  %s12071_s11, 64, %s18685_s23, [#allocation22]  }
0x1204   :  { %v12044_v48 = vpop.xlane.xlu0 %12043 }
0x1205   :  { %15551 = vlog2.f32 %v12044_v48 }
0x120f   :  { %v15552_v45 = vpop.eup %15551 }
0x1210   :  { %v12046_v19 = vmul.f32 0.6931472, %v15552_v45 }
0x1212   :  { %v12047_v55 = vadd.f32 %v12046_v19, %v12038_v24 }
0x1214   :  { %v12048_v18 = vsub.f32 %v12028_v35, %v12047_v55 }
0x1216   :  { %12049 = vst.msk [vmem:[%s18683_s21] sm:$0x1] %vm12035_vm14, %v12048_v18 }
0x1217   :  { %15859 = dma.done.wait [#allocation4], 32  }
0x1218   :  { %15860 = vsyncadd [#allocation4], 4294967264 }
0x1219   :  { %15861 = dma.done.wait [#allocation22], 64  }
0x121a   :  { %15862 = vsyncadd [#allocation22], 4294967232 }
0x121b   :  { %12084 = vsyncpa [#allocation3], 1 }
0x121c   :  { %12085 = vsyncpa [#allocation6], 1 }
0x121d   :  { %12086 = vsyncpa [#allocation9], 1 }
0x121e   :  { %12087 = vsyncpa [#allocation12], 1 }
0x121f   :  { %12088 = vsyncpa [#allocation15], 1 }
0x1220   :  { %12089 = vsyncpa [#allocation18], 1 }
0x1221   :  { %12090 = vsyncpa [#allocation4], 1 }
0x1222   :  { %12091 = vsyncpa [#allocation22], 1 }

</bundles_post_ra>
